<compile_context>
chip_gen: v5e
topology: v5e:2x2
jax: 0.10.0
libtpu: 0.0.40
codegen_flags: <defaults>
</compile_context>

<pallas_src>
import functools

import numpy as np
import jax
import jax.numpy as jnp
from jax.experimental import pallas as pl
from jax.experimental.pallas import tpu as pltpu

NEG_SLOPE = 0.01
EPS = 1e-5


def _leaky(v):
    # max(v, 0.01*v) == LeakyReLU(0.01)(v); 2 VPU ops instead of cmp+sel+mul.
    return jnp.maximum(v, NEG_SLOPE * v)


def _ab_block_kernel(x_ref, a_ref, bits_ref, w_ref, g_ref, beta_ref, skip_ref,
                     out_ref, cols_ref, *, D, H, W, C_in, Cp):
    # x_ref    : (C_in, DHW)   resized x, one sample (lane-dense)
    # a_ref    : (1, DHW)      resized attention, one sample
    # bits_ref : (1, DHW)      int32 halo-validity bits (6 bits used)
    # w_ref    : (C_out, 27*Cp) conv weight in im2col layout
    # g_ref    : (C_out, 1)    InstanceNorm gamma
    # beta_ref : (C_out, 1)    InstanceNorm beta
    # skip_ref : (C_out, DHW)
    # out_ref  : (C_out, DHW)
    # cols_ref : (27*Cp, DHW)  VMEM im2col scratch
    DHW = D * H * W

    # Fused attention gating (1-channel attn broadcast over channels) plus an
    # in-register zero-pad of the channel/sublane axis up to a multiple of 8
    # so every im2col store below is sublane-aligned.
    xa = x_ref[...] * a_ref[...]                        # (C_in, DHW)
    if Cp != C_in:
        xa = jnp.concatenate(
            [xa, jnp.zeros((Cp - C_in, DHW), xa.dtype)], axis=0)  # (Cp, DHW)

    bits = bits_ref[...]                                # (1, DHW)

    # Build im2col: 27 lane-rolled, boundary-masked copies of xa stacked along
    # sublanes.  pltpu.roll (XLU) + a bitmask select replaces the unaligned
    # strided slices of a padded volume.
    t = 0
    for dd in (-1, 0, 1):
        for dh in (-1, 0, 1):
            for dw in (-1, 0, 1):
                s = dd * H * W + dh * W + dw            # flat neighbor offset
                rolled = xa if s == 0 else pltpu.roll(xa, shift=(-s) % DHW,
                                                      axis=1)
                need = ((1 if dd == -1 else 0) | (2 if dd == 1 else 0)
                        | (4 if dh == -1 else 0) | (8 if dh == 1 else 0)
                        | (16 if dw == -1 else 0) | (32 if dw == 1 else 0))
                if need:
                    valid = (bits & need) == need       # (1, DHW) broadcast
                    patch = jnp.where(valid, rolled, 0.0)
                else:
                    patch = rolled
                cols_ref[pl.ds(t * Cp, Cp), :] = patch  # aligned sublane store
                t += 1

    # Whole conv as one lane-dense MXU matmul.  (No conv bias: cancelled by
    # the InstanceNorm mean subtraction.)
    y = jnp.dot(w_ref[...], cols_ref[...],
                preferred_element_type=jnp.float32)     # (C_out, DHW)

    # One-pass InstanceNorm stats (biased var), fused into a single FMA.
    inv_n = 1.0 / DHW
    mean = jnp.sum(y, axis=1, keepdims=True) * inv_n            # (C_out, 1)
    ex2 = jnp.sum(y * y, axis=1, keepdims=True) * inv_n
    var = jnp.maximum(ex2 - mean * mean, 0.0)
    scale = g_ref[...] * jax.lax.rsqrt(var + EPS)               # (C_out, 1)
    shift = beta_ref[...] - mean * scale
    yn = y * scale + shift

    # LeakyReLU -> residual add with skip -> LeakyReLU.  Output block is
    # lane-dense (C_out, DHW): full-width unmasked lane stores.
    out_ref[...] = _leaky(skip_ref[...] + _leaky(yn))


def _halo_bits(D, H, W):
    """Per-voxel validity bits for the 6 halo directions (precomputed once)."""
    d = np.arange(D)[:, None, None]
    h = np.arange(H)[None, :, None]
    w = np.arange(W)[None, None, :]
    bits = ((d >= 1) * 1 + (d <= D - 2) * 2
            + (h >= 1) * 4 + (h <= H - 2) * 8
            + (w >= 1) * 16 + (w <= W - 2) * 32)
    return jnp.asarray(bits.reshape(1, D * H * W).astype(np.int32))


def _pack_weight(w, Cp):
    """PyTorch Conv3d weight (C_out,C_in,3,3,3) -> dense (C_out, 27*Cp)."""
    C_out, C_in = w.shape[0], w.shape[1]
    wt = jnp.transpose(w, (0, 2, 3, 4, 1)).reshape(C_out, 27, C_in)
    if Cp != C_in:
        wt = jnp.pad(wt, ((0, 0), (0, 0), (0, Cp - C_in)))
    return wt.reshape(C_out, 27 * Cp)


def ab_block(x_flat, a_flat, bits, w2, gamma, beta, skip_flat,
             *, D, H, W, C_in, Cp):
    """Fused conv + InstanceNorm + LeakyReLU + residual for one skip level."""
    N, _, DHW = x_flat.shape
    C_out = skip_flat.shape[1]
    KK = 27 * Cp

    kernel = functools.partial(_ab_block_kernel, D=D, H=H, W=W,
                               C_in=C_in, Cp=Cp)

    return pl.pallas_call(
        kernel,
        out_shape=jax.ShapeDtypeStruct((N, C_out, DHW), jnp.float32),
        grid_spec=pltpu.PrefetchScalarGridSpec(
            num_scalar_prefetch=0,
            grid=(N,),
            in_specs=[
                pl.BlockSpec((None, C_in, DHW), lambda n: (n, 0, 0)),
                pl.BlockSpec((None, 1, DHW), lambda n: (n, 0, 0)),
                pl.BlockSpec((1, DHW), lambda n: (0, 0)),
                pl.BlockSpec((C_out, KK), lambda n: (0, 0)),
                pl.BlockSpec((C_out, 1), lambda n: (0, 0)),
                pl.BlockSpec((C_out, 1), lambda n: (0, 0)),
                pl.BlockSpec((None, C_out, DHW), lambda n: (n, 0, 0)),
            ],
            out_specs=pl.BlockSpec((None, C_out, DHW), lambda n: (n, 0, 0)),
            scratch_shapes=[pltpu.VMEM((KK, DHW), jnp.float32)],
        ),
        compiler_params=pltpu.CompilerParams(
            dimension_semantics=("parallel",)),
    )(x_flat, a_flat, bits, w2, gamma, beta, skip_flat)


def ablayer_forward(x, skips, attn, params):
    """x/attn/skips in PyTorch NCDHW; returns list of updated skips (NCDHW)."""
    N, C_in = x.shape[:2]
    Cp = ((C_in + 7) // 8) * 8          # channel padding for aligned im2col
    outs = []
    for i, skip in enumerate(skips):
        Ds, Hs, Ws = skip.shape[2:]
        DHW = Ds * Hs * Ws
        # F.interpolate(mode='trilinear'): half-pixel centers, no antialias.
        _x = jax.image.resize(x, (N, C_in, Ds, Hs, Ws),
                              method='trilinear', antialias=False)
        _a = jax.image.resize(attn, (N, attn.shape[1], Ds, Hs, Ws),
                              method='trilinear', antialias=False)
        w, _b, gamma, beta = params[i]  # conv bias _b is dead compute
        C_out = w.shape[0]
        out_flat = ab_block(
            _x.reshape(N, C_in, DHW),       # NCDHW is already lane-dense
            _a.reshape(N, 1, DHW),
            _halo_bits(Ds, Hs, Ws),
            _pack_weight(w, Cp),
            gamma.reshape(C_out, 1), beta.reshape(C_out, 1),
            skip.reshape(N, C_out, DHW),
            D=Ds, H=Hs, W=Ws, C_in=C_in, Cp=Cp)
        outs.append(out_flat.reshape(N, C_out, Ds, Hs, Ws))
    return outs


def _reference_forward(x, skips, attn, params):
    """Pure-JAX reference mirroring the PyTorch module (for correctness)."""
    N, C_in = x.shape[:2]
    outs = []
    for i, skip in enumerate(skips):
        Ds, Hs, Ws = skip.shape[2:]
        _x = jax.image.resize(x, (N, C_in, Ds, Hs, Ws),
                              method='trilinear', antialias=False)
        _a = jax.image.resize(attn, (N, attn.shape[1], Ds, Hs, Ws),
                              method='trilinear', antialias=False)
        xa = _x * _a
        w, b, gamma, beta = params[i]
        y = jax.lax.conv_general_dilated(
            xa, w, window_strides=(1, 1, 1),
            padding=((1, 1), (1, 1), (1, 1)),
            dimension_numbers=('NCDHW', 'OIDHW', 'NCDHW'))
        y = y + b.reshape(1, -1, 1, 1, 1)
        mean = jnp.mean(y, axis=(2, 3, 4), keepdims=True)
        var = jnp.mean((y - mean) ** 2, axis=(2, 3, 4), keepdims=True)
        yn = (y - mean) * jax.lax.rsqrt(var + EPS)
        yn = yn * gamma.reshape(1, -1, 1, 1, 1) + beta.reshape(1, -1, 1, 1, 1)
        yn = jnp.where(yn >= 0, yn, NEG_SLOPE * yn)
        out = skip + yn
        outs.append(jnp.where(out >= 0, out, NEG_SLOPE * out))
    return outs


if __name__ == "__main__":
    key = jax.random.PRNGKey(0)
    N, C_in = 2, 4
    out_channels = (4, 8)               # two skip levels
    x_spatial = (8, 8, 8)
    attn_spatial = (8, 8, 8)
    skip_spatials = [(16, 16, 16), (8, 8, 8)]

    keys = jax.random.split(key, 16)
    x = jax.random.normal(keys[0], (N, C_in) + x_spatial, jnp.float32)
    attn = jax.random.uniform(keys[1], (N, 1) + attn_spatial, jnp.float32)
    skips = [
        jax.random.normal(keys[2 + i], (N, out_channels[i]) + skip_spatials[i],
                          jnp.float32)
        for i in range(len(out_channels))
    ]

    params = []
    for i, c_out in enumerate(out_channels):
        wk = jax.random.normal(keys[4 + 2 * i], (c_out, C_in, 3, 3, 3),
                               jnp.float32) * 0.1
        bk = jax.random.normal(keys[5 + 2 * i], (c_out,), jnp.float32) * 0.05
        gamma = 1.0 + 0.1 * jax.random.normal(keys[8 + 2 * i], (c_out,),
                                              jnp.float32)
        beta = 0.1 * jax.random.normal(keys[9 + 2 * i], (c_out,), jnp.float32)
        params.append((wk, bk, gamma, beta))

    outs = ablayer_forward(x, skips, attn, params)
    for o in outs:
        jax.block_until_ready(o)

    # Correctness check vs a pure-JAX reference (also confirms that dropping
    # the conv bias is exact).  Tolerance covers TPU default matmul precision.
    refs = _reference_forward(x, skips, attn, params)
    for o, r, c_out, sp in zip(outs, refs, out_channels, skip_spatials):
        assert o.shape == (N, c_out) + sp
        err = float(jnp.max(jnp.abs(o - r)))
        assert err < 5e-2, f"max abs err {err}"

    print("KERNEL_OK")
</pallas_src>

<mosaic_0001>
module attributes {stable_mosaic.version = 11 : i64} {
  func.func @_ab_block_kernel(%arg0: i32, %arg1: memref<1x4x4096xf32, #tpu.memory_space<vmem>>, %arg2: memref<1x1x4096xf32, #tpu.memory_space<vmem>>, %arg3: memref<1x4096xi32, #tpu.memory_space<vmem>>, %arg4: memref<4x216xf32, #tpu.memory_space<vmem>>, %arg5: memref<4x1xf32, #tpu.memory_space<vmem>>, %arg6: memref<4x1xf32, #tpu.memory_space<vmem>>, %arg7: memref<1x4x4096xf32, #tpu.memory_space<vmem>>, %arg8: memref<1x4x4096xf32, #tpu.memory_space<vmem>>, %arg9: memref<216x4096xf32, #tpu.memory_space<vmem>>) attributes {dimension_semantics = [#tpu.dimension_semantics<parallel>], iteration_bounds = array<i64: 2>, scalar_prefetch = 0 : i64, scratch_operands = 1 : i64, tpu.core_type = #tpu.core_type<tc>, window_params = [{transform_indices = @transform_0, window_bounds = array<i64: 1, 4, 4096>}, {transform_indices = @transform_1, window_bounds = array<i64: 1, 1, 4096>}, {pipeline_mode = #tpu.pipeline_mode<synchronous>, transform_indices = @transform_2, window_bounds = array<i64: 1, 4096>}, {pipeline_mode = #tpu.pipeline_mode<synchronous>, transform_indices = @transform_3, window_bounds = array<i64: 4, 216>}, {pipeline_mode = #tpu.pipeline_mode<synchronous>, transform_indices = @transform_4, window_bounds = array<i64: 4, 1>}, {pipeline_mode = #tpu.pipeline_mode<synchronous>, transform_indices = @transform_5, window_bounds = array<i64: 4, 1>}, {transform_indices = @transform_6, window_bounds = array<i64: 1, 4, 4096>}, {transform_indices = @transform_7, window_bounds = array<i64: 1, 4, 4096>}]} {
    %c0 = arith.constant 0 : index
    %c0_0 = arith.constant 0 : index
    %c0_1 = arith.constant 0 : index
    %0 = vector.load %arg1[%c0, %c0_0, %c0_1] : memref<1x4x4096xf32, #tpu.memory_space<vmem>>, vector<1x4x4096xf32>
    %1 = vector.shape_cast %0 : vector<1x4x4096xf32> to vector<4x4096xf32>
    %c0_2 = arith.constant 0 : index
    %c0_3 = arith.constant 0 : index
    %c0_4 = arith.constant 0 : index
    %2 = vector.load %arg2[%c0_2, %c0_3, %c0_4] : memref<1x1x4096xf32, #tpu.memory_space<vmem>>, vector<1x1x4096xf32>
    %3 = vector.shape_cast %2 : vector<1x1x4096xf32> to vector<1x4096xf32>
    %4 = vector.broadcast %3 : vector<1x4096xf32> to vector<4x4096xf32>
    %5 = arith.mulf %1, %4 : vector<4x4096xf32>
    %cst = arith.constant 0.000000e+00 : f32
    %6 = vector.broadcast %cst : f32 to vector<4x4096xf32>
    %7 = tpu.concatenate %5, %6 in 0 : vector<4x4096xf32>, vector<4x4096xf32> -> vector<8x4096xf32>
    %c0_5 = arith.constant 0 : index
    %c0_6 = arith.constant 0 : index
    %8 = vector.load %arg3[%c0_5, %c0_6] : memref<1x4096xi32, #tpu.memory_space<vmem>>, vector<1x4096xi32>
    %c273_i32 = arith.constant 273 : i32
    %9 = tpu.dynamic_rotate %7 by %c273_i32 dim 1 : vector<8x4096xf32>, i32 -> vector<8x4096xf32>
    %c21_i32 = arith.constant 21 : i32
    %10 = vector.broadcast %c21_i32 : i32 to vector<1x4096xi32>
    %11 = arith.andi %8, %10 : vector<1x4096xi32>
    %c21_i32_7 = arith.constant 21 : i32
    %12 = vector.broadcast %c21_i32_7 : i32 to vector<1x4096xi32>
    %13 = arith.cmpi eq, %11, %12 : vector<1x4096xi32>
    %cst_8 = arith.constant 0.000000e+00 : f32
    %14 = vector.shape_cast %13 : vector<1x4096xi1> to vector<1x4096xi1>
    %15 = vector.broadcast %14 : vector<1x4096xi1> to vector<8x4096xi1>
    %16 = vector.broadcast %cst_8 : f32 to vector<8x4096xf32>
    %17 = arith.select %15, %9, %16 : vector<8x4096xi1>, vector<8x4096xf32>
    %c0_9 = arith.constant 0 : index
    %c0_10 = arith.constant 0 : index
    %18 = vector.load %arg9[%c0_9, %c0_10] : memref<216x4096xf32, #tpu.memory_space<vmem>>, vector<8x4096xf32>
    tpu.vector_store %arg9[%c0_9, %c0_10], %17 {strides = array<i32>} : memref<216x4096xf32, #tpu.memory_space<vmem>>, vector<8x4096xf32>,
    %c272_i32 = arith.constant 272 : i32
    %19 = tpu.dynamic_rotate %7 by %c272_i32 dim 1 : vector<8x4096xf32>, i32 -> vector<8x4096xf32>
    %c5_i32 = arith.constant 5 : i32
    %20 = vector.broadcast %c5_i32 : i32 to vector<1x4096xi32>
    %21 = arith.andi %8, %20 : vector<1x4096xi32>
    %c5_i32_11 = arith.constant 5 : i32
    %22 = vector.broadcast %c5_i32_11 : i32 to vector<1x4096xi32>
    %23 = arith.cmpi eq, %21, %22 : vector<1x4096xi32>
    %cst_12 = arith.constant 0.000000e+00 : f32
    %24 = vector.shape_cast %23 : vector<1x4096xi1> to vector<1x4096xi1>
    %25 = vector.broadcast %24 : vector<1x4096xi1> to vector<8x4096xi1>
    %26 = vector.broadcast %cst_12 : f32 to vector<8x4096xf32>
    %27 = arith.select %25, %19, %26 : vector<8x4096xi1>, vector<8x4096xf32>
    %c8 = arith.constant 8 : index
    %c0_13 = arith.constant 0 : index
    %28 = vector.load %arg9[%c8, %c0_13] : memref<216x4096xf32, #tpu.memory_space<vmem>>, vector<8x4096xf32>
    tpu.vector_store %arg9[%c8, %c0_13], %27 {strides = array<i32>} : memref<216x4096xf32, #tpu.memory_space<vmem>>, vector<8x4096xf32>,
    %c271_i32 = arith.constant 271 : i32
    %29 = tpu.dynamic_rotate %7 by %c271_i32 dim 1 : vector<8x4096xf32>, i32 -> vector<8x4096xf32>
    %c37_i32 = arith.constant 37 : i32
    %30 = vector.broadcast %c37_i32 : i32 to vector<1x4096xi32>
    %31 = arith.andi %8, %30 : vector<1x4096xi32>
    %c37_i32_14 = arith.constant 37 : i32
    %32 = vector.broadcast %c37_i32_14 : i32 to vector<1x4096xi32>
    %33 = arith.cmpi eq, %31, %32 : vector<1x4096xi32>
    %cst_15 = arith.constant 0.000000e+00 : f32
    %34 = vector.shape_cast %33 : vector<1x4096xi1> to vector<1x4096xi1>
    %35 = vector.broadcast %34 : vector<1x4096xi1> to vector<8x4096xi1>
    %36 = vector.broadcast %cst_15 : f32 to vector<8x4096xf32>
    %37 = arith.select %35, %29, %36 : vector<8x4096xi1>, vector<8x4096xf32>
    %c16 = arith.constant 16 : index
    %c0_16 = arith.constant 0 : index
    %38 = vector.load %arg9[%c16, %c0_16] : memref<216x4096xf32, #tpu.memory_space<vmem>>, vector<8x4096xf32>
    tpu.vector_store %arg9[%c16, %c0_16], %37 {strides = array<i32>} : memref<216x4096xf32, #tpu.memory_space<vmem>>, vector<8x4096xf32>,
    %c257_i32 = arith.constant 257 : i32
    %39 = tpu.dynamic_rotate %7 by %c257_i32 dim 1 : vector<8x4096xf32>, i32 -> vector<8x4096xf32>
    %c17_i32 = arith.constant 17 : i32
    %40 = vector.broadcast %c17_i32 : i32 to vector<1x4096xi32>
    %41 = arith.andi %8, %40 : vector<1x4096xi32>
    %c17_i32_17 = arith.constant 17 : i32
    %42 = vector.broadcast %c17_i32_17 : i32 to vector<1x4096xi32>
    %43 = arith.cmpi eq, %41, %42 : vector<1x4096xi32>
    %cst_18 = arith.constant 0.000000e+00 : f32
    %44 = vector.shape_cast %43 : vector<1x4096xi1> to vector<1x4096xi1>
    %45 = vector.broadcast %44 : vector<1x4096xi1> to vector<8x4096xi1>
    %46 = vector.broadcast %cst_18 : f32 to vector<8x4096xf32>
    %47 = arith.select %45, %39, %46 : vector<8x4096xi1>, vector<8x4096xf32>
    %c24 = arith.constant 24 : index
    %c0_19 = arith.constant 0 : index
    %48 = vector.load %arg9[%c24, %c0_19] : memref<216x4096xf32, #tpu.memory_space<vmem>>, vector<8x4096xf32>
    tpu.vector_store %arg9[%c24, %c0_19], %47 {strides = array<i32>} : memref<216x4096xf32, #tpu.memory_space<vmem>>, vector<8x4096xf32>,
    %c256_i32 = arith.constant 256 : i32
    %49 = tpu.dynamic_rotate %7 by %c256_i32 dim 1 : vector<8x4096xf32>, i32 -> vector<8x4096xf32>
    %c1_i32 = arith.constant 1 : i32
    %50 = vector.broadcast %c1_i32 : i32 to vector<1x4096xi32>
    %51 = arith.andi %8, %50 : vector<1x4096xi32>
    %c1_i32_20 = arith.constant 1 : i32
    %52 = vector.broadcast %c1_i32_20 : i32 to vector<1x4096xi32>
    %53 = arith.cmpi eq, %51, %52 : vector<1x4096xi32>
    %cst_21 = arith.constant 0.000000e+00 : f32
    %54 = vector.shape_cast %53 : vector<1x4096xi1> to vector<1x4096xi1>
    %55 = vector.broadcast %54 : vector<1x4096xi1> to vector<8x4096xi1>
    %56 = vector.broadcast %cst_21 : f32 to vector<8x4096xf32>
    %57 = arith.select %55, %49, %56 : vector<8x4096xi1>, vector<8x4096xf32>
    %c32 = arith.constant 32 : index
    %c0_22 = arith.constant 0 : index
    %58 = vector.load %arg9[%c32, %c0_22] : memref<216x4096xf32, #tpu.memory_space<vmem>>, vector<8x4096xf32>
    tpu.vector_store %arg9[%c32, %c0_22], %57 {strides = array<i32>} : memref<216x4096xf32, #tpu.memory_space<vmem>>, vector<8x4096xf32>,
    %c255_i32 = arith.constant 255 : i32
    %59 = tpu.dynamic_rotate %7 by %c255_i32 dim 1 : vector<8x4096xf32>, i32 -> vector<8x4096xf32>
    %c33_i32 = arith.constant 33 : i32
    %60 = vector.broadcast %c33_i32 : i32 to vector<1x4096xi32>
    %61 = arith.andi %8, %60 : vector<1x4096xi32>
    %c33_i32_23 = arith.constant 33 : i32
    %62 = vector.broadcast %c33_i32_23 : i32 to vector<1x4096xi32>
    %63 = arith.cmpi eq, %61, %62 : vector<1x4096xi32>
    %cst_24 = arith.constant 0.000000e+00 : f32
    %64 = vector.shape_cast %63 : vector<1x4096xi1> to vector<1x4096xi1>
    %65 = vector.broadcast %64 : vector<1x4096xi1> to vector<8x4096xi1>
    %66 = vector.broadcast %cst_24 : f32 to vector<8x4096xf32>
    %67 = arith.select %65, %59, %66 : vector<8x4096xi1>, vector<8x4096xf32>
    %c40 = arith.constant 40 : index
    %c0_25 = arith.constant 0 : index
    %68 = vector.load %arg9[%c40, %c0_25] : memref<216x4096xf32, #tpu.memory_space<vmem>>, vector<8x4096xf32>
    tpu.vector_store %arg9[%c40, %c0_25], %67 {strides = array<i32>} : memref<216x4096xf32, #tpu.memory_space<vmem>>, vector<8x4096xf32>,
    %c241_i32 = arith.constant 241 : i32
    %69 = tpu.dynamic_rotate %7 by %c241_i32 dim 1 : vector<8x4096xf32>, i32 -> vector<8x4096xf32>
    %c25_i32 = arith.constant 25 : i32
    %70 = vector.broadcast %c25_i32 : i32 to vector<1x4096xi32>
    %71 = arith.andi %8, %70 : vector<1x4096xi32>
    %c25_i32_26 = arith.constant 25 : i32
    %72 = vector.broadcast %c25_i32_26 : i32 to vector<1x4096xi32>
    %73 = arith.cmpi eq, %71, %72 : vector<1x4096xi32>
    %cst_27 = arith.constant 0.000000e+00 : f32
    %74 = vector.shape_cast %73 : vector<1x4096xi1> to vector<1x4096xi1>
    %75 = vector.broadcast %74 : vector<1x4096xi1> to vector<8x4096xi1>
    %76 = vector.broadcast %cst_27 : f32 to vector<8x4096xf32>
    %77 = arith.select %75, %69, %76 : vector<8x4096xi1>, vector<8x4096xf32>
    %c48 = arith.constant 48 : index
    %c0_28 = arith.constant 0 : index
    %78 = vector.load %arg9[%c48, %c0_28] : memref<216x4096xf32, #tpu.memory_space<vmem>>, vector<8x4096xf32>
    tpu.vector_store %arg9[%c48, %c0_28], %77 {strides = array<i32>} : memref<216x4096xf32, #tpu.memory_space<vmem>>, vector<8x4096xf32>,
    %c240_i32 = arith.constant 240 : i32
    %79 = tpu.dynamic_rotate %7 by %c240_i32 dim 1 : vector<8x4096xf32>, i32 -> vector<8x4096xf32>
    %c9_i32 = arith.constant 9 : i32
    %80 = vector.broadcast %c9_i32 : i32 to vector<1x4096xi32>
    %81 = arith.andi %8, %80 : vector<1x4096xi32>
    %c9_i32_29 = arith.constant 9 : i32
    %82 = vector.broadcast %c9_i32_29 : i32 to vector<1x4096xi32>
    %83 = arith.cmpi eq, %81, %82 : vector<1x4096xi32>
    %cst_30 = arith.constant 0.000000e+00 : f32
    %84 = vector.shape_cast %83 : vector<1x4096xi1> to vector<1x4096xi1>
    %85 = vector.broadcast %84 : vector<1x4096xi1> to vector<8x4096xi1>
    %86 = vector.broadcast %cst_30 : f32 to vector<8x4096xf32>
    %87 = arith.select %85, %79, %86 : vector<8x4096xi1>, vector<8x4096xf32>
    %c56 = arith.constant 56 : index
    %c0_31 = arith.constant 0 : index
    %88 = vector.load %arg9[%c56, %c0_31] : memref<216x4096xf32, #tpu.memory_space<vmem>>, vector<8x4096xf32>
    tpu.vector_store %arg9[%c56, %c0_31], %87 {strides = array<i32>} : memref<216x4096xf32, #tpu.memory_space<vmem>>, vector<8x4096xf32>,
    %c239_i32 = arith.constant 239 : i32
    %89 = tpu.dynamic_rotate %7 by %c239_i32 dim 1 : vector<8x4096xf32>, i32 -> vector<8x4096xf32>
    %c41_i32 = arith.constant 41 : i32
    %90 = vector.broadcast %c41_i32 : i32 to vector<1x4096xi32>
    %91 = arith.andi %8, %90 : vector<1x4096xi32>
    %c41_i32_32 = arith.constant 41 : i32
    %92 = vector.broadcast %c41_i32_32 : i32 to vector<1x4096xi32>
    %93 = arith.cmpi eq, %91, %92 : vector<1x4096xi32>
    %cst_33 = arith.constant 0.000000e+00 : f32
    %94 = vector.shape_cast %93 : vector<1x4096xi1> to vector<1x4096xi1>
    %95 = vector.broadcast %94 : vector<1x4096xi1> to vector<8x4096xi1>
    %96 = vector.broadcast %cst_33 : f32 to vector<8x4096xf32>
    %97 = arith.select %95, %89, %96 : vector<8x4096xi1>, vector<8x4096xf32>
    %c64 = arith.constant 64 : index
    %c0_34 = arith.constant 0 : index
    %98 = vector.load %arg9[%c64, %c0_34] : memref<216x4096xf32, #tpu.memory_space<vmem>>, vector<8x4096xf32>
    tpu.vector_store %arg9[%c64, %c0_34], %97 {strides = array<i32>} : memref<216x4096xf32, #tpu.memory_space<vmem>>, vector<8x4096xf32>,
    %c17_i32_35 = arith.constant 17 : i32
    %99 = tpu.dynamic_rotate %7 by %c17_i32_35 dim 1 : vector<8x4096xf32>, i32 -> vector<8x4096xf32>
    %c20_i32 = arith.constant 20 : i32
    %100 = vector.broadcast %c20_i32 : i32 to vector<1x4096xi32>
    %101 = arith.andi %8, %100 : vector<1x4096xi32>
    %c20_i32_36 = arith.constant 20 : i32
    %102 = vector.broadcast %c20_i32_36 : i32 to vector<1x4096xi32>
    %103 = arith.cmpi eq, %101, %102 : vector<1x4096xi32>
    %cst_37 = arith.constant 0.000000e+00 : f32
    %104 = vector.shape_cast %103 : vector<1x4096xi1> to vector<1x4096xi1>
    %105 = vector.broadcast %104 : vector<1x4096xi1> to vector<8x4096xi1>
    %106 = vector.broadcast %cst_37 : f32 to vector<8x4096xf32>
    %107 = arith.select %105, %99, %106 : vector<8x4096xi1>, vector<8x4096xf32>
    %c72 = arith.constant 72 : index
    %c0_38 = arith.constant 0 : index
    %108 = vector.load %arg9[%c72, %c0_38] : memref<216x4096xf32, #tpu.memory_space<vmem>>, vector<8x4096xf32>
    tpu.vector_store %arg9[%c72, %c0_38], %107 {strides = array<i32>} : memref<216x4096xf32, #tpu.memory_space<vmem>>, vector<8x4096xf32>,
    %c16_i32 = arith.constant 16 : i32
    %109 = tpu.dynamic_rotate %7 by %c16_i32 dim 1 : vector<8x4096xf32>, i32 -> vector<8x4096xf32>
    %c4_i32 = arith.constant 4 : i32
    %110 = vector.broadcast %c4_i32 : i32 to vector<1x4096xi32>
    %111 = arith.andi %8, %110 : vector<1x4096xi32>
    %c4_i32_39 = arith.constant 4 : i32
    %112 = vector.broadcast %c4_i32_39 : i32 to vector<1x4096xi32>
    %113 = arith.cmpi eq, %111, %112 : vector<1x4096xi32>
    %cst_40 = arith.constant 0.000000e+00 : f32
    %114 = vector.shape_cast %113 : vector<1x4096xi1> to vector<1x4096xi1>
    %115 = vector.broadcast %114 : vector<1x4096xi1> to vector<8x4096xi1>
    %116 = vector.broadcast %cst_40 : f32 to vector<8x4096xf32>
    %117 = arith.select %115, %109, %116 : vector<8x4096xi1>, vector<8x4096xf32>
    %c80 = arith.constant 80 : index
    %c0_41 = arith.constant 0 : index
    %118 = vector.load %arg9[%c80, %c0_41] : memref<216x4096xf32, #tpu.memory_space<vmem>>, vector<8x4096xf32>
    tpu.vector_store %arg9[%c80, %c0_41], %117 {strides = array<i32>} : memref<216x4096xf32, #tpu.memory_space<vmem>>, vector<8x4096xf32>,
    %c15_i32 = arith.constant 15 : i32
    %119 = tpu.dynamic_rotate %7 by %c15_i32 dim 1 : vector<8x4096xf32>, i32 -> vector<8x4096xf32>
    %c36_i32 = arith.constant 36 : i32
    %120 = vector.broadcast %c36_i32 : i32 to vector<1x4096xi32>
    %121 = arith.andi %8, %120 : vector<1x4096xi32>
    %c36_i32_42 = arith.constant 36 : i32
    %122 = vector.broadcast %c36_i32_42 : i32 to vector<1x4096xi32>
    %123 = arith.cmpi eq, %121, %122 : vector<1x4096xi32>
    %cst_43 = arith.constant 0.000000e+00 : f32
    %124 = vector.shape_cast %123 : vector<1x4096xi1> to vector<1x4096xi1>
    %125 = vector.broadcast %124 : vector<1x4096xi1> to vector<8x4096xi1>
    %126 = vector.broadcast %cst_43 : f32 to vector<8x4096xf32>
    %127 = arith.select %125, %119, %126 : vector<8x4096xi1>, vector<8x4096xf32>
    %c88 = arith.constant 88 : index
    %c0_44 = arith.constant 0 : index
    %128 = vector.load %arg9[%c88, %c0_44] : memref<216x4096xf32, #tpu.memory_space<vmem>>, vector<8x4096xf32>
    tpu.vector_store %arg9[%c88, %c0_44], %127 {strides = array<i32>} : memref<216x4096xf32, #tpu.memory_space<vmem>>, vector<8x4096xf32>,
    %c1_i32_45 = arith.constant 1 : i32
    %129 = tpu.dynamic_rotate %7 by %c1_i32_45 dim 1 : vector<8x4096xf32>, i32 -> vector<8x4096xf32>
    %c16_i32_46 = arith.constant 16 : i32
    %130 = vector.broadcast %c16_i32_46 : i32 to vector<1x4096xi32>
    %131 = arith.andi %8, %130 : vector<1x4096xi32>
    %c16_i32_47 = arith.constant 16 : i32
    %132 = vector.broadcast %c16_i32_47 : i32 to vector<1x4096xi32>
    %133 = arith.cmpi eq, %131, %132 : vector<1x4096xi32>
    %cst_48 = arith.constant 0.000000e+00 : f32
    %134 = vector.shape_cast %133 : vector<1x4096xi1> to vector<1x4096xi1>
    %135 = vector.broadcast %134 : vector<1x4096xi1> to vector<8x4096xi1>
    %136 = vector.broadcast %cst_48 : f32 to vector<8x4096xf32>
    %137 = arith.select %135, %129, %136 : vector<8x4096xi1>, vector<8x4096xf32>
    %c96 = arith.constant 96 : index
    %c0_49 = arith.constant 0 : index
    %138 = vector.load %arg9[%c96, %c0_49] : memref<216x4096xf32, #tpu.memory_space<vmem>>, vector<8x4096xf32>
    tpu.vector_store %arg9[%c96, %c0_49], %137 {strides = array<i32>} : memref<216x4096xf32, #tpu.memory_space<vmem>>, vector<8x4096xf32>,
    %c104 = arith.constant 104 : index
    %c0_50 = arith.constant 0 : index
    %139 = vector.load %arg9[%c104, %c0_50] : memref<216x4096xf32, #tpu.memory_space<vmem>>, vector<8x4096xf32>
    tpu.vector_store %arg9[%c104, %c0_50], %7 {strides = array<i32>} : memref<216x4096xf32, #tpu.memory_space<vmem>>, vector<8x4096xf32>,
    %c4095_i32 = arith.constant 4095 : i32
    %140 = tpu.dynamic_rotate %7 by %c4095_i32 dim 1 : vector<8x4096xf32>, i32 -> vector<8x4096xf32>
    %c32_i32 = arith.constant 32 : i32
    %141 = vector.broadcast %c32_i32 : i32 to vector<1x4096xi32>
    %142 = arith.andi %8, %141 : vector<1x4096xi32>
    %c32_i32_51 = arith.constant 32 : i32
    %143 = vector.broadcast %c32_i32_51 : i32 to vector<1x4096xi32>
    %144 = arith.cmpi eq, %142, %143 : vector<1x4096xi32>
    %cst_52 = arith.constant 0.000000e+00 : f32
    %145 = vector.shape_cast %144 : vector<1x4096xi1> to vector<1x4096xi1>
    %146 = vector.broadcast %145 : vector<1x4096xi1> to vector<8x4096xi1>
    %147 = vector.broadcast %cst_52 : f32 to vector<8x4096xf32>
    %148 = arith.select %146, %140, %147 : vector<8x4096xi1>, vector<8x4096xf32>
    %c112 = arith.constant 112 : index
    %c0_53 = arith.constant 0 : index
    %149 = vector.load %arg9[%c112, %c0_53] : memref<216x4096xf32, #tpu.memory_space<vmem>>, vector<8x4096xf32>
    tpu.vector_store %arg9[%c112, %c0_53], %148 {strides = array<i32>} : memref<216x4096xf32, #tpu.memory_space<vmem>>, vector<8x4096xf32>,
    %c4081_i32 = arith.constant 4081 : i32
    %150 = tpu.dynamic_rotate %7 by %c4081_i32 dim 1 : vector<8x4096xf32>, i32 -> vector<8x4096xf32>
    %c24_i32 = arith.constant 24 : i32
    %151 = vector.broadcast %c24_i32 : i32 to vector<1x4096xi32>
    %152 = arith.andi %8, %151 : vector<1x4096xi32>
    %c24_i32_54 = arith.constant 24 : i32
    %153 = vector.broadcast %c24_i32_54 : i32 to vector<1x4096xi32>
    %154 = arith.cmpi eq, %152, %153 : vector<1x4096xi32>
    %cst_55 = arith.constant 0.000000e+00 : f32
    %155 = vector.shape_cast %154 : vector<1x4096xi1> to vector<1x4096xi1>
    %156 = vector.broadcast %155 : vector<1x4096xi1> to vector<8x4096xi1>
    %157 = vector.broadcast %cst_55 : f32 to vector<8x4096xf32>
    %158 = arith.select %156, %150, %157 : vector<8x4096xi1>, vector<8x4096xf32>
    %c120 = arith.constant 120 : index
    %c0_56 = arith.constant 0 : index
    %159 = vector.load %arg9[%c120, %c0_56] : memref<216x4096xf32, #tpu.memory_space<vmem>>, vector<8x4096xf32>
    tpu.vector_store %arg9[%c120, %c0_56], %158 {strides = array<i32>} : memref<216x4096xf32, #tpu.memory_space<vmem>>, vector<8x4096xf32>,
    %c4080_i32 = arith.constant 4080 : i32
    %160 = tpu.dynamic_rotate %7 by %c4080_i32 dim 1 : vector<8x4096xf32>, i32 -> vector<8x4096xf32>
    %c8_i32 = arith.constant 8 : i32
    %161 = vector.broadcast %c8_i32 : i32 to vector<1x4096xi32>
    %162 = arith.andi %8, %161 : vector<1x4096xi32>
    %c8_i32_57 = arith.constant 8 : i32
    %163 = vector.broadcast %c8_i32_57 : i32 to vector<1x4096xi32>
    %164 = arith.cmpi eq, %162, %163 : vector<1x4096xi32>
    %cst_58 = arith.constant 0.000000e+00 : f32
    %165 = vector.shape_cast %164 : vector<1x4096xi1> to vector<1x4096xi1>
    %166 = vector.broadcast %165 : vector<1x4096xi1> to vector<8x4096xi1>
    %167 = vector.broadcast %cst_58 : f32 to vector<8x4096xf32>
    %168 = arith.select %166, %160, %167 : vector<8x4096xi1>, vector<8x4096xf32>
    %c128 = arith.constant 128 : index
    %c0_59 = arith.constant 0 : index
    %169 = vector.load %arg9[%c128, %c0_59] : memref<216x4096xf32, #tpu.memory_space<vmem>>, vector<8x4096xf32>
    tpu.vector_store %arg9[%c128, %c0_59], %168 {strides = array<i32>} : memref<216x4096xf32, #tpu.memory_space<vmem>>, vector<8x4096xf32>,
    %c4079_i32 = arith.constant 4079 : i32
    %170 = tpu.dynamic_rotate %7 by %c4079_i32 dim 1 : vector<8x4096xf32>, i32 -> vector<8x4096xf32>
    %c40_i32 = arith.constant 40 : i32
    %171 = vector.broadcast %c40_i32 : i32 to vector<1x4096xi32>
    %172 = arith.andi %8, %171 : vector<1x4096xi32>
    %c40_i32_60 = arith.constant 40 : i32
    %173 = vector.broadcast %c40_i32_60 : i32 to vector<1x4096xi32>
    %174 = arith.cmpi eq, %172, %173 : vector<1x4096xi32>
    %cst_61 = arith.constant 0.000000e+00 : f32
    %175 = vector.shape_cast %174 : vector<1x4096xi1> to vector<1x4096xi1>
    %176 = vector.broadcast %175 : vector<1x4096xi1> to vector<8x4096xi1>
    %177 = vector.broadcast %cst_61 : f32 to vector<8x4096xf32>
    %178 = arith.select %176, %170, %177 : vector<8x4096xi1>, vector<8x4096xf32>
    %c136 = arith.constant 136 : index
    %c0_62 = arith.constant 0 : index
    %179 = vector.load %arg9[%c136, %c0_62] : memref<216x4096xf32, #tpu.memory_space<vmem>>, vector<8x4096xf32>
    tpu.vector_store %arg9[%c136, %c0_62], %178 {strides = array<i32>} : memref<216x4096xf32, #tpu.memory_space<vmem>>, vector<8x4096xf32>,
    %c3857_i32 = arith.constant 3857 : i32
    %180 = tpu.dynamic_rotate %7 by %c3857_i32 dim 1 : vector<8x4096xf32>, i32 -> vector<8x4096xf32>
    %c22_i32 = arith.constant 22 : i32
    %181 = vector.broadcast %c22_i32 : i32 to vector<1x4096xi32>
    %182 = arith.andi %8, %181 : vector<1x4096xi32>
    %c22_i32_63 = arith.constant 22 : i32
    %183 = vector.broadcast %c22_i32_63 : i32 to vector<1x4096xi32>
    %184 = arith.cmpi eq, %182, %183 : vector<1x4096xi32>
    %cst_64 = arith.constant 0.000000e+00 : f32
    %185 = vector.shape_cast %184 : vector<1x4096xi1> to vector<1x4096xi1>
    %186 = vector.broadcast %185 : vector<1x4096xi1> to vector<8x4096xi1>
    %187 = vector.broadcast %cst_64 : f32 to vector<8x4096xf32>
    %188 = arith.select %186, %180, %187 : vector<8x4096xi1>, vector<8x4096xf32>
    %c144 = arith.constant 144 : index
    %c0_65 = arith.constant 0 : index
    %189 = vector.load %arg9[%c144, %c0_65] : memref<216x4096xf32, #tpu.memory_space<vmem>>, vector<8x4096xf32>
    tpu.vector_store %arg9[%c144, %c0_65], %188 {strides = array<i32>} : memref<216x4096xf32, #tpu.memory_space<vmem>>, vector<8x4096xf32>,
    %c3856_i32 = arith.constant 3856 : i32
    %190 = tpu.dynamic_rotate %7 by %c3856_i32 dim 1 : vector<8x4096xf32>, i32 -> vector<8x4096xf32>
    %c6_i32 = arith.constant 6 : i32
    %191 = vector.broadcast %c6_i32 : i32 to vector<1x4096xi32>
    %192 = arith.andi %8, %191 : vector<1x4096xi32>
    %c6_i32_66 = arith.constant 6 : i32
    %193 = vector.broadcast %c6_i32_66 : i32 to vector<1x4096xi32>
    %194 = arith.cmpi eq, %192, %193 : vector<1x4096xi32>
    %cst_67 = arith.constant 0.000000e+00 : f32
    %195 = vector.shape_cast %194 : vector<1x4096xi1> to vector<1x4096xi1>
    %196 = vector.broadcast %195 : vector<1x4096xi1> to vector<8x4096xi1>
    %197 = vector.broadcast %cst_67 : f32 to vector<8x4096xf32>
    %198 = arith.select %196, %190, %197 : vector<8x4096xi1>, vector<8x4096xf32>
    %c152 = arith.constant 152 : index
    %c0_68 = arith.constant 0 : index
    %199 = vector.load %arg9[%c152, %c0_68] : memref<216x4096xf32, #tpu.memory_space<vmem>>, vector<8x4096xf32>
    tpu.vector_store %arg9[%c152, %c0_68], %198 {strides = array<i32>} : memref<216x4096xf32, #tpu.memory_space<vmem>>, vector<8x4096xf32>,
    %c3855_i32 = arith.constant 3855 : i32
    %200 = tpu.dynamic_rotate %7 by %c3855_i32 dim 1 : vector<8x4096xf32>, i32 -> vector<8x4096xf32>
    %c38_i32 = arith.constant 38 : i32
    %201 = vector.broadcast %c38_i32 : i32 to vector<1x4096xi32>
    %202 = arith.andi %8, %201 : vector<1x4096xi32>
    %c38_i32_69 = arith.constant 38 : i32
    %203 = vector.broadcast %c38_i32_69 : i32 to vector<1x4096xi32>
    %204 = arith.cmpi eq, %202, %203 : vector<1x4096xi32>
    %cst_70 = arith.constant 0.000000e+00 : f32
    %205 = vector.shape_cast %204 : vector<1x4096xi1> to vector<1x4096xi1>
    %206 = vector.broadcast %205 : vector<1x4096xi1> to vector<8x4096xi1>
    %207 = vector.broadcast %cst_70 : f32 to vector<8x4096xf32>
    %208 = arith.select %206, %200, %207 : vector<8x4096xi1>, vector<8x4096xf32>
    %c160 = arith.constant 160 : index
    %c0_71 = arith.constant 0 : index
    %209 = vector.load %arg9[%c160, %c0_71] : memref<216x4096xf32, #tpu.memory_space<vmem>>, vector<8x4096xf32>
    tpu.vector_store %arg9[%c160, %c0_71], %208 {strides = array<i32>} : memref<216x4096xf32, #tpu.memory_space<vmem>>, vector<8x4096xf32>,
    %c3841_i32 = arith.constant 3841 : i32
    %210 = tpu.dynamic_rotate %7 by %c3841_i32 dim 1 : vector<8x4096xf32>, i32 -> vector<8x4096xf32>
    %c18_i32 = arith.constant 18 : i32
    %211 = vector.broadcast %c18_i32 : i32 to vector<1x4096xi32>
    %212 = arith.andi %8, %211 : vector<1x4096xi32>
    %c18_i32_72 = arith.constant 18 : i32
    %213 = vector.broadcast %c18_i32_72 : i32 to vector<1x4096xi32>
    %214 = arith.cmpi eq, %212, %213 : vector<1x4096xi32>
    %cst_73 = arith.constant 0.000000e+00 : f32
    %215 = vector.shape_cast %214 : vector<1x4096xi1> to vector<1x4096xi1>
    %216 = vector.broadcast %215 : vector<1x4096xi1> to vector<8x4096xi1>
    %217 = vector.broadcast %cst_73 : f32 to vector<8x4096xf32>
    %218 = arith.select %216, %210, %217 : vector<8x4096xi1>, vector<8x4096xf32>
    %c168 = arith.constant 168 : index
    %c0_74 = arith.constant 0 : index
    %219 = vector.load %arg9[%c168, %c0_74] : memref<216x4096xf32, #tpu.memory_space<vmem>>, vector<8x4096xf32>
    tpu.vector_store %arg9[%c168, %c0_74], %218 {strides = array<i32>} : memref<216x4096xf32, #tpu.memory_space<vmem>>, vector<8x4096xf32>,
    %c3840_i32 = arith.constant 3840 : i32
    %220 = tpu.dynamic_rotate %7 by %c3840_i32 dim 1 : vector<8x4096xf32>, i32 -> vector<8x4096xf32>
    %c2_i32 = arith.constant 2 : i32
    %221 = vector.broadcast %c2_i32 : i32 to vector<1x4096xi32>
    %222 = arith.andi %8, %221 : vector<1x4096xi32>
    %c2_i32_75 = arith.constant 2 : i32
    %223 = vector.broadcast %c2_i32_75 : i32 to vector<1x4096xi32>
    %224 = arith.cmpi eq, %222, %223 : vector<1x4096xi32>
    %cst_76 = arith.constant 0.000000e+00 : f32
    %225 = vector.shape_cast %224 : vector<1x4096xi1> to vector<1x4096xi1>
    %226 = vector.broadcast %225 : vector<1x4096xi1> to vector<8x4096xi1>
    %227 = vector.broadcast %cst_76 : f32 to vector<8x4096xf32>
    %228 = arith.select %226, %220, %227 : vector<8x4096xi1>, vector<8x4096xf32>
    %c176 = arith.constant 176 : index
    %c0_77 = arith.constant 0 : index
    %229 = vector.load %arg9[%c176, %c0_77] : memref<216x4096xf32, #tpu.memory_space<vmem>>, vector<8x4096xf32>
    tpu.vector_store %arg9[%c176, %c0_77], %228 {strides = array<i32>} : memref<216x4096xf32, #tpu.memory_space<vmem>>, vector<8x4096xf32>,
    %c3839_i32 = arith.constant 3839 : i32
    %230 = tpu.dynamic_rotate %7 by %c3839_i32 dim 1 : vector<8x4096xf32>, i32 -> vector<8x4096xf32>
    %c34_i32 = arith.constant 34 : i32
    %231 = vector.broadcast %c34_i32 : i32 to vector<1x4096xi32>
    %232 = arith.andi %8, %231 : vector<1x4096xi32>
    %c34_i32_78 = arith.constant 34 : i32
    %233 = vector.broadcast %c34_i32_78 : i32 to vector<1x4096xi32>
    %234 = arith.cmpi eq, %232, %233 : vector<1x4096xi32>
    %cst_79 = arith.constant 0.000000e+00 : f32
    %235 = vector.shape_cast %234 : vector<1x4096xi1> to vector<1x4096xi1>
    %236 = vector.broadcast %235 : vector<1x4096xi1> to vector<8x4096xi1>
    %237 = vector.broadcast %cst_79 : f32 to vector<8x4096xf32>
    %238 = arith.select %236, %230, %237 : vector<8x4096xi1>, vector<8x4096xf32>
    %c184 = arith.constant 184 : index
    %c0_80 = arith.constant 0 : index
    %239 = vector.load %arg9[%c184, %c0_80] : memref<216x4096xf32, #tpu.memory_space<vmem>>, vector<8x4096xf32>
    tpu.vector_store %arg9[%c184, %c0_80], %238 {strides = array<i32>} : memref<216x4096xf32, #tpu.memory_space<vmem>>, vector<8x4096xf32>,
    %c3825_i32 = arith.constant 3825 : i32
    %240 = tpu.dynamic_rotate %7 by %c3825_i32 dim 1 : vector<8x4096xf32>, i32 -> vector<8x4096xf32>
    %c26_i32 = arith.constant 26 : i32
    %241 = vector.broadcast %c26_i32 : i32 to vector<1x4096xi32>
    %242 = arith.andi %8, %241 : vector<1x4096xi32>
    %c26_i32_81 = arith.constant 26 : i32
    %243 = vector.broadcast %c26_i32_81 : i32 to vector<1x4096xi32>
    %244 = arith.cmpi eq, %242, %243 : vector<1x4096xi32>
    %cst_82 = arith.constant 0.000000e+00 : f32
    %245 = vector.shape_cast %244 : vector<1x4096xi1> to vector<1x4096xi1>
    %246 = vector.broadcast %245 : vector<1x4096xi1> to vector<8x4096xi1>
    %247 = vector.broadcast %cst_82 : f32 to vector<8x4096xf32>
    %248 = arith.select %246, %240, %247 : vector<8x4096xi1>, vector<8x4096xf32>
    %c192 = arith.constant 192 : index
    %c0_83 = arith.constant 0 : index
    %249 = vector.load %arg9[%c192, %c0_83] : memref<216x4096xf32, #tpu.memory_space<vmem>>, vector<8x4096xf32>
    tpu.vector_store %arg9[%c192, %c0_83], %248 {strides = array<i32>} : memref<216x4096xf32, #tpu.memory_space<vmem>>, vector<8x4096xf32>,
    %c3824_i32 = arith.constant 3824 : i32
    %250 = tpu.dynamic_rotate %7 by %c3824_i32 dim 1 : vector<8x4096xf32>, i32 -> vector<8x4096xf32>
    %c10_i32 = arith.constant 10 : i32
    %251 = vector.broadcast %c10_i32 : i32 to vector<1x4096xi32>
    %252 = arith.andi %8, %251 : vector<1x4096xi32>
    %c10_i32_84 = arith.constant 10 : i32
    %253 = vector.broadcast %c10_i32_84 : i32 to vector<1x4096xi32>
    %254 = arith.cmpi eq, %252, %253 : vector<1x4096xi32>
    %cst_85 = arith.constant 0.000000e+00 : f32
    %255 = vector.shape_cast %254 : vector<1x4096xi1> to vector<1x4096xi1>
    %256 = vector.broadcast %255 : vector<1x4096xi1> to vector<8x4096xi1>
    %257 = vector.broadcast %cst_85 : f32 to vector<8x4096xf32>
    %258 = arith.select %256, %250, %257 : vector<8x4096xi1>, vector<8x4096xf32>
    %c200 = arith.constant 200 : index
    %c0_86 = arith.constant 0 : index
    %259 = vector.load %arg9[%c200, %c0_86] : memref<216x4096xf32, #tpu.memory_space<vmem>>, vector<8x4096xf32>
    tpu.vector_store %arg9[%c200, %c0_86], %258 {strides = array<i32>} : memref<216x4096xf32, #tpu.memory_space<vmem>>, vector<8x4096xf32>,
    %c3823_i32 = arith.constant 3823 : i32
    %260 = tpu.dynamic_rotate %7 by %c3823_i32 dim 1 : vector<8x4096xf32>, i32 -> vector<8x4096xf32>
    %c42_i32 = arith.constant 42 : i32
    %261 = vector.broadcast %c42_i32 : i32 to vector<1x4096xi32>
    %262 = arith.andi %8, %261 : vector<1x4096xi32>
    %c42_i32_87 = arith.constant 42 : i32
    %263 = vector.broadcast %c42_i32_87 : i32 to vector<1x4096xi32>
    %264 = arith.cmpi eq, %262, %263 : vector<1x4096xi32>
    %cst_88 = arith.constant 0.000000e+00 : f32
    %265 = vector.shape_cast %264 : vector<1x4096xi1> to vector<1x4096xi1>
    %266 = vector.broadcast %265 : vector<1x4096xi1> to vector<8x4096xi1>
    %267 = vector.broadcast %cst_88 : f32 to vector<8x4096xf32>
    %268 = arith.select %266, %260, %267 : vector<8x4096xi1>, vector<8x4096xf32>
    %c208 = arith.constant 208 : index
    %c0_89 = arith.constant 0 : index
    %269 = vector.load %arg9[%c208, %c0_89] : memref<216x4096xf32, #tpu.memory_space<vmem>>, vector<8x4096xf32>
    tpu.vector_store %arg9[%c208, %c0_89], %268 {strides = array<i32>} : memref<216x4096xf32, #tpu.memory_space<vmem>>, vector<8x4096xf32>,
    %c0_90 = arith.constant 0 : index
    %c0_91 = arith.constant 0 : index
    %270 = vector.load %arg4[%c0_90, %c0_91] : memref<4x216xf32, #tpu.memory_space<vmem>>, vector<4x216xf32>
    %c0_92 = arith.constant 0 : index
    %c0_93 = arith.constant 0 : index
    %271 = vector.load %arg9[%c0_92, %c0_93] : memref<216x4096xf32, #tpu.memory_space<vmem>>, vector<216x4096xf32>
    %cst_94 = arith.constant dense<0.000000e+00> : vector<4x4096xf32>
    %272 = tpu.matmul %270, %271, %cst_94 {dimension_numbers = #tpu.dot_dimension_numbers<[1], [0], [0], [1], [0, 0, 1, 1], [], []>} : vector<4x216xf32>, vector<216x4096xf32>, vector<4x4096xf32> -> vector<4x4096xf32>
    %cst_95 = arith.constant dense<0.000000e+00> : vector<4xf32>
    %273 = vector.multi_reduction <add>, %272, %cst_95 [1] : vector<4x4096xf32> to vector<4xf32>
    %274 = vector.shape_cast %273 : vector<4xf32> to vector<4x1xf32>
    %cst_96 = arith.constant 2.44140625E-4 : f32
    %275 = vector.broadcast %cst_96 : f32 to vector<4x1xf32>
    %276 = arith.mulf %274, %275 : vector<4x1xf32>
    %277 = arith.mulf %272, %272 : vector<4x4096xf32>
    %cst_97 = arith.constant dense<0.000000e+00> : vector<4xf32>
    %278 = vector.multi_reduction <add>, %277, %cst_97 [1] : vector<4x4096xf32> to vector<4xf32>
    %279 = vector.shape_cast %278 : vector<4xf32> to vector<4x1xf32>
    %cst_98 = arith.constant 2.44140625E-4 : f32
    %280 = vector.broadcast %cst_98 : f32 to vector<4x1xf32>
    %281 = arith.mulf %279, %280 : vector<4x1xf32>
    %282 = arith.mulf %276, %276 : vector<4x1xf32>
    %283 = arith.subf %281, %282 : vector<4x1xf32>
    %cst_99 = arith.constant 0.000000e+00 : f32
    %284 = vector.broadcast %cst_99 : f32 to vector<4x1xf32>
    %285 = arith.maximumf %283, %284 : vector<4x1xf32>
    %c0_100 = arith.constant 0 : index
    %c0_101 = arith.constant 0 : index
    %286 = vector.load %arg5[%c0_100, %c0_101] : memref<4x1xf32, #tpu.memory_space<vmem>>, vector<4x1xf32>
    %cst_102 = arith.constant 9.99999974E-6 : f32
    %287 = vector.broadcast %cst_102 : f32 to vector<4x1xf32>
    %288 = arith.addf %285, %287 : vector<4x1xf32>
    %289 = math.rsqrt %288 : vector<4x1xf32>
    %290 = arith.mulf %286, %289 : vector<4x1xf32>
    %c0_103 = arith.constant 0 : index
    %c0_104 = arith.constant 0 : index
    %291 = vector.load %arg6[%c0_103, %c0_104] : memref<4x1xf32, #tpu.memory_space<vmem>>, vector<4x1xf32>
    %292 = arith.mulf %276, %290 : vector<4x1xf32>
    %293 = arith.subf %291, %292 : vector<4x1xf32>
    %294 = vector.broadcast %290 : vector<4x1xf32> to vector<4x4096xf32>
    %295 = arith.mulf %272, %294 : vector<4x4096xf32>
    %296 = vector.broadcast %293 : vector<4x1xf32> to vector<4x4096xf32>
    %297 = arith.addf %295, %296 : vector<4x4096xf32>
    %c0_105 = arith.constant 0 : index
    %c0_106 = arith.constant 0 : index
    %c0_107 = arith.constant 0 : index
    %298 = vector.load %arg7[%c0_105, %c0_106, %c0_107] : memref<1x4x4096xf32, #tpu.memory_space<vmem>>, vector<1x4x4096xf32>
    %299 = vector.shape_cast %298 : vector<1x4x4096xf32> to vector<4x4096xf32>
    %cst_108 = arith.constant 0.00999999977 : f32
    %300 = vector.broadcast %cst_108 : f32 to vector<4x4096xf32>
    %301 = arith.mulf %300, %297 : vector<4x4096xf32>
    %302 = arith.maximumf %297, %301 : vector<4x4096xf32>
    %303 = arith.addf %299, %302 : vector<4x4096xf32>
    %cst_109 = arith.constant 0.00999999977 : f32
    %304 = vector.broadcast %cst_109 : f32 to vector<4x4096xf32>
    %305 = arith.mulf %304, %303 : vector<4x4096xf32>
    %306 = arith.maximumf %303, %305 : vector<4x4096xf32>
    %c0_110 = arith.constant 0 : index
    %c0_111 = arith.constant 0 : index
    %c0_112 = arith.constant 0 : index
    %307 = vector.load %arg8[%c0_110, %c0_111, %c0_112] : memref<1x4x4096xf32, #tpu.memory_space<vmem>>, vector<1x4x4096xf32>
    %308 = vector.shape_cast %307 : vector<1x4x4096xf32> to vector<4x4096xf32>
    %309 = vector.shape_cast %306 : vector<4x4096xf32> to vector<1x4x4096xf32>
    tpu.vector_store %arg8[%c0_110, %c0_111, %c0_112], %309 {strides = array<i32>} : memref<1x4x4096xf32, #tpu.memory_space<vmem>>, vector<1x4x4096xf32>,
    return
  }
  func.func @transform_0(%arg0: i32) -> (i32, i32, i32) {
    %c0_i32 = arith.constant 0 : i32
    %c0_i32_0 = arith.constant 0 : i32
    %c0_i32_1 = arith.constant 0 : i32
    return %arg0, %c0_i32, %c0_i32_0 : i32, i32, i32
  }
  func.func @transform_1(%arg0: i32) -> (i32, i32, i32) {
    %c0_i32 = arith.constant 0 : i32
    %c0_i32_0 = arith.constant 0 : i32
    %c0_i32_1 = arith.constant 0 : i32
    return %arg0, %c0_i32, %c0_i32_0 : i32, i32, i32
  }
  func.func @transform_2(%arg0: i32) -> (i32, i32) {
    %c0_i32 = arith.constant 0 : i32
    %c0_i32_0 = arith.constant 0 : i32
    %c0_i32_1 = arith.constant 0 : i32
    return %c0_i32, %c0_i32_0 : i32, i32
  }
  func.func @transform_3(%arg0: i32) -> (i32, i32) {
    %c0_i32 = arith.constant 0 : i32
    %c0_i32_0 = arith.constant 0 : i32
    %c0_i32_1 = arith.constant 0 : i32
    return %c0_i32, %c0_i32_0 : i32, i32
  }
  func.func @transform_4(%arg0: i32) -> (i32, i32) {
    %c0_i32 = arith.constant 0 : i32
    %c0_i32_0 = arith.constant 0 : i32
    %c0_i32_1 = arith.constant 0 : i32
    return %c0_i32, %c0_i32_0 : i32, i32
  }
  func.func @transform_5(%arg0: i32) -> (i32, i32) {
    %c0_i32 = arith.constant 0 : i32
    %c0_i32_0 = arith.constant 0 : i32
    %c0_i32_1 = arith.constant 0 : i32
    return %c0_i32, %c0_i32_0 : i32, i32
  }
  func.func @transform_6(%arg0: i32) -> (i32, i32, i32) {
    %c0_i32 = arith.constant 0 : i32
    %c0_i32_0 = arith.constant 0 : i32
    %c0_i32_1 = arith.constant 0 : i32
    return %arg0, %c0_i32, %c0_i32_0 : i32, i32, i32
  }
  func.func @transform_7(%arg0: i32) -> (i32, i32, i32) {
    %c0_i32 = arith.constant 0 : i32
    %c0_i32_0 = arith.constant 0 : i32
    %c0_i32_1 = arith.constant 0 : i32
    return %arg0, %c0_i32, %c0_i32_0 : i32, i32, i32
  }
}

</mosaic_0001>

<bundles_post_ra>
// kernel: tpu_custom_call.1
= control target key start
LH: loop header
LB: loop body
LE: loop exit
PB: predicated region body
PF: predicated region fallthrough
CT: control target
= control target key end

     0   :  { %s18344_s0 = inlined_call_operand.hbm [shape: f32[2,4,4096], index: 0, kind: input, shape index: {}]   ;;  %s18345_s1 = inlined_call_operand.hbm [shape: f32[2,1,4096], index: 1, kind: input, shape index: {}]   ;;  %s18346_s2 = inlined_call_operand.hbm [shape: s32[1,4096], index: 2, kind: input, shape index: {}]   ;;  %s18347_s3 = inlined_call_operand.vmem [shape: f32[4,216], index: 3, kind: input, shape index: {}]   ;;  %s18348_s4 = inlined_call_operand.vmem [shape: f32[4,1], index: 4, kind: input, shape index: {}]   ;;  %s18349_s5 = inlined_call_operand.vmem [shape: f32[4,1], index: 5, kind: input, shape index: {}]   ;;  %s18350_s6 = inlined_call_operand.hbm [shape: f32[2,4,4096], index: 6, kind: input, shape index: {}]   ;;  %s18351_s7 = inlined_call_operand.hbm [shape: f32[2,4,4096], index: 7, kind: output, shape index: {}]  }
   0x1   :  { %19092 = sst [smem:[#allocation223_spill]] %s18346_s2 }
   0x2   :  { %12 = vsyncpa [#allocation4], 0 }
   0x3   :  { %14 = vsyncpa [#allocation4 + $0x1], 0 }
   0x4   :  { %15 = vsyncpa [#allocation7], 0 }
   0x5   :  { %17 = vsyncpa [#allocation7 + $0x1], 0 }
   0x6   :  { %18 = vsyncpa [#allocation10], 0 }
   0x7   :  { %20 = vsyncpa [#allocation10 + $0x1], 0 }
   0x8   :  { %21 = vsyncpa [#allocation5], 0 }
   0x9   :  { %23 = vsyncpa [#allocation5 + $0x1], 0  ;;  %s9139_s24 = smov 0   ;;  %s9141_s25 = smov 0  }
   0xa   :  { %s9143_s26 = smov 0   ;;  %s9145_s27 = smov 0  }
   0xb LB: > { %19093 = sst [smem:[#allocation17_spill]] %s9075_s24  ;;  %s9160_s28 = sadd.s32 4294967295, %s9087_s27   ;;  %s9087_s27 = sphi %s9145_s27, %s21678_s27   ;;  %s9083_s26 = sphi %s9143_s26, %s21683_s26   ;;  %s9079_s25 = sphi %s9141_s25, %s21682_s25   ;;  %s9075_s24 = sphi %s9139_s24, %s21681_s24  }
   0xc   : > { %19094 = sst [smem:[#allocation18_spill]] %s9083_s26  ;;  %s7872_s29 = sadd.s32 4294967294, %s9087_s27  }
   0xd   : > { %p49_p0 = scmp.ne.s32.totalorder %s9079_s25, %s9075_s24  ;;  %p50_p1 = scmp.eq.s32.totalorder %s9160_s28, 0 }
   0xe   : > { %p209_p2 = scmp.eq.s32.totalorder %s9160_s28, 1  ;;  %p215_p3 = scmp.eq.s32.totalorder %s7872_s29, 1 }
   0xf   : > { %p9169_p4 = por %p50_p1, %p49_p0  ;;  %p7873_p5 = scmp.ge.s32.totalorder %s9087_s27, 1 }
  0x10   : > { %p9174_p6 = por %p215_p3, %p49_p0  ;;  %p222_p7 = scmp.lt.s32.totalorder %s9087_s27, 3 }
  0x11   : > { %s19098_s2 = sld [smem:[#allocation223_spill]]  ;;  %s9089_s13 = smov [#allocation8]  }
  0x12   : > { %s19096_s8 = scalar_select %p9174_p6, 1, 0 }
  0x13   : > { %p9182_p8 = pnand %p7873_p5, %p222_p7  ;;  %s236_s14 = sshll.u32 %s9089_s13, 4  ;;  %s237_s14 = int_to_ptr.vmem [resolvable:$true] %s236_s14 }
  0x14   : > { %19097 = sst [smem:[#allocation19_spill]] %s19096_s8  ;;  %s9192_s15 = sadd.s32 1, %s9087_s27  }
  0x15   : > { %p8806_p10 = pneg %p9182_p8  ;;  %19100 = sst [smem:[#allocation20_spill]] %s9192_s15 }
  0x16   : > { %s36_s16 = sadd.s32 1, %s9083_s26  ;;  %s33_s17 = ssub.s32 %s9087_s27, %s9192_s15 }
  0x17   : > { %s234_s11 = sshll.u32 %s19098_s2, 4  ;;  %p8807_p11 = pnand %p8806_p10, %p50_p1  ;;  %s235_s11 = int_to_ptr.hbm [resolvable:$true] %s234_s11 }
  0x18   : > { %p34_p12 = scmp.eq.s32.totalorder %s33_s17, 0  ;;  %p43_p13 = scmp.ne.s32.totalorder %s9083_s26, %s9079_s25 }
  0x19   : > { %8809 = dma.hbm_to_vmem [thread:$0]  (!%p8807_p11), %s235_s11, 512, %s237_s14, [#allocation7]  }
  0x1a   : > { %p44_p0 = scmp.eq.s32.totalorder %s9087_s27, 0  ;;  %p8825_p3 = scmp.lt.s32.totalorder %s9087_s27, 2 }
  0x1b   : > { %s9202_s18 = scalar_select %p34_p12, %s9083_s26, %s36_s16  }
  0x1c   : > { %p45_p5 = por %p44_p0, %p43_p13  ;;  %p9206_p7 = por %p209_p2, %p43_p13 }
  0x1d   : > { %19101 = sst [smem:[#allocation21_spill]] %s9202_s18  ;;  %s9211_s20 = sand.u32 1, %s9083_s26  }
  0x1e   : > { %s19102_s19 = scalar_select %p9206_p7, 1, 0 }
  0x1f   : > { %s18353_s21 = sshll.u32 %s9087_s27, 7  ;;  %s18352_s22 = sshll.u32 %s9211_s20, 7 }
  0x20   : > { %19103 = sst [smem:[#allocation22_spill]] %s19102_s19  ;;  %s265_s9 = scalar_lea.hbm %s18344_s0, %s18353_s21 }
  0x21   : > { %s267_s10 = sshll.u32 %s265_s9, 4  ;;  %s260_s11 = scalar_lea.vmem [#allocation3], %s18352_s22  ;;  %s268_s10 = int_to_ptr.hbm [resolvable:$true] %s267_s10 }
  0x22   : > { %s269_s13 = sshll.u32 %s260_s11, 4  ;;  %p9224_p2 = pnand %p8825_p3, %p45_p5  ;;  %s270_s13 = int_to_ptr.vmem [resolvable:$true] %s269_s13 }
  0x23   : > { %s276_s16 = sand.u32 1, %s9087_s27   ;;  %s7879_s17 = sshll.u32 %s9211_s20, 5 }
  0x24   : > { %s257_s2 = scalar_lea.sflag [#allocation4], %s9211_s20  ;;  %s8919_s18 = sshra.s32 %s268_s10, 4  ;;  %s8920_s18 = int_to_ptr.hbm [resolvable:$true] %s8919_s18 }
  0x25   : > { %s8921_s23 = scalar_lea.hbm %s8920_s18, 128  ;;  %p8923_p11 = pneg %p9224_p2 }
  0x26   : > { %p8922_p10 = scmp.ne.s32.totalorder %s8920_s18, %s8921_s23  ;;  %s8926_s11 = scalar_lea.hbm %s18344_s0, 256 }
  0x27   : > { %p8927_p0 = scmp.lt.s32.totalorder %s8920_s18, %s18344_s0  ;;  %p8928_p3 = scmp.lt.s32.totalorder %s8926_s11, %s8921_s23 }
  0x28   : > { %p8924_p12 = pnand %p8923_p11, %p8922_p10 }
  0x29   : > { %p8929_p5 = por %p8928_p3, %p8927_p0 }
  0x2a   : > { %p8925_p13 = pneg %p8924_p12 }
  0x2c   : > { %p8930_p9 = pnand %p8929_p5, %p8925_p13 }
  0x2e   : > { %8933 = shalt.err (!%p8930_p9)
}
  0x2f   : > { %8813 = dma.hbm_to_vmem [thread:$0]  (!%p9224_p2), %s268_s10, 2048, %s270_s13, %s257_s2  }
  0x30   : > { %s7880_s26 = sshll.u32 %s9087_s27, 5  ;;  %s280_s15 = scalar_lea.vmem [#allocation6], %s7879_s17 }
  0x31   : > { %s288_s8 = sshll.u32 %s280_s15, 4  ;;  %s284_s29 = scalar_lea.hbm %s18345_s1, %s7880_s26  ;;  %s289_s8 = int_to_ptr.vmem [resolvable:$true] %s288_s8 }
  0x32   : > { %s286_s9 = sshll.u32 %s284_s29, 4  ;;  %s277_s18 = scalar_lea.sflag [#allocation7], %s276_s16  ;;  %s287_s9 = int_to_ptr.hbm [resolvable:$true] %s286_s9 }
  0x33   : > { %s8949_s21 = sshra.s32 %s287_s9, 4  ;;  %s8956_s15 = scalar_lea.hbm %s18345_s1, 64  ;;  %s8950_s21 = int_to_ptr.hbm [resolvable:$true] %s8949_s21 }
  0x34   : > { %s8951_s22 = scalar_lea.hbm %s8950_s21, 32  ;;  %p8957_p13 = scmp.lt.s32.totalorder %s8950_s21, %s18345_s1 }
  0x35   : > { %p8952_p9 = scmp.ne.s32.totalorder %s8950_s21, %s8951_s22  ;;  %p8958_p0 = scmp.lt.s32.totalorder %s8956_s15, %s8951_s22 }
  0x37   : > { %p8954_p10 = pnand %p8952_p9, %p8923_p11  ;;  %p8959_p3 = por %p8958_p0, %p8957_p13 }
  0x39   : > { %p8955_p12 = pneg %p8954_p10 }
  0x3b   : > { %p8960_p5 = pnand %p8959_p3, %p8955_p12 }
  0x3d   : > { %8963 = shalt.err (!%p8960_p5)
}
  0x3e   : > { %8816 = dma.hbm_to_vmem [thread:$0]  (!%p9224_p2), %s287_s9, 512, %s289_s8, %s277_s18  }
  0x3f   : > { %s19105_s24 = sshll.u32 %s9087_s27, 7  ;;  %s19106_s23 = sshll.u32 %s9211_s20, 7 }
  0x40   : > { %s304_s16 = scalar_lea.hbm %s18350_s6, %s19105_s24  ;;  %s299_s11 = scalar_lea.vmem [#allocation9], %s19106_s23 }
  0x41   : > { %s308_s29 = sshll.u32 %s299_s11, 4  ;;  %s306_s21 = sshll.u32 %s304_s16, 4  ;;  %s309_s29 = int_to_ptr.vmem [resolvable:$true] %s308_s29  ;;  %s307_s21 = int_to_ptr.hbm [resolvable:$true] %s306_s21 }
  0x42   : > { %s296_s22 = scalar_lea.sflag [#allocation10], %s9211_s20  ;;  %s8979_s2 = sshra.s32 %s307_s21, 4  ;;  %s8980_s2 = int_to_ptr.hbm [resolvable:$true] %s8979_s2 }
  0x43   : > { %s8981_s10 = scalar_lea.hbm %s8980_s2, 128  ;;  %s8986_s18 = scalar_lea.hbm %s18350_s6, 256 }
  0x44   : > { %p8982_p9 = scmp.ne.s32.totalorder %s8980_s2, %s8981_s10  ;;  %p8987_p13 = scmp.lt.s32.totalorder %s8980_s2, %s18350_s6 }
  0x45   : > { %p8988_p0 = scmp.lt.s32.totalorder %s8986_s18, %s8981_s10 }
  0x46   : > { %p8984_p10 = pnand %p8982_p9, %p8923_p11 }
  0x47   : > { %p8989_p3 = por %p8988_p0, %p8987_p13 }
  0x48   : > { %p8985_p12 = pneg %p8984_p10 }
  0x4a   : > { %p8990_p5 = pnand %p8989_p3, %p8985_p12 }
  0x4c   : > { %8993 = shalt.err (!%p8990_p5)
}
  0x4d   : > { %8819 = dma.hbm_to_vmem [thread:$0]  (!%p9224_p2), %s307_s21, 2048, %s309_s29, %s296_s22  }
  0x4e   : > { %317 = sbr.rel (%p9182_p8) target bundleno = 1586 (0x632), region = 48 }
  0x53   : > { %s9281_s20 = sand.u32 1, %s9079_s25  }
  0x54   : > { %s9284_s17 = sshll.u32 %s9281_s20, 7  ;;  %s320_s24 = scalar_lea.sflag [#allocation4], %s9281_s20 }
  0x55   : > { %s9288_s26 = scalar_lea.vmem [#allocation3], %s9284_s17 }
  0x56   : > { %9054 = dma.done.wait (%p9169_p4), %s320_s24, 2048  }
  0x57   : > { %9056 = vsyncadd (%p9169_p4), %s320_s24, 4294965248  ;;  %s329_s12 = sand.u32 1, %s9160_s28   ;;  %s7886_s14 = sshll.u32 %s9281_s20, 5 }
  0x58   : > { %s330_s19 = scalar_lea.sflag [#allocation7], %s329_s12  ;;  %s9296_s16 = scalar_lea.vmem [#allocation6], %s7886_s14 }
  0x59   : > { %9058 = dma.done.wait (%p9169_p4), %s330_s19, 512  }
  0x5a   : > { %9060 = vsyncadd (%p9169_p4), %s330_s19, 4294966784 }
  0x5b   : > { %9062 = dma.done.wait (%p50_p1), [#allocation7], 512  }
  0x5c   : > { %9064 = vsyncadd (%p50_p1), [#allocation7], 4294966784  ;;  %s345_s23 = scalar_lea.sflag [#allocation10], %s9281_s20  ;;  %s9308_s11 = scalar_lea.vmem [#allocation9], %s9284_s17 }
  0x5d   : > { %9066 = dma.done.wait (%p9169_p4), %s345_s23, 2048  }
  0x5e   : > { %9068 = vsyncadd (%p9169_p4), %s345_s23, 4294965248  ;;  %v406_v0 = vld [vmem:[%s9296_s16] sm:$0xff]  ;;  %vm18613_vm0 = vcmask 1043456   ;;  %v407_v7 = vld [vmem:[%s9296_s16 + $0x8] sm:$0xff]  ;;  %s9090_s30 = smov 17   ;;  %s9091_s22 = smov 16  }
  0x5f   : > { %v418_v1 = vperm.slane %v406_v0, 4  ;;  %v419_v2 = vperm.slane %v406_v0, 5  ;;  %v416_v3 = vperm.slane %v406_v0, 2  ;;  %v417_v4 = vperm.slane %v406_v0, 3  ;;  %v392_v8 = vld [vmem:[%s9288_s26 + $0x10] sm:$0xff]  ;;  %v391_v10 = vld [vmem:[%s9288_s26 + $0x8] sm:$0xff] }
  0x60   : > { %v414_v5 = vperm.slane %v406_v0, 0  ;;  %v415_v6 = vperm.slane %v406_v0, 1  ;;  %v427_v12 = vperm.slane %v407_v7, 5  ;;  %v390_v13 = vld [vmem:[%s9288_s26] sm:$0xff]  ;;  %v425_v15 = vperm.slane %v407_v7, 3  ;;  %v393_v32 = vld [vmem:[%s9288_s26 + $0x18] sm:$0xff] }
  0x61   : > { %v448_v9 = vrot.slane %v419_v2, 4  ;;  %v447_v11 = vrot.slane %v417_v4, 4  ;;  %v426_v18 = vperm.slane %v407_v7, 4  ;;  %v423_v19 = vperm.slane %v407_v7, 1  ;;  %v396_v34 = vld [vmem:[%s9288_s26 + $0x30] sm:$0xff]  ;;  %v395_v40 = vld [vmem:[%s9288_s26 + $0x28] sm:$0xff] }
  0x62   : > { %v446_v14 = vrot.slane %v415_v6, 4  ;;  %v452_v23 = vrot.slane %v427_v12, 4  ;;  %v420_v25 = vperm.slane %v406_v0, 6  ;;  %v421_v26 = vperm.slane %v406_v0, 7  ;;  %v9327_v39 = vld [vmem:[%s9296_s16 + $0x10] sm:$0xff]  ;;  %v394_v45 = vld [vmem:[%s9288_s26 + $0x20] sm:$0xff] }
  0x63   : > { %v465_v16 = vsel %vm18613_vm0, %v418_v1, %v448_v9  ;;  %v464_v17 = vsel %vm18613_vm0, %v416_v3, %v447_v11  ;;  %v424_v27 = vperm.slane %v407_v7, 2  ;;  %v451_v28 = vrot.slane %v425_v15, 4  ;;  %v397_v47 = vld [vmem:[%s9288_s26 + $0x38] sm:$0xff]  ;;  %v399_v2 = vld [vmem:[%s9288_s26 + $0x48] sm:$0xff]  ;;  %v398_v9 = vld [vmem:[%s9288_s26 + $0x40] sm:$0xff]  ;;  %s9092_s2 = smov 15  }
  0x64   : > { %v497_v20 = vmul.f32 %v465_v16, %v392_v8  ;;  %v496_v21 = vmul.f32 %v464_v17, %v391_v10  ;;  %v463_v22 = vsel %vm18613_vm0, %v414_v5, %v446_v14  ;;  %v429_v29 = vperm.slane %v407_v7, 7  ;;  %v400_v15 = vld [vmem:[%s9288_s26 + $0x50] sm:$0xff]  ;;  %s9093_s10 = smov 113   ;;  %s9094_s8 = smov 1  }
  0x65   : > { %v495_v24 = vmul.f32 %v463_v22, %v390_v13  ;;  %v422_v30 = vperm.slane %v407_v7, 0  ;;  %v450_v31 = vrot.slane %v423_v19, 4  ;;  %v449_v33 = vrot.slane %v421_v26, 4  ;;  %s9095_s9 = smov 127   ;;  %s9096_s18 = smov 111  }
  0x66   : > { %531 = vst [vmem:[#allocation1 + $0x20] ss:$2 sm:$0xff] %v497_v20  ;;  %v469_v35 = vsel %vm18613_vm0, %v426_v18, %v452_v23  ;;  %v428_v37 = vperm.slane %v407_v7, 6  ;;  %v453_v38 = vrot.slane %v429_v29, 4  ;;  %v468_v41 = vsel %vm18613_vm0, %v424_v27, %v451_v28  ;;  %v401_v20 = vld [vmem:[%s9288_s26 + $0x58] sm:$0xff]  ;;  %s9097_s15 = smov 112  }
  0x67   : > { %529 = vst [vmem:[#allocation1 + $0x10] ss:$2 sm:$0xff] %v496_v21  ;;  %v466_v36 = vsel %vm18613_vm0, %v420_v25, %v449_v33  ;;  %v433_v43 = vperm.slane %v9327_v39, 3  ;;  %v501_v44 = vmul.f32 %v469_v35, %v396_v34  ;;  %v467_v46 = vsel %vm18613_vm0, %v422_v30, %v450_v31  ;;  %v409_v35 = vld [vmem:[%s9296_s16 + $0x18] sm:$0xff]  ;;  %s18292_s14 = scalar_lea.vmem [#allocation11], %s9284_s17  ;;  %s7929_s17 = sshll.u32 %s9160_s28, 7 }
  0x68   : > { %527 = vst [vmem:[#allocation1] ss:$2 sm:$0xff] %v495_v24  ;;  %v498_v42 = vmul.f32 %v466_v36, %v393_v32  ;;  %v431_v48 = vperm.slane %v9327_v39, 1  ;;  %v500_v51 = vmul.f32 %v468_v41, %v395_v40  ;;  %v470_v52 = vsel %vm18613_vm0, %v428_v37, %v453_v38  ;;  %s7742_s23 = scalar_lea.hbm %s18351_s7, %s7929_s17  ;;  %s7731_s29 = scalar_lea.sflag [#allocation5], %s9281_s20 }
  0x69   : > { %v499_v55 = vmul.f32 %v467_v46, %v394_v45  ;;  %v432_v56 = vperm.slane %v9327_v39, 2  ;;  %v455_v57 = vrot.slane %v433_v43, 4  ;;  %v502_v62 = vmul.f32 %v470_v52, %v397_v47  ;;  %v403_v46 = vld [vmem:[%s9288_s26 + $0x68] sm:$0xff] }
  0x6a   : > { %533 = vst [vmem:[#allocation1 + $0x30] ss:$2 sm:$0xff] %v498_v42  ;;  %v430_v63 = vperm.slane %v9327_v39, 0  ;;  %v454_v0 = vrot.slane %v431_v48, 4  ;;  %v434_v4 = vperm.slane %v9327_v39, 4  ;;  %v435_v5 = vperm.slane %v9327_v39, 5 }
  0x6b   : > { %v472_v3 = vsel %vm18613_vm0, %v432_v56, %v455_v57  ;;  %v437_v12 = vperm.slane %v9327_v39, 7  ;;  %v436_v16 = vperm.slane %v9327_v39, 6  ;;  %v438_v37 = vperm.slane %v409_v35, 0  ;;  %v402_v39 = vld [vmem:[%s9288_s26 + $0x60] sm:$0xff] }
  0x6c   : > { %v471_v10 = vsel %vm18613_vm0, %v430_v63, %v454_v0  ;;  %v456_v11 = vrot.slane %v435_v5, 4  ;;  %v504_v14 = vmul.f32 %v472_v3, %v399_v2  ;;  %v439_v38 = vperm.slane %v409_v35, 1  ;;  %v404_v0 = vld [vmem:[%s9288_s26 + $0x70] sm:$0xff] }
  0x6d   : > { %v9336_v49 = vld.sshfl [vmem:[#allocation1 + $0x20] sm:$0xff pattern:$0x75316420]  ;;  %v9338_v50 = vld.sshfl [vmem:[#allocation1 + $0x28] sm:$0xff pattern:$0x75316420]  ;;  %v503_v19 = vmul.f32 %v471_v10, %v398_v9 }
  0x6e   : > { %19107 = vst [vmem:[#allocation23_spill] sm:$0xff] %v9336_v49  ;;  %v9343_v53 = vsel %vm18613_vm0, %v9336_v49, 0.0  ;;  %v9345_v54 = vld.sshfl [vmem:[#allocation1 + $0x10] sm:$0xff pattern:$0x75316420]  ;;  %v9379_v8 = vsel %vm18613_vm0, %v9338_v50, 0.0  ;;  %v473_v18 = vsel %vm18613_vm0, %v434_v4, %v456_v11 }
  0x6f   : > { %19108 = vst [vmem:[#allocation24_spill] sm:$0xff] %v9338_v50  ;;  %654 = vrot.lane.b32.xlu2 %v9343_v53, %s9090_s30  ;;  %v9352_v58 = vsel %vm18613_vm0, %v9345_v54, 0.0  ;;  %v9354_v59 = vld.sshfl [vmem:[#allocation1] sm:$0xff pattern:$0x75316420]  ;;  %v457_v21 = vrot.slane %v437_v12, 4  ;;  %v505_v24 = vmul.f32 %v473_v18, %v400_v15 }
  0x70   : > { %19109 = vst [vmem:[#allocation25_spill] sm:$0xff] %v9343_v53  ;;  %650 = vrot.lane.b32.xlu1 %v9352_v58, %s9090_s30  ;;  %v9360_v60 = vsel %vm18613_vm0, %v9354_v59, 0.0  ;;  %v9362_v61 = vld.sshfl [vmem:[#allocation1 + $0x18] sm:$0xff pattern:$0x75316420]  ;;  %v458_v40 = vrot.slane %v439_v38, 4 }
  0x71   : > { %19110 = vst [vmem:[#allocation26_spill] sm:$0xff] %v9345_v54  ;;  %646 = vrot.lane.b32.xlu0 %v9360_v60, %s9090_s30  ;;  %v9367_v1 = vld.sshfl [vmem:[#allocation1 + $0x8] sm:$0xff pattern:$0x75316420]  ;;  %v9386_v13 = vsel %vm18613_vm0, %v9362_v61, 0.0  ;;  %v474_v27 = vsel %vm18613_vm0, %v436_v16, %v457_v21  ;;  %v440_v41 = vperm.slane %v409_v35, 2 }
  0x72   : > { %19111 = vst [vmem:[#allocation27_spill] sm:$0xff] %v9352_v58  ;;  %v9373_v6 = vld.sshfl [vmem:[#allocation1 + $0x38] sm:$0xff pattern:$0x75316420]  ;;  %v9392_v17 = vsel %vm18613_vm0, %v9367_v1, 0.0  ;;  %v506_v30 = vmul.f32 %v474_v27, %v401_v20  ;;  %v441_v42 = vperm.slane %v409_v35, 3  ;;  %v475_v43 = vsel %vm18613_vm0, %v438_v37, %v458_v40 }
  0x73   : > { %544 = vst [vmem:[#allocation1 + $0x20] ss:$2 sm:$0xff] %v501_v44  ;;  %v9375_v7 = vld.sshfl [vmem:[#allocation1 + $0x30] sm:$0xff pattern:$0x75316420]  ;;  %v9425_v34 = vsel %vm18613_vm0, %v9373_v6, 0.0  ;;  %v507_v45 = vmul.f32 %v475_v43, %v402_v39 }
  0x74   : > { %19112 = vst [vmem:[#allocation28_spill] sm:$0xff] %v9360_v60  ;;  %v9430_v36 = vsel %vm18613_vm0, %v9375_v7, 0.0  ;;  %v459_v47 = vrot.slane %v441_v42, 4  ;;  %v442_v52 = vperm.slane %v409_v35, 4  ;;  %v444_v10 = vperm.slane %v409_v35, 6  ;;  %v405_v15 = vld [vmem:[%s9288_s26 + $0x78] sm:$0xff] }
  0x75   : > { %19113 = vst [vmem:[#allocation29_spill] sm:$0xff] %v9362_v61  ;;  %v445_v11 = vperm.slane %v409_v35, 7  ;;  %v9920_v49 = vld [vmem:[#allocation8] sm:$0xff] }
  0x76   : > { %543 = vst [vmem:[#allocation1 + $0x10] ss:$2 sm:$0xff] %v500_v51  ;;  %v476_v57 = vsel %vm18613_vm0, %v440_v41, %v459_v47 }
  0x77   : > { %542 = vst [vmem:[#allocation1] ss:$2 sm:$0xff] %v499_v55  ;;  %656 = vrot.lane.b32.xlu2 %v9379_v8, %s9090_s30  ;;  %v443_v55 = vperm.slane %v409_v35, 5  ;;  %v508_v63 = vmul.f32 %v476_v57, %v403_v46  ;;  %v461_v16 = vrot.slane %v445_v11, 4  ;;  %v5096_v35 = vld [vmem:[%s18347_s3] sm:$0xff] }
  0x78   : > { %19114 = vst [vmem:[#allocation30_spill] sm:$0xff] %v9373_v6  ;;  %652 = vrot.lane.b32.xlu1 %v9386_v13, %s9090_s30 }
  0x79   : > { %19115 = vst [vmem:[#allocation31_spill] sm:$0xff] %v9375_v7  ;;  %648 = vrot.lane.b32.xlu0 %v9392_v17, %s9090_s30  ;;  %v460_v2 = vrot.slane %v443_v55, 4  ;;  %v478_v20 = vsel %vm18613_vm0, %v444_v10, %v461_v16 }
  0x7a   : > { %19116 = vst [vmem:[#allocation32_spill] sm:$0xff] %v9379_v8  ;;  %v9408_v26 = vld.sshfl [vmem:[#allocation1 + $0x28] sm:$0xff pattern:$0x75316420] }
  0x7b   : > { %545 = vst [vmem:[#allocation1 + $0x30] ss:$2 sm:$0xff] %v502_v62  ;;  %v9413_v29 = vld.sshfl [vmem:[#allocation1 + $0x20] sm:$0xff pattern:$0x75316420]  ;;  %v477_v5 = vsel %vm18613_vm0, %v442_v52, %v460_v2 }
  0x7c   : > { %19117 = vst [vmem:[#allocation33_spill] sm:$0xff] %v9386_v13  ;;  %v509_v9 = vmul.f32 %v477_v5, %v404_v0  ;;  %v9486_v21 = vsel %vm18613_vm0, %v9413_v29, 0.0 }
  0x7d   : > { %19118 = vst [vmem:[#allocation34_spill] sm:$0xff] %v9392_v17  ;;  %v9400_v22 = vld.sshfl [vmem:[#allocation1 + $0x10] sm:$0xff pattern:$0x75316420] }
  0x7e   : > { %19119 = vst [vmem:[#allocation35_spill] sm:$0xff] %v9400_v22  ;;  %v9402_v23 = vld.sshfl [vmem:[#allocation1 + $0x18] sm:$0xff pattern:$0x75316420]  ;;  %v9451_v56 = vsel %vm18613_vm0, %v9400_v22, 0.0 }
  0x7f   : > { %19120 = vst [vmem:[#allocation36_spill] sm:$0xff] %v9402_v23  ;;  %v9406_v25 = vld.sshfl [vmem:[#allocation1] sm:$0xff pattern:$0x75316420]  ;;  %v9445_v48 = vsel %vm18613_vm0, %v9402_v23, 0.0 }
  0x80   : > { %19121 = vst [vmem:[#allocation37_spill] sm:$0xff] %v9406_v25  ;;  %v9411_v28 = vld.sshfl [vmem:[#allocation1 + $0x8] sm:$0xff pattern:$0x75316420]  ;;  %v9419_v32 = vsel %vm18613_vm0, %v9406_v25, 0.0  ;;  %660 = vrot.lane.b32.xlu1 %v9425_v34, %s9090_s30 }
  0x81   : > { %555 = vst [vmem:[#allocation1 + $0x10] ss:$2 sm:$0xff] %v504_v14  ;;  %662 = vrot.lane.b32.xlu2 %v9419_v32, %s9090_s30  ;;  %658 = vrot.lane.b32.xlu0 %v9430_v36, %s9090_s30  ;;  %v9456_v62 = vsel %vm18613_vm0, %v9411_v28, 0.0 }
  0x82   : > { %19122 = vst [vmem:[#allocation38_spill] sm:$0xff] %v9408_v26  ;;  %v9415_v31 = vld.sshfl [vmem:[#allocation1 + $0x30] sm:$0xff pattern:$0x75316420] }
  0x83   : > { %19123 = vst [vmem:[#allocation39_spill] sm:$0xff] %v9411_v28  ;;  %v9421_v33 = vld.sshfl [vmem:[#allocation1 + $0x38] sm:$0xff pattern:$0x75316420]  ;;  %v9477_v18 = vsel %vm18613_vm0, %v9415_v31, 0.0 }
  0x84   : > { %19124 = vst [vmem:[#allocation40_spill] sm:$0xff] %v9413_v29  ;;  %v9515_v41 = vsel %vm18613_vm0, %v9421_v33, 0.0 }
  0x85   : > { %554 = vst [vmem:[#allocation1] ss:$2 sm:$0xff] %v503_v19  ;;  %v9481_v19 = vsel %vm18613_vm0, %v9408_v26, 0.0 }
  0x86   : > { %19125 = vst [vmem:[#allocation41_spill] sm:$0xff] %v9415_v31 }
  0x87   : > { %19126 = vst [vmem:[#allocation42_spill] sm:$0xff] %v9419_v32 }
  0x88   : > { %556 = vst [vmem:[#allocation1 + $0x20] ss:$2 sm:$0xff] %v505_v24  ;;  %v9461_v3 = vld.sshfl [vmem:[#allocation1 + $0x10] sm:$0xff pattern:$0x75316420]  ;;  %666 = vrot.lane.b32.xlu1 %v9451_v56, %s9090_s30  ;;  %v510_v24 = vmul.f32 %v478_v20, %v405_v15 }
  0x89   : > { %19127 = vst [vmem:[#allocation43_spill] sm:$0xff] %v9421_v33  ;;  %668 = vrot.lane.b32.xlu2 %v9445_v48, %s9090_s30  ;;  %v9463_v4 = vld.sshfl [vmem:[#allocation1 + $0x18] sm:$0xff pattern:$0x75316420]  ;;  %664 = vrot.lane.b32.xlu0 %v9456_v62, %s9090_s30 }
  0x8a   : > { %19128 = vst [vmem:[#allocation44_spill] sm:$0xff] %v9425_v34  ;;  %v9529_v43 = vsel %vm18613_vm0, %v9463_v4, 0.0 }
  0x8b   : > { %557 = vst [vmem:[#allocation1 + $0x30] ss:$2 sm:$0xff] %v506_v30 }
  0x8c   : > { %19129 = vst [vmem:[#allocation45_spill] sm:$0xff] %v9430_v36  ;;  %v9440_v44 = vld.sshfl [vmem:[#allocation1 + $0x8] sm:$0xff pattern:$0x75316420] }
  0x8d   : > { %19130 = vst [vmem:[#allocation46_spill] sm:$0xff] %v9440_v44  ;;  %v9447_v51 = vld.sshfl [vmem:[#allocation1] sm:$0xff pattern:$0x75316420]  ;;  %v9507_v39 = vsel %vm18613_vm0, %v9440_v44, 0.0 }
  0x8e   : > { %19131 = vst [vmem:[#allocation47_spill] sm:$0xff] %v9445_v48  ;;  %v9511_v40 = vsel %vm18613_vm0, %v9447_v51, 0.0 }
  0x8f   : > { %19132 = vst [vmem:[#allocation48_spill] sm:$0xff] %v9447_v51  ;;  %v9470_v12 = vld.sshfl [vmem:[#allocation1 + $0x20] sm:$0xff pattern:$0x75316420] }
  0x90   : > { %19133 = vst [vmem:[#allocation49_spill] sm:$0xff] %v9451_v56  ;;  %v9472_v14 = vld.sshfl [vmem:[#allocation1 + $0x28] sm:$0xff pattern:$0x75316420]  ;;  %672 = vrot.lane.b32.xlu1 %v9481_v19, %s9090_s30  ;;  %v9525_v42 = vsel %vm18613_vm0, %v9470_v12, 0.0 }
  0x91   : > { %566 = vst [vmem:[#allocation1] ss:$2 sm:$0xff] %v507_v45  ;;  %674 = vrot.lane.b32.xlu2 %v9477_v18, %s9090_s30  ;;  %670 = vrot.lane.b32.xlu0 %v9486_v21, %s9090_s30  ;;  %v9533_v45 = vsel %vm18613_vm0, %v9461_v3, 0.0  ;;  %v9551_v52 = vsel %vm18613_vm0, %v9472_v14, 0.0 }
  0x92   : > { %19134 = vst [vmem:[#allocation50_spill] sm:$0xff] %v9456_v62  ;;  %v9490_v27 = vld.sshfl [vmem:[#allocation1 + $0x38] sm:$0xff pattern:$0x75316420] }
  0x93   : > { %19135 = vst [vmem:[#allocation51_spill] sm:$0xff] %v9461_v3  ;;  %v9492_v30 = vld.sshfl [vmem:[#allocation1 + $0x30] sm:$0xff pattern:$0x75316420]  ;;  %v9543_v46 = vsel %vm18613_vm0, %v9490_v27, 0.0 }
  0x94   : > { %19136 = vst [vmem:[#allocation52_spill] sm:$0xff] %v9463_v4  ;;  %v9547_v47 = vsel %vm18613_vm0, %v9492_v30, 0.0 }
  0x95   : > { %567 = vst [vmem:[#allocation1 + $0x10] ss:$2 sm:$0xff] %v508_v63 }
  0x96   : > { %19137 = vst [vmem:[#allocation53_spill] sm:$0xff] %v9470_v12 }
  0x97   : > { %19138 = vst [vmem:[#allocation54_spill] sm:$0xff] %v9472_v14 }
  0x98   : > { %568 = vst [vmem:[#allocation1 + $0x20] ss:$2 sm:$0xff] %v509_v9  ;;  %v9501_v37 = vld.sshfl [vmem:[#allocation1 + $0x8] sm:$0xff pattern:$0x75316420]  ;;  %678 = vrot.lane.b32.xlu1 %v9511_v40, %s9090_s30 }
  0x99   : > { %19139 = vst [vmem:[#allocation55_spill] sm:$0xff] %v9477_v18  ;;  %v9503_v38 = vld.sshfl [vmem:[#allocation1] sm:$0xff pattern:$0x75316420]  ;;  %680 = vrot.lane.b32.xlu2 %v9507_v39, %s9090_s30  ;;  %676 = vrot.lane.b32.xlu0 %v9515_v41, %s9090_s30  ;;  %v9564_v63 = vsel %vm18613_vm0, %v9501_v37, 0.0 }
  0x9a   : > { %19140 = vst [vmem:[#allocation56_spill] sm:$0xff] %v9481_v19  ;;  %v9568_v0 = vsel %vm18613_vm0, %v9503_v38, 0.0 }
  0x9b   : > { %19141 = vst [vmem:[#allocation57_spill] sm:$0xff] %v9486_v21 }
  0x9c   : > { %19142 = vst [vmem:[#allocation58_spill] sm:$0xff] %v9490_v27  ;;  %v572_v55 = vld.sshfl [vmem:[#allocation1 + $0x10] sm:$0xff pattern:$0x75316420] }
  0x9d   : > { %19143 = vst [vmem:[#allocation59_spill] sm:$0xff] %v9492_v30  ;;  %v9560_v57 = vsel %vm18613_vm0, %v572_v55, 0.0  ;;  %v573_v9 = vld.sshfl [vmem:[#allocation1 + $0x18] sm:$0xff pattern:$0x75316420] }
  0x9e   : > { %569 = vst [vmem:[#allocation1 + $0x30] ss:$2 sm:$0xff] %v510_v24  ;;  %v9583_v15 = vsel %vm18613_vm0, %v573_v9, 0.0 }
  0x9f   : > { %19144 = vst [vmem:[#allocation60_spill] sm:$0xff] %v9501_v37  ;;  %v575_v2 = vld.sshfl [vmem:[#allocation1 + $0x28] sm:$0xff pattern:$0x75316420] }
  0xa0   : > { %19145 = vst [vmem:[#allocation61_spill] sm:$0xff] %v9503_v38  ;;  %684 = vrot.lane.b32.xlu1 %v9529_v43, %s9090_s30  ;;  %v574_v5 = vld.sshfl [vmem:[#allocation1 + $0x20] sm:$0xff pattern:$0x75316420]  ;;  %v9577_v10 = vsel %vm18613_vm0, %v575_v2, 0.0 }
  0xa1   : > { %5962 = vst [vmem:[#allocation1] ss:$2 sm:$0xff] %v5096_v35  ;;  %686 = vrot.lane.b32.xlu2 %v9525_v42, %s9090_s30  ;;  %682 = vrot.lane.b32.xlu0 %v9533_v45, %s9090_s30  ;;  %v9580_v11 = vsel %vm18613_vm0, %v574_v5, 0.0 }
  0xa2   : > { %19146 = vst [vmem:[#allocation62_spill] sm:$0xff] %v9507_v39 }
  0xa3   : > { %19147 = vst [vmem:[#allocation63_spill] sm:$0xff] %v9511_v40 }
  0xa4   : > { %19148 = vst [vmem:[#allocation64_spill] sm:$0xff] %v9515_v41 }
  0xa5   : > { %19149 = vst [vmem:[#allocation65_spill] sm:$0xff] %v9525_v42  ;;  %v577_v16 = vld.sshfl [vmem:[#allocation1 + $0x38] sm:$0xff pattern:$0x75316420] }
  0xa6   : > { %19150 = vst [vmem:[#allocation66_spill] sm:$0xff] %v9529_v43  ;;  %v576_v20 = vld.sshfl [vmem:[#allocation1 + $0x30] sm:$0xff pattern:$0x75316420]  ;;  %v9592_v24 = vsel %vm18613_vm0, %v577_v16, 0.0 }
  0xa7   : > { %19151 = vst [vmem:[#allocation67_spill] sm:$0xff] %v9533_v45  ;;  %v9595_v35 = vsel %vm18613_vm0, %v576_v20, 0.0 }
  0xa8   : > { %19152 = vst [vmem:[#allocation68_spill] sm:$0xff] %v9543_v46  ;;  %690 = vrot.lane.b32.xlu1 %v9547_v47, %s9090_s30 }
  0xa9   : > { %19153 = vst [vmem:[#allocation69_spill] sm:$0xff] %v9547_v47  ;;  %692 = vrot.lane.b32.xlu2 %v9543_v46, %s9090_s30  ;;  %688 = vrot.lane.b32.xlu0 %v9551_v52, %s9090_s30 }
  0xaa   : > { %19154 = vst [vmem:[#allocation70_spill] sm:$0xff] %v9551_v52 }
  0xab   : > { %19155 = vst [vmem:[#allocation71_spill] sm:$0xff] %v9560_v57 }
  0xac   : > { %19156 = vst [vmem:[#allocation72_spill] sm:$0xff] %v9564_v63 }
  0xad   : > { %19157 = vst [vmem:[#allocation73_spill] sm:$0xff] %v9568_v0 }
  0xae   : > { %19158 = vst [vmem:[#allocation74_spill] sm:$0xff] %v9577_v10 }
  0xaf   : > { %19159 = vst [vmem:[#allocation75_spill] sm:$0xff] %v9580_v11 }
  0xb0   : > { %696 = vrot.lane.b32.xlu1 %v9564_v63, %s9090_s30  ;;  %19160 = vst [vmem:[#allocation76_spill] sm:$0xff] %v9583_v15 }
  0xb1   : > { %698 = vrot.lane.b32.xlu2 %v9560_v57, %s9090_s30  ;;  %694 = vrot.lane.b32.xlu0 %v9568_v0, %s9090_s30  ;;  %19161 = vst [vmem:[#allocation77_spill] sm:$0xff] %v9592_v24 }
  0xb2   : > { %19162 = vst [vmem:[#allocation78_spill] sm:$0xff] %v9595_v35 }
  0xb8   : > { %702 = vrot.lane.b32.xlu1 %v9580_v11, %s9090_s30 }
  0xb9   : > { %704 = vrot.lane.b32.xlu2 %v9577_v10, %s9090_s30  ;;  %700 = vrot.lane.b32.xlu0 %v9583_v15, %s9090_s30 }
  0xc0   : > { %708 = vrot.lane.b32.xlu1 %v9592_v24, %s9090_s30 }
  0xc1   : > { %885 = vrot.lane.b32.xlu2 %v9360_v60, %s9091_s22  ;;  %706 = vrot.lane.b32.xlu0 %v9595_v35, %s9090_s30  ;;  %s7746_s30 = sshll.u32 %s7742_s23, 4  ;;  %s7747_s30 = int_to_ptr.hbm [resolvable:$true] %s7746_s30 }
  0xc2   : > { %s9023_s21 = sshra.s32 %s7747_s30, 4  ;;  %s9024_s21 = int_to_ptr.hbm [resolvable:$true] %s9023_s21 }
  0xc3   : > { %p9030_p2 = scmp.lt.s32.totalorder %s9024_s21, %s18351_s7 }
  0xc8   : > { %889 = vrot.lane.b32.xlu1 %v9352_v58, %s9091_s22 }
  0xc9   : > { %891 = vrot.lane.b32.xlu2 %v9386_v13, %s9091_s22  ;;  %887 = vrot.lane.b32.xlu0 %v9392_v17, %s9091_s22  ;;  %v9609_v55 = vpop.permute.xlu2 %654 }
  0xca   : > { %19163 = vst [vmem:[#allocation79_spill] sm:$0xff] %v9609_v55 }
  0xd0   : > { %895 = vrot.lane.b32.xlu1 %v9379_v8, %s9091_s22 }
  0xd1   : > { %897 = vrot.lane.b32.xlu2 %v9430_v36, %s9091_s22  ;;  %893 = vrot.lane.b32.xlu0 %v9343_v53, %s9091_s22  ;;  %v9617_v2 = vpop.permute.xlu2 %656 }
  0xd2   : > { %19164 = vst [vmem:[#allocation80_spill] sm:$0xff] %v9617_v2 }
  0xd8   : > { %901 = vrot.lane.b32.xlu1 %v9419_v32, %s9091_s22 }
  0xd9   : > { %903 = vrot.lane.b32.xlu2 %v9456_v62, %s9091_s22  ;;  %899 = vrot.lane.b32.xlu0 %v9425_v34, %s9091_s22 }
  0xdb   : > { %v9625_v5 = vpop.permute.xlu2 %662 }
  0xdc   : > { %19165 = vst [vmem:[#allocation81_spill] sm:$0xff] %v9625_v5 }
  0xe0   : > { %907 = vrot.lane.b32.xlu1 %v9445_v48, %s9091_s22 }
  0xe1   : > { %909 = vrot.lane.b32.xlu2 %v9486_v21, %s9091_s22  ;;  %905 = vrot.lane.b32.xlu0 %v9451_v56, %s9091_s22 }
  0xe2   : > { %v9635_v16 = vpop.permute.xlu1 %650 }
  0xe3   : > { %v9633_v9 = vpop.permute.xlu2 %668  ;;  %v9637_v20 = vpop.permute.xlu0 %646 }
  0xe4   : > { %19166 = vst [vmem:[#allocation82_spill] sm:$0xff] %v9633_v9 }
  0xe8   : > { %913 = vrot.lane.b32.xlu1 %v9477_v18, %s9091_s22 }
  0xe9   : > { %915 = vrot.lane.b32.xlu2 %v9515_v41, %s9091_s22  ;;  %911 = vrot.lane.b32.xlu0 %v9481_v19, %s9091_s22  ;;  %v4676_v41 = vand.u32 26, %v9920_v49 }
  0xea   : > { %v9647_v38 = vpop.permute.xlu1 %652 }
  0xeb   : > { %v9645_v37 = vpop.permute.xlu2 %674  ;;  %19168 = vst [vmem:[#allocation84_spill] sm:$0xff] %v9647_v38  ;;  %v9649_v27 = vpop.permute.xlu0 %648 }
  0xec   : > { %19167 = vst [vmem:[#allocation83_spill] sm:$0xff] %v9645_v37 }
  0xf0   : > { %919 = vrot.lane.b32.xlu1 %v9507_v39, %s9091_s22 }
  0xf1   : > { %921 = vrot.lane.b32.xlu2 %v9533_v45, %s9091_s22  ;;  %917 = vrot.lane.b32.xlu0 %v9511_v40, %s9091_s22  ;;  %v18444_v45 = vmov 0   ;;  %v4956_v40 = vand.u32 42, %v9920_v49 }
  0xf2   : > { %v9659_v14 = vpop.permute.xlu1 %660  ;;  %8870 = vset.pattern.permute.xlu0 %v18444_v45 }
  0xf3   : > { %v9657_v30 = vpop.permute.xlu2 %680  ;;  %19170 = vst [vmem:[#allocation86_spill] sm:$0xff] %v9659_v14  ;;  %v9661_v12 = vpop.permute.xlu0 %658  ;;  %v2684_v14 = vand.u32 20, %v9920_v49  ;;  %vm4960_vm11 = vcmp.eq.s32.totalorder %v4956_v40, 42 }
  0xf4   : > { %19169 = vst [vmem:[#allocation85_spill] sm:$0xff] %v9657_v30 }
  0xf5   : > { %19171 = vst [vmem:[#allocation87_spill] sm:$0xff] %v9661_v12  ;;  %vm2688_vm10 = vcmp.eq.s32.totalorder %v2684_v14, 20 }
  0xf8   : > { %925 = vrot.lane.b32.xlu1 %v9525_v42, %s9091_s22 }
  0xf9   : > { %927 = vrot.lane.b32.xlu2 %v9551_v52, %s9091_s22  ;;  %923 = vrot.lane.b32.xlu0 %v9529_v43, %s9091_s22 }
  0xfa   : > { %v9671_v3 = vpop.permute.xlu1 %666 }
  0xfb   : > { %v9669_v4 = vpop.permute.xlu2 %686  ;;  %19173 = vst [vmem:[#allocation89_spill] sm:$0xff] %v9671_v3  ;;  %v9673_v44 = vpop.permute.xlu0 %664 }
  0xfc   : > { %19172 = vst [vmem:[#allocation88_spill] sm:$0xff] %v9669_v4 }
  0xfd   : > { %19174 = vst [vmem:[#allocation90_spill] sm:$0xff] %v9673_v44  ;;  %v2964_v44 = vand.u32 36, %v9920_v49 }
  0xff   : > { %vm2968_vm8 = vcmp.eq.s32.totalorder %v2964_v44, 36 }
 0x100   : > { %931 = vrot.lane.b32.xlu1 %v9543_v46, %s9091_s22 }
 0x101   : > { %933 = vrot.lane.b32.xlu2 %v9568_v0, %s9091_s22  ;;  %929 = vrot.lane.b32.xlu0 %v9547_v47, %s9091_s22 }
 0x102   : > { %v9683_v33 = vpop.permute.xlu1 %672 }
 0x103   : > { %v9681_v51 = vpop.permute.xlu2 %692  ;;  %19176 = vst [vmem:[#allocation92_spill] sm:$0xff] %v9683_v33  ;;  %v9685_v31 = vpop.permute.xlu0 %670 }
 0x104   : > { %19175 = vst [vmem:[#allocation91_spill] sm:$0xff] %v9681_v51 }
 0x105   : > { %19177 = vst [vmem:[#allocation93_spill] sm:$0xff] %v9685_v31 }
 0x108   : > { %937 = vrot.lane.b32.xlu1 %v9560_v57, %s9091_s22 }
 0x109   : > { %939 = vrot.lane.b32.xlu2 %v9583_v15, %s9091_s22  ;;  %935 = vrot.lane.b32.xlu0 %v9564_v63, %s9091_s22 }
 0x10a   : > { %v9695_v26 = vpop.permute.xlu1 %678 }
 0x10b   : > { %v9693_v4 = vpop.permute.xlu2 %698  ;;  %19179 = vst [vmem:[#allocation95_spill] sm:$0xff] %v9695_v26  ;;  %v9697_v0 = vpop.permute.xlu0 %676 }
 0x10c   : > { %19178 = vst [vmem:[#allocation94_spill] sm:$0xff] %v9693_v4 }
 0x10d   : > { %19180 = vst [vmem:[#allocation96_spill] sm:$0xff] %v9697_v0 }
 0x110   : > { %943 = vrot.lane.b32.xlu1 %v9577_v10, %s9091_s22 }
 0x111   : > { %945 = vrot.lane.b32.xlu2 %v9595_v35, %s9091_s22  ;;  %941 = vrot.lane.b32.xlu0 %v9580_v11, %s9091_s22 }
 0x112   : > { %v9707_v15 = vpop.permute.xlu1 %684 }
 0x113   : > { %v9705_v51 = vpop.permute.xlu2 %704  ;;  %19182 = vst [vmem:[#allocation98_spill] sm:$0xff] %v9707_v15  ;;  %v9709_v57 = vpop.permute.xlu0 %682 }
 0x114   : > { %19181 = vst [vmem:[#allocation97_spill] sm:$0xff] %v9705_v51 }
 0x115   : > { %19183 = vst [vmem:[#allocation99_spill] sm:$0xff] %v9709_v57 }
 0x118   : > { %1122 = vrot.lane.b32.xlu1 %v9360_v60, %s9092_s2 }
 0x119   : > { %1124 = vrot.lane.b32.xlu2 %v9392_v17, %s9092_s2  ;;  %947 = vrot.lane.b32.xlu0 %v9592_v24, %s9091_s22  ;;  %s9025_s22 = scalar_lea.hbm %s9024_s21, 128 }
 0x11a   : > { %v9719_v63 = vpop.permute.xlu1 %690  ;;  %p9026_p1 = scmp.ne.s32.totalorder %s9024_s21, %s9025_s22 }
 0x11b   : > { %v9717_v4 = vpop.permute.xlu2 %885  ;;  %19184 = vst [vmem:[#allocation100_spill] sm:$0xff] %v9719_v63  ;;  %v9721_v11 = vpop.permute.xlu0 %688 }
 0x11c   : > { %19185 = vst [vmem:[#allocation101_spill] sm:$0xff] %v9721_v11  ;;  %p9027_p4 = pnand %p9026_p1, %p9206_p7 }
 0x11e   : > { %p9028_p8 = pneg %p9027_p4 }
 0x120   : > { %1128 = vrot.lane.b32.xlu1 %v9386_v13, %s9092_s2 }
 0x121   : > { %1130 = vrot.lane.b32.xlu2 %v9343_v53, %s9092_s2  ;;  %1126 = vrot.lane.b32.xlu0 %v9352_v58, %s9092_s2 }
 0x122   : > { %v9731_v57 = vpop.permute.xlu1 %696 }
 0x123   : > { %v9729_v15 = vpop.permute.xlu2 %891  ;;  %19187 = vst [vmem:[#allocation103_spill] sm:$0xff] %v9731_v57  ;;  %v9733_v29 = vpop.permute.xlu0 %694 }
 0x124   : > { %19186 = vst [vmem:[#allocation102_spill] sm:$0xff] %v9729_v15 }
 0x125   : > { %19188 = vst [vmem:[#allocation104_spill] sm:$0xff] %v9733_v29 }
 0x128   : > { %1134 = vrot.lane.b32.xlu1 %v9430_v36, %s9092_s2 }
 0x129   : > { %1136 = vrot.lane.b32.xlu2 %v9425_v34, %s9092_s2  ;;  %1132 = vrot.lane.b32.xlu0 %v9379_v8, %s9092_s2 }
 0x12a   : > { %v9743_v11 = vpop.permute.xlu1 %702 }
 0x12b   : > { %v9741_v63 = vpop.permute.xlu2 %897  ;;  %19190 = vst [vmem:[#allocation106_spill] sm:$0xff] %v9743_v11  ;;  %v9745_v46 = vpop.permute.xlu0 %700 }
 0x12c   : > { %19189 = vst [vmem:[#allocation105_spill] sm:$0xff] %v9741_v63 }
 0x12d   : > { %19191 = vst [vmem:[#allocation107_spill] sm:$0xff] %v9745_v46 }
 0x130   : > { %1140 = vrot.lane.b32.xlu1 %v9456_v62, %s9092_s2 }
 0x131   : > { %1142 = vrot.lane.b32.xlu2 %v9451_v56, %s9092_s2  ;;  %1138 = vrot.lane.b32.xlu0 %v9419_v32, %s9092_s2 }
 0x132   : > { %v9755_v29 = vpop.permute.xlu1 %708 }
 0x133   : > { %v9753_v57 = vpop.permute.xlu2 %903  ;;  %v9757_v23 = vpop.permute.xlu0 %706 }
 0x134   : > { %19192 = vst [vmem:[#allocation108_spill] sm:$0xff] %v9753_v57  ;;  %v3276_v57 = vand.u32 32, %v9920_v49 }
 0x136   : > { %vm3280_vm3 = vcmp.eq.s32.totalorder %v3276_v57, 32  ;;  %v3104_v57 = vand.u32 16, %v9920_v49 }
 0x138   : > { %1146 = vrot.lane.b32.xlu1 %v9486_v21, %s9092_s2  ;;  %vm3108_vm5 = vcmp.eq.s32.totalorder %v3104_v57, 16 }
 0x139   : > { %1148 = vrot.lane.b32.xlu2 %v9481_v19, %s9092_s2  ;;  %1144 = vrot.lane.b32.xlu0 %v9445_v48, %s9092_s2 }
 0x13a   : > { %v9767_v46 = vpop.permute.xlu1 %889 }
 0x13b   : > { %v9765_v11 = vpop.permute.xlu2 %909  ;;  %v9769_v30 = vpop.permute.xlu0 %887 }
 0x13c   : > { %19193 = vst [vmem:[#allocation109_spill] sm:$0xff] %v9765_v11 }
 0x140   : > { %1975 = vrot.lane.b32.xlu1 %v9392_v17, %s9093_s10 }
 0x141   : > { %1977 = vrot.lane.b32.xlu2 %v9352_v58, %s9093_s10  ;;  %1150 = vrot.lane.b32.xlu0 %v9477_v18, %s9092_s2 }
 0x142   : > { %v9779_v0 = vpop.permute.xlu1 %895 }
 0x143   : > { %v9777_v26 = vpop.permute.xlu2 %915  ;;  %19195 = vst [vmem:[#allocation111_spill] sm:$0xff] %v9779_v0  ;;  %v9781_v37 = vpop.permute.xlu0 %893 }
 0x144   : > { %19194 = vst [vmem:[#allocation110_spill] sm:$0xff] %v9777_v26 }
 0x145   : > { %19196 = vst [vmem:[#allocation112_spill] sm:$0xff] %v9781_v37 }
 0x148   : > { %1740 = vrot.lane.b32.xlu1 %v9352_v58, %s9095_s9 }
 0x149   : > { %1359 = vrot.lane.b32.xlu2 %v9360_v60, %s9094_s8  ;;  %1738 = vrot.lane.b32.xlu0 %v9392_v17, %s9095_s9 }
 0x14a   : > { %v9791_v33 = vpop.permute.xlu1 %901 }
 0x14b   : > { %v9789_v11 = vpop.permute.xlu2 %921  ;;  %19198 = vst [vmem:[#allocation114_spill] sm:$0xff] %v9791_v33  ;;  %v9793_v26 = vpop.permute.xlu0 %899 }
 0x14c   : > { %19197 = vst [vmem:[#allocation113_spill] sm:$0xff] %v9789_v11 }
 0x14d   : > { %19199 = vst [vmem:[#allocation115_spill] sm:$0xff] %v9793_v26  ;;  %v710_v26 = vlaneseq }
 0x150   : > { %1973 = vrot.lane.b32.xlu1 %v9360_v60, %s9093_s10 }
 0x151   : > { %2453 = vrot.lane.b32.xlu2 %v9386_v13, %s9096_s18  ;;  %1361 = vrot.lane.b32.xlu0 %v9392_v17, %s9094_s8 }
 0x152   : > { %v9803_v47 = vpop.permute.xlu1 %907 }
 0x153   : > { %v9801_v31 = vpop.permute.xlu2 %927  ;;  %19201 = vst [vmem:[#allocation117_spill] sm:$0xff] %v9803_v47  ;;  %v9805_v22 = vpop.permute.xlu0 %905 }
 0x154   : > { %19200 = vst [vmem:[#allocation116_spill] sm:$0xff] %v9801_v31 }
 0x155   : > { %19202 = vst [vmem:[#allocation118_spill] sm:$0xff] %v9805_v22 }
 0x158   : > { %1736 = vrot.lane.b32.xlu1 %v9360_v60, %s9095_s9 }
 0x159   : > { %2216 = vrot.lane.b32.xlu2 %v9386_v13, %s9097_s15  ;;  %2455 = vrot.lane.b32.xlu0 %v9343_v53, %s9096_s18 }
 0x15a   : > { %v9815_v9 = vpop.permute.xlu1 %913 }
 0x15b   : > { %v9813_v11 = vpop.permute.xlu2 %933  ;;  %19204 = vst [vmem:[#allocation120_spill] sm:$0xff] %v9815_v9  ;;  %v9817_v52 = vpop.permute.xlu0 %911 }
 0x15c   : > { %19203 = vst [vmem:[#allocation119_spill] sm:$0xff] %v9813_v11 }
 0x15d   : > { %19205 = vst [vmem:[#allocation121_spill] sm:$0xff] %v9817_v52 }
 0x160   : > { %1979 = vrot.lane.b32.xlu1 %v9386_v13, %s9093_s10 }
 0x161   : > { %1981 = vrot.lane.b32.xlu2 %v9343_v53, %s9093_s10  ;;  %2218 = vrot.lane.b32.xlu0 %v9343_v53, %s9097_s15 }
 0x162   : > { %v9827_v47 = vpop.permute.xlu1 %919 }
 0x163   : > { %v9825_v31 = vpop.permute.xlu2 %939  ;;  %19207 = vst [vmem:[#allocation123_spill] sm:$0xff] %v9827_v47  ;;  %v9829_v28 = vpop.permute.xlu0 %917 }
 0x164   : > { %19206 = vst [vmem:[#allocation122_spill] sm:$0xff] %v9825_v31 }
 0x165   : > { %19208 = vst [vmem:[#allocation124_spill] sm:$0xff] %v9829_v28 }
 0x168   : > { %1742 = vrot.lane.b32.xlu1 %v9386_v13, %s9095_s9 }
 0x169   : > { %1744 = vrot.lane.b32.xlu2 %v9343_v53, %s9095_s9  ;;  %1421 = vrot.lane.b32.xlu0 %v9592_v24, %s9094_s8 }
 0x16a   : > { %v9839_v9 = vpop.permute.xlu1 %925 }
 0x16b   : > { %v9837_v11 = vpop.permute.xlu2 %945  ;;  %19209 = vst [vmem:[#allocation125_spill] sm:$0xff] %v9839_v9  ;;  %v9841_v52 = vpop.permute.xlu0 %923 }
 0x16c   : > { %19210 = vst [vmem:[#allocation126_spill] sm:$0xff] %v9841_v52 }
 0x170   : > { %2509 = vrot.lane.b32.xlu1 %v9592_v24, %s9096_s18 }
 0x171   : > { %1184 = vrot.lane.b32.xlu2 %v9592_v24, %s9092_s2  ;;  %2447 = vrot.lane.b32.xlu0 %v9360_v60, %s9096_s18 }
 0x172   : > { %v9851_v47 = vpop.permute.xlu1 %931 }
 0x173   : > { %v9849_v31 = vpop.permute.xlu2 %1124  ;;  %19211 = vst [vmem:[#allocation127_spill] sm:$0xff] %v9851_v47  ;;  %v9853_v28 = vpop.permute.xlu0 %929 }
 0x174   : > { %19212 = vst [vmem:[#allocation128_spill] sm:$0xff] %v9853_v28 }
 0x178   : > { %2210 = vrot.lane.b32.xlu1 %v9360_v60, %s9097_s15 }
 0x179   : > { %2272 = vrot.lane.b32.xlu2 %v9592_v24, %s9097_s15  ;;  %2451 = vrot.lane.b32.xlu0 %v9352_v58, %s9096_s18 }
 0x17a   : > { %v9863_v52 = vpop.permute.xlu1 %937 }
 0x17b   : > { %v9861_v9 = vpop.permute.xlu2 %1130  ;;  %19214 = vst [vmem:[#allocation130_spill] sm:$0xff] %v9863_v52  ;;  %v9865_v25 = vpop.permute.xlu0 %935 }
 0x17c   : > { %19213 = vst [vmem:[#allocation129_spill] sm:$0xff] %v9861_v9 }
 0x17d   : > { %19215 = vst [vmem:[#allocation131_spill] sm:$0xff] %v9865_v25 }
 0x180   : > { %1363 = vrot.lane.b32.xlu1 %v9352_v58, %s9094_s8 }
 0x181   : > { %1365 = vrot.lane.b32.xlu2 %v9386_v13, %s9094_s8  ;;  %2214 = vrot.lane.b32.xlu0 %v9352_v58, %s9097_s15 }
 0x182   : > { %v9875_v28 = vpop.permute.xlu1 %943 }
 0x183   : > { %v9873_v47 = vpop.permute.xlu2 %1136  ;;  %19217 = vst [vmem:[#allocation133_spill] sm:$0xff] %v9875_v28  ;;  %v9877_v42 = vpop.permute.xlu0 %941 }
 0x184   : > { %19216 = vst [vmem:[#allocation132_spill] sm:$0xff] %v9873_v47  ;;  %v3416_v47 = vand.u32 24, %v9920_v49 }
 0x185   : > { %19218 = vst [vmem:[#allocation134_spill] sm:$0xff] %v9877_v42 }
 0x186   : > { %vm3420_vm1 = vcmp.eq.s32.totalorder %v3416_v47, 24 }
 0x188   : > { %1798 = vrot.lane.b32.xlu1 %v9592_v24, %s9095_s9 }
 0x189   : > { %2507 = vrot.lane.b32.xlu2 %v9595_v35, %s9096_s18  ;;  %2035 = vrot.lane.b32.xlu0 %v9592_v24, %s9093_s10 }
 0x18a   : > { %v9887_v25 = vpop.permute.xlu1 %1122 }
 0x18b   : > { %v9885_v52 = vpop.permute.xlu2 %1142  ;;  %v9889_v43 = vpop.permute.xlu0 %947 }
 0x18c   : > { %19219 = vst [vmem:[#allocation135_spill] sm:$0xff] %v9885_v52 }
 0x190   : > { %1419 = vrot.lane.b32.xlu1 %v9595_v35, %s9094_s8 }
 0x191   : > { %2033 = vrot.lane.b32.xlu2 %v9595_v35, %s9093_s10  ;;  %2270 = vrot.lane.b32.xlu0 %v9595_v35, %s9097_s15 }
 0x192   : > { %v9899_v6 = vpop.permute.xlu1 %1128 }
 0x193   : > { %v9897_v42 = vpop.permute.xlu2 %1148  ;;  %19221 = vst [vmem:[#allocation137_spill] sm:$0xff] %v9899_v6  ;;  %v9901_v7 = vpop.permute.xlu0 %1126 }
 0x194   : > { %19220 = vst [vmem:[#allocation136_spill] sm:$0xff] %v9897_v42 }
 0x198   : > { %2449 = vrot.lane.b32.xlu1 %v9392_v17, %s9096_s18 }
 0x199   : > { %1796 = vrot.lane.b32.xlu2 %v9595_v35, %s9095_s9  ;;  %1182 = vrot.lane.b32.xlu0 %v9595_v35, %s9092_s2 }
 0x19a   : > { %v9912_v50 = vpop.permute.xlu1 %1134 }
 0x19b   : > { %v9910_v39 = vpop.permute.xlu2 %1977  ;;  %19222 = vst [vmem:[#allocation138_spill] sm:$0xff] %v9912_v50  ;;  %v9914_v42 = vpop.permute.xlu0 %1132 }
 0x19c   : > { %19223 = vst [vmem:[#allocation139_spill] sm:$0xff] %v9914_v42 }
 0x1a0   : > { %1983 = vrot.lane.b32.xlu1 %v9379_v8, %s9093_s10 }
 0x1a1   : > { %1417 = vrot.lane.b32.xlu2 %v9577_v10, %s9094_s8  ;;  %2212 = vrot.lane.b32.xlu0 %v9392_v17, %s9097_s15  ;;  %v4816_v17 = vand.u32 10, %v9920_v49 }
 0x1a2   : > { %v9926_v52 = vpop.permute.xlu1 %1140 }
 0x1a3   : > { %v9924_v45 = vpop.permute.xlu2 %1359  ;;  %19224 = vst [vmem:[#allocation140_spill] sm:$0xff] %v9926_v52  ;;  %v9928_v22 = vpop.permute.xlu0 %1138  ;;  %v19227_v52 = vmov 0  }
 0x1a4   : > { %19225 = vst [vmem:[#allocation141_spill] sm:$0xff] %v9928_v22  ;;  %v9942_v33 = vsel %vm3420_vm1, 1, %v19227_v52  ;;  %v9967_v0 = vsel %vm3280_vm3, 1, %v19227_v52  ;;  %v9987_v37 = vsel %vm3108_vm5, 1, %v19227_v52  ;;  %v9998_v44 = vsel %vm2968_vm8, 1, %v19227_v52 }
 0x1a5   : > { %v3429_v47 = vperm.slane %v9942_v33, 1  ;;  %v3289_v63 = vperm.slane %v9967_v0, 1  ;;  %19232 = vst [vmem:[#allocation147_spill] sm:$0xff] %v9987_v37  ;;  %v3428_v55 = vperm.slane %v9942_v33, 0  ;;  %v2977_v2 = vperm.slane %v9998_v44, 1 }
 0x1a6   : > { %19234 = vst [vmem:[#allocation149_spill] sm:$0xff] %v9998_v44  ;;  %v10017_v14 = vsel %vm2688_vm10, 1, %v19227_v52  ;;  %vm4820_vm8 = vcmp.eq.s32.totalorder %v4816_v17, 10  ;;  %v3116_v54 = vperm.slane %v9987_v37, 0 }
 0x1a7   : > { %vm3461_vm4 = vcmp.eq.s32.totalorder %v3429_v47, 1  ;;  %v2824_v47 = vand.u32 4, %v9920_v49  ;;  %vm3321_vm7 = vcmp.eq.s32.totalorder %v3289_v63, 1  ;;  %v3117_v63 = vperm.slane %v9987_v37, 1  ;;  %19237 = vst [vmem:[#allocation152_spill] sm:$0xff] %v10017_v14 }
 0x1a8   : > { %1985 = vrot.lane.b32.xlu1 %v9430_v36, %s9093_s10  ;;  %vm3460_vm12 = vcmp.eq.s32.totalorder %v3428_v55, 1  ;;  %v10031_v55 = vsel %vm4960_vm11, 1, %v19227_v52  ;;  %vm3009_vm1 = vcmp.eq.s32.totalorder %v2977_v2, 1  ;;  %vm4680_vm11 = vcmp.eq.s32.totalorder %v4676_v41, 26 }
 0x1a9   : > { %1180 = vrot.lane.b32.xlu2 %v9577_v10, %s9092_s2  ;;  %1746 = vrot.lane.b32.xlu0 %v9379_v8, %s9095_s9  ;;  %v9948_v10 = vand.u32 127, %v710_v26  ;;  %vm2828_vm9 = vcmp.eq.s32.totalorder %v2824_v47, 4  ;;  %vm3149_vm14 = vcmp.eq.s32.totalorder %v3117_v63, 1  ;;  %19239 = vst [vmem:[#allocation154_spill] sm:$0xff] %v10031_v55  ;;  %v4969_v2 = vperm.slane %v10031_v55, 1 }
 0x1aa   : > { %v9939_v42 = vpop.permute.xlu1 %1146  ;;  %v10006_v47 = vsel %vm2828_vm9, 1, %v19227_v52  ;;  %v10088_v41 = vsel %vm4820_vm8, 1, %v19227_v52 }
 0x1ab   : > { %v9937_v50 = vpop.permute.xlu2 %2453  ;;  %19226 = vst [vmem:[#allocation142_spill] sm:$0xff] %v9939_v42  ;;  %v9944_v22 = vpop.permute.xlu0 %1144  ;;  %vm18708_vm2 = vcmp.lt.s32.totalorder %v9948_v10, 113  ;;  %vm18577_vm6 = vcmp.lt.s32.totalorder %v9948_v10, 127  ;;  %vm18696_vm13 = vcmp.lt.s32.totalorder %v9948_v10, 1  ;;  %vm18693_vm15 = vcmp.lt.s32.totalorder %v9948_v10, 15 }
 0x1ac   : > { %19228 = vst [vmem:[#allocation143_spill] sm:$0xff] %v9944_v22  ;;  %vm18684_vm3 = vcmp.lt.s32.totalorder %v9948_v10, 16  ;;  %vm18682_vm5 = vcmp.lt.s32.totalorder %v9948_v10, 17  ;;  %vm18709_vm10 = vcmp.lt.s32.totalorder %v9948_v10, 111  ;;  %v2836_v61 = vperm.slane %v10006_v47, 0 }
 0x1ad   : > { %19235 = vst [vmem:[#allocation150_spill] sm:$0xff] %v10006_v47 }
 0x1ae   : > { %19246 = vst [vmem:[#allocation161_spill] sm:$0xff] %v10088_v41 }
 0x1b0   : > { %1748 = vrot.lane.b32.xlu1 %v9430_v36, %s9095_s9 }
 0x1b1   : > { %2220 = vrot.lane.b32.xlu2 %v9379_v8, %s9097_s15  ;;  %2457 = vrot.lane.b32.xlu0 %v9379_v8, %s9096_s18 }
 0x1b2   : > { %v1976_v22 = vpop.permute.xlu1 %1975 }
 0x1b3   : > { %v9957_v42 = vpop.permute.xlu2 %2216  ;;  %v9959_v3 = vpop.permute.xlu0 %1150  ;;  %v9964_v26 = vsel %vm18708_vm2, %v1976_v22, %v9910_v39 }
 0x1b4   : > { %19229 = vst [vmem:[#allocation144_spill] sm:$0xff] %v9959_v3  ;;  %7957 = vmatpush.msk.msra.mxu2 %vm3461_vm4, %v9964_v26 }
 0x1b5   : > { %19230 = vst [vmem:[#allocation145_spill] sm:$0xff] %v9964_v26 }
 0x1b8   : > { %1367 = vrot.lane.b32.xlu1 %v9343_v53, %s9094_s8  ;;  %v2837_v53 = vperm.slane %v10006_v47, 1 }
 0x1b9   : > { %2222 = vrot.lane.b32.xlu2 %v9430_v36, %s9097_s15  ;;  %2459 = vrot.lane.b32.xlu0 %v9430_v36, %s9096_s18 }
 0x1ba   : > { %v9983_v12 = vpop.permute.xlu1 %1740  ;;  %vm2869_vm4 = vcmp.eq.s32.totalorder %v2837_v53, 1 }
 0x1bb   : > { %v9980_v3 = vpop.permute.xlu2 %1981  ;;  %v1739_v5 = vpop.permute.xlu0 %1738 }
 0x1bc   : > { %19231 = vst [vmem:[#allocation146_spill] sm:$0xff] %v9980_v3  ;;  %v9992_v57 = vsel %vm18577_vm6, %v1739_v5, %v9983_v12 }
 0x1bd   : > { %19233 = vst [vmem:[#allocation148_spill] sm:$0xff] %v9992_v57  ;;  %7958 = vmatpush.msk.msra.mxu2 %vm3321_vm7, %v9992_v57  ;;  %v10050_v57 = vsel %vm18693_vm15, %v9887_v25, %v9849_v31 }
 0x1be   : > { %19241 = vst [vmem:[#allocation156_spill] sm:$0xff] %v10050_v57 }
 0x1bf   : > { %7959 = vmatpush.msk.msra.mxu2 %vm18613_vm0, %v9367_v1 }
 0x1c0   : > { %1987 = vrot.lane.b32.xlu1 %v9425_v34, %s9093_s10 }
 0x1c1   : > { %1750 = vrot.lane.b32.xlu2 %v9425_v34, %s9095_s9  ;;  %1369 = vrot.lane.b32.xlu0 %v9379_v8, %s9094_s8  ;;  %v2697_v8 = vperm.slane %v10017_v14, 1 }
 0x1c2   : > { %v10019_v1 = vpop.permute.xlu1 %1973 }
 0x1c3   : > { %v10013_v9 = vpop.permute.xlu2 %1744  ;;  %v10022_v60 = vpop.permute.xlu0 %1361  ;;  %v10027_v40 = vsel %vm18708_vm2, %v10019_v1, %v1976_v22  ;;  %v3288_v22 = vperm.slane %v9967_v0, 0  ;;  %vm2729_vm7 = vcmp.eq.s32.totalorder %v2697_v8, 1 }
 0x1c4   : > { %19236 = vst [vmem:[#allocation151_spill] sm:$0xff] %v10013_v9  ;;  %7930 = vmatpush.msk.msra.mxu0 %vm3460_vm12, %v10027_v40  ;;  %v10038_v63 = vsel %vm18696_vm13, %v9924_v45, %v10022_v60  ;;  %vm5001_vm12 = vcmp.eq.s32.totalorder %v4969_v2, 1 }
 0x1c5   : > { %19238 = vst [vmem:[#allocation153_spill] sm:$0xff] %v10027_v40  ;;  %7960 = vmatpush.msk.msra.mxu2 %vm3149_vm14, %v10038_v63  ;;  %vm3320_vm9 = vcmp.eq.s32.totalorder %v3288_v22, 1  ;;  %v10077_v40 = vsel %vm18682_vm5, %v9637_v20, %v9649_v27  ;;  %v4536_v22 = vand.u32 34, %v9920_v49 }
 0x1c6   : > { %19240 = vst [vmem:[#allocation155_spill] sm:$0xff] %v10038_v63  ;;  %v10063_v63 = vsel %vm18684_vm3, %v9717_v4, %v9769_v30 }
 0x1c7   : > { %7961 = vmatpush.msk.msra.mxu2 %vm3009_vm1, %v10050_v57  ;;  %19242 = vst [vmem:[#allocation157_spill] sm:$0xff] %v10063_v63  ;;  %vm4540_vm14 = vcmp.eq.s32.totalorder %v4536_v22, 34  ;;  %vm18694_vm1 = vcmp.lt.s32.totalorder %v9948_v10, 112 }
 0x1c8   : > { %2461 = vrot.lane.b32.xlu1 %v9425_v34, %s9096_s18  ;;  %19243 = vst [vmem:[#allocation158_spill] sm:$0xff] %v10077_v40 }
 0x1c9   : > { %1752 = vrot.lane.b32.xlu2 %v9419_v32, %s9095_s9  ;;  %1989 = vrot.lane.b32.xlu0 %v9419_v32, %s9093_s10 }
 0x1ca   : > { %7962 = vmatpush.msk.msra.mxu2 %vm2869_vm4, %v10063_v63  ;;  %v10071_v57 = vpop.permute.xlu1 %1736  ;;  %v4829_v63 = vperm.slane %v10088_v41, 1 }
 0x1cb   : > { %v10068_v53 = vpop.permute.xlu2 %1184  ;;  %v10080_v8 = vpop.permute.xlu0 %2455  ;;  %v10085_v17 = vsel %vm18577_vm6, %v10071_v57, %v1739_v5  ;;  %v4396_v5 = vand.u32 2, %v9920_v49 }
 0x1cc   : > { %7963 = vmatpush.msk.msra.mxu2 %vm2729_vm7, %v10077_v40  ;;  %19244 = vst [vmem:[#allocation159_spill] sm:$0xff] %v10080_v8  ;;  %7931 = vmatpush.msk.msra.mxu0 %vm3320_vm9, %v10085_v17  ;;  %v10096_v2 = vsel %vm18709_vm10, %v9937_v50, %v10080_v8  ;;  %v10099_v40 = vsel %vm4680_vm11, 1, %v19227_v52  ;;  %vm4861_vm7 = vcmp.eq.s32.totalorder %v4829_v63, 1  ;;  %v2544_v63 = vand.u32 41, %v9920_v49 }
 0x1cd   : > { %19245 = vst [vmem:[#allocation160_spill] sm:$0xff] %v10085_v17  ;;  %7973 = vmatpush.msk.msra.mxu3 %vm5001_vm12, %v10096_v2  ;;  %v4689_v17 = vperm.slane %v10099_v40, 1  ;;  %vm4400_vm4 = vcmp.eq.s32.totalorder %v4396_v5, 2  ;;  %vm3148_vm12 = vcmp.eq.s32.totalorder %v3116_v54, 1 }
 0x1ce   : > { %19247 = vst [vmem:[#allocation162_spill] sm:$0xff] %v10096_v2  ;;  %7932 = vmatpush.msk.msra.mxu0 %vm18613_vm0, %v9354_v59  ;;  %v10119_v59 = vsel %vm4540_vm14, 1, %v19227_v52  ;;  %v10137_v8 = vsel %vm4400_vm4, 1, %v19227_v52  ;;  %vm2548_vm9 = vcmp.eq.s32.totalorder %v2544_v63, 41 }
 0x1cf   : > { %19248 = vst [vmem:[#allocation163_spill] sm:$0xff] %v10099_v40  ;;  %vm4721_vm8 = vcmp.eq.s32.totalorder %v4689_v17, 1  ;;  %v4549_v17 = vperm.slane %v10119_v59, 1  ;;  %v10165_v63 = vsel %vm2548_vm9, 1, %v19227_v52 }
 0x1d0   : > { %2463 = vrot.lane.b32.xlu1 %v9419_v32, %s9096_s18  ;;  %19249 = vst [vmem:[#allocation164_spill] sm:$0xff] %v10119_v59  ;;  %v2556_v47 = vperm.slane %v10165_v63, 0 }
 0x1d1   : > { %1371 = vrot.lane.b32.xlu2 %v9430_v36, %s9094_s8  ;;  %2224 = vrot.lane.b32.xlu0 %v9425_v34, %s9097_s15  ;;  %vm4581_vm11 = vcmp.eq.s32.totalorder %v4549_v17, 1  ;;  %19255 = vst [vmem:[#allocation170_spill] sm:$0xff] %v10165_v63  ;;  %v2696_v17 = vperm.slane %v10017_v14, 0 }
 0x1d2   : > { %v10116_v26 = vpop.permute.xlu1 %1979 }
 0x1d3   : > { %v10113_v2 = vpop.permute.xlu2 %2272  ;;  %v10121_v36 = vpop.permute.xlu0 %2218  ;;  %v10133_v5 = vsel %vm18708_vm2, %v10116_v26, %v9980_v3  ;;  %v2976_v3 = vperm.slane %v9998_v44, 0  ;;  %v2307_v44 = vand.u32 9, %v9920_v49  ;;  %vm2728_vm9 = vcmp.eq.s32.totalorder %v2696_v17, 1 }
 0x1d4   : > { %19250 = vst [vmem:[#allocation165_spill] sm:$0xff] %v10121_v36  ;;  %v10127_v22 = vsel %vm18694_vm1, %v9957_v42, %v10121_v36  ;;  %v4409_v36 = vperm.slane %v10137_v8, 1 }
 0x1d5   : > { %19251 = vst [vmem:[#allocation166_spill] sm:$0xff] %v10127_v22  ;;  %7974 = vmatpush.msk.msra.mxu3 %vm4861_vm7, %v10127_v22  ;;  %vm3008_vm4 = vcmp.eq.s32.totalorder %v2976_v3, 1  ;;  %vm2868_vm7 = vcmp.eq.s32.totalorder %v2836_v61, 1  ;;  %v10195_v61 = vsel %vm18684_vm3, %v9889_v43, %v9717_v4 }
 0x1d6   : > { %19252 = vst [vmem:[#allocation167_spill] sm:$0xff] %v10133_v5  ;;  %vm4441_vm14 = vcmp.eq.s32.totalorder %v4409_v36, 1  ;;  %v2557_v36 = vperm.slane %v10165_v63, 1  ;;  %v4828_v63 = vperm.slane %v10088_v41, 0 }
 0x1d7   : > { %7975 = vmatpush.msk.msra.mxu3 %vm4721_vm8, %v10133_v5  ;;  %vm2311_vm8 = vcmp.eq.s32.totalorder %v2307_v44, 9  ;;  %19258 = vst [vmem:[#allocation173_spill] sm:$0xff] %v10195_v61 }
 0x1d8   : > { %1373 = vrot.lane.b32.xlu1 %v9425_v34, %s9094_s8  ;;  %v10209_v4 = vsel %vm2311_vm8, 1, %v19227_v52 }
 0x1d9   : > { %1991 = vrot.lane.b32.xlu2 %v9456_v62, %s9093_s10  ;;  %2226 = vrot.lane.b32.xlu0 %v9419_v32, %s9097_s15  ;;  %19261 = vst [vmem:[#allocation176_spill] sm:$0xff] %v10209_v4 }
 0x1da   : > { %v10153_v18 = vpop.permute.xlu1 %1742 }
 0x1db   : > { %v10151_v22 = vpop.permute.xlu2 %1365  ;;  %v10156_v37 = vpop.permute.xlu0 %1421  ;;  %v10162_v34 = vsel %vm18577_vm6, %v10153_v18, %v10013_v9  ;;  %v10181_v9 = vsel %vm18693_vm15, %v10068_v53, %v9887_v25 }
 0x1dc   : > { %19253 = vst [vmem:[#allocation168_spill] sm:$0xff] %v10151_v22  ;;  %v10172_v54 = vsel %vm18696_vm13, %v10156_v37, %v9924_v45  ;;  %7976 = vmatpush.msk.msra.mxu3 %vm4581_vm11, %v10162_v34  ;;  %v10206_v45 = vsel %vm18682_vm5, %v9755_v29, %v9637_v20  ;;  %vm2589_vm11 = vcmp.eq.s32.totalorder %v2557_v36, 1  ;;  %v2320_v36 = vperm.slane %v10209_v4, 1 }
 0x1dd   : > { %19254 = vst [vmem:[#allocation169_spill] sm:$0xff] %v10162_v34  ;;  %7933 = vmatpush.msk.msra.mxu0 %vm3148_vm12, %v10172_v54  ;;  %vm2588_vm12 = vcmp.eq.s32.totalorder %v2556_v47, 1  ;;  %v4116_v47 = vand.u32 38, %v9920_v49  ;;  %v10353_v34 = vsel %vm18577_vm6, %v9983_v12, %v10153_v18  ;;  %v10370_v12 = vsel %vm18682_vm5, %v9635_v16, %v9647_v38 }
 0x1de   : > { %19256 = vst [vmem:[#allocation171_spill] sm:$0xff] %v10172_v54  ;;  %7977 = vmatpush.msk.msra.mxu3 %vm4441_vm14, %v9386_v13  ;;  %v4256_v13 = vand.u32 18, %v9920_v49 }
 0x1df   : > { %19257 = vst [vmem:[#allocation172_spill] sm:$0xff] %v10181_v9  ;;  %7934 = vmatpush.msk.msra.mxu0 %vm3008_vm4, %v10181_v9  ;;  %vm4120_vm4 = vcmp.eq.s32.totalorder %v4116_v47, 38 }
 0x1e0   : > { %1993 = vrot.lane.b32.xlu1 %v9451_v56, %s9093_s10  ;;  %19260 = vst [vmem:[#allocation175_spill] sm:$0xff] %v10206_v45  ;;  %vm4260_vm14 = vcmp.eq.s32.totalorder %v4256_v13, 18  ;;  %v10254_v9 = vsel %vm4120_vm4, 1, %v19227_v52 }
 0x1e1   : > { %2465 = vrot.lane.b32.xlu2 %v9456_v62, %s9096_s18  ;;  %1754 = vrot.lane.b32.xlu0 %v9456_v62, %s9095_s9  ;;  %19281 = vst [vmem:[#allocation192_spill] sm:$0xff] %v10353_v34 }
 0x1e2   : > { %7935 = vmatpush.msk.msra.mxu0 %vm2868_vm7, %v10195_v61  ;;  %v2510_v3 = vpop.permute.xlu1 %2509  ;;  %vm2352_vm7 = vcmp.eq.s32.totalorder %v2320_v36, 1  ;;  %v10243_v61 = vsel %vm4260_vm14, 1, %v19227_v52  ;;  %v2070_v36 = vand.u32 25, %v9920_v49  ;;  %19284 = vst [vmem:[#allocation195_spill] sm:$0xff] %v10370_v12 }
 0x1e3   : > { %v10200_v25 = vpop.permute.xlu2 %2507  ;;  %v10212_v44 = vpop.permute.xlu0 %2447  ;;  %v4269_v54 = vperm.slane %v10243_v61, 1 }
 0x1e4   : > { %19259 = vst [vmem:[#allocation174_spill] sm:$0xff] %v10200_v25  ;;  %7936 = vmatpush.msk.msra.mxu0 %vm2728_vm9, %v10206_v45  ;;  %v10217_v17 = vsel %vm18709_vm10, %v10200_v25, %v2510_v3  ;;  %v10223_v20 = vsel %vm18709_vm10, %v2510_v3, %v10212_v44  ;;  %v4968_v45 = vperm.slane %v10031_v55, 0  ;;  %v3976_v25 = vand.u32 6, %v9920_v49 }
 0x1e5   : > { %19262 = vst [vmem:[#allocation177_spill] sm:$0xff] %v10217_v17  ;;  %7964 = vmatpush.msk.msra.mxu2 %vm2589_vm11, %v10223_v20  ;;  %v1833_v55 = vand.u32 33, %v9920_v49  ;;  %vm4301_vm14 = vcmp.eq.s32.totalorder %v4269_v54, 1 }
 0x1e6   : > { %19263 = vst [vmem:[#allocation178_spill] sm:$0xff] %v10223_v20  ;;  %7937 = vmatpush.msk.msra.mxu0 %vm2588_vm12, %v10217_v17  ;;  %v3836_v20 = vand.u32 22, %v9920_v49  ;;  %vm5000_vm8 = vcmp.eq.s32.totalorder %v4968_v45, 1  ;;  %vm3980_vm9 = vcmp.eq.s32.totalorder %v3976_v25, 6  ;;  %v4129_v25 = vperm.slane %v10254_v9, 1 }
 0x1e7   : > { %v10270_v14 = vsel %vm3980_vm9, 1, %v19227_v52  ;;  %vm2074_vm12 = vcmp.eq.s32.totalorder %v2070_v36, 25  ;;  %vm1837_vm4 = vcmp.eq.s32.totalorder %v1833_v55, 33 }
 0x1e8   : > { %2228 = vrot.lane.b32.xlu1 %v9456_v62, %s9097_s15  ;;  %vm3840_vm11 = vcmp.eq.s32.totalorder %v3836_v20, 22  ;;  %19268 = vst [vmem:[#allocation183_spill] sm:$0xff] %v10270_v14  ;;  %v10300_v55 = vsel %vm2074_vm12, 1, %v19227_v52 }
 0x1e9   : > { %2467 = vrot.lane.b32.xlu2 %v9451_v56, %s9096_s18  ;;  %1756 = vrot.lane.b32.xlu0 %v9451_v56, %s9095_s9 }
 0x1ea   : > { %v10240_v17 = vpop.permute.xlu1 %2210 }
 0x1eb   : > { %v10237_v3 = vpop.permute.xlu2 %2033  ;;  %19265 = vst [vmem:[#allocation180_spill] sm:$0xff] %v10240_v17  ;;  %v10245_v13 = vpop.permute.xlu0 %2451  ;;  %v10251_v47 = vsel %vm18694_vm1, %v10113_v2, %v10240_v17  ;;  %v10319_v17 = vsel %vm18693_vm15, %v9901_v7, %v9899_v6  ;;  %v4268_v6 = vperm.slane %v10243_v61, 0 }
 0x1ec   : > { %19264 = vst [vmem:[#allocation179_spill] sm:$0xff] %v10237_v3  ;;  %v10260_v45 = vsel %vm18709_vm10, %v10245_v13, %v9937_v50  ;;  %7965 = vmatpush.msk.msra.mxu2 %vm2352_vm7, %v10251_v47  ;;  %v4688_v50 = vperm.slane %v10099_v40, 0  ;;  %vm4860_vm7 = vcmp.eq.s32.totalorder %v4828_v63, 1  ;;  %v4548_v40 = vperm.slane %v10119_v59, 0 }
 0x1ed   : > { %19266 = vst [vmem:[#allocation181_spill] sm:$0xff] %v10251_v47  ;;  %7946 = vmatpush.msk.msra.mxu1 %vm5000_vm8, %v10260_v45  ;;  %v10278_v47 = vsel %vm3840_vm11, 1, %v19227_v52  ;;  %vm10286_vm8 = vcmp.eq.s32.totalorder %v4129_v25, 1  ;;  %v1456_v63 = vand.u32 17, %v9920_v49  ;;  %v4408_v59 = vperm.slane %v10137_v8, 0 }
 0x1ee   : > { %19267 = vst [vmem:[#allocation182_spill] sm:$0xff] %v10260_v45  ;;  %v3989_v45 = vperm.slane %v10270_v14, 1  ;;  %v3849_v54 = vperm.slane %v10278_v47, 1  ;;  %vm4720_vm9 = vcmp.eq.s32.totalorder %v4688_v50, 1 }
 0x1ef   : > { %19269 = vst [vmem:[#allocation184_spill] sm:$0xff] %v10278_v47 }
 0x1f0   : > { %2230 = vrot.lane.b32.xlu1 %v9451_v56, %s9097_s15  ;;  %19276 = vst [vmem:[#allocation189_spill] sm:$0xff] %v10319_v17  ;;  %vm4021_vm11 = vcmp.eq.s32.totalorder %v3989_v45, 1 }
 0x1f1   : > { %1377 = vrot.lane.b32.xlu2 %v9456_v62, %s9094_s8  ;;  %1375 = vrot.lane.b32.xlu0 %v9419_v32, %s9094_s8  ;;  %v1596_v62 = vand.u32 1, %v9920_v49 }
 0x1f2   : > { %v1364_v41 = vpop.permute.xlu1 %1363 }
 0x1f3   : > { %v10282_v20 = vpop.permute.xlu2 %1796  ;;  %v10291_v36 = vpop.permute.xlu0 %2214  ;;  %v10296_v32 = vsel %vm18696_vm13, %v1364_v41, %v10151_v22  ;;  %v10312_v22 = vsel %vm1837_vm4, 1, %v19227_v52  ;;  %vm10327_vm12 = vcmp.eq.s32.totalorder %v1596_v62, 1  ;;  %vm3881_vm4 = vcmp.eq.s32.totalorder %v3849_v54, 1 }
 0x1f4   : > { %19270 = vst [vmem:[#allocation185_spill] sm:$0xff] %v10282_v20  ;;  %v10307_v25 = vsel %vm18694_vm1, %v10291_v36, %v9957_v42  ;;  %7978 = vmatpush.msk.msra.mxu3 %vm4301_vm14, %v10296_v32  ;;  %v10325_v42 = vsel %vm18684_vm3, %v9767_v46, %v9729_v15  ;;  %vm4580_vm14 = vcmp.eq.s32.totalorder %v4548_v40, 1  ;;  %v2083_v15 = vperm.slane %v10300_v55, 1 }
 0x1f5   : > { %19273 = vst [vmem:[#allocation186_spill] sm:$0xff] %v10296_v32  ;;  %7947 = vmatpush.msk.msra.mxu1 %vm4860_vm7, %v10307_v25  ;;  %v4128_v62 = vperm.slane %v10254_v9, 0  ;;  %vm1460_vm7 = vcmp.eq.s32.totalorder %v1456_v63, 17 }
 0x1f6   : > { %19274 = vst [vmem:[#allocation187_spill] sm:$0xff] %v10307_v25  ;;  %v10335_v25 = vsel %vm18708_vm2, %v9910_v39, %v10116_v26  ;;  %7979 = vmatpush.msk.msra.mxu3 %vm10286_vm8, %v10319_v17  ;;  %v1846_v39 = vperm.slane %v10312_v22, 1  ;;  %vm4440_vm8 = vcmp.eq.s32.totalorder %v4408_v59, 1  ;;  %v10359_v26 = vsel %vm10327_vm12, 1, %v19227_v52 }
 0x1f7   : > { %19275 = vst [vmem:[#allocation188_spill] sm:$0xff] %v10312_v22  ;;  %7948 = vmatpush.msk.msra.mxu1 %vm4720_vm9, %v10335_v25  ;;  %vm4300_vm9 = vcmp.eq.s32.totalorder %v4268_v6, 1  ;;  %v3988_v59 = vperm.slane %v10270_v14, 0  ;;  %v10377_v45 = vsel %vm1460_vm7, 1, %v19227_v52  ;;  %vm10380_vm12 = vcmp.eq.s32.totalorder %v4128_v62, 1 }
 0x1f8   : > { %19277 = vst [vmem:[#allocation190_spill] sm:$0xff] %v10325_v42  ;;  %1758 = vrot.lane.b32.xlu1 %v9445_v48, %s9095_s9  ;;  %7980 = vmatpush.msk.msra.mxu3 %vm4021_vm11, %v10325_v42  ;;  %vm2115_vm11 = vcmp.eq.s32.totalorder %v2083_v15, 1  ;;  %v1609_v38 = vperm.slane %v10359_v26, 1  ;;  %v3696_v6 = vand.u32 40, %v9920_v49  ;;  %v10393_v15 = vsel %vm18696_vm13, %v10022_v60, %v1364_v41 }
 0x1f9   : > { %19280 = vst [vmem:[#allocation191_spill] sm:$0xff] %v10335_v25  ;;  %1997 = vrot.lane.b32.xlu2 %v9486_v21, %s9093_s10  ;;  %1995 = vrot.lane.b32.xlu0 %v9445_v48, %s9093_s10  ;;  %v10408_v14 = vsel %vm18693_vm15, %v9849_v31, %v9901_v7  ;;  %v1469_v60 = vperm.slane %v10377_v45, 1  ;;  %v2319_v41 = vperm.slane %v10209_v4, 0  ;;  %v10429_v7 = vsel %vm18684_vm3, %v9769_v30, %v9767_v46 }
 0x1fa   : > { %19282 = vst [vmem:[#allocation193_spill] sm:$0xff] %v10359_v26  ;;  %7949 = vmatpush.msk.msra.mxu1 %vm4580_vm14, %v10353_v34  ;;  %v10372_v18 = vpop.permute.xlu1 %1798  ;;  %7981 = vmatpush.msk.msra.mxu3 %vm3881_vm4, %v10370_v12  ;;  %vm10384_vm14 = vcmp.eq.s32.totalorder %v1846_v39, 1  ;;  %v1219_v39 = vand.u32 37, %v9920_v49  ;;  %vm4020_vm4 = vcmp.eq.s32.totalorder %v3988_v59, 1  ;;  %vm1641_vm7 = vcmp.eq.s32.totalorder %v1609_v38, 1 }
 0x1fb   : > { %v10364_v40 = vpop.permute.xlu2 %1417  ;;  %19285 = vst [vmem:[#allocation196_spill] sm:$0xff] %v10377_v45  ;;  %v2036_v54 = vpop.permute.xlu0 %2035  ;;  %v1845_v59 = vperm.slane %v10312_v22, 0  ;;  %v745_v38 = vand.u32 21, %v9920_v49 }
 0x1fc   : > { %19283 = vst [vmem:[#allocation194_spill] sm:$0xff] %v10364_v40  ;;  %7950 = vmatpush.msk.msra.mxu1 %vm4440_vm8, %v9352_v58  ;;  %v10398_v62 = vsel %vm18708_vm2, %v2036_v54, %v10019_v1  ;;  %v3848_v58 = vperm.slane %v10278_v47, 0  ;;  %v10415_v1 = vsel %vm18577_vm6, %v10372_v18, %v10071_v57  ;;  %v982_v47 = vand.u32 5, %v9920_v49 }
 0x1fd   : > { %19290 = vst [vmem:[#allocation197_spill] sm:$0xff] %v10393_v15  ;;  %7966 = vmatpush.msk.msra.mxu2 %vm2115_vm11, %v10398_v62  ;;  %vm10431_vm8 = vcmp.eq.s32.totalorder %v3696_v6, 40  ;;  %v2082_v57 = vperm.slane %v10300_v55, 0  ;;  %vm10441_vm11 = vcmp.eq.s32.totalorder %v1219_v39, 37 }
 0x1fe   : > { %19291 = vst [vmem:[#allocation198_spill] sm:$0xff] %v10398_v62  ;;  %7951 = vmatpush.msk.msra.mxu1 %vm4300_vm9, %v10393_v15  ;;  %vm3880_vm9 = vcmp.eq.s32.totalorder %v3848_v58, 1  ;;  %v10455_v58 = vsel %vm18682_vm5, %v9649_v27, %v9635_v16  ;;  %v10461_v50 = vsel %vm10431_vm8, 1, %v19227_v52  ;;  %v1608_v27 = vperm.slane %v10359_v26, 0 }
 0x1ff   : > { %19292 = vst [vmem:[#allocation199_spill] sm:$0xff] %v10408_v14  ;;  %7967 = vmatpush.msk.msra.mxu2 %vm10384_vm14, %v10415_v1  ;;  %vm2351_vm14 = vcmp.eq.s32.totalorder %v2319_v41, 1  ;;  %v10475_v16 = vsel %vm10441_vm11, 1, %v19227_v52  ;;  %vm10484_vm8 = vcmp.eq.s32.totalorder %v1845_v59, 1  ;;  %v3708_v41 = vperm.slane %v10461_v50, 0 }
 0x200   : > { %19293 = vst [vmem:[#allocation200_spill] sm:$0xff] %v10415_v1  ;;  %7952 = vmatpush.msk.msra.mxu1 %vm10380_vm12, %v10408_v14  ;;  %1760 = vrot.lane.b32.xlu1 %v9486_v21, %s9095_s9  ;;  %vm1501_vm12 = vcmp.eq.s32.totalorder %v1469_v60, 1  ;;  %v3709_v31 = vperm.slane %v10461_v50, 1  ;;  %v1232_v59 = vperm.slane %v10475_v16, 1  ;;  %vm10504_vm11 = vcmp.eq.s32.totalorder %v1608_v27, 1 }
 0x201   : > { %19294 = vst [vmem:[#allocation201_spill] sm:$0xff] %v10429_v7  ;;  %2232 = vrot.lane.b32.xlu2 %v9445_v48, %s9097_s15  ;;  %2469 = vrot.lane.b32.xlu0 %v9445_v48, %s9096_s18 }
 0x202   : > { %7953 = vmatpush.msk.msra.mxu1 %vm4020_vm4, %v10429_v7  ;;  %v1420_v46 = vpop.permute.xlu1 %1419  ;;  %19300 = vst [vmem:[#allocation203_spill] sm:$0xff] %v10455_v58  ;;  %7968 = vmatpush.msk.msra.mxu2 %vm1641_vm7, %v9592_v24  ;;  %vm986_vm4 = vcmp.eq.s32.totalorder %v982_v47, 5  ;;  %vm2114_vm7 = vcmp.eq.s32.totalorder %v2082_v57, 1  ;;  %v1468_v57 = vperm.slane %v10377_v45, 0 }
 0x203   : > { %v10448_v30 = vpop.permute.xlu2 %1180  ;;  %v10464_v6 = vpop.permute.xlu0 %2270  ;;  %v10469_v39 = vsel %vm18696_vm13, %v1420_v46, %v10156_v37  ;;  %19303 = vst [vmem:[#allocation206_spill] sm:$0xff] %v10475_v16  ;;  %v3556_v37 = vand.u32 8, %v9920_v49  ;;  %v10493_v63 = vsel %vm986_vm4, 1, %v19227_v52  ;;  %v1231_v49 = vperm.slane %v10475_v16, 0 }
 0x204   : > { %19299 = vst [vmem:[#allocation202_spill] sm:$0xff] %v10448_v30  ;;  %7954 = vmatpush.msk.msra.mxu1 %vm3880_vm9, %v10455_v58  ;;  %v10481_v47 = vsel %vm18694_vm1, %v10464_v6, %v10113_v2  ;;  %7969 = vmatpush.msk.msra.mxu2 %vm1501_vm12, %v10469_v39  ;;  %vm749_vm9 = vcmp.eq.s32.totalorder %v745_v38, 21  ;;  %v10498_v2 = vsel %vm18708_vm2, %v10237_v3, %v2036_v54  ;;  %v995_v38 = vperm.slane %v10493_v63, 1 }
 0x205   : > { %19301 = vst [vmem:[#allocation204_spill] sm:$0xff] %v10464_v6  ;;  %7938 = vmatpush.msk.msra.mxu0 %vm2351_vm14, %v10481_v47  ;;  %v10516_v54 = vsel %vm18577_vm6, %v10282_v20, %v10372_v18  ;;  %v10520_v24 = vsel %vm749_vm9, 1, %v19227_v52  ;;  %vm10522_vm12 = vcmp.eq.s32.totalorder %v3556_v37, 8  ;;  %vm3740_vm14 = vcmp.eq.s32.totalorder %v3708_v41, 1 }
 0x206   : > { %19302 = vst [vmem:[#allocation205_spill] sm:$0xff] %v10469_v39  ;;  %vm3741_vm4 = vcmp.eq.s32.totalorder %v3709_v31, 1  ;;  %vm10537_vm9 = vcmp.eq.s32.totalorder %v1232_v59, 1  ;;  %vm10541_vm6 = vcmp.eq.s32.totalorder %v1231_v49, 1  ;;  %v994_v60 = vperm.slane %v10493_v63, 0 }
 0x207   : > { %19304 = vst [vmem:[#allocation207_spill] sm:$0xff] %v10481_v47  ;;  %7939 = vmatpush.msk.msra.mxu0 %vm2114_vm7, %v10498_v2  ;;  %vm10533_vm7 = vcmp.eq.s32.totalorder %v1468_v57, 1  ;;  %v758_v59 = vperm.slane %v10520_v24, 1  ;;  %v10563_v49 = vsel %vm10522_vm12, 1, %v19227_v52  ;;  %v10568_v39 = vsel %vm18696_vm13, %v10364_v40, %v1420_v46  ;;  %v19344_v40 = vld [vmem:[#allocation161_spill] sm:$0xff] }
 0x208   : > { %19307 = vst [vmem:[#allocation208_spill] sm:$0xff] %v10493_v63  ;;  %1379 = vrot.lane.b32.xlu1 %v9451_v56, %s9094_s8  ;;  %v10588_v46 = vsel %vm18684_vm3, %v9837_v11, %v9889_v43  ;;  %v3568_v62 = vperm.slane %v10563_v49, 0  ;;  %v3569_v27 = vperm.slane %v10563_v49, 1  ;;  %v3430_v43 = vperm.slane %v9942_v33, 2  ;;  %v19347_v56 = vld [vmem:[#allocation163_spill] sm:$0xff]  ;;  %v19350_v52 = vld [vmem:[#allocation165_spill] sm:$0xff] }
 0x209   : > { %19308 = vst [vmem:[#allocation209_spill] sm:$0xff] %v10498_v2  ;;  %2234 = vrot.lane.b32.xlu2 %v9486_v21, %s9097_s15  ;;  %2471 = vrot.lane.b32.xlu0 %v9486_v21, %s9096_s18  ;;  %vm790_vm12 = vcmp.eq.s32.totalorder %v758_v59, 1  ;;  %v10604_v37 = vld.sshfl [vmem:[#allocation1] sm:$0xff pattern:$0x75316420]  ;;  %v10614_v2 = vsel %vm18684_vm3, %v9875_v28, %v9837_v11  ;;  %v3290_v59 = vperm.slane %v9967_v0, 2 }
 0x20a   : > { %19311 = vst [vmem:[#allocation210_spill] sm:$0xff] %v10516_v54  ;;  %7940 = vmatpush.msk.msra.mxu0 %vm10484_vm8, %v10516_v54  ;;  %v2450_v18 = vpop.permute.xlu1 %2449  ;;  %vm1027_vm8 = vcmp.eq.s32.totalorder %v995_v38, 1  ;;  %v10677_v54 = vld.sshfl [vmem:[#allocation1 + $0x8] sm:$0xff pattern:$0x75316420]  ;;  %v2321_v20 = vperm.slane %v10209_v4, 2 }
 0x20b   : > { %19312 = vst [vmem:[#allocation211_spill] sm:$0xff] %v10520_v24  ;;  %v10531_v1 = vpop.permute.xlu2 %2220  ;;  %v1183_v41 = vpop.permute.xlu0 %1182  ;;  %v10552_v31 = vsel %vm18709_vm10, %v10212_v44, %v2450_v18  ;;  %v10557_v57 = vsel %vm18709_vm10, %v2450_v18, %v10245_v13  ;;  %v757_v13 = vperm.slane %v10520_v24, 0  ;;  %v3291_v18 = vperm.slane %v9967_v0, 3 }
 0x20c   : > { %7941 = vmatpush.msk.msra.mxu0 %vm10504_vm11, %v9595_v35  ;;  %19321 = vst [vmem:[#allocation212_spill] sm:$0xff] %v10552_v31  ;;  %7955 = vmatpush.msk.msra.mxu1 %vm3740_vm14, %v10552_v31  ;;  %v10574_v44 = vsel %vm18693_vm15, %v1183_v41, %v10068_v53  ;;  %v3431_v53 = vperm.slane %v9942_v33, 3  ;;  %v10594_v38 = vsel %vm18693_vm15, %v10448_v30, %v1183_v41  ;;  %vm1026_vm11 = vcmp.eq.s32.totalorder %v994_v60, 1  ;;  %v19341_v30 = vld [vmem:[#allocation170_spill] sm:$0xff] }
 0x20d   : > { %19322 = vst [vmem:[#allocation213_spill] sm:$0xff] %v10557_v57  ;;  %7982 = vmatpush.msk.msra.mxu3 %vm3741_vm4, %v10557_v57  ;;  %7970 = vmatpush.msk.msra.mxu2 %vm10537_vm9, %v10574_v44  ;;  %v10623_v60 = vsel %vm18682_vm5, %v9757_v23, %v9755_v29  ;;  %vm3600_vm4 = vcmp.eq.s32.totalorder %v3568_v62, 1  ;;  %vm3462_vm9 = vcmp.eq.s32.totalorder %v3430_v43, 1  ;;  %v19333_v62 = vld [vmem:[#allocation147_spill] sm:$0xff]  ;;  %v2559_v3 = vperm.slane %v19341_v30, 3 }
 0x20e   : > { %19323 = vst [vmem:[#allocation214_spill] sm:$0xff] %v10568_v39  ;;  %7942 = vmatpush.msk.msra.mxu0 %vm10533_vm7, %v10568_v39  ;;  %vm3463_vm14 = vcmp.eq.s32.totalorder %v3431_v53, 1  ;;  %vm3601_vm7 = vcmp.eq.s32.totalorder %v3569_v27, 1  ;;  %v19330_v53 = vld [vmem:[#allocation180_spill] sm:$0xff]  ;;  %v3119_v27 = vperm.slane %v19333_v62, 3  ;;  %v3118_v43 = vperm.slane %v19333_v62, 2 }
 0x20f   : > { %19324 = vst [vmem:[#allocation215_spill] sm:$0xff] %v10574_v44  ;;  %7971 = vmatpush.msk.msra.mxu2 %vm1027_vm8, %v10588_v46  ;;  %vm3323_vm8 = vcmp.eq.s32.totalorder %v3291_v18, 1  ;;  %v19334_v18 = vld [vmem:[#allocation169_spill] sm:$0xff]  ;;  %v19339_v39 = vld [vmem:[#allocation26_spill] sm:$0xff]  ;;  %v4830_v6 = vperm.slane %v19344_v40, 2 }
 0x210   : > { %19325 = vst [vmem:[#allocation216_spill] sm:$0xff] %v10588_v46  ;;  %7943 = vmatpush.msk.msra.mxu0 %vm10541_vm6, %v10594_v38  ;;  %1999 = vrot.lane.b32.xlu1 %v9481_v19, %s9093_s10  ;;  %vm789_vm6 = vcmp.eq.s32.totalorder %v757_v13, 1  ;;  %v10635_v13 = vsel %vm18682_vm5, %v9705_v51, %v9757_v23 }
 0x211   : > { %19326 = vst [vmem:[#allocation217_spill] sm:$0xff] %v10594_v38  ;;  %1762 = vrot.lane.b32.xlu2 %v9481_v19, %s9095_s9  ;;  %1381 = vrot.lane.b32.xlu0 %v9445_v48, %s9094_s8  ;;  %v19345_v48 = vld [vmem:[#allocation159_spill] sm:$0xff] }
 0x212   : > { %19327 = vst [vmem:[#allocation218_spill] sm:$0xff] %v10614_v2  ;;  %7944 = vmatpush.msk.msra.mxu0 %vm1026_vm11, %v10614_v2  ;;  %7972 = vmatpush.msk.msra.mxu2 %vm790_vm12, %v10623_v60  ;;  %v10629_v11 = vpop.permute.xlu1 %1983  ;;  %vm3322_vm11 = vcmp.eq.s32.totalorder %v3290_v59, 1  ;;  %vm3151_vm12 = vcmp.eq.s32.totalorder %v3119_v27, 1 }
 0x213   : > { %19328 = vst [vmem:[#allocation219_spill] sm:$0xff] %v10623_v60  ;;  %v10625_v41 = vpop.permute.xlu2 %2222  ;;  %v2213_v29 = vpop.permute.xlu0 %2212  ;;  %6025 = vmatmul.f32.vlgmr.msra.gmra.mxu2 %v10604_v37 }
 0x214   : > { %19329 = vst [vmem:[#allocation220_spill] sm:$0xff] %v10635_v13  ;;  %7945 = vmatpush.msk.msra.mxu0 %vm789_vm6, %v10635_v13  ;;  %v10643_v60 = vsel %vm18694_vm1, %v19330_v53, %v2213_v29  ;;  %v10648_v23 = vsel %vm18694_vm1, %v2213_v29, %v10291_v36  ;;  %v19335_v53 = vld [vmem:[#allocation149_spill] sm:$0xff]  ;;  %v19337_v29 = vld [vmem:[#allocation150_spill] sm:$0xff]  ;;  %v19338_v13 = vld [vmem:[#allocation55_spill] sm:$0xff]  ;;  %vm3150_vm6 = vcmp.eq.s32.totalorder %v3118_v43, 1 }
 0x215   : > { %19331 = vst [vmem:[#allocation180_spill] sm:$0xff] %v10643_v60  ;;  %7956 = vmatpush.msk.msra.mxu1 %vm3600_vm4, %v10643_v60  ;;  %7983 = vmatpush.msk.msra.mxu3 %vm3601_vm7, %v10648_v23  ;;  %v2979_v46 = vperm.slane %v19335_v53, 3  ;;  %v2978_v44 = vperm.slane %v19335_v53, 2  ;;  %v19336_v36 = vld [vmem:[#allocation29_spill] sm:$0xff]  ;;  %v2839_v59 = vperm.slane %v19337_v29, 3  ;;  %v2838_v38 = vperm.slane %v19337_v29, 2 }
 0x216   : > { %8011 = vmatpush.msk.msrb.mxu0 %vm3463_vm14, %v10133_v5  ;;  %19332 = vst [vmem:[#allocation221_spill] sm:$0xff] %v10648_v23  ;;  %v19372_v5 = vld [vmem:[#allocation160_spill] sm:$0xff] }
 0x217   : > { %7984 = vmatpush.msk.msrb.mxu1 %vm3462_vm9, %v10335_v25  ;;  %5985 = vmatmul.f32.vlgmr.msra.gmra.mxu0 %v10604_v37  ;;  %vm3011_vm14 = vcmp.eq.s32.totalorder %v2979_v46, 1  ;;  %vm3010_vm4 = vcmp.eq.s32.totalorder %v2978_v44, 1  ;;  %vm2871_vm7 = vcmp.eq.s32.totalorder %v2839_v59, 1  ;;  %vm2870_vm9 = vcmp.eq.s32.totalorder %v2838_v38, 1  ;;  %v19342_v44 = vld [vmem:[#allocation154_spill] sm:$0xff]  ;;  %v19420_v25 = vld [vmem:[#allocation84_spill] sm:$0xff] }
 0x218   : > { %8012 = vmatpush.msk.msrb.mxu0 %vm3323_vm8, %v19334_v18  ;;  %2473 = vrot.lane.b32.xlu1 %v9481_v19, %s9096_s18  ;;  %vm18632_vm8 = vcmask 719872   ;;  %v2322_v46 = vperm.slane %v10209_v4, 3  ;;  %v4970_v59 = vperm.slane %v19342_v44, 2  ;;  %v19385_v18 = vld [vmem:[#allocation155_spill] sm:$0xff] }
 0x219   : > { %7985 = vmatpush.msk.msrb.mxu1 %vm3322_vm11, %v10353_v34  ;;  %1764 = vrot.lane.b32.xlu2 %v19338_v13, %s9095_s9  ;;  %v4271_v34 = vperm.slane %v10243_v61, 3 }
 0x21a   : > { %8013 = vmatpush.msk.msrb.mxu0 %vm18613_vm0, %v19336_v36  ;;  %2001 = vrot.lane.b32.xlu0 %v19338_v13, %s9093_s10  ;;  %v10674_v27 = vpop.permute.xlu1 %1985  ;;  %v19340_v36 = vld [vmem:[#allocation152_spill] sm:$0xff] }
 0x21b   : > { %v10667_v2 = vpop.permute.xlu2 %1750  ;;  %7986 = vmatpush.msk.msrb.mxu1 %vm18613_vm0, %v19339_v39  ;;  %v2699_v35 = vperm.slane %v19340_v36, 3  ;;  %v10680_v47 = vpop.permute.xlu0 %1746  ;;  %v2698_v43 = vperm.slane %v19340_v36, 2  ;;  %v2558_v39 = vperm.slane %v19341_v30, 2  ;;  %7891 = vmatmul.msk.f32.vlgmr.msra.gmra.mxu3 %vm18632_vm8, %v10677_v54 }
 0x21c   : > { %8014 = vmatpush.msk.msrb.mxu0 %vm3151_vm12, %v10296_v32  ;;  %7890 = vmatmul.msk.f32.vlgmr.msra.gmra.mxu1 %vm18632_vm8, %v10677_v54  ;;  %v4270_v32 = vperm.slane %v10243_v61, 2 }
 0x21d   : > { %7987 = vmatpush.msk.msrb.mxu1 %vm3150_vm6, %v10393_v15  ;;  %vm2731_vm11 = vcmp.eq.s32.totalorder %v2699_v35, 1  ;;  %vm2730_vm12 = vcmp.eq.s32.totalorder %v2698_v43, 1  ;;  %vm2591_vm6 = vcmp.eq.s32.totalorder %v2559_v3, 1  ;;  %v2085_v35 = vperm.slane %v10300_v55, 3  ;;  %v19409_v15 = vld [vmem:[#allocation80_spill] sm:$0xff] }
 0x21e   : > { %8015 = vmatpush.msk.msrb.mxu0 %vm3011_vm14, %v10319_v17  ;;  %vm2590_vm14 = vcmp.eq.s32.totalorder %v2558_v39, 1  ;;  %v2084_v3 = vperm.slane %v10300_v55, 2  ;;  %v1848_v43 = vperm.slane %v10312_v22, 3  ;;  %v4690_v39 = vperm.slane %v19347_v56, 2 }
 0x21f   : > { %7988 = vmatpush.msk.msrb.mxu1 %vm3010_vm4, %v10408_v14  ;;  %vm2354_vm4 = vcmp.eq.s32.totalorder %v2322_v46, 1  ;;  %v1847_v46 = vperm.slane %v10312_v22, 2  ;;  %v1470_v17 = vperm.slane %v10377_v45, 2  ;;  %v19426_v22 = vld [vmem:[#allocation158_spill] sm:$0xff] }
 0x220   : > { %8016 = vmatpush.msk.msrb.mxu0 %vm2871_vm7, %v10325_v42  ;;  %2475 = vrot.lane.b32.xlu1 %v19338_v13, %s9096_s18  ;;  %vm5002_vm7 = vcmp.eq.s32.totalorder %v4970_v59, 1  ;;  %vm1880_vm0 = vcmp.eq.s32.totalorder %v1848_v43, 1  ;;  %v996_v43 = vperm.slane %v10493_v63, 2  ;;  %v19425_v42 = vld [vmem:[#allocation173_spill] sm:$0xff] }
 0x221   : > { %7989 = vmatpush.msk.msrb.mxu1 %vm2870_vm9, %v10429_v7  ;;  %1383 = vrot.lane.b32.xlu2 %v9486_v21, %s9094_s8  ;;  %vm2353_vm9 = vcmp.eq.s32.totalorder %v2321_v20, 1  ;;  %v19348_v20 = vld [vmem:[#allocation164_spill] sm:$0xff]  ;;  %v1233_v7 = vperm.slane %v10475_v16, 2 }
 0x222   : > { %8017 = vmatpush.msk.msrb.mxu0 %vm2731_vm11, %v10370_v12  ;;  %2236 = vrot.lane.b32.xlu0 %v9481_v19, %s9097_s15  ;;  %v10708_v28 = vpop.permute.xlu1 %1748  ;;  %vm2117_vm11 = vcmp.eq.s32.totalorder %v2085_v35, 1  ;;  %v4550_v59 = vperm.slane %v19348_v20, 2  ;;  %v19349_v35 = vld [vmem:[#allocation145_spill] sm:$0xff]  ;;  %v19357_v12 = vld [vmem:[#allocation148_spill] sm:$0xff] }
 0x223   : > { %v10701_v38 = vpop.permute.xlu2 %1752  ;;  %7990 = vmatpush.msk.msrb.mxu1 %vm2730_vm12, %v10455_v58  ;;  %v2458_v51 = vpop.permute.xlu0 %2457  ;;  %vm4862_vm12 = vcmp.eq.s32.totalorder %v4830_v6, 1  ;;  %v1610_v6 = vperm.slane %v10359_v26, 2  ;;  %v19361_v58 = vld [vmem:[#allocation64_spill] sm:$0xff] }
 0x224   : > { %19343 = vst [vmem:[#allocation147_spill] sm:$0xff] %v10701_v38  ;;  %8018 = vmatpush.msk.msrb.mxu0 %vm2591_vm6, %v10557_v57  ;;  %v10717_v21 = vsel %vm18709_vm10, %v19345_v48, %v2458_v51  ;;  %v1611_v57 = vperm.slane %v10359_v26, 3  ;;  %vm2116_vm6 = vcmp.eq.s32.totalorder %v2084_v3, 1  ;;  %v4971_v48 = vperm.slane %v19342_v44, 3  ;;  %v19373_v3 = vld [vmem:[#allocation34_spill] sm:$0xff] }
 0x225   : > { %19346 = vst [vmem:[#allocation149_spill] sm:$0xff] %v10717_v21  ;;  %7991 = vmatpush.msk.msrb.mxu1 %vm2590_vm14, %v10552_v31  ;;  %8000 = vmatpush.msk.msrb.mxu3 %vm5002_vm7, %v10717_v21  ;;  %v1471_v31 = vperm.slane %v10377_v45, 3  ;;  %vm10738_vm14 = vcmp.eq.s32.totalorder %v4690_v39, 1  ;;  %v997_v21 = vperm.slane %v10493_v63, 3  ;;  %v19418_v63 = vld [vmem:[#allocation102_spill] sm:$0xff] }
 0x226   : > { %8019 = vmatpush.msk.msrb.mxu0 %vm2354_vm4, %v10648_v23  ;;  %v10733_v23 = vsel %vm18694_vm1, %v19350_v52, %v10531_v1  ;;  %vm10742_vm4 = vcmp.eq.s32.totalorder %v1847_v46, 1  ;;  %v19356_v52 = vld [vmem:[#allocation153_spill] sm:$0xff]  ;;  %vm10750_vm7 = vcmp.eq.s32.totalorder %v1611_v57, 1  ;;  %v1234_v46 = vperm.slane %v10475_v16, 3  ;;  %v19423_v45 = vld [vmem:[#allocation86_spill] sm:$0xff] }
 0x227   : > { %7992 = vmatpush.msk.msrb.mxu1 %vm2353_vm9, %v10643_v60  ;;  %19351 = vst [vmem:[#allocation29_spill] sm:$0xff] %v10733_v23  ;;  %8001 = vmatpush.msk.msrb.mxu3 %vm4862_vm12, %v10733_v23  ;;  %v4831_v60 = vperm.slane %v19344_v40, 3  ;;  %vm10775_vm9 = vcmp.eq.s32.totalorder %v4971_v48, 1  ;;  %vm10791_vm12 = vcmp.eq.s32.totalorder %v1471_v31, 1  ;;  %v19384_v23 = vld [vmem:[#allocation28_spill] sm:$0xff]  ;;  %v19390_v48 = vld [vmem:[#allocation183_spill] sm:$0xff] }
 0x228   : > { %8020 = vmatpush.msk.msrb.mxu0 %vm2117_vm11, %v19349_v35  ;;  %v4410_v35 = vperm.slane %v10137_v8, 2  ;;  %1385 = vrot.lane.b32.xlu1 %v9481_v19, %s9094_s8  ;;  %v4691_v19 = vperm.slane %v19347_v56, 3  ;;  %vm10787_vm11 = vcmp.eq.s32.totalorder %v1610_v6, 1  ;;  %v19374_v6 = vld [vmem:[#allocation151_spill] sm:$0xff] }
 0x229   : > { %7993 = vmatpush.msk.msrb.mxu1 %vm2116_vm6, %v19356_v52  ;;  %2003 = vrot.lane.b32.xlu2 %v19361_v58, %s9093_s10  ;;  %vm19375_vm6 = vcmp.lt.s32.totalorder %v9948_v10, 127  ;;  %vm4863_vm8 = vcmp.eq.s32.totalorder %v4831_v60, 1  ;;  %v4130_v60 = vperm.slane %v10254_v9, 2 }
 0x22a   : > { %8021 = vmatpush.msk.msrb.mxu0 %vm1880_vm0, %v19357_v12  ;;  %v19362_v12 = vld [vmem:[#allocation146_spill] sm:$0xff]  ;;  %v10769_v52 = vpop.permute.xlu1 %1367  ;;  %vm10771_vm0 = vcmp.eq.s32.totalorder %v4550_v59, 1  ;;  %2238 = vrot.lane.b32.xlu0 %v19338_v13, %s9097_s15  ;;  %v10807_v31 = vsel %vm19375_vm6, %v19374_v6, %v10680_v47  ;;  %vm10828_vm6 = vcmp.eq.s32.totalorder %v4270_v32, 1  ;;  %v19389_v59 = vld [vmem:[#allocation25_spill] sm:$0xff]  ;;  %v3990_v6 = vperm.slane %v19390_v48, 2 }
 0x22b   : > { %v10754_v39 = vpop.permute.xlu2 %1371  ;;  %v10767_v57 = vsel %vm18708_vm2, %v19362_v12, %v10629_v11  ;;  %v10785_v12 = vpop.permute.xlu0 %2459  ;;  %7994 = vmatpush.msk.msrb.mxu1 %vm10742_vm4, %v19372_v5  ;;  %19376 = vst [vmem:[#allocation152_spill] sm:$0xff] %v10807_v31  ;;  %vm10820_vm4 = vcmp.eq.s32.totalorder %v1470_v17, 1  ;;  %v10843_v17 = vsel %vm18694_vm1, %v10531_v1, %v10625_v41  ;;  %v19391_v1 = vld [vmem:[#allocation171_spill] sm:$0xff]  ;;  %v19401_v5 = vld [vmem:[#allocation157_spill] sm:$0xff] }
 0x22c   : > { %19360 = vst [vmem:[#allocation150_spill] sm:$0xff] %v10754_v39  ;;  %8002 = vmatpush.msk.msrb.mxu3 %vm10738_vm14, %v10767_v57  ;;  %8022 = vmatpush.msk.msrb.mxu0 %vm10750_vm7, %v19373_v3  ;;  %vm4442_vm14 = vcmp.eq.s32.totalorder %v4410_v35, 1  ;;  %v10812_v14 = vsel %vm18709_vm10, %v2458_v51, %v10785_v12  ;;  %vm10824_vm7 = vcmp.eq.s32.totalorder %v1234_v46, 1  ;;  %v760_v46 = vperm.slane %v10520_v24, 3  ;;  %v19393_v3 = vld [vmem:[#allocation168_spill] sm:$0xff]  ;;  %v19402_v51 = vld [vmem:[#allocation129_spill] sm:$0xff] }
 0x22d   : > { %19363 = vst [vmem:[#allocation26_spill] sm:$0xff] %v10767_v57  ;;  %8027 = vmatpush.msk.msrb.mxu2 %vm10775_vm9, %v10812_v14  ;;  %7995 = vmatpush.msk.msrb.mxu1 %vm10787_vm11, %v19384_v23  ;;  %vm1265_vm9 = vcmp.eq.s32.totalorder %v1233_v7, 1  ;;  %vm1029_vm11 = vcmp.eq.s32.totalorder %v997_v21, 1  ;;  %v10865_v23 = vsel %vm18696_vm13, %v19393_v3, %v10769_v52  ;;  %v10871_v21 = vsel %vm18708_vm2, %v10629_v11, %v10674_v27  ;;  %v19399_v35 = vld [vmem:[#allocation184_spill] sm:$0xff]  ;;  %v19422_v39 = vld [vmem:[#allocation81_spill] sm:$0xff] }
 0x22e   : > { %19377 = vst [vmem:[#allocation154_spill] sm:$0xff] %v10812_v14  ;;  %8003 = vmatpush.msk.msrb.mxu3 %vm10771_vm0, %v10807_v31  ;;  %8023 = vmatpush.msk.msrb.mxu0 %vm10791_vm12, %v19385_v18  ;;  %vm10845_vm0 = vcmp.eq.s32.totalorder %v4691_v19, 1  ;;  %v4551_v18 = vperm.slane %v19348_v20, 3  ;;  %v19392_v19 = vld [vmem:[#allocation156_spill] sm:$0xff]  ;;  %v759_v7 = vperm.slane %v10520_v24, 2  ;;  %v4411_v11 = vperm.slane %v10137_v8, 3 }
 0x22f   : > { %19386 = vst [vmem:[#allocation161_spill] sm:$0xff] %v10843_v17  ;;  %8028 = vmatpush.msk.msrb.mxu2 %vm4863_vm8, %v10843_v17  ;;  %7996 = vmatpush.msk.msrb.mxu1 %vm10820_vm4, %v19391_v1  ;;  %vm10877_vm8 = vcmp.eq.s32.totalorder %v4130_v60, 1  ;;  %v19400_v1 = vld [vmem:[#allocation172_spill] sm:$0xff]  ;;  %vm10896_vm12 = vcmp.eq.s32.totalorder %v996_v43, 1  ;;  %vm10916_vm4 = vcmp.eq.s32.totalorder %v3990_v6, 1  ;;  %v3710_v24 = vperm.slane %v10461_v50, 2 }
 0x230   : > { %8004 = vmatpush.msk.msrb.mxu3 %vm4442_vm14, %v19389_v59  ;;  %8024 = vmatpush.msk.msrb.mxu0 %vm10824_vm7, %v19392_v19  ;;  %19394 = vst [vmem:[#allocation159_spill] sm:$0xff] %v10865_v23  ;;  %v3850_v19 = vperm.slane %v19399_v35, 2  ;;  %v19403_v59 = vld [vmem:[#allocation137_spill] sm:$0xff]  ;;  %vm10900_vm14 = vcmp.eq.s32.totalorder %v760_v46, 1  ;;  %vm10920_vm7 = vcmp.eq.s32.totalorder %v4551_v18, 1  ;;  %v19417_v6 = vld [vmem:[#allocation112_spill] sm:$0xff]  ;;  %v10949_v26 = vsel %vm18682_vm5, %v19423_v45, %v19422_v39 }
 0x231   : > { %19395 = vst [vmem:[#allocation163_spill] sm:$0xff] %v10871_v21  ;;  %8029 = vmatpush.msk.msrb.mxu2 %vm10845_vm0, %v10871_v21  ;;  %7997 = vmatpush.msk.msrb.mxu1 %vm1265_vm9, %v19400_v1  ;;  %v10894_v60 = vsel %vm18693_vm15, %v19403_v59, %v19402_v51  ;;  %v19410_v1 = vld [vmem:[#allocation79_spill] sm:$0xff]  ;;  %v10937_v18 = vsel %vm18684_vm3, %v19418_v63, %v19417_v6  ;;  %vm19427_vm0 = vcmp.lt.s32.totalorder %v9948_v10, 127  ;;  %v3570_v63 = vperm.slane %v10563_v49, 2 }
 0x232   : > { %8005 = vmatpush.msk.msrb.mxu3 %vm10828_vm6, %v10865_v23  ;;  %8025 = vmatpush.msk.msrb.mxu0 %vm1029_vm11, %v19401_v5  ;;  %19404 = vst [vmem:[#allocation165_spill] sm:$0xff] %v10894_v60  ;;  %v10904_v14 = vpop.permute.xlu1 %1987  ;;  %v10910_v5 = vsel %vm18682_vm5, %v19410_v1, %v19409_v15  ;;  %vm791_vm6 = vcmp.eq.s32.totalorder %v759_v7, 1  ;;  %v10943_v16 = vsel %vm18682_vm5, %v19420_v25, %v19410_v1  ;;  %vm3882_vm9 = vcmp.eq.s32.totalorder %v3850_v19, 1  ;;  %v19429_v7 = vld [vmem:[#allocation87_spill] sm:$0xff] }
 0x233   : > { %v10884_v3 = vpop.permute.xlu2 %1991  ;;  %19411 = vst [vmem:[#allocation146_spill] sm:$0xff] %v10910_v5  ;;  %2477 = vrot.lane.b32.xlu2 %v19361_v58, %s9096_s18  ;;  %v10924_v59 = vpop.permute.xlu0 %1369  ;;  %1766 = vrot.lane.b32.xlu0 %v19361_v58, %s9095_s9  ;;  %v10961_v25 = vsel %vm19427_vm0, %v10680_v47, %v10708_v28  ;;  %vm4443_vm11 = vcmp.eq.s32.totalorder %v4411_v11, 1  ;;  %v4131_v17 = vperm.slane %v10254_v9, 3  ;;  %v3432_v1 = vperm.slane %v9942_v33, 4  ;;  %v19432_v11 = vld [vmem:[#allocation175_spill] sm:$0xff] }
 0x234   : > { %19398 = vst [vmem:[#allocation164_spill] sm:$0xff] %v10884_v3  ;;  %v19412_v3 = vld [vmem:[#allocation63_spill] sm:$0xff]  ;;  %8006 = vmatpush.msk.msrb.mxu3 %vm10877_vm8, %v10894_v60  ;;  %7998 = vmatpush.msk.msrb.mxu1 %vm10896_vm12, %v19425_v42  ;;  %v10976_v47 = vsel %vm18682_vm5, %v19409_v15, %v19429_v7  ;;  %v10982_v19 = vsel %vm18682_vm5, %v19429_v7, %v19423_v45  ;;  %vm10985_vm8 = vcmp.eq.s32.totalorder %v3710_v24, 1  ;;  %vm10989_vm12 = vcmp.eq.s32.totalorder %v4271_v34, 1  ;;  %v19437_v15 = vld [vmem:[#allocation90_spill] sm:$0xff]  ;;  %v19439_v24 = vld [vmem:[#allocation32_spill] sm:$0xff] }
 0x235   : > { %2005 = vrot.lane.b32.xlu1 %v19412_v3, %s9093_s10  ;;  %19419 = vst [vmem:[#allocation151_spill] sm:$0xff] %v10937_v18  ;;  %8026 = vmatpush.msk.msrb.mxu0 %vm10900_vm14, %v19426_v22  ;;  %v4972_v46 = vperm.slane %v19342_v44, 4  ;;  %v10999_v45 = vsel %vm18682_vm5, %v19422_v39, %v19437_v15  ;;  %v3991_v7 = vperm.slane %v19390_v48, 3  ;;  %v3292_v34 = vperm.slane %v9967_v0, 4  ;;  %v19440_v22 = vld [vmem:[#allocation105_spill] sm:$0xff] }
 0x236   : > { %19421 = vst [vmem:[#allocation183_spill] sm:$0xff] %v10943_v16  ;;  %8007 = vmatpush.msk.msrb.mxu3 %vm10916_vm4, %v10937_v18  ;;  %8030 = vmatpush.msk.msrb.mxu2 %vm10920_vm7, %v10961_v25  ;;  %vm11023_vm14 = vcmp.eq.s32.totalorder %v3570_v63, 1  ;;  %v19453_v63 = vld [vmem:[#allocation182_spill] sm:$0xff]  ;;  %vm11048_vm4 = vcmp.eq.s32.totalorder %v4131_v17, 1  ;;  %vm11052_vm7 = vcmp.eq.s32.totalorder %v3432_v1, 1  ;;  %v19460_v17 = vld [vmem:[#allocation139_spill] sm:$0xff] }
 0x237   : > { %19424 = vst [vmem:[#allocation168_spill] sm:$0xff] %v10949_v26  ;;  %7999 = vmatpush.msk.msrb.mxu1 %vm791_vm6, %v19432_v11  ;;  %6105 = vmatmul.f32.vlgmr.msrb.gmra.mxu0 %v10604_v37  ;;  %v19441_v11 = vld [vmem:[#allocation111_spill] sm:$0xff]  ;;  %v19443_v26 = vld [vmem:[#allocation89_spill] sm:$0xff]  ;;  %v11071_v1 = vsel %vm18693_vm15, %v19402_v51, %v19460_v17  ;;  %vm5004_vm6 = vcmp.eq.s32.totalorder %v4972_v46, 1  ;;  %vm4023_vm0 = vcmp.eq.s32.totalorder %v3991_v7, 1  ;;  %v3120_v51 = vperm.slane %v19333_v62, 4 }
 0x238   : > { %19428 = vst [vmem:[#allocation184_spill] sm:$0xff] %v10961_v25  ;;  %8008 = vmatpush.msk.msrb.mxu3 %vm3882_vm9, %v10943_v16  ;;  %8031 = vmatpush.msk.msrb.mxu2 %vm4443_vm11, %v19439_v24  ;;  %v11009_v42 = vsel %vm18684_vm3, %v19441_v11, %v19440_v22  ;;  %v11015_v39 = vsel %vm18682_vm5, %v19437_v15, %v19443_v26  ;;  %v19450_v15 = vld [vmem:[#allocation108_spill] sm:$0xff]  ;;  %v19451_v26 = vld [vmem:[#allocation114_spill] sm:$0xff]  ;;  %vm3324_vm9 = vcmp.eq.s32.totalorder %v3292_v34, 1 }
 0x239   : > { %19430 = vst [vmem:[#allocation129_spill] sm:$0xff] %v10976_v47  ;;  %v11021_v24 = vsel %vm18696_vm13, %v10769_v52, %v10924_v59  ;;  %v11033_v47 = vsel %vm18684_vm3, %v19417_v6, %v19441_v11  ;;  %6065 = vmatmul.f32.vlgmr.msrb.gmra.mxu1 %v10604_v37  ;;  %v11040_v52 = vsel %vm18684_vm3, %v19451_v26, %v19450_v15  ;;  %v3851_v11 = vperm.slane %v19399_v35, 3  ;;  %v19469_v34 = vld [vmem:[#allocation118_spill] sm:$0xff] }
 0x23a   : > { %19431 = vst [vmem:[#allocation137_spill] sm:$0xff] %v10982_v19  ;;  %8009 = vmatpush.msk.msrb.mxu3 %vm10985_vm8, %v19453_v63  ;;  %8032 = vmatpush.msk.msrb.mxu2 %vm10989_vm12, %v11021_v24  ;;  %v2462_v6 = vpop.permute.xlu1 %2461  ;;  %v3571_v37 = vperm.slane %v10563_v49, 3  ;;  %vm19473_vm8 = vcmask 719872  }
 0x23b   : > { %19438 = vst [vmem:[#allocation80_spill] sm:$0xff] %v10999_v45  ;;  %v11027_v19 = vpop.permute.xlu2 %2465  ;;  %2479 = vrot.lane.b32.xlu2 %v19412_v3, %s9096_s18  ;;  %v11076_v43 = vsel %vm18709_vm10, %v10785_v12, %v2462_v6  ;;  %1768 = vrot.lane.b32.xlu0 %v19412_v3, %s9095_s9  ;;  %v3711_v12 = vperm.slane %v10461_v50, 3  ;;  %v19467_v45 = vld [vmem:[#allocation132_spill] sm:$0xff]  ;;  %vm11117_vm11 = vcmp.eq.s32.totalorder %v3851_v11, 1  ;;  %v19474_v11 = vld [vmem:[#allocation141_spill] sm:$0xff] }
 0x23c   : > { %19442 = vst [vmem:[#allocation79_spill] sm:$0xff] %v11009_v42  ;;  %8033 = vmatpush.msk.msrb.mxu2 %vm11048_vm4, %v11071_v1  ;;  %8054 = vmatpush.msk.msra.mxu1 %vm5004_vm6, %v11076_v43  ;;  %vm19484_vm4 = vcmp.lt.s32.totalorder %v9948_v10, 127  ;;  %vm19489_vm6 = vcmask 1043456   ;;  %v4552_v42 = vperm.slane %v19348_v20, 4 }
 0x23d   : > { %19444 = vst [vmem:[#allocation112_spill] sm:$0xff] %v11015_v39  ;;  %2240 = vrot.lane.b32.xlu1 %v19361_v58, %s9097_s15  ;;  %v11115_v39 = vsel %vm18684_vm3, %v19450_v15, %v19469_v34  ;;  %v2840_v15 = vperm.slane %v19337_v29, 4  ;;  %v19476_v34 = vld [vmem:[#allocation140_spill] sm:$0xff]  ;;  %vm11148_vm12 = vcmp.eq.s32.totalorder %v3711_v12, 1 }
 0x23e   : > { %19445 = vst [vmem:[#allocation102_spill] sm:$0xff] %v11021_v24  ;;  %8034 = vmatpush.msk.msrb.mxu2 %vm4023_vm0, %v11033_v47  ;;  %vm11179_vm0 = vcmp.eq.s32.totalorder %v3571_v37, 1 }
 0x23f   : > { %19448 = vst [vmem:[#allocation84_spill] sm:$0xff] %v11027_v19  ;;  %v11078_v19 = vpop.permute.xlu0 %1989 }
 0x240   : > { %19449 = vst [vmem:[#allocation81_spill] sm:$0xff] %v11033_v47  ;;  %8035 = vmatpush.msk.msrb.mxu2 %vm11117_vm11, %v10910_v5  ;;  %vm11202_vm11 = vcmp.eq.s32.totalorder %v2840_v15, 1  ;;  %v19502_v15 = vld [vmem:[#allocation166_spill] sm:$0xff] }
 0x241   : > { %19452 = vst [vmem:[#allocation86_spill] sm:$0xff] %v11040_v52  ;;  %v19458_v52 = vld [vmem:[#allocation115_spill] sm:$0xff] }
 0x242   : > { %v11061_v32 = vsel %vm18684_vm3, %v19440_v22, %v19458_v52  ;;  %19461 = vst [vmem:[#allocation90_spill] sm:$0xff] %v11071_v1  ;;  %v11084_v22 = vsel %vm18684_vm3, %v19458_v52, %v19451_v26  ;;  %v19465_v26 = vld [vmem:[#allocation138_spill] sm:$0xff]  ;;  %v19622_v52 = vld [vmem:[#allocation149_spill] sm:$0xff] }
 0x243   : > { %19459 = vst [vmem:[#allocation87_spill] sm:$0xff] %v11061_v32  ;;  %v19464_v32 = vld [vmem:[#allocation187_spill] sm:$0xff]  ;;  %v11103_v46 = vsel %vm18693_vm15, %v19460_v17, %v19465_v26  ;;  %v11109_v7 = vsel %vm18693_vm15, %v19465_v26, %v19467_v45  ;;  %v2980_v17 = vperm.slane %v19335_v53, 4  ;;  %v11134_v26 = vsel %vm18693_vm15, %v19467_v45, %v19474_v11  ;;  %1389 = vrot.lane.b32.xlu2 %v19361_v58, %s9094_s8 }
 0x244   : > { %19462 = vst [vmem:[#allocation105_spill] sm:$0xff] %v11076_v43  ;;  %8010 = vmatpush.msk.msrb.mxu3 %vm11023_vm14, %v19464_v32  ;;  %v19478_v43 = vld [vmem:[#allocation135_spill] sm:$0xff]  ;;  %vm11152_vm14 = vcmp.eq.s32.totalorder %v3120_v51, 1  ;;  %v4832_v45 = vperm.slane %v19344_v40, 4  ;;  %1387 = vrot.lane.b32.xlu0 %v19338_v13, %s9094_s8  ;;  %v4272_v13 = vperm.slane %v10243_v61, 4 }
 0x245   : > { %19463 = vst [vmem:[#allocation111_spill] sm:$0xff] %v11084_v22  ;;  %7892 = vmatmul.msk.f32.vlgmr.msrb.gmra.mxu3 %vm19473_vm8, %v10677_v54  ;;  %v11146_v22 = vsel %vm18693_vm15, %v19476_v34, %v19478_v43  ;;  %v19488_v51 = vld [vmem:[#allocation23_spill] sm:$0xff]  ;;  %v3293_v43 = vperm.slane %v9967_v0, 5  ;;  %2242 = vrot.lane.b32.xlu1 %v19412_v3, %s9097_s15 }
 0x246   : > { %8038 = vmatpush.msk.msra.mxu3 %vm11052_vm7, %v10767_v57  ;;  %19466 = vst [vmem:[#allocation108_spill] sm:$0xff] %v11103_v46  ;;  %v3433_v57 = vperm.slane %v9942_v33, 5  ;;  %vm19486_vm7 = vmmov %vm19484_vm4 }
 0x247   : > { %19468 = vst [vmem:[#allocation114_spill] sm:$0xff] %v11109_v7  ;;  %v11168_v12 = vsel %vm19486_vm7, %v10667_v2, %v10701_v38  ;;  %v19497_v38 = vld [vmem:[#allocation162_spill] sm:$0xff]  ;;  %v11200_v37 = vpop.permute.xlu0 %2224 }
 0x248   : > { %19470 = vst [vmem:[#allocation182_spill] sm:$0xff] %v11115_v39  ;;  %8039 = vmatpush.msk.msra.mxu3 %vm3324_vm9, %v10807_v31  ;;  %v11140_v39 = vsel %vm18693_vm15, %v19474_v11, %v19476_v34  ;;  %v11162_v11 = vsel %vm19484_vm4, %v10708_v28, %v10667_v2  ;;  %v11175_v34 = vpop.permute.xlu2 %2467  ;;  %v2700_v28 = vperm.slane %v19340_v36, 4  ;;  %vm11183_vm9 = vcmp.eq.s32.totalorder %v2980_v17, 1  ;;  %8036 = vmatpush.msk.msrb.mxu2 %vm11148_vm12, %v19497_v38  ;;  %v19559_v17 = vld [vmem:[#allocation191_spill] sm:$0xff] }
 0x249   : > { %19475 = vst [vmem:[#allocation115_spill] sm:$0xff] %v11134_v26  ;;  %v4973_v26 = vperm.slane %v19342_v44, 5  ;;  %vm11187_vm8 = vcmp.eq.s32.totalorder %v3433_v57, 1  ;;  %v2560_v57 = vperm.slane %v19341_v30, 4  ;;  %v11222_v7 = vsel %vm18694_vm1, %v10625_v41, %v11200_v37 }
 0x24a   : > { %19477 = vst [vmem:[#allocation139_spill] sm:$0xff] %v11140_v39  ;;  %8040 = vmatpush.msk.msra.mxu3 %vm19489_vm6, %v19488_v51  ;;  %v11191_v39 = vpop.permute.xlu1 %2463  ;;  %v4692_v51 = vperm.slane %v19347_v56, 4  ;;  %vm4864_vm12 = vcmp.eq.s32.totalorder %v4832_v45, 1  ;;  %8037 = vmatpush.msk.msrb.mxu2 %vm11179_vm0, %v19502_v15  ;;  %vm11229_vm4 = vcmp.eq.s32.totalorder %v3293_v43, 1  ;;  %vm11233_vm7 = vcmp.eq.s32.totalorder %v2700_v28, 1 }
 0x24b   : > { %19479 = vst [vmem:[#allocation187_spill] sm:$0xff] %v11146_v22  ;;  %v11216_v31 = vsel %vm18709_vm10, %v2462_v6, %v11191_v39  ;;  %v2323_v41 = vperm.slane %v10209_v4, 4  ;;  %v2981_v45 = vperm.slane %v19335_v53, 5  ;;  %v4412_v22 = vperm.slane %v10137_v8, 4  ;;  %8055 = vmatpush.msk.msra.mxu1 %vm4864_vm12, %v11222_v7 }
 0x24c   : > { %19485 = vst [vmem:[#allocation138_spill] sm:$0xff] %v11162_v11  ;;  %8041 = vmatpush.msk.msra.mxu3 %vm11152_vm14, %v10865_v23  ;;  %vm5005_vm14 = vcmp.eq.s32.totalorder %v4973_v26, 1  ;;  %8065 = vmatpush.msk.msra.mxu2 %vm11187_vm8, %v10871_v21  ;;  %vm11245_vm6 = vcmp.eq.s32.totalorder %v4692_v51, 1  ;;  %v2086_v26 = vperm.slane %v10300_v55, 4  ;;  %v2841_v28 = vperm.slane %v19337_v29, 5 }
 0x24d   : > { %19487 = vst [vmem:[#allocation132_spill] sm:$0xff] %v11168_v12  ;;  %8081 = vmatpush.msk.msra.mxu0 %vm5005_vm14, %v11216_v31  ;;  %vm11254_vm0 = vcmp.eq.s32.totalorder %v2560_v57, 1  ;;  %vm11262_vm8 = vcmp.eq.s32.totalorder %v4552_v42, 1  ;;  %v11271_v21 = vsel %vm18708_vm2, %v10674_v27, %v10904_v14  ;;  %v4833_v42 = vperm.slane %v19344_v40, 5  ;;  %1152 = vrot.lane.b32.xlu0 %v19361_v58, %s9092_s2  ;;  %v19673_v27 = vld [vmem:[#allocation31_spill] sm:$0xff] }
 0x24e   : > { %19490 = vst [vmem:[#allocation141_spill] sm:$0xff] %v11175_v34  ;;  %v3121_v34 = vperm.slane %v19333_v62, 5  ;;  %8042 = vmatpush.msk.msra.mxu3 %vm11183_vm9, %v10894_v60  ;;  %8066 = vmatpush.msk.msra.mxu2 %vm11229_vm4, %v10961_v25  ;;  %vm11285_vm12 = vcmp.eq.s32.totalorder %v2323_v41, 1  ;;  %vm11289_vm14 = vcmp.eq.s32.totalorder %v2981_v45, 1  ;;  %v4132_v25 = vperm.slane %v10254_v9, 4  ;;  %v19523_v41 = vld [vmem:[#allocation24_spill] sm:$0xff] }
 0x24f   : > { %19500 = vst [vmem:[#allocation140_spill] sm:$0xff] %v11216_v31  ;;  %v2701_v31 = vperm.slane %v19340_v36, 5  ;;  %8056 = vmatpush.msk.msra.mxu1 %vm11245_vm6, %v11271_v21  ;;  %vm19524_vm4 = vcmask 1043456   ;;  %vm11306_vm6 = vcmp.eq.s32.totalorder %v4412_v22, 1  ;;  %vm11310_vm5 = vcmp.eq.s32.totalorder %v2086_v26, 1 }
 0x250   : > { %19501 = vst [vmem:[#allocation23_spill] sm:$0xff] %v11222_v7  ;;  %vm11258_vm9 = vcmp.eq.s32.totalorder %v3121_v34, 1  ;;  %8043 = vmatpush.msk.msra.mxu3 %vm11202_vm11, %v10937_v18  ;;  %v19516_v34 = vld [vmem:[#allocation188_spill] sm:$0xff]  ;;  %v11293_v23 = vpop.permute.xlu2 %1377  ;;  %v4693_v18 = vperm.slane %v19347_v56, 5  ;;  %vm19522_vm11 = vcmask 719872   ;;  %8067 = vmatpush.msk.msra.mxu2 %vm19524_vm4, %v19523_v41  ;;  %vm11314_vm3 = vcmp.eq.s32.totalorder %v2841_v28, 1  ;;  %v11322_v41 = vpop.permute.xlu0 %2226 }
 0x251   : > { %19515 = vst [vmem:[#allocation162_spill] sm:$0xff] %v11271_v21  ;;  %v1849_v57 = vperm.slane %v19516_v34, 4  ;;  %7893 = vmatmul.msk.f32.vlgmr.msrb.gmra.mxu2 %vm19522_vm11, %v10677_v54  ;;  %v19531_v54 = vld [vmem:[#allocation193_spill] sm:$0xff]  ;;  %8057 = vmatpush.msk.msra.mxu1 %vm11262_vm8, %v11162_v11  ;;  %v2561_v26 = vperm.slane %v19341_v30, 5  ;;  %v4553_v28 = vperm.slane %v19348_v20, 5  ;;  %vm11337_vm8 = vcmp.eq.s32.totalorder %v4833_v42, 1 }
 0x252   : > { %19521 = vst [vmem:[#allocation166_spill] sm:$0xff] %v11293_v23  ;;  %8044 = vmatpush.msk.msra.mxu3 %vm11233_vm7, %v10943_v16  ;;  %v11304_v45 = vpop.permute.xlu1 %1373  ;;  %v1612_v6 = vperm.slane %v19531_v54, 4  ;;  %vm11324_vm7 = vcmp.eq.s32.totalorder %v4272_v13, 1  ;;  %v3992_v16 = vperm.slane %v19390_v48, 4  ;;  %8068 = vmatpush.msk.msra.mxu2 %vm11258_vm9, %v11021_v24  ;;  %vm11345_vm4 = vcmp.eq.s32.totalorder %v2701_v31, 1  ;;  %v19540_v11 = vld [vmem:[#allocation196_spill] sm:$0xff] }
 0x253   : > { %vm11341_vm11 = vcmp.eq.s32.totalorder %v1849_v57, 1  ;;  %v1472_v30 = vperm.slane %v19540_v11, 4  ;;  %v11358_v2 = vsel %vm18694_vm1, %v11200_v37, %v11322_v41  ;;  %vm11364_vm9 = vcmp.eq.s32.totalorder %v4693_v18, 1  ;;  %v19547_v57 = vld [vmem:[#allocation150_spill] sm:$0xff]  ;;  %v19582_v18 = vld [vmem:[#allocation164_spill] sm:$0xff] }
 0x254   : > { %8045 = vmatpush.msk.msra.mxu3 %vm11254_vm0, %v19453_v63  ;;  %v19541_v63 = vld [vmem:[#allocation62_spill] sm:$0xff]  ;;  %19542 = vst [vmem:[#allocation24_spill] sm:$0xff] %v11358_v2  ;;  %vm11360_vm0 = vcmp.eq.s32.totalorder %v4132_v25, 1  ;;  %v2324_v42 = vperm.slane %v10209_v4, 5  ;;  %v11373_v24 = vsel %vm18696_vm13, %v10924_v59, %v19547_v57  ;;  %vm11380_vm15 = vcmp.eq.s32.totalorder %v1612_v6, 1  ;;  %8069 = vmatpush.msk.msra.mxu2 %vm11289_vm14, %v11071_v1  ;;  %v19551_v59 = vld [vmem:[#allocation45_spill] sm:$0xff] }
 0x255   : > { %2007 = vrot.lane.b32.xlu1 %v19541_v63, %s9093_s10  ;;  %1770 = vrot.lane.b32.xlu2 %v19541_v63, %s9095_s9  ;;  %19548 = vst [vmem:[#allocation150_spill] sm:$0xff] %v11373_v24  ;;  %v3852_v25 = vperm.slane %v19399_v35, 4  ;;  %v4413_v37 = vperm.slane %v10137_v8, 5  ;;  %vm11392_vm1 = vcmp.eq.s32.totalorder %v2561_v26, 1  ;;  %vm11400_vm13 = vcmp.eq.s32.totalorder %v4553_v28, 1  ;;  %v19558_v6 = vld [vmem:[#allocation206_spill] sm:$0xff] }
 0x256   : > { %8046 = vmatpush.msk.msra.mxu3 %vm11285_vm12, %v19464_v32  ;;  %8058 = vmatpush.msk.msra.mxu1 %vm11306_vm6, %v19551_v59  ;;  %vm11396_vm12 = vcmp.eq.s32.totalorder %v3992_v16, 1  ;;  %v1235_v4 = vperm.slane %v19558_v6, 4  ;;  %vm11411_vm14 = vcmp.eq.s32.totalorder %v1472_v30, 1  ;;  %v2087_v16 = vperm.slane %v10300_v55, 5  ;;  %v19601_v32 = vld [vmem:[#allocation44_spill] sm:$0xff] }
 0x257   : > { %8082 = vmatpush.msk.msra.mxu0 %vm11337_vm8, %v11358_v2  ;;  %v3712_v26 = vperm.slane %v10461_v50, 4  ;;  %v4273_v28 = vperm.slane %v10243_v61, 5  ;;  %v11422_v60 = vsel %vm18708_vm2, %v10904_v14, %v11078_v19  ;;  %8070 = vmatpush.msk.msra.mxu2 %vm11314_vm3, %v11033_v47  ;;  %v1850_v1 = vperm.slane %v19516_v34, 5  ;;  %v19567_v14 = vld [vmem:[#allocation192_spill] sm:$0xff]  ;;  %v19575_v34 = vld [vmem:[#allocation27_spill] sm:$0xff] }
 0x258   : > { %8047 = vmatpush.msk.msra.mxu3 %vm11310_vm5, %v19559_v17  ;;  %19562 = vst [vmem:[#allocation191_spill] sm:$0xff] %v11422_v60  ;;  %8059 = vmatpush.msk.msra.mxu1 %vm11324_vm7, %v11373_v24  ;;  %vm11430_vm5 = vcmp.eq.s32.totalorder %v2324_v42, 1  ;;  %v11434_v51 = vpop.permute.xlu2 %1997  ;;  %v19566_v17 = vld [vmem:[#allocation208_spill] sm:$0xff]  ;;  %vm11446_vm3 = vcmp.eq.s32.totalorder %v3852_v25, 1  ;;  %vm11450_vm6 = vcmp.eq.s32.totalorder %v4413_v37, 1  ;;  %v3572_v47 = vperm.slane %v10563_v49, 4  ;;  %v11462_v13 = vpop.permute.xlu0 %1754 }
 0x259   : > { %19565 = vst [vmem:[#allocation222_spill] sm:$0xff] %v11434_v51  ;;  %v998_v59 = vperm.slane %v19566_v17, 4  ;;  %8083 = vmatpush.msk.msra.mxu0 %vm11364_vm9, %v11422_v60  ;;  %v4133_v2 = vperm.slane %v10254_v9, 5  ;;  %8071 = vmatpush.msk.msra.mxu2 %vm11345_vm4, %v10910_v5  ;;  %vm11464_vm7 = vcmp.eq.s32.totalorder %v1235_v4, 1  ;;  %v19574_v25 = vld [vmem:[#allocation211_spill] sm:$0xff]  ;;  %v3434_v51 = vperm.slane %v9942_v33, 6 }
 0x25a   : > { %8048 = vmatpush.msk.msra.mxu3 %vm11341_vm11, %v19567_v14  ;;  %v11444_v7 = vpop.permute.xlu1 %1993  ;;  %8060 = vmatpush.msk.msra.mxu1 %vm11360_vm0, %v11103_v46  ;;  %v761_v37 = vperm.slane %v19574_v25, 4  ;;  %v1613_v14 = vperm.slane %v19531_v54, 5  ;;  %vm11477_vm8 = vcmp.eq.s32.totalorder %v2087_v16, 1  ;;  %vm11481_vm11 = vcmp.eq.s32.totalorder %v3712_v26, 1  ;;  %v19611_v42 = vld [vmem:[#allocation199_spill] sm:$0xff]  ;;  %v19627_v4 = vld [vmem:[#allocation114_spill] sm:$0xff] }
 0x25b   : > { %8084 = vmatpush.msk.msra.mxu0 %vm11400_vm13, %v11168_v12  ;;  %vm11485_vm4 = vcmp.eq.s32.totalorder %v4273_v28, 1  ;;  %v3993_v5 = vperm.slane %v19390_v48, 5  ;;  %8072 = vmatpush.msk.msra.mxu2 %vm11392_vm1, %v19497_v38  ;;  %vm11501_vm13 = vcmp.eq.s32.totalorder %v998_v59, 1  ;;  %v4974_v26 = vperm.slane %v19342_v44, 6  ;;  %v19593_v28 = vld [vmem:[#allocation79_spill] sm:$0xff]  ;;  %v19594_v12 = vld [vmem:[#allocation197_spill] sm:$0xff] }
 0x25c   : > { %8049 = vmatpush.msk.msra.mxu3 %vm11380_vm15, %v19575_v34  ;;  %v11494_v34 = vsel %vm18708_vm2, %v11078_v19, %v19582_v18  ;;  %vm11505_vm15 = vcmp.eq.s32.totalorder %v1850_v1, 1  ;;  %v19588_v19 = vld [vmem:[#allocation67_spill] sm:$0xff]  ;;  %vm11514_vm1 = vcmp.eq.s32.totalorder %v3572_v47, 1  ;;  %vm11518_vm0 = vcmp.eq.s32.totalorder %v4133_v2, 1  ;;  %8061 = vmatpush.msk.msra.mxu1 %vm11396_vm12, %v19593_v28  ;;  %v19605_v28 = vld [vmem:[#allocation84_spill] sm:$0xff]  ;;  %v19634_v16 = vld [vmem:[#allocation29_spill] sm:$0xff] }
 0x25d   : > { %19583 = vst [vmem:[#allocation192_spill] sm:$0xff] %v11494_v34  ;;  %2481 = vrot.lane.b32.xlu1 %v19541_v63, %s9096_s18  ;;  %1772 = vrot.lane.b32.xlu2 %v19588_v19, %s9095_s9  ;;  %v1473_v1 = vperm.slane %v19540_v11, 5  ;;  %v3294_v59 = vperm.slane %v9967_v0, 6  ;;  %vm11530_vm9 = vcmp.eq.s32.totalorder %v761_v37, 1  ;;  %vm11534_vm2 = vcmp.eq.s32.totalorder %v1613_v14, 1  ;;  %v19604_v14 = vld [vmem:[#allocation141_spill] sm:$0xff] }
 0x25e   : > { %2009 = vrot.lane.b32.xlu0 %v19588_v19, %s9093_s10  ;;  %8050 = vmatpush.msk.msra.mxu3 %vm11411_vm14, %v19594_v12  ;;  %vm11538_vm10 = vcmp.eq.s32.totalorder %v3434_v51, 1  ;;  %v3853_v54 = vperm.slane %v19399_v35, 5  ;;  %vm11549_vm12 = vcmp.eq.s32.totalorder %v3993_v5, 1  ;;  %v1236_v43 = vperm.slane %v19558_v6, 5  ;;  %v19614_v6 = vld [vmem:[#allocation167_spill] sm:$0xff]  ;;  %v19652_v12 = vld [vmem:[#allocation186_spill] sm:$0xff] }
 0x25f   : > { %8073 = vmatpush.msk.msra.mxu2 %vm11430_vm5, %v19502_v15  ;;  %8085 = vmatpush.msk.msra.mxu0 %vm11450_vm6, %v19601_v32  ;;  %v3713_v51 = vperm.slane %v10461_v50, 5  ;;  %v4834_v37 = vperm.slane %v19344_v40, 6  ;;  %vm19606_vm14 = vcmp.lt.s32.totalorder %v9948_v10, 111  ;;  %vm19608_vm5 = vcmp.lt.s32.totalorder %v9948_v10, 1  ;;  %v19610_v15 = vld [vmem:[#allocation129_spill] sm:$0xff]  ;;  %v19635_v38 = vld [vmem:[#allocation203_spill] sm:$0xff] }
 0x260   : > { %v11560_v30 = vsel %vm19606_vm14, %v19605_v28, %v19604_v14  ;;  %v11566_v5 = vsel %vm19608_vm5, %v19547_v57, %v11304_v45  ;;  %8062 = vmatpush.msk.msra.mxu1 %vm11446_vm3, %v19610_v15  ;;  %8051 = vmatpush.msk.msra.mxu3 %vm11464_vm7, %v19611_v42  ;;  %vm11574_vm6 = vcmp.eq.s32.totalorder %v4974_v26, 1  ;;  %v999_v14 = vperm.slane %v19566_v17, 5  ;;  %v11595_v26 = vpop.permute.xlu2 %2232  ;;  %v19660_v32 = vld [vmem:[#allocation138_spill] sm:$0xff]  ;;  %v19661_v57 = vld [vmem:[#allocation137_spill] sm:$0xff] }
 0x261   : > { %19607 = vst [vmem:[#allocation27_spill] sm:$0xff] %v11560_v30  ;;  %8074 = vmatpush.msk.msra.mxu2 %vm11477_vm8, %v19614_v6  ;;  %8086 = vmatpush.msk.msra.mxu0 %vm11485_vm4, %v11566_v5  ;;  %vm11585_vm14 = vcmp.eq.s32.totalorder %v1473_v1, 1  ;;  %vm11589_vm3 = vcmp.eq.s32.totalorder %v3294_v59, 1  ;;  %v3122_v42 = vperm.slane %v19333_v62, 6  ;;  %v3573_v6 = vperm.slane %v10563_v49, 5  ;;  %v19623_v1 = vld [vmem:[#allocation201_spill] sm:$0xff] }
 0x262   : > { %19609 = vst [vmem:[#allocation164_spill] sm:$0xff] %v11566_v5  ;;  %v11593_v31 = vpop.permute.xlu1 %2228  ;;  %vm19620_vm7 = vcmp.lt.s32.totalorder %v9948_v10, 111  ;;  %8063 = vmatpush.msk.msra.mxu1 %vm11481_vm11, %v19622_v52  ;;  %8052 = vmatpush.msk.msra.mxu3 %vm11501_vm13, %v19623_v1  ;;  %vm11611_vm8 = vcmp.eq.s32.totalorder %v3853_v54, 1  ;;  %v4694_v17 = vperm.slane %v19347_v56, 6  ;;  %v762_v5 = vperm.slane %v19574_v25, 5  ;;  %v19638_v25 = vld [vmem:[#allocation33_spill] sm:$0xff] }
 0x263   : > { %19619 = vst [vmem:[#allocation197_spill] sm:$0xff] %v11595_v26  ;;  %v11603_v23 = vsel %vm19620_vm7, %v11191_v39, %v19605_v28  ;;  %v11615_v26 = vpop.permute.xlu0 %1756  ;;  %v19626_v39 = vld [vmem:[#allocation169_spill] sm:$0xff]  ;;  %8087 = vmatpush.msk.msra.mxu0 %vm11518_vm0, %v19627_v4  ;;  %vm11625_vm11 = vcmp.eq.s32.totalorder %v1236_v43, 1  ;;  %vm11629_vm4 = vcmp.eq.s32.totalorder %v3713_v51, 1  ;;  %vm11633_vm13 = vcmp.eq.s32.totalorder %v4834_v37, 1 }
 0x264   : > { %19621 = vst [vmem:[#allocation84_spill] sm:$0xff] %v11603_v23  ;;  %8075 = vmatpush.msk.msra.mxu2 %vm11505_vm15, %v19626_v39  ;;  %v2982_v1 = vperm.slane %v19335_v53, 6  ;;  %8064 = vmatpush.msk.msra.mxu1 %vm11514_vm1, %v19634_v16  ;;  %vm11644_vm15 = vcmp.eq.s32.totalorder %v999_v14, 1  ;;  %v3435_v51 = vperm.slane %v9942_v33, 7  ;;  %v4554_v37 = vperm.slane %v19348_v20, 6  ;;  %v19667_v59 = vld [vmem:[#allocation189_spill] sm:$0xff] }
 0x265   : > { %8053 = vmatpush.msk.msra.mxu3 %vm11530_vm9, %v19635_v38  ;;  %v4975_v39 = vperm.slane %v19342_v44, 7  ;;  %vm11657_vm1 = vcmp.eq.s32.totalorder %v3122_v42, 1  ;;  %vm11661_vm0 = vcmp.eq.s32.totalorder %v3573_v6, 1  ;;  %v2842_v33 = vperm.slane %v19337_v29, 6  ;;  %2483 = vrot.lane.b32.xlu1 %v19588_v19, %s9096_s18 }
 0x266   : > { %8076 = vmatpush.msk.msra.mxu2 %vm11534_vm2, %v19638_v25  ;;  %8092 = vmatpush.msk.msrb.mxu1 %vm11538_vm10, %v11271_v21  ;;  %v3295_v44 = vperm.slane %v9967_v0, 7  ;;  %vm11671_vm2 = vcmp.eq.s32.totalorder %v4694_v17, 1  ;;  %vm11675_vm10 = vcmp.eq.s32.totalorder %v762_v5, 1  ;;  %v4414_v2 = vperm.slane %v10137_v8, 6  ;;  %v19647_v0 = vld [vmem:[#allocation87_spill] sm:$0xff] }
 0x267   : > { %1391 = vrot.lane.b32.xlu2 %v19412_v3, %s9094_s8  ;;  %v2702_v14 = vperm.slane %v19340_v36, 6  ;;  %2244 = vrot.lane.b32.xlu0 %v19541_v63, %s9097_s15  ;;  %vm19648_vm9 = vcmp.lt.s32.totalorder %v9948_v10, 112  ;;  %vm11692_vm5 = vcmp.eq.s32.totalorder %v2982_v1, 1  ;;  %v4274_v42 = vperm.slane %v10243_v61, 6  ;;  %v19695_v25 = vld [vmem:[#allocation147_spill] sm:$0xff]  ;;  %v19717_v1 = vld [vmem:[#allocation132_spill] sm:$0xff] }
 0x268   : > { %8088 = vmatpush.msk.msra.mxu0 %vm11549_vm12, %v19647_v0  ;;  %v11690_v17 = vsel %vm19648_vm9, %v11322_v41, %v11593_v31  ;;  %v4835_v6 = vperm.slane %v19344_v40, 7  ;;  %8108 = vmatpush.msk.msrb.mxu3 %vm11574_vm6, %v11603_v23  ;;  %vm11704_vm12 = vcmp.eq.s32.totalorder %v3435_v51, 1  ;;  %vm11708_vm7 = vcmp.eq.s32.totalorder %v4554_v37, 1  ;;  %v19659_v40 = vld [vmem:[#allocation170_spill] sm:$0xff]  ;;  %v19715_v41 = vld [vmem:[#allocation193_spill] sm:$0xff] }
 0x269   : > { %19649 = vst [vmem:[#allocation199_spill] sm:$0xff] %v11690_v17  ;;  %8077 = vmatpush.msk.msra.mxu2 %vm11585_vm14, %v19652_v12  ;;  %vm11712_vm9 = vcmp.eq.s32.totalorder %v4975_v39, 1  ;;  %v2562_v21 = vperm.slane %v19659_v40, 6  ;;  %8093 = vmatpush.msk.msrb.mxu1 %vm11589_vm3, %v19660_v32  ;;  %vm11723_vm6 = vcmp.eq.s32.totalorder %v2842_v33, 1  ;;  %vm11727_vm14 = vcmp.eq.s32.totalorder %v3295_v44, 1  ;;  %v11733_v12 = vpop.permute.xlu2 %2234  ;;  %v11737_v32 = vld [vmem:[#allocation8 + $0x8] sm:$0xff] }
 0x26a   : > { %8089 = vmatpush.msk.msra.mxu0 %vm11611_vm8, %v19661_v57  ;;  %v11731_v39 = vpop.permute.xlu1 %2230  ;;  %19666 = vst [vmem:[#allocation167_spill] sm:$0xff] %v11733_v12  ;;  %v3123_v23 = vperm.slane %v19333_v62, 7  ;;  %v4134_v22 = vperm.slane %v10254_v9, 6  ;;  %8109 = vmatpush.msk.msrb.mxu3 %vm11633_vm13, %v11690_v17  ;;  %vm11745_vm3 = vcmp.eq.s32.totalorder %v4414_v2, 1  ;;  %v19668_v33 = vmov 0  ;;  %v19672_v12 = vld [vmem:[#allocation176_spill] sm:$0xff] }
 0x26b   : > { %8078 = vmatpush.msk.msra.mxu2 %vm11625_vm11, %v19667_v59  ;;  %v19669_v33 = vsel %vm11745_vm3, 4294967295, %v19668_v33  ;;  %v11749_v44 = vpop.permute.xlu0 %1375  ;;  %vm11751_vm8 = vcmp.eq.s32.totalorder %v2702_v14, 1  ;;  %v4695_v57 = vperm.slane %v19347_v56, 7  ;;  %v2325_v0 = vperm.slane %v19672_v12, 6  ;;  %v19675_v59 = vld [vmem:[#allocation154_spill] sm:$0xff] }
 0x26c   : > { %vm19674_vm11 = vcmask 1043456   ;;  %8090 = vmatpush.msk.msra.mxu0 %vm11629_vm4, %v19675_v59  ;;  %vm11762_vm13 = vcmp.eq.s32.totalorder %v4274_v42, 1  ;;  %vm11766_vm3 = vcmp.eq.s32.totalorder %v4835_v6, 1  ;;  %v2983_v14 = vperm.slane %v19335_v53, 7  ;;  %v19680_v17 = vld [vmem:[#allocation190_spill] sm:$0xff]  ;;  %8110 = vmatpush.msk.msrb.mxu3 %vm11671_vm2, %v11494_v34 }
 0x26d   : > { %8094 = vmatpush.msk.msrb.mxu1 %vm19674_vm11, %v19673_v27  ;;  %v4555_v56 = vperm.slane %v19348_v20, 7  ;;  %8079 = vmatpush.msk.msra.mxu2 %vm11644_vm15, %v19680_v17  ;;  %vm11778_vm4 = vcmp.eq.s32.totalorder %v2562_v21, 1  ;;  %v3994_v42 = vperm.slane %v19390_v48, 6  ;;  %v2088_v6 = vperm.slane %v10300_v55, 6  ;;  %v19683_v20 = vld [vmem:[#allocation161_spill] sm:$0xff]  ;;  %v19688_v27 = vld [vmem:[#allocation195_spill] sm:$0xff] }
 0x26e   : > { %v3417_v53 = vand.u32 24, %v11737_v32  ;;  %8091 = vmatpush.msk.msra.mxu0 %vm11661_vm0, %v19683_v20  ;;  %vm11791_vm15 = vcmp.eq.s32.totalorder %v3123_v23, 1  ;;  %vm11795_vm2 = vcmp.eq.s32.totalorder %v4134_v22, 1  ;;  %v2843_v11 = vperm.slane %v19337_v29, 7  ;;  %1154 = vrot.lane.b32.xlu1 %v19412_v3, %s9092_s2  ;;  %v19724_v37 = vld [vmem:[#allocation42_spill] sm:$0xff]  ;;  %v19743_v23 = vld [vmem:[#allocation164_spill] sm:$0xff] }
 0x26f   : > { %8095 = vmatpush.msk.msrb.mxu1 %vm11657_vm1, %v11373_v24  ;;  %v4415_v17 = vperm.slane %v10137_v8, 7  ;;  %8080 = vmatpush.msk.msra.mxu2 %vm11675_vm10, %v19688_v27  ;;  %vm11807_vm1 = vcmp.eq.s32.totalorder %v4695_v57, 1  ;;  %vm11811_vm0 = vcmp.eq.s32.totalorder %v2325_v0, 1  ;;  %v19691_v58 = vmov 0  ;;  %v19765_v0 = vld [vmem:[#allocation208_spill] sm:$0xff] }
 0x270   : > { %8119 = vmatpush.msk.msrb.mxu0 %vm11704_vm12, %v11422_v60  ;;  %v19692_v58 = vsel %vm11811_vm0, 4294967295, %v19691_v58  ;;  %v3854_v29 = vperm.slane %v19399_v35, 6  ;;  %v3277_v8 = vand.u32 32, %v11737_v32  ;;  %vm19693_vm10 = vcmp.lt.s32.totalorder %v9948_v10, 113  ;;  %1393 = vrot.lane.b32.xlu2 %v19541_v63, %s9094_s8  ;;  %v19716_v60 = vld [vmem:[#allocation79_spill] sm:$0xff] }
 0x271   : > { %v11821_v47 = vsel %vm19693_vm10, %v19582_v18, %v11444_v7  ;;  %vm19696_vm12 = vcmp.lt.s32.totalorder %v9948_v10, 127  ;;  %8096 = vmatpush.msk.msrb.mxu1 %vm11692_vm5, %v11103_v46  ;;  %vm11834_vm11 = vcmp.eq.s32.totalorder %v2983_v14, 1  ;;  %vm11838_vm0 = vcmp.eq.s32.totalorder %v4555_v56, 1  ;;  %2246 = vrot.lane.b32.xlu0 %v19588_v19, %s9097_s15  ;;  %v19708_v14 = vld [vmem:[#allocation188_spill] sm:$0xff] }
 0x272   : > { %19694 = vst [vmem:[#allocation149_spill] sm:$0xff] %v11821_v47  ;;  %v11827_v38 = vsel %vm19696_vm12, %v19695_v25, %v11462_v13  ;;  %v19700_v18 = vmov 0  ;;  %vm19702_vm5 = vcmp.lt.s32.totalorder %v9948_v10, 112  ;;  %vm11852_vm10 = vcmp.eq.s32.totalorder %v3994_v42, 1  ;;  %8135 = vmatpush.msk.msrb.mxu2 %vm11712_vm9, %v11560_v30  ;;  %v11876_v42 = vpop.permute.xlu1 %1758  ;;  %8120 = vmatpush.msk.msrb.mxu0 %vm11727_vm14, %v19717_v1  ;;  %v19727_v1 = vld [vmem:[#allocation196_spill] sm:$0xff] }
 0x273   : > { %19697 = vst [vmem:[#allocation201_spill] sm:$0xff] %v11827_v38  ;;  %v19701_v18 = vsel %vm11838_vm0, 4294967295, %v19700_v18  ;;  %v11850_v5 = vsel %vm19702_vm5, %v11593_v31, %v11731_v39  ;;  %vm11856_vm12 = vcmp.eq.s32.totalorder %v2088_v6, 1  ;;  %v19706_v22 = vmov 0  ;;  %8111 = vmatpush.msk.msrb.mxu3 %vm11708_vm7, %v11827_v38  ;;  %8097 = vmatpush.msk.msrb.mxu1 %vm11723_vm6, %v19716_v60  ;;  %v19786_v31 = vld [vmem:[#allocation166_spill] sm:$0xff] }
 0x274   : > { %19703 = vst [vmem:[#allocation169_spill] sm:$0xff] %v11850_v5  ;;  %v19707_v22 = vsel %vm11856_vm12, 4294967295, %v19706_v22  ;;  %v1851_v56 = vperm.slane %v19708_v14, 6  ;;  %v2703_v27 = vperm.slane %v19340_v36, 7  ;;  %vm11862_vm0 = vcmp.eq.s32.totalorder %v3417_v53, 24  ;;  %8136 = vmatpush.msk.msrb.mxu2 %vm11766_vm3, %v11850_v5 }
 0x275   : > { %vm11872_vm5 = vcmp.eq.s32.totalorder %v2843_v11, 1  ;;  %vm11878_vm12 = vcmp.eq.s32.totalorder %v4415_v17, 1  ;;  %v3714_v6 = vperm.slane %v10461_v50, 6  ;;  %v4275_v53 = vperm.slane %v10243_v61, 7  ;;  %v11901_v61 = vpop.permute.xlu0 %1995  ;;  %8098 = vmatpush.msk.msrb.mxu1 %vm11751_vm8, %v19610_v15 }
 0x276   : > { %v1614_v3 = vperm.slane %v19715_v41, 6  ;;  %vm19718_vm7 = vcmp.lt.s32.totalorder %v9948_v10, 1  ;;  %vm11897_vm9 = vcmp.eq.s32.totalorder %v3854_v29, 1  ;;  %v2563_v30 = vperm.slane %v19659_v40, 7  ;;  %8137 = vmatpush.msk.msrb.mxu2 %vm11807_vm1, %v11821_v47 }
 0x277   : > { %v11895_v11 = vsel %vm19718_vm7, %v11304_v45, %v11749_v44  ;;  %v3574_v51 = vperm.slane %v10563_v49, 6  ;;  %vm11905_vm6 = vcmp.eq.s32.totalorder %v3277_v8, 32  ;;  %vm19725_vm14 = vnez %v19669_v33  ;;  %v11915_v45 = vpop.permute.xlu2 %1762  ;;  %v19730_v33 = vld [vmem:[#allocation30_spill] sm:$0xff]  ;;  %8099 = vmatpush.msk.msrb.mxu1 %vm11778_vm4, %v19622_v52 }
 0x278   : > { %19719 = vst [vmem:[#allocation29_spill] sm:$0xff] %v11895_v11  ;;  %8112 = vmatpush.msk.msrb.mxu3 %vm19725_vm14, %v19724_v37  ;;  %v4135_v29 = vperm.slane %v10254_v9, 7  ;;  %v1474_v40 = vperm.slane %v19727_v1, 6  ;;  %v19728_v46 = vmov 0   ;;  %v3105_v24 = vand.u32 16, %v11737_v32  ;;  %v19749_v52 = vld [vmem:[#allocation66_spill] sm:$0xff] }
 0x279   : > { %19726 = vst [vmem:[#allocation203_spill] sm:$0xff] %v11915_v45  ;;  %v11922_v8 = vsel %vm11862_vm0, 1, %v19728_v46  ;;  %vm19731_vm7 = vcmask 1043456   ;;  %vm11930_vm3 = vcmp.eq.s32.totalorder %v1851_v56, 1  ;;  %vm11934_vm14 = vcmp.eq.s32.totalorder %v2703_v27, 1  ;;  %2011 = vrot.lane.b32.xlu1 %v19749_v52, %s9093_s10  ;;  %1774 = vrot.lane.b32.xlu2 %v19749_v52, %s9095_s9 }
 0x27a   : > { %19729 = vst [vmem:[#allocation33_spill] sm:$0xff] %v11922_v8  ;;  %8121 = vmatpush.msk.msrb.mxu0 %vm19731_vm7, %v19730_v33  ;;  %v2326_v25 = vperm.slane %v19672_v12, 7  ;;  %v4957_v37 = vand.u32 42, %v11737_v32  ;;  %8113 = vmatpush.msk.msrb.mxu3 %vm11762_vm13, %v11895_v11  ;;  %vm11946_vm8 = vcmp.eq.s32.totalorder %v3714_v6, 1  ;;  %vm11950_vm0 = vcmp.eq.s32.totalorder %v4275_v53, 1  ;;  %v19748_v53 = vld [vmem:[#allocation115_spill] sm:$0xff] }
 0x27b   : > { %vm11954_vm7 = vcmp.eq.s32.totalorder %v1614_v3, 1  ;;  %v11961_v28 = vsel %vm11905_vm6, 1, %v19728_v46  ;;  %vm11969_vm13 = vcmp.eq.s32.totalorder %v2563_v30, 1  ;;  %vm11973_vm1 = vcmp.eq.s32.totalorder %v3574_v51, 1  ;;  %v19754_v51 = vld [vmem:[#allocation206_spill] sm:$0xff]  ;;  %1156 = vrot.lane.b32.xlu0 %v19541_v63, %s9092_s2 }
 0x27c   : > { %19742 = vst [vmem:[#allocation186_spill] sm:$0xff] %v11961_v28  ;;  %8122 = vmatpush.msk.msrb.mxu0 %vm11791_vm15, %v19743_v23  ;;  %v19746_v3 = vmov 0  ;;  %v3436_v60 = vperm.slane %v11922_v8, 0  ;;  %v2965_v6 = vand.u32 36, %v11737_v32  ;;  %8114 = vmatpush.msk.msrb.mxu3 %vm11795_vm2, %v19748_v53  ;;  %vm11984_vm4 = vcmp.eq.s32.totalorder %v4135_v29, 1  ;;  %v19771_v23 = vld [vmem:[#allocation111_spill] sm:$0xff] }
 0x27d   : > { %v19747_v3 = vsel %vm11973_vm1, 4294967295, %v19746_v3  ;;  %v19750_v30 = vmov 0  ;;  %vm11988_vm15 = vcmp.eq.s32.totalorder %v1474_v40, 1  ;;  %v19752_v54 = vmov 0  ;;  %v12039_v63 = vpop.permute.xlu0 %2469 }
 0x27e   : > { %v19751_v30 = vsel %vm11984_vm4, 4294967295, %v19750_v30  ;;  %v19753_v54 = vsel %vm11988_vm15, 4294967295, %v19752_v54  ;;  %v3995_v43 = vperm.slane %v19390_v48, 7  ;;  %v1237_v33 = vperm.slane %v19754_v51, 6  ;;  %8123 = vmatpush.msk.msrb.mxu0 %vm11834_vm11, %v19627_v4  ;;  %8115 = vmatpush.msk.msrb.mxu3 %vm11852_vm10, %v19771_v23  ;;  %v19887_v4 = vld [vmem:[#allocation140_spill] sm:$0xff] }
 0x27f   : > { %vm11994_vm6 = vcmp.eq.s32.totalorder %v3105_v24, 16  ;;  %vm19757_vm2 = vnez %v19692_v58  ;;  %vm12004_vm4 = vcmp.eq.s32.totalorder %v2326_v25, 1  ;;  %v19758_v21 = vmov 0  ;;  %v12024_v58 = vpop.permute.xlu1 %1760  ;;  %v12029_v25 = vld.sshfl [vmem:[#allocation1] sm:$0xff pattern:$0x75316420] }
 0x280   : > { %8100 = vmatpush.msk.msrb.mxu1 %vm19757_vm2, %v19634_v16  ;;  %v19759_v21 = vsel %vm12004_vm4, 4294967295, %v19758_v21  ;;  %v2089_v48 = vperm.slane %v10300_v55, 7  ;;  %v3296_v29 = vperm.slane %v11961_v28, 0  ;;  %vm12010_vm15 = vcmp.eq.s32.totalorder %v4957_v37, 42  ;;  %19764 = vst [vmem:[#allocation189_spill] sm:$0xff] %v12024_v58  ;;  %6145 = vmatmul.f32.vlgmr.msra.gmra.mxu3 %v12029_v25  ;;  %v19785_v24 = vld [vmem:[#allocation211_spill] sm:$0xff] }
 0x281   : > { %vm19762_vm2 = vcmp.lt.s32.totalorder %v9948_v10, 127  ;;  %v3855_v55 = vperm.slane %v19399_v35, 7  ;;  %v1000_v37 = vperm.slane %v19765_v0, 6  ;;  %v4817_v40 = vand.u32 10, %v11737_v32  ;;  %6185 = vmatmul.f32.vlgmr.msra.gmra.mxu2 %v12029_v25  ;;  %2485 = vrot.lane.b32.xlu1 %v19749_v52, %s9096_s18 }
 0x282   : > { %v12018_v16 = vsel %vm19762_vm2, %v11462_v13, %v11615_v26  ;;  %vm19766_vm11 = vnez %v19701_v18  ;;  %vm12035_vm2 = vcmp.eq.s32.totalorder %v3436_v60, 1  ;;  %v19767_v13 = vmov 0  ;;  %v19772_v18 = vld [vmem:[#allocation26_spill] sm:$0xff]  ;;  %v12169_v12 = vld.sshfl [vmem:[#allocation1 + $0x8] sm:$0xff pattern:$0x75316420] }
 0x283   : > { %19763 = vst [vmem:[#allocation170_spill] sm:$0xff] %v12018_v16  ;;  %8138 = vmatpush.msk.msrb.mxu2 %vm19766_vm11, %v12018_v16  ;;  %v19768_v13 = vsel %vm12035_vm2, 4294967295, %v19767_v13  ;;  %v1852_v35 = vperm.slane %v19708_v14, 7  ;;  %v12045_v5 = vsel %vm11994_vm6, 1, %v19728_v46  ;;  %vm12047_vm4 = vcmp.eq.s32.totalorder %v2965_v6, 36  ;;  %v19861_v60 = vld [vmem:[#allocation163_spill] sm:$0xff] }
 0x284   : > { %vm19773_vm11 = vnez %v19707_v22  ;;  %vm12057_vm2 = vcmp.eq.s32.totalorder %v3995_v43, 1  ;;  %vm12061_vm1 = vcmp.eq.s32.totalorder %v1237_v33, 1  ;;  %v3715_v45 = vperm.slane %v10461_v50, 7  ;;  %v19780_v43 = vld [vmem:[#allocation50_spill] sm:$0xff]  ;;  %19815 = vst [vmem:[#allocation195_spill] sm:$0xff] %v12169_v12  ;;  %v19869_v33 = vld [vmem:[#allocation80_spill] sm:$0xff] }
 0x285   : > { %8101 = vmatpush.msk.msrb.mxu1 %vm19773_vm11, %v19772_v18  ;;  %v12069_v6 = vsel %vm12010_vm15, 1, %v19728_v46  ;;  %v2825_v57 = vand.u32 4, %v11737_v32  ;;  %v4677_v22 = vand.u32 26, %v11737_v32  ;;  %v19779_v18 = vld [vmem:[#allocation87_spill] sm:$0xff]  ;;  %8139 = vmatpush.msk.msrb.mxu2 %vm11878_vm12, %v19780_v43  ;;  %vm12079_vm10 = vcmp.eq.s32.totalorder %v2089_v48, 1  ;;  %v19789_v48 = vld [vmem:[#allocation168_spill] sm:$0xff]  ;;  %v12102_v43 = vpop.permute.xlu2 %1764 }
 0x286   : > { %19778 = vst [vmem:[#allocation176_spill] sm:$0xff] %v12069_v6  ;;  %8124 = vmatpush.msk.msrb.mxu0 %vm11872_vm5, %v19779_v18  ;;  %vm12083_vm6 = vcmp.eq.s32.totalorder %v3296_v29, 1  ;;  %v763_v15 = vperm.slane %v19785_v24, 6  ;;  %v1615_v16 = vperm.slane %v19715_v41, 7  ;;  %v2685_v23 = vand.u32 20, %v11737_v32  ;;  %8116 = vmatpush.msk.msrb.mxu3 %vm11897_vm9, %v19789_v48  ;;  %v19790_v29 = vld [vmem:[#allocation152_spill] sm:$0xff] }
 0x287   : > { %vm19787_vm5 = vcmp.lt.s32.totalorder %v9948_v10, 1  ;;  %8102 = vmatpush.msk.msrb.mxu1 %vm11930_vm3, %v19790_v29  ;;  %19791 = vst [vmem:[#allocation154_spill] sm:$0xff] %v12102_v43  ;;  %vm12104_vm12 = vcmp.eq.s32.totalorder %v3855_v55, 1  ;;  %vm12108_vm15 = vcmp.eq.s32.totalorder %v1000_v37, 1  ;;  %v12116_v17 = vsel %vm12047_vm4, 1, %v19728_v46  ;;  %v19798_v29 = vld [vmem:[#allocation197_spill] sm:$0xff] }
 0x288   : > { %v12094_v36 = vsel %vm19787_vm5, %v11749_v44, %v19786_v31  ;;  %v3124_v44 = vperm.slane %v12045_v5, 0  ;;  %vm12118_vm9 = vcmp.eq.s32.totalorder %v4817_v40, 10  ;;  %vm19799_vm3 = vcmp.lt.s32.totalorder %v9948_v10, 112  ;;  %v19801_v37 = vld [vmem:[#allocation167_spill] sm:$0xff]  ;;  %v19804_v48 = vld [vmem:[#allocation137_spill] sm:$0xff] }
 0x289   : > { %19788 = vst [vmem:[#allocation31_spill] sm:$0xff] %v12094_v36  ;;  %v12126_v55 = vsel %vm19799_vm3, %v11731_v39, %v19798_v29  ;;  %vm19802_vm11 = vmmov %vm19799_vm3  ;;  %8125 = vmatpush.msk.msrb.mxu0 %vm11934_vm14, %v19804_v48  ;;  %8140 = vmatpush.msk.msrb.mxu2 %vm11950_vm0, %v12094_v36  ;;  %vm12140_vm4 = vcmp.eq.s32.totalorder %v1852_v35, 1  ;;  %v3575_v39 = vperm.slane %v10563_v49, 7  ;;  %v4976_v40 = vperm.slane %v12069_v6, 0  ;;  %v19807_v31 = vld [vmem:[#allocation105_spill] sm:$0xff]  ;;  %v19870_v50 = vld [vmem:[#allocation151_spill] sm:$0xff] }
 0x28a   : > { %19800 = vst [vmem:[#allocation190_spill] sm:$0xff] %v12126_v55  ;;  %v12132_v43 = vsel %vm19802_vm11, %v19798_v29, %v19801_v37  ;;  %8117 = vmatpush.msk.msrb.mxu3 %vm11946_vm8, %v19807_v31  ;;  %v19808_v29 = vld [vmem:[#allocation25_spill] sm:$0xff]  ;;  %vm12152_vm14 = vcmp.eq.s32.totalorder %v3715_v45, 1  ;;  %v1475_v56 = vperm.slane %v19727_v1, 7  ;;  %vm12157_vm0 = vcmp.eq.s32.totalorder %v2825_v57, 4  ;;  %v19828_v37 = vld [vmem:[#allocation139_spill] sm:$0xff] }
 0x28b   : > { %19803 = vst [vmem:[#allocation161_spill] sm:$0xff] %v12132_v43  ;;  %8103 = vmatpush.msk.msrb.mxu1 %vm11954_vm7, %v19808_v29  ;;  %vm12161_vm5 = vcmp.eq.s32.totalorder %v4677_v22, 26  ;;  %v4537_v62 = vand.u32 34, %v11737_v32  ;;  %8126 = vmatpush.msk.msrb.mxu0 %vm11969_vm13, %v19675_v59  ;;  %vm19816_vm8 = vcmask 719872   ;;  %v2984_v1 = vperm.slane %v12116_v17, 0  ;;  %v19820_v59 = vld [vmem:[#allocation23_spill] sm:$0xff] }
 0x28c   : > { %7894 = vmatmul.msk.f32.vlgmr.msra.gmra.mxu1 %vm19816_vm8, %v12169_v12  ;;  %v3437_v45 = vperm.slane %v11922_v8, 1  ;;  %v12178_v57 = vsel %vm12118_vm9, 1, %v19728_v46  ;;  %vm12180_vm7 = vcmp.eq.s32.totalorder %v2685_v23, 20  ;;  %vm19821_vm13 = vnez %v19747_v3  ;;  %v12200_v23 = vpop.permute.xlu1 %1379  ;;  %v19857_v43 = vld [vmem:[#allocation86_spill] sm:$0xff]  ;;  %v19877_v18 = vld [vmem:[#allocation37_spill] sm:$0xff]  ;;  %v19932_v14 = vld [vmem:[#allocation111_spill] sm:$0xff] }
 0x28d   : > { %19817 = vst [vmem:[#allocation147_spill] sm:$0xff] %v12178_v57  ;;  %8118 = vmatpush.msk.msrb.mxu3 %vm19821_vm13, %v19820_v59  ;;  %vm12188_vm3 = vcmp.eq.s32.totalorder %v763_v15, 1  ;;  %v19822_v27 = vmov 0  ;;  %vm12192_vm11 = vcmp.eq.s32.totalorder %v1615_v16, 1  ;;  %v19824_v29 = vmov 0  ;;  %v19830_v15 = vld [vmem:[#allocation159_spill] sm:$0xff]  ;;  %v12321_v35 = vpop.permute.xlu2 %1383 }
 0x28e   : > { %v19823_v27 = vsel %vm12188_vm3, 4294967295, %v19822_v27  ;;  %v19825_v29 = vsel %vm12192_vm11, 4294967295, %v19824_v29  ;;  %vm12196_vm9 = vcmp.eq.s32.totalorder %v3124_v44, 1  ;;  %v2545_v48 = vand.u32 41, %v11737_v32  ;;  %19866 = vst [vmem:[#allocation26_spill] sm:$0xff] %v12321_v35  ;;  %v19975_v3 = vld [vmem:[#allocation139_spill] sm:$0xff] }
 0x28f   : > { %vm19829_vm8 = vnez %v19751_v30  ;;  %vm19831_vm13 = vnez %v19753_v54  ;;  %vm12209_vm3 = vcmp.eq.s32.totalorder %v3575_v39, 1  ;;  %vm12213_vm11 = vcmp.eq.s32.totalorder %v4976_v40, 1  ;;  %v12228_v54 = vpop.permute.xlu0 %2471 }
 0x290   : > { %8141 = vmatpush.msk.msrb.mxu2 %vm19829_vm8, %v19828_v37  ;;  %8104 = vmatpush.msk.msrb.mxu1 %vm19831_vm13, %v19830_v15  ;;  %v19834_v16 = vmov 0  ;;  %v1238_v44 = vperm.slane %v19754_v51, 7  ;;  %v12221_v8 = vsel %vm12157_vm0, 1, %v19728_v46  ;;  %v12226_v30 = vsel %vm12161_vm5, 1, %v19728_v46  ;;  %v19858_v37 = vld [vmem:[#allocation165_spill] sm:$0xff] }
 0x291   : > { %v19835_v16 = vsel %vm12213_vm11, 4294967295, %v19834_v16  ;;  %19836 = vst [vmem:[#allocation188_spill] sm:$0xff] %v12221_v8  ;;  %vm19838_vm8 = vnez %v19759_v21  ;;  %vm19839_vm13 = vnez %v19768_v13  ;;  %vm12236_vm11 = vcmp.eq.s32.totalorder %v1475_v56, 1  ;;  %v19846_v13 = vld [vmem:[#allocation65_spill] sm:$0xff] }
 0x292   : > { %19837 = vst [vmem:[#allocation193_spill] sm:$0xff] %v12226_v30  ;;  %8127 = vmatpush.msk.msrb.mxu0 %vm19838_vm8, %v19683_v20  ;;  %8146 = vmatpush.msk.msra.mxu3 %vm19839_vm13, %v11494_v34  ;;  %v4836_v39 = vperm.slane %v12178_v57, 0  ;;  %v12244_v40 = vsel %vm12180_vm7, 1, %v19728_v46  ;;  %vm12246_vm0 = vcmp.eq.s32.totalorder %v4537_v62, 34  ;;  %v4397_v20 = vand.u32 2, %v11737_v32  ;;  %v19854_v34 = vld [vmem:[#allocation222_spill] sm:$0xff] }
 0x293   : > { %vm19844_vm5 = vcmp.lt.s32.totalorder %v9948_v10, 127  ;;  %1776 = vrot.lane.b32.xlu2 %v19846_v13, %s9095_s9  ;;  %vm12261_vm7 = vcmp.eq.s32.totalorder %v2984_v1, 1  ;;  %vm12265_vm8 = vcmp.eq.s32.totalorder %v3437_v45, 1  ;;  %v19849_v49 = vmov 0  ;;  %2013 = vrot.lane.b32.xlu0 %v19846_v13, %s9093_s10 }
 0x294   : > { %v12255_v21 = vsel %vm19844_vm5, %v11615_v26, %v11876_v42  ;;  %v19850_v49 = vsel %vm12265_vm8, 4294967295, %v19849_v49  ;;  %v3297_v62 = vperm.slane %v11961_v28, 1  ;;  %v2308_v22 = vand.u32 9, %v11737_v32  ;;  %8142 = vmatpush.msk.msrb.mxu2 %vm12057_vm2, %v19857_v43  ;;  %8105 = vmatpush.msk.msrb.mxu1 %vm12061_vm1, %v19858_v37 }
 0x295   : > { %19845 = vst [vmem:[#allocation196_spill] sm:$0xff] %v12255_v21  ;;  %vm19851_vm13 = vcmask 719872   ;;  %v2844_v26 = vperm.slane %v12221_v8, 0  ;;  %v4696_v1 = vperm.slane %v12226_v30, 0  ;;  %v1001_v15 = vperm.slane %v19765_v0, 7  ;;  %8128 = vmatpush.msk.msrb.mxu0 %vm12079_vm10, %v19861_v60  ;;  %8147 = vmatpush.msk.msra.mxu3 %vm12083_vm6, %v11827_v38  ;;  %v19876_v60 = vld [vmem:[#allocation184_spill] sm:$0xff]  ;;  %v12367_v38 = vpop.permute.xlu1 %1999 }
 0x296   : > { %7896 = vmatmul.msk.f32.vlgmr.msrb.gmra.mxu3 %vm19851_vm13, %v12169_v12  ;;  %vm12278_vm5 = vcmp.eq.s32.totalorder %v2545_v48, 41  ;;  %vm19855_vm8 = vcmp.lt.s32.totalorder %v9948_v10, 113  ;;  %v2704_v0 = vperm.slane %v12244_v40, 0  ;;  %v12298_v48 = vsel %vm12246_vm0, 1, %v19728_v46  ;;  %8143 = vmatpush.msk.msrb.mxu2 %vm12104_vm12, %v19869_v33  ;;  %19885 = vst [vmem:[#allocation152_spill] sm:$0xff] %v12367_v38 }
 0x297   : > { %v12286_v28 = vsel %vm19855_vm8, %v11901_v61, %v19854_v34  ;;  %19859 = vst [vmem:[#allocation206_spill] sm:$0xff] %v12298_v48  ;;  %v4257_v59 = vand.u32 18, %v11737_v32  ;;  %v12305_v34 = vsel %vm19855_vm8, %v11444_v7, %v11901_v61  ;;  %vm12313_vm1 = vcmp.eq.s32.totalorder %v4836_v39, 1  ;;  %8106 = vmatpush.msk.msrb.mxu1 %vm12108_vm15, %v19870_v50  ;;  %8129 = vmatpush.msk.msrb.mxu0 %vm12140_vm4, %v19876_v60  ;;  %v19896_v61 = vld [vmem:[#allocation32_spill] sm:$0xff] }
 0x298   : > { %19856 = vst [vmem:[#allocation30_spill] sm:$0xff] %v12286_v28  ;;  %vm12317_vm2 = vcmp.eq.s32.totalorder %v1238_v44, 1  ;;  %v764_v7 = vperm.slane %v19785_v24, 7  ;;  %vm12324_vm0 = vcmp.eq.s32.totalorder %v4397_v20, 2  ;;  %vm12334_vm10 = vcmp.eq.s32.totalorder %v3297_v62, 1  ;;  %8144 = vmatpush.msk.msrb.mxu2 %vm12152_vm14, %v19887_v4  ;;  %2487 = vrot.lane.b32.xlu1 %v19846_v13, %s9096_s18  ;;  %v19942_v62 = vld [vmem:[#allocation170_spill] sm:$0xff] }
 0x299   : > { %19860 = vst [vmem:[#allocation208_spill] sm:$0xff] %v12305_v34  ;;  %v12341_v24 = vsel %vm12278_vm5, 1, %v19728_v46  ;;  %v3125_v39 = vperm.slane %v12045_v5, 1  ;;  %vm12344_vm6 = vcmp.eq.s32.totalorder %v2308_v22, 9  ;;  %v2071_v41 = vand.u32 25, %v11737_v32  ;;  %v20009_v22 = vld [vmem:[#allocation182_spill] sm:$0xff] }
 0x29a   : > { %19873 = vst [vmem:[#allocation211_spill] sm:$0xff] %v12341_v24  ;;  %vm19878_vm12 = vcmask 1043456   ;;  %vm12354_vm15 = vcmp.eq.s32.totalorder %v2844_v26, 1  ;;  %vm12358_vm13 = vcmp.eq.s32.totalorder %v4696_v1, 1  ;;  %vm12362_vm5 = vcmp.eq.s32.totalorder %v1001_v15, 1 }
 0x29b   : > { %8148 = vmatpush.msk.msra.mxu3 %vm19878_vm12, %v19877_v18  ;;  %v4556_v50 = vperm.slane %v12298_v48, 0  ;;  %vm19886_vm4 = vcmask 719872   ;;  %vm12374_vm8 = vcmp.eq.s32.totalorder %v2704_v0, 1  ;;  %v19888_v26 = vmov 0  ;;  %v12388_v18 = vpop.permute.xlu0 %1381  ;;  %v19894_v0 = vld [vmem:[#allocation183_spill] sm:$0xff]  ;;  %1395 = vrot.lane.b32.xlu2 %v19588_v19, %s9094_s8 }
 0x29c   : > { %7895 = vmatmul.msk.f32.vlgmr.msra.gmra.mxu0 %vm19886_vm4, %v12169_v12  ;;  %v19889_v26 = vsel %vm12374_vm8, 4294967295, %v19888_v26  ;;  %v12381_v1 = vsel %vm12324_vm0, 1, %v19728_v46  ;;  %v4977_v15 = vperm.slane %v12069_v6, 1  ;;  %vm12384_vm12 = vcmp.eq.s32.totalorder %v4257_v59, 18  ;;  %2248 = vrot.lane.b32.xlu0 %v19749_v52, %s9097_s15  ;;  %v20037_v59 = vld [vmem:[#allocation143_spill] sm:$0xff] }
 0x29d   : > { %vm19892_vm14 = vcmp.lt.s32.totalorder %v9948_v10, 127  ;;  %vm19895_vm4 = vnez %v19823_v27  ;;  %vm19897_vm0 = vnez %v19825_v29  ;;  %vm12402_vm8 = vcmp.eq.s32.totalorder %v764_v7, 1  ;;  %v19900_v27 = vld [vmem:[#allocation141_spill] sm:$0xff]  ;;  %8149 = vmatpush.msk.msra.mxu3 %vm12196_vm9, %v11895_v11  ;;  %v12538_v37 = vpop.permute.xlu1 %2473 }
 0x29e   : > { %v12394_v9 = vsel %vm19892_vm14, %v11876_v42, %v12024_v58  ;;  %8107 = vmatpush.msk.msrb.mxu1 %vm19895_vm4, %v19894_v0  ;;  %8130 = vmatpush.msk.msrb.mxu0 %vm19897_vm0, %v19896_v61  ;;  %v2564_v35 = vperm.slane %v12341_v24, 0  ;;  %v12410_v38 = vsel %vm12344_vm6, 1, %v19728_v46  ;;  %v2985_v42 = vperm.slane %v12116_v17, 1  ;;  %v19912_v58 = vld [vmem:[#allocation102_spill] sm:$0xff] }
 0x29f   : > { %19893 = vst [vmem:[#allocation197_spill] sm:$0xff] %v12394_v9  ;;  %vm19901_vm14 = vcmp.lt.s32.totalorder %v9948_v10, 111  ;;  %6225 = vmatmul.f32.vlgmr.msrb.gmra.mxu1 %v12029_v25  ;;  %vm12423_vm4 = vcmp.eq.s32.totalorder %v3125_v39, 1  ;;  %vm12427_vm6 = vcmp.eq.s32.totalorder %v2071_v41, 25  ;;  %v4117_v20 = vand.u32 38, %v11737_v32  ;;  %8150 = vmatpush.msk.msra.mxu3 %vm12261_vm7, %v19748_v53 }
 0x2a0   : > { %v12417_v0 = vsel %vm19901_vm14, %v19900_v27, %v12039_v63  ;;  %v1834_v61 = vand.u32 33, %v11737_v32  ;;  %v19907_v27 = vld [vmem:[#allocation24_spill] sm:$0xff]  ;;  %vm19908_vm9 = vnez %v19835_v16  ;;  %vm12439_vm0 = vcmp.eq.s32.totalorder %v4556_v50, 1  ;;  %8131 = vmatpush.msk.msrb.mxu0 %vm12236_vm11, %v19912_v58  ;;  %1158 = vrot.lane.b32.xlu1 %v19588_v19, %s9092_s2 }
 0x2a1   : > { %19902 = vst [vmem:[#allocation105_spill] sm:$0xff] %v12417_v0  ;;  %8145 = vmatpush.msk.msrb.mxu2 %vm12209_vm3, %v19907_v27  ;;  %8162 = vmatpush.msk.msra.mxu1 %vm19908_vm9, %v12417_v0  ;;  %v4416_v39 = vperm.slane %v12381_v1, 0  ;;  %v12447_v41 = vsel %vm12384_vm12, 1, %v19728_v46  ;;  %v4837_v11 = vperm.slane %v12178_v57, 1  ;;  %vm12456_vm3 = vcmp.eq.s32.totalorder %v4977_v15, 1 }
 0x2a2   : > { %19911 = vst [vmem:[#allocation25_spill] sm:$0xff] %v12447_v41  ;;  %v2327_v16 = vperm.slane %v12410_v38, 0  ;;  %v2845_v50 = vperm.slane %v12221_v8, 1  ;;  %v3977_v60 = vand.u32 6, %v11737_v32  ;;  %vm19915_vm12 = vnez %v19850_v49  ;;  %v19931_v8 = vld [vmem:[#allocation90_spill] sm:$0xff]  ;;  %8151 = vmatpush.msk.msra.mxu3 %vm12354_vm15, %v19932_v14  ;;  %v19956_v14 = vld [vmem:[#allocation39_spill] sm:$0xff] }
 0x2a3   : > { %8173 = vmatpush.msk.msra.mxu2 %vm19915_vm12, %v11821_v47  ;;  %vm12468_vm11 = vcmp.eq.s32.totalorder %v2564_v35, 1  ;;  %vm12472_vm7 = vcmp.eq.s32.totalorder %v2985_v42, 1  ;;  %v19918_v51 = vmov 0  ;;  %v12479_v56 = vsel %vm12427_vm6, 1, %v19728_v46  ;;  %8163 = vmatpush.msk.msra.mxu1 %vm12313_vm1, %v12126_v55  ;;  %v12566_v45 = vpop.permute.xlu0 %2001  ;;  %v19974_v47 = vld [vmem:[#allocation23_spill] sm:$0xff]  ;;  %v19991_v35 = vld [vmem:[#allocation162_spill] sm:$0xff] }
 0x2a4   : > { %v19919_v51 = vsel %vm12472_vm7, 4294967295, %v19918_v51  ;;  %19920 = vst [vmem:[#allocation159_spill] sm:$0xff] %v12479_v56  ;;  %v1597_v15 = vand.u32 1, %v11737_v32  ;;  %v4276_v49 = vperm.slane %v12447_v41, 0  ;;  %vm12487_vm14 = vcmp.eq.s32.totalorder %v4117_v20, 38  ;;  %8132 = vmatpush.msk.msrb.mxu0 %vm12317_vm2, %v19931_v8  ;;  %1397 = vrot.lane.b32.xlu2 %v19749_v52, %s9094_s8 }
 0x2a5   : > { %vm12491_vm9 = vcmp.eq.s32.totalorder %v1834_v61, 33  ;;  %v3837_v7 = vand.u32 22, %v11737_v32  ;;  %vm19925_vm6 = vcmask 719872   ;;  %vm12501_vm12 = vcmp.eq.s32.totalorder %v4416_v39, 1  ;;  %v12509_v61 = vpop.permute.xlu2 %2003  ;;  %v19933_v39 = vld [vmem:[#allocation166_spill] sm:$0xff]  ;;  %8174 = vmatpush.msk.msra.mxu2 %vm12334_vm10, %v19942_v62  ;;  %8164 = vmatpush.msk.msra.mxu1 %vm12358_vm13, %v12305_v34  ;;  %19948 = vst [vmem:[#allocation37_spill] sm:$0xff] %v12566_v45 }
 0x2a6   : > { %7897 = vmatmul.msk.f32.vlgmr.msrb.gmra.mxu2 %vm19925_vm6, %v12169_v12  ;;  %vm12505_vm7 = vcmp.eq.s32.totalorder %v4837_v11, 1  ;;  %v19928_v20 = vmov 0  ;;  %19930 = vst [vmem:[#allocation165_spill] sm:$0xff] %v12509_v61  ;;  %v4697_v53 = vperm.slane %v12226_v30, 1  ;;  %v1457_v0 = vand.u32 17, %v11737_v32  ;;  %2250 = vrot.lane.b32.xlu0 %v19846_v13, %s9097_s15  ;;  %v20038_v45 = vld [vmem:[#allocation135_spill] sm:$0xff] }
 0x2a7   : > { %v19929_v20 = vsel %vm12505_vm7, 4294967295, %v19928_v20  ;;  %vm19934_vm1 = vcmp.lt.s32.totalorder %v9948_v10, 1  ;;  %vm12525_vm6 = vcmp.eq.s32.totalorder %v2327_v16, 1  ;;  %v2090_v55 = vperm.slane %v12479_v56, 0  ;;  %8165 = vmatpush.msk.msra.mxu1 %vm12439_vm0, %v12255_v21  ;;  %v20041_v12 = vld [vmem:[#allocation199_spill] sm:$0xff] }
 0x2a8   : > { %v12523_v11 = vsel %vm19934_vm1, %v19933_v39, %v12200_v23  ;;  %vm12530_vm7 = vcmp.eq.s32.totalorder %v2845_v50, 1  ;;  %vm12534_vm2 = vcmp.eq.s32.totalorder %v3977_v60, 6  ;;  %vm19943_vm15 = vcmp.lt.s32.totalorder %v9948_v10, 111  ;;  %v19949_v39 = vld [vmem:[#allocation81_spill] sm:$0xff] }
 0x2a9   : > { %19935 = vst [vmem:[#allocation163_spill] sm:$0xff] %v12523_v11  ;;  %v12550_v16 = vsel %vm19943_vm15, %v12039_v63, %v12228_v54  ;;  %v12555_v50 = vsel %vm12487_vm14, 1, %v19728_v46  ;;  %v12560_v44 = vsel %vm12491_vm9, 1, %v19728_v46  ;;  %vm12562_vm10 = vcmp.eq.s32.totalorder %v1597_v15, 1  ;;  %8133 = vmatpush.msk.msrb.mxu0 %vm12362_vm5, %v19949_v39  ;;  %v19950_v63 = vld [vmem:[#allocation168_spill] sm:$0xff]  ;;  %v19968_v39 = vld [vmem:[#allocation49_spill] sm:$0xff] }
 0x2aa   : > { %19944 = vst [vmem:[#allocation151_spill] sm:$0xff] %v12550_v16  ;;  %vm19951_vm13 = vnez %v19889_v26  ;;  %vm12574_vm14 = vcmp.eq.s32.totalorder %v4276_v49, 1  ;;  %v2705_v42 = vperm.slane %v12244_v40, 1  ;;  %vm12579_vm9 = vcmp.eq.s32.totalorder %v3837_v7, 22  ;;  %8166 = vmatpush.msk.msra.mxu1 %vm12501_vm12, %v19968_v39 }
 0x2ab   : > { %19945 = vst [vmem:[#allocation184_spill] sm:$0xff] %v12555_v50  ;;  %8152 = vmatpush.msk.msra.mxu3 %vm19951_vm13, %v19950_v63  ;;  %v3697_v62 = vand.u32 40, %v11737_v32  ;;  %vm19957_vm1 = vcmask 1043456   ;;  %vm12589_vm5 = vcmp.eq.s32.totalorder %v4697_v53, 1  ;;  %v12596_v26 = vsel %vm12534_vm2, 1, %v19728_v46  ;;  %v20012_v63 = vld [vmem:[#allocation112_spill] sm:$0xff] }
 0x2ac   : > { %8175 = vmatpush.msk.msra.mxu2 %vm19957_vm1, %v19956_v14  ;;  %19960 = vst [vmem:[#allocation140_spill] sm:$0xff] %v12596_v26  ;;  %vm12598_vm15 = vcmp.eq.s32.totalorder %v1457_v0, 17  ;;  %v1220_v7 = vand.u32 37, %v11737_v32  ;;  %v19963_v14 = vld [vmem:[#allocation146_spill] sm:$0xff]  ;;  %v4136_v53 = vperm.slane %v12555_v50, 0  ;;  %v1853_v2 = vperm.slane %v12560_v44, 0  ;;  %8167 = vmatpush.msk.msra.mxu1 %vm12574_vm14, %v12523_v11 }
 0x2ad   : > { %8134 = vmatpush.msk.msrb.mxu0 %vm12402_vm8, %v19963_v14  ;;  %8153 = vmatpush.msk.msra.mxu3 %vm12468_vm11, %v19807_v31  ;;  %v12614_v0 = vsel %vm12562_vm10, 1, %v19728_v46  ;;  %v3557_v8 = vand.u32 8, %v11737_v32  ;;  %vm12621_vm8 = vcmp.eq.s32.totalorder %v2090_v55, 1  ;;  %v4557_v31 = vperm.slane %v12298_v48, 1  ;;  %v12696_v19 = vpop.permute.xlu2 %2477  ;;  %v20013_v14 = vld [vmem:[#allocation47_spill] sm:$0xff] }
 0x2ae   : > { %19964 = vst [vmem:[#allocation183_spill] sm:$0xff] %v12614_v0  ;;  %8176 = vmatpush.msk.msra.mxu2 %vm12423_vm4, %v12094_v36  ;;  %6265 = vmatmul.f32.vlgmr.msrb.gmra.mxu0 %v12029_v25  ;;  %v12629_v58 = vsel %vm12579_vm9, 1, %v19728_v46  ;;  %v983_v60 = vand.u32 5, %v11737_v32  ;;  %vm12638_vm4 = vcmp.eq.s32.totalorder %v2705_v42, 1  ;;  %v3996_v29 = vperm.slane %v12596_v26, 0  ;;  %v19989_v36 = vld [vmem:[#allocation161_spill] sm:$0xff] }
 0x2af   : > { %19967 = vst [vmem:[#allocation32_spill] sm:$0xff] %v12629_v58  ;;  %8189 = vmatpush.msk.msra.mxu0 %vm12456_vm3, %v12550_v16  ;;  %v12646_v15 = vsel %vm12598_vm15, 1, %v19728_v46  ;;  %vm12648_vm0 = vcmp.eq.s32.totalorder %v3697_v62, 40  ;;  %8154 = vmatpush.msk.msra.mxu3 %vm12525_vm6, %v19974_v47  ;;  %vm19976_vm3 = vnez %v19919_v51  ;;  %v1616_v42 = vperm.slane %v12614_v0, 0  ;;  %v12702_v16 = vpop.permute.xlu0 %2236 }
 0x2b0   : > { %19971 = vst [vmem:[#allocation141_spill] sm:$0xff] %v12646_v15  ;;  %8177 = vmatpush.msk.msra.mxu2 %vm19976_vm3, %v19975_v3  ;;  %v2565_v39 = vperm.slane %v12341_v24, 1  ;;  %vm12660_vm11 = vcmp.eq.s32.totalorder %v1220_v7, 37  ;;  %v746_v62 = vand.u32 21, %v11737_v32  ;;  %vm12669_vm12 = vcmp.eq.s32.totalorder %v4136_v53, 1  ;;  %v12682_v32 = vpop.permute.xlu1 %2475  ;;  %v20010_v3 = vld [vmem:[#allocation45_spill] sm:$0xff]  ;;  %1160 = vrot.lane.b32.xlu0 %v19749_v52, %s9092_s2 }
 0x2b1   : > { %vm12673_vm6 = vcmp.eq.s32.totalorder %v1853_v2, 1  ;;  %v3856_v7 = vperm.slane %v12629_v58, 0  ;;  %vm12678_vm2 = vcmp.eq.s32.totalorder %v3557_v8, 8  ;;  %v4417_v53 = vperm.slane %v12381_v1, 1  ;;  %19986 = vst [vmem:[#allocation102_spill] sm:$0xff] %v12696_v19  ;;  %8155 = vmatpush.msk.msra.mxu3 %vm12621_vm8, %v19991_v35 }
 0x2b2   : > { %v1476_v2 = vperm.slane %v12646_v15, 0  ;;  %v12694_v8 = vsel %vm12648_vm0, 1, %v19728_v46  ;;  %vm12698_vm10 = vcmp.eq.s32.totalorder %v983_v60, 5  ;;  %vm19990_vm13 = vnez %v19929_v20  ;;  %8178 = vmatpush.msk.msra.mxu2 %vm12530_vm7, %v19857_v43  ;;  %v19997_v20 = vld [vmem:[#allocation187_spill] sm:$0xff] }
 0x2b3   : > { %19985 = vst [vmem:[#allocation24_spill] sm:$0xff] %v12694_v8  ;;  %8190 = vmatpush.msk.msra.mxu0 %vm19990_vm13, %v19989_v36  ;;  %vm12710_vm14 = vcmp.eq.s32.totalorder %v3996_v29, 1  ;;  %vm12714_vm9 = vcmp.eq.s32.totalorder %v4557_v31, 1  ;;  %v2328_v60 = vperm.slane %v12410_v38, 1  ;;  %v12722_v19 = vsel %vm12660_vm11, 1, %v19728_v46  ;;  %8168 = vmatpush.msk.msra.mxu1 %vm12669_vm12, %v19997_v20  ;;  %v20035_v36 = vld [vmem:[#allocation108_spill] sm:$0xff] }
 0x2b4   : > { %19996 = vst [vmem:[#allocation90_spill] sm:$0xff] %v12722_v19  ;;  %vm12730_vm1 = vcmp.eq.s32.totalorder %v1616_v42, 1  ;;  %vm12734_vm15 = vcmp.eq.s32.totalorder %v2565_v39, 1  ;;  %v12741_v29 = vsel %vm12678_vm2, 1, %v19728_v46  ;;  %vm12743_vm8 = vcmp.eq.s32.totalorder %v746_v62, 21  ;;  %v20005_v42 = vld [vmem:[#allocation138_spill] sm:$0xff]  ;;  %8179 = vmatpush.msk.msra.mxu2 %vm12638_vm4, %v19869_v33 }
 0x2b5   : > { %20002 = vst [vmem:[#allocation166_spill] sm:$0xff] %v12741_v29  ;;  %8191 = vmatpush.msk.msra.mxu0 %vm12589_vm5, %v12286_v28  ;;  %8156 = vmatpush.msk.msra.mxu3 %vm12673_vm6, %v20005_v42  ;;  %vm12753_vm7 = vcmp.eq.s32.totalorder %v3856_v7, 1  ;;  %v3716_v49 = vperm.slane %v12694_v8, 0  ;;  %v4277_v61 = vperm.slane %v12447_v41, 1  ;;  %v12762_v62 = vsel %vm12698_vm10, 1, %v19728_v46  ;;  %v20020_v39 = vld [vmem:[#allocation70_spill] sm:$0xff]  ;;  %v12849_v52 = vpop.permute.xlu2 %2479 }
 0x2b6   : > { %20008 = vst [vmem:[#allocation81_spill] sm:$0xff] %v12762_v62  ;;  %8169 = vmatpush.msk.msra.mxu1 %vm12710_vm14, %v20009_v22  ;;  %vm4449_vm5 = vcmp.eq.s32.totalorder %v4417_v53, 1  ;;  %vm1508_vm0 = vcmp.eq.s32.totalorder %v1476_v2, 1  ;;  %v1239_v51 = vperm.slane %v12722_v19, 0  ;;  %v2091_v7 = vperm.slane %v12479_v56, 1  ;;  %8180 = vmatpush.msk.msra.mxu2 %vm12734_vm15, %v19887_v4  ;;  %v20019_v4 = vld [vmem:[#allocation33_spill] sm:$0xff] }
 0x2b7   : > { %8192 = vmatpush.msk.msra.mxu0 %vm12714_vm9, %v12394_v9  ;;  %8157 = vmatpush.msk.msra.mxu3 %vm12730_vm1, %v20010_v3  ;;  %vm2360_vm3 = vcmp.eq.s32.totalorder %v2328_v60, 1  ;;  %v3576_v55 = vperm.slane %v12741_v29, 0  ;;  %v4137_v47 = vperm.slane %v12555_v50, 1  ;;  %v12783_v53 = vsel %vm12743_vm8, 1, %v19728_v46  ;;  %v20014_v60 = vld [vmem:[#allocation150_spill] sm:$0xff]  ;;  %v12839_v43 = vpop.permute.xlu0 %2238  ;;  %20034 = vst [vmem:[#allocation162_spill] sm:$0xff] %v12849_v52 }
 0x2b8   : > { %20011 = vst [vmem:[#allocation39_spill] sm:$0xff] %v12783_v53  ;;  %8170 = vmatpush.msk.msra.mxu1 %vm12753_vm7, %v20012_v63  ;;  %v1002_v2 = vperm.slane %v12762_v62, 0  ;;  %v1854_v35 = vperm.slane %v12560_v44, 1  ;;  %vm12795_vm4 = vcmp.eq.s32.totalorder %v3716_v49, 1  ;;  %vm12799_vm11 = vcmp.eq.s32.totalorder %v4277_v61, 1  ;;  %8181 = vmatpush.msk.msra.mxu2 %vm2360_vm3, %v19907_v27  ;;  %v12818_v46 = vpop.permute.xlu1 %1385  ;;  %v20045_v3 = vld [vmem:[#allocation118_spill] sm:$0xff] }
 0x2b9   : > { %8193 = vmatpush.msk.msra.mxu0 %vm4449_vm5, %v20013_v14  ;;  %8158 = vmatpush.msk.msra.mxu3 %vm1508_vm0, %v20014_v60  ;;  %v3438_v31 = vperm.slane %v20019_v4, 2  ;;  %v3997_v42 = vperm.slane %v12596_v26, 1  ;;  %vm12808_vm12 = vcmp.eq.s32.totalorder %v1239_v51, 1  ;;  %vm12812_vm6 = vcmp.eq.s32.totalorder %v2091_v7, 1  ;;  %20025 = vst [vmem:[#allocation146_spill] sm:$0xff] %v12818_v46  ;;  %v20032_v14 = vld [vmem:[#allocation186_spill] sm:$0xff] }
 0x2ba   : > { %2015 = vrot.lane.b32.xlu1 %v20020_v39, %s9093_s10  ;;  %v765_v61 = vperm.slane %v12783_v53, 0  ;;  %v1617_v60 = vperm.slane %v12614_v0, 1  ;;  %vm20026_vm2 = vcmp.lt.s32.totalorder %v9948_v10, 1  ;;  %1778 = vrot.lane.b32.xlu2 %v20020_v39, %s9095_s9  ;;  %vm12830_vm10 = vcmp.eq.s32.totalorder %v3576_v55, 1  ;;  %v20036_v46 = vld [vmem:[#allocation191_spill] sm:$0xff]  ;;  %v20049_v51 = vld [vmem:[#allocation44_spill] sm:$0xff] }
 0x2bb   : > { %v12824_v27 = vsel %vm20026_vm2, %v12200_v23, %v12388_v18  ;;  %vm12834_vm13 = vcmp.eq.s32.totalorder %v4137_v47, 1  ;;  %v3298_v33 = vperm.slane %v20032_v14, 2  ;;  %v20033_v23 = vld [vmem:[#allocation84_spill] sm:$0xff]  ;;  %vm1034_vm14 = vcmp.eq.s32.totalorder %v1002_v2, 1  ;;  %8159 = vmatpush.msk.msra.mxu3 %vm12808_vm12, %v20035_v36  ;;  %8182 = vmatpush.msk.msra.mxu2 %vm12812_vm6, %v20036_v46  ;;  %v20042_v46 = vld [vmem:[#allocation79_spill] sm:$0xff] }
 0x2bc   : > { %20027 = vst [vmem:[#allocation23_spill] sm:$0xff] %v12824_v27  ;;  %8171 = vmatpush.msk.msra.mxu1 %vm12795_vm4, %v20033_v23  ;;  %8194 = vmatpush.msk.msra.mxu0 %vm12799_vm11, %v12824_v27  ;;  %vm1886_vm9 = vcmp.eq.s32.totalorder %v1854_v35, 1  ;;  %v3857_v55 = vperm.slane %v12629_v58, 1  ;;  %v4978_v47 = vperm.slane %v12069_v6, 2  ;;  %vm20039_vm1 = vcmp.lt.s32.totalorder %v9948_v10, 15  ;;  %v20043_v36 = vld [vmem:[#allocation132_spill] sm:$0xff] }
 0x2bd   : > { %v12861_v2 = vsel %vm20039_vm1, %v20038_v45, %v20037_v59  ;;  %vm3470_vm15 = vcmp.eq.s32.totalorder %v3438_v31, 1  ;;  %vm4029_vm8 = vcmp.eq.s32.totalorder %v3997_v42, 1  ;;  %v1477_v35 = vperm.slane %v12646_v15, 1  ;;  %8160 = vmatpush.msk.msra.mxu3 %vm1034_vm14, %v20042_v46  ;;  %8183 = vmatpush.msk.msra.mxu2 %vm1886_vm9, %v20043_v36  ;;  %v20044_v45 = vld [vmem:[#allocation117_spill] sm:$0xff]  ;;  %v20066_v52 = vld [vmem:[#allocation188_spill] sm:$0xff] }
 0x2be   : > { %20040 = vst [vmem:[#allocation138_spill] sm:$0xff] %v12861_v2  ;;  %8172 = vmatpush.msk.msra.mxu1 %vm12830_vm10, %v20041_v12  ;;  %8195 = vmatpush.msk.msra.mxu0 %vm12834_vm13, %v12861_v2  ;;  %vm797_vm7 = vcmp.eq.s32.totalorder %v765_v61, 1  ;;  %vm1649_vm5 = vcmp.eq.s32.totalorder %v1617_v60, 1  ;;  %vm20046_vm0 = vcmp.lt.s32.totalorder %v9948_v10, 16  ;;  %vm3330_vm3 = vcmp.eq.s32.totalorder %v3298_v33, 1  ;;  %v20048_v60 = vld [vmem:[#allocation129_spill] sm:$0xff] }
 0x2bf   : > { %v12876_v31 = vsel %vm20046_vm0, %v20045_v3, %v20044_v45  ;;  %v3717_v42 = vperm.slane %v12694_v8, 1  ;;  %vm3889_vm4 = vcmp.eq.s32.totalorder %v3857_v55, 1  ;;  %vm5010_vm11 = vcmp.eq.s32.totalorder %v4978_v47, 1  ;;  %8161 = vmatpush.msk.msra.mxu3 %vm797_vm7, %v20048_v60  ;;  %8184 = vmatpush.msk.msra.mxu2 %vm1649_vm5, %v20049_v51  ;;  %v20052_v55 = vld [vmem:[#allocation82_spill] sm:$0xff]  ;;  %v20053_v47 = vld [vmem:[#allocation89_spill] sm:$0xff] }
 0x2c0   : > { %20047 = vst [vmem:[#allocation45_spill] sm:$0xff] %v12876_v31  ;;  %8200 = vmatpush.msk.msrb.mxu1 %vm3470_vm15, %v12305_v34  ;;  %8196 = vmatpush.msk.msra.mxu0 %vm4029_vm8, %v12876_v31  ;;  %v1240_v49 = vperm.slane %v12722_v19, 1  ;;  %v3126_v61 = vperm.slane %v12045_v5, 2  ;;  %vm1509_vm12 = vcmp.eq.s32.totalorder %v1477_v35, 1  ;;  %v3577_v7 = vperm.slane %v12741_v29, 1  ;;  %v12910_v51 = vpop.permute.xlu1 %2005  ;;  %v20111_v34 = vld [vmem:[#allocation85_spill] sm:$0xff] }
 0x2c1   : > { %vm20050_vm6 = vcmp.lt.s32.totalorder %v9948_v10, 111  ;;  %6305 = vmatmul.f32.vlgmr.msra.gmra.mxu3 %v12029_v25  ;;  %vm20054_vm2 = vcmp.lt.s32.totalorder %v9948_v10, 17  ;;  %v1003_v35 = vperm.slane %v12762_v62, 1  ;;  %v2986_v36 = vperm.slane %v12116_v17, 2  ;;  %20058 = vst [vmem:[#allocation108_spill] sm:$0xff] %v12910_v51  ;;  %v12925_v62 = vpop.permute.xlu0 %1766 }
 0x2c2   : > { %v12890_v33 = vsel %vm20050_vm6, %v12228_v54, %v12538_v37  ;;  %8201 = vmatpush.msk.msrb.mxu1 %vm3330_vm3, %v12255_v21  ;;  %v12898_v46 = vsel %vm20054_vm2, %v20053_v47, %v20052_v55  ;;  %vm12904_vm10 = vcmp.eq.s32.totalorder %v3717_v42, 1  ;;  %v3439_v3 = vperm.slane %v20019_v4, 3  ;;  %v20059_v47 = vld [vmem:[#allocation164_spill] sm:$0xff]  ;;  %v20060_v21 = vld [vmem:[#allocation35_spill] sm:$0xff]  ;;  %20067 = vst [vmem:[#allocation191_spill] sm:$0xff] %v12925_v62  ;;  %2489 = vrot.lane.b32.xlu1 %v20020_v39, %s9096_s18  ;;  %v20086_v42 = vld [vmem:[#allocation93_spill] sm:$0xff] }
 0x2c3   : > { %20051 = vst [vmem:[#allocation150_spill] sm:$0xff] %v12890_v33  ;;  %8197 = vmatpush.msk.msra.mxu0 %vm3889_vm4, %v12898_v46  ;;  %8216 = vmatpush.msk.msrb.mxu3 %vm5010_vm11, %v12890_v33  ;;  %v4838_v60 = vperm.slane %v12178_v57, 2  ;;  %vm20061_vm13 = vcmask 1043456   ;;  %vm12915_vm14 = vcmp.eq.s32.totalorder %v1240_v49, 1  ;;  %vm12919_vm9 = vcmp.eq.s32.totalorder %v3126_v61, 1  ;;  %v20069_v49 = vld [vmem:[#allocation27_spill] sm:$0xff]  ;;  %vm20090_vm6 = vmmov %vm20054_vm2 }
 0x2c4   : > { %20055 = vst [vmem:[#allocation84_spill] sm:$0xff] %v12898_v46  ;;  %8185 = vmatpush.msk.msra.mxu2 %vm1509_vm12, %v20059_v47  ;;  %8202 = vmatpush.msk.msrb.mxu1 %vm20061_vm13, %v20060_v21  ;;  %v766_v33 = vperm.slane %v12783_v53, 1  ;;  %v2846_v4 = vperm.slane %v20066_v52, 2  ;;  %v20068_v47 = vld [vmem:[#allocation69_spill] sm:$0xff]  ;;  %vm3609_vm1 = vcmp.eq.s32.totalorder %v3577_v7, 1  ;;  %v3299_v21 = vperm.slane %v20032_v14, 3  ;;  %v12947_v14 = vpop.permute.xlu2 %1389  ;;  %vm20087_vm12 = vmmov %vm20054_vm2 }
 0x2c5   : > { %1780 = vrot.lane.b32.xlu2 %v20068_v47, %s9095_s9  ;;  %2017 = vrot.lane.b32.xlu0 %v20068_v47, %s9093_s10  ;;  %vm12937_vm15 = vcmp.eq.s32.totalorder %v1003_v35, 1  ;;  %vm12941_vm8 = vcmp.eq.s32.totalorder %v2986_v36, 1  ;;  %v4698_v51 = vperm.slane %v12226_v30, 2  ;;  %v4979_v7 = vperm.slane %v12069_v6, 3  ;;  %20074 = vst [vmem:[#allocation143_spill] sm:$0xff] %v12947_v14  ;;  %v20075_v53 = vld [vmem:[#allocation114_spill] sm:$0xff]  ;;  %vm20099_vm13 = vmmov %vm20090_vm6 }
 0x2c6   : > { %8198 = vmatpush.msk.msra.mxu0 %vm12904_vm10, %v20069_v49  ;;  %8186 = vmatpush.msk.msra.mxu2 %vm12915_vm14, %v20075_v53  ;;  %v20076_v35 = vld [vmem:[#allocation167_spill] sm:$0xff]  ;;  %vm20077_vm7 = vcmp.lt.s32.totalorder %v9948_v10, 112  ;;  %vm3471_vm5 = vcmp.eq.s32.totalorder %v3439_v3, 1  ;;  %vm4870_vm0 = vcmp.eq.s32.totalorder %v4838_v60, 1  ;;  %v2706_v54 = vperm.slane %v12244_v40, 2  ;;  %v20079_v6 = vld [vmem:[#allocation169_spill] sm:$0xff]  ;;  %vm20096_vm10 = vmmov %vm20090_vm6 }
 0x2c7   : > { %8203 = vmatpush.msk.msrb.mxu1 %vm12919_vm9, %v12523_v11  ;;  %v12959_v36 = vsel %vm20077_vm7, %v20076_v35, %v12702_v16  ;;  %v20080_v14 = vld [vmem:[#allocation195_spill] sm:$0xff]  ;;  %vm20081_vm3 = vcmask 719872   ;;  %vm12965_vm4 = vcmp.eq.s32.totalorder %v766_v33, 1  ;;  %vm12969_vm11 = vcmp.eq.s32.totalorder %v2846_v4, 1  ;;  %v20089_v60 = vld [vmem:[#allocation92_spill] sm:$0xff]  ;;  %v20115_v53 = vld [vmem:[#allocation222_spill] sm:$0xff] }
 0x2c8   : > { %20078 = vst [vmem:[#allocation135_spill] sm:$0xff] %v12959_v36  ;;  %8199 = vmatpush.msk.msra.mxu0 %vm3609_vm1, %v20079_v6  ;;  %7898 = vmatmul.msk.f32.vlgmr.msra.gmra.mxu1 %vm20081_vm3, %v20080_v14  ;;  %v12977_v3 = vsel %vm20087_vm12, %v20052_v55, %v20086_v42  ;;  %v12983_v35 = vsel %vm20090_vm6, %v20086_v42, %v20089_v60  ;;  %v20092_v33 = vld [vmem:[#allocation87_spill] sm:$0xff]  ;;  %vm12991_vm2 = vcmp.eq.s32.totalorder %v3299_v21, 1  ;;  %v4558_v55 = vperm.slane %v12298_v48, 2  ;;  %v20126_v62 = vld [vmem:[#allocation36_spill] sm:$0xff]  ;;  %v20150_v21 = vld [vmem:[#allocation57_spill] sm:$0xff] }
 0x2c9   : > { %20088 = vst [vmem:[#allocation199_spill] sm:$0xff] %v12977_v3  ;;  %8187 = vmatpush.msk.msra.mxu2 %vm12937_vm15, %v20092_v33  ;;  %8204 = vmatpush.msk.msrb.mxu1 %vm12941_vm8, %v19997_v20  ;;  %v20095_v11 = vld [vmem:[#allocation83_spill] sm:$0xff]  ;;  %vm13010_vm14 = vcmp.eq.s32.totalorder %v4698_v51, 1  ;;  %vm13014_vm9 = vcmp.eq.s32.totalorder %v4979_v7, 1  ;;  %v3127_v33 = vperm.slane %v12045_v5, 3  ;;  %v20105_v20 = vld [vmem:[#allocation137_spill] sm:$0xff]  ;;  %v13031_v7 = vpop.permute.xlu1 %2240  ;;  %vm20109_vm15 = vmmov %vm20090_vm6 }
 0x2ca   : > { %20091 = vst [vmem:[#allocation79_spill] sm:$0xff] %v12983_v35  ;;  %v13000_v42 = vsel %vm20096_vm10, %v20089_v60, %v20095_v11  ;;  %v20098_v35 = vld [vmem:[#allocation96_spill] sm:$0xff]  ;;  %8227 = vmatpush.msk.msrb.mxu0 %vm3471_vm5, %v12286_v28  ;;  %8217 = vmatpush.msk.msrb.mxu3 %vm4870_vm0, %v12959_v36  ;;  %v2566_v60 = vperm.slane %v12341_v24, 2  ;;  %vm13026_vm1 = vcmp.eq.s32.totalorder %v2706_v54, 1  ;;  %v4418_v51 = vperm.slane %v12381_v1, 2  ;;  %vm20112_vm8 = vmmov %vm20090_vm6 }
 0x2cb   : > { %20097 = vst [vmem:[#allocation132_spill] sm:$0xff] %v13000_v42  ;;  %v13006_v61 = vsel %vm20099_vm13, %v20095_v11, %v20098_v35  ;;  %8188 = vmatpush.msk.msra.mxu2 %vm12965_vm4, %v20105_v20  ;;  %8205 = vmatpush.msk.msrb.mxu1 %vm12969_vm11, %v20009_v22  ;;  %v20114_v54 = vld [vmem:[#allocation152_spill] sm:$0xff]  ;;  %vm20116_vm7 = vcmp.lt.s32.totalorder %v9948_v10, 113  ;;  %vm20118_vm5 = vcmp.lt.s32.totalorder %v9948_v10, 111  ;;  %vm13071_vm0 = vcmp.eq.s32.totalorder %v4558_v55, 1  ;;  %v20147_v55 = vld [vmem:[#allocation26_spill] sm:$0xff] }
 0x2cc   : > { %20100 = vst [vmem:[#allocation117_spill] sm:$0xff] %v13006_v61  ;;  %v20108_v61 = vld [vmem:[#allocation95_spill] sm:$0xff]  ;;  %v13049_v22 = vsel %vm20116_vm7, %v20115_v53, %v20114_v54  ;;  %v13055_v36 = vsel %vm20118_vm5, %v12538_v37, %v12682_v32  ;;  %8228 = vmatpush.msk.msrb.mxu0 %vm12991_vm2, %v12394_v9  ;;  %6345 = vmatmul.f32.vlgmr.msra.gmra.mxu2 %v12029_v25  ;;  %v4278_v25 = vperm.slane %v12447_v41, 2  ;;  %v4839_v4 = vperm.slane %v12178_v57, 3  ;;  %v20123_v53 = vld [vmem:[#allocation109_spill] sm:$0xff] }
 0x2cd   : > { %v13037_v28 = vsel %vm20109_vm15, %v20098_v35, %v20108_v61  ;;  %v13043_v20 = vsel %vm20112_vm8, %v20108_v61, %v20111_v34  ;;  %20117 = vst [vmem:[#allocation44_spill] sm:$0xff] %v13049_v22  ;;  %v2329_v35 = vperm.slane %v12410_v38, 2  ;;  %v2987_v61 = vperm.slane %v12116_v17, 3  ;;  %v13063_v34 = vpop.permute.xlu0 %1768  ;;  %8218 = vmatpush.msk.msrb.mxu3 %vm13010_vm14, %v13049_v22  ;;  %8243 = vmatpush.msk.msrb.mxu2 %vm13014_vm9, %v13055_v36  ;;  %v20133_v9 = vld [vmem:[#allocation189_spill] sm:$0xff] }
 0x2ce   : > { %20110 = vst [vmem:[#allocation118_spill] sm:$0xff] %v13037_v28  ;;  %vm20124_vm3 = vcmp.lt.s32.totalorder %v9948_v10, 16  ;;  %8206 = vmatpush.msk.msrb.mxu1 %vm13026_vm1, %v20012_v63  ;;  %vm20127_vm4 = vcmask 1043456   ;;  %vm13088_vm11 = vcmp.eq.s32.totalorder %v2566_v60, 1  ;;  %vm13092_vm12 = vcmp.eq.s32.totalorder %v3127_v33, 1  ;;  %2491 = vrot.lane.b32.xlu1 %v20068_v47, %s9096_s18  ;;  %v20219_v60 = vld [vmem:[#allocation105_spill] sm:$0xff] }
 0x2cf   : > { %20113 = vst [vmem:[#allocation129_spill] sm:$0xff] %v13043_v20  ;;  %v13081_v20 = vsel %vm20124_vm3, %v20044_v45, %v20123_v53  ;;  %8229 = vmatpush.msk.msrb.mxu0 %vm20127_vm4, %v20126_v62  ;;  %v2092_v28 = vperm.slane %v12479_v56, 2  ;;  %v2847_v45 = vperm.slane %v20066_v52, 3  ;;  %vm20134_vm6 = vcmp.lt.s32.totalorder %v9948_v10, 127  ;;  %1399 = vrot.lane.b32.xlu2 %v19846_v13, %s9094_s8  ;;  %vm20145_vm15 = vmmov %vm20124_vm3 }
 0x2d0   : > { %20119 = vst [vmem:[#allocation82_spill] sm:$0xff] %v13055_v36  ;;  %v20132_v36 = vld [vmem:[#allocation203_spill] sm:$0xff]  ;;  %vm13108_vm2 = vcmp.eq.s32.totalorder %v4418_v51, 1  ;;  %v4138_v33 = vperm.slane %v12555_v50, 2  ;;  %v4699_v62 = vperm.slane %v12226_v30, 3  ;;  %2252 = vrot.lane.b32.xlu0 %v20020_v39, %s9097_s15  ;;  %vm13119_vm10 = vcmp.eq.s32.totalorder %v2329_v35, 1  ;;  %8207 = vmatpush.msk.msrb.mxu1 %vm13088_vm11, %v20033_v23 }
 0x2d1   : > { %20120 = vst [vmem:[#allocation89_spill] sm:$0xff] %v13063_v34  ;;  %v13102_v11 = vsel %vm20134_vm6, %v20133_v9, %v20132_v36  ;;  %vm13123_vm13 = vcmp.eq.s32.totalorder %v2987_v61, 1  ;;  %v1855_v63 = vperm.slane %v12560_v44, 2  ;;  %v2707_v42 = vperm.slane %v12244_v40, 3  ;;  %v13129_v34 = vpop.permute.xlu2 %1770  ;;  %8230 = vmatpush.msk.msrb.mxu0 %vm13092_vm12, %v12824_v27  ;;  %v20144_v61 = vld [vmem:[#allocation121_spill] sm:$0xff]  ;;  %v13197_v9 = vpop.permute.xlu1 %2242 }
 0x2d2   : > { %20125 = vst [vmem:[#allocation164_spill] sm:$0xff] %v13081_v20  ;;  %8219 = vmatpush.msk.msrb.mxu3 %vm13071_vm0, %v13102_v11  ;;  %vm20142_vm14 = vcmp.lt.s32.totalorder %v9948_v10, 112  ;;  %vm4310_vm9 = vcmp.eq.s32.totalorder %v4278_v25, 1  ;;  %vm4871_vm1 = vcmp.eq.s32.totalorder %v4839_v4, 1  ;;  %v13147_v37 = vsel %vm20145_vm15, %v20123_v53, %v20144_v61  ;;  %8208 = vmatpush.msk.msrb.mxu1 %vm13119_vm10, %v20041_v12  ;;  %v20165_v51 = vld [vmem:[#allocation37_spill] sm:$0xff] }
 0x2d3   : > { %20135 = vst [vmem:[#allocation35_spill] sm:$0xff] %v13102_v11  ;;  %v13141_v35 = vsel %vm20142_vm14, %v12702_v16, %v12839_v43  ;;  %vm20148_vm8 = vcmp.lt.s32.totalorder %v9948_v10, 1  ;;  %vm20151_vm7 = vcmask 719872   ;;  %vm13160_vm5 = vcmp.eq.s32.totalorder %v2092_v28, 1  ;;  %8231 = vmatpush.msk.msrb.mxu0 %vm13123_vm13, %v12861_v2 }
 0x2d4   : > { %20143 = vst [vmem:[#allocation188_spill] sm:$0xff] %v13141_v35  ;;  %v13153_v23 = vsel %vm20148_vm8, %v12388_v18, %v20147_v55  ;;  %8220 = vmatpush.msk.msrb.mxu3 %vm13108_vm2, %v20150_v21  ;;  %7899 = vmatmul.msk.f32.vlgmr.msra.gmra.mxu0 %vm20151_vm7, %v20080_v14  ;;  %vm13164_vm0 = vcmp.eq.s32.totalorder %v2847_v45, 1  ;;  %v3998_v4 = vperm.slane %v12596_v26, 2  ;;  %vm13175_vm3 = vcmp.eq.s32.totalorder %v4138_v33, 1 }
 0x2d5   : > { %20146 = vst [vmem:[#allocation27_spill] sm:$0xff] %v13147_v37  ;;  %vm13179_vm4 = vcmp.eq.s32.totalorder %v4699_v62, 1  ;;  %v4559_v53 = vperm.slane %v12298_v48, 3  ;;  %v1618_v45 = vperm.slane %v12614_v0, 2  ;;  %8244 = vmatpush.msk.msrb.mxu2 %vm4871_vm1, %v13141_v35  ;;  %vm13187_vm11 = vcmp.eq.s32.totalorder %v1855_v63, 1  ;;  %v20168_v63 = vld [vmem:[#allocation192_spill] sm:$0xff]  ;;  %8232 = vmatpush.msk.msrb.mxu0 %vm13164_vm0, %v12876_v31 }
 0x2d6   : > { %20149 = vst [vmem:[#allocation114_spill] sm:$0xff] %v13153_v23  ;;  %8221 = vmatpush.msk.msrb.mxu3 %vm4310_vm9, %v13153_v23  ;;  %vm13191_vm12 = vcmp.eq.s32.totalorder %v2707_v42, 1  ;;  %v2567_v33 = vperm.slane %v12341_v24, 3  ;;  %v3858_v62 = vperm.slane %v12629_v58, 2  ;;  %vm20166_vm6 = vcmp.lt.s32.totalorder %v9948_v10, 113  ;;  %8209 = vmatpush.msk.msrb.mxu1 %vm13160_vm5, %v20168_v63  ;;  %v20169_v42 = vld [vmem:[#allocation142_spill] sm:$0xff] }
 0x2d7   : > { %20164 = vst [vmem:[#allocation167_spill] sm:$0xff] %v13197_v9  ;;  %v13203_v21 = vsel %vm20166_vm6, %v20114_v54, %v20165_v51  ;;  %vm20170_vm2 = vcmp.lt.s32.totalorder %v9948_v10, 15  ;;  %v4419_v27 = vperm.slane %v12381_v1, 3  ;;  %v1478_v35 = vperm.slane %v12646_v15, 2  ;;  %v13219_v54 = vpop.permute.xlu0 %1387  ;;  %v20172_v24 = vld [vmem:[#allocation154_spill] sm:$0xff]  ;;  %v20177_v31 = vld [vmem:[#allocation201_spill] sm:$0xff]  ;;  %8233 = vmatpush.msk.msrb.mxu0 %vm13191_vm12, %v12898_v46  ;;  %1162 = vrot.lane.b32.xlu1 %v19846_v13, %s9092_s2 }
 0x2d8   : > { %20167 = vst [vmem:[#allocation169_spill] sm:$0xff] %v13203_v21  ;;  %v13215_v2 = vsel %vm20170_vm2, %v20037_v59, %v20169_v42  ;;  %vm20173_vm10 = vcmp.lt.s32.totalorder %v9948_v10, 127  ;;  %8245 = vmatpush.msk.msrb.mxu2 %vm13179_vm4, %v13203_v21  ;;  %vm13233_vm13 = vcmp.eq.s32.totalorder %v3998_v4, 1  ;;  %v2330_v25 = vperm.slane %v12410_v38, 3  ;;  %8210 = vmatpush.msk.msrb.mxu1 %vm13187_vm11, %v20177_v31  ;;  %v20190_v13 = vld [vmem:[#allocation81_spill] sm:$0xff] }
 0x2d9   : > { %20171 = vst [vmem:[#allocation195_spill] sm:$0xff] %v13215_v2  ;;  %v13225_v16 = vsel %vm20173_vm10, %v20132_v36, %v20172_v24  ;;  %8222 = vmatpush.msk.msrb.mxu3 %vm13175_vm3, %v13215_v2  ;;  %v3718_v63 = vperm.slane %v12694_v8, 2  ;;  %vm13245_vm14 = vcmp.eq.s32.totalorder %v4559_v53, 1  ;;  %vm13249_vm9 = vcmp.eq.s32.totalorder %v1618_v45, 1  ;;  %1401 = vrot.lane.b32.xlu2 %v20020_v39, %s9094_s8  ;;  %v20210_v53 = vld [vmem:[#allocation56_spill] sm:$0xff] }
 0x2da   : > { %20174 = vst [vmem:[#allocation93_spill] sm:$0xff] %v13225_v16  ;;  %v4279_v18 = vperm.slane %v12447_v41, 3  ;;  %v1241_v28 = vperm.slane %v12722_v19, 2  ;;  %vm13259_vm1 = vcmp.eq.s32.totalorder %v2567_v33, 1  ;;  %vm13263_vm15 = vcmp.eq.s32.totalorder %v3858_v62, 1  ;;  %2254 = vrot.lane.b32.xlu0 %v20068_v47, %s9097_s15  ;;  %8246 = vmatpush.msk.msrb.mxu2 %vm13245_vm14, %v13225_v16  ;;  %v20191_v47 = vld [vmem:[#allocation42_spill] sm:$0xff] }
 0x2db   : > { %v2093_v45 = vperm.slane %v12479_v56, 3  ;;  %v3578_v12 = vperm.slane %v12741_v29, 2  ;;  %8223 = vmatpush.msk.msrb.mxu3 %vm13233_vm13, %v13081_v20  ;;  %vm13274_vm8 = vcmp.eq.s32.totalorder %v4419_v27, 1  ;;  %vm13278_vm7 = vcmp.eq.s32.totalorder %v1478_v35, 1  ;;  %8211 = vmatpush.msk.msrb.mxu1 %vm13249_vm9, %v20191_v47  ;;  %v13299_v56 = vpop.permute.xlu2 %1772  ;;  %v20196_v20 = vld [vmem:[#allocation120_spill] sm:$0xff]  ;;  %v20228_v27 = vld [vmem:[#allocation186_spill] sm:$0xff] }
 0x2dc   : > { %v4139_v62 = vperm.slane %v12555_v50, 3  ;;  %v1004_v46 = vperm.slane %v20190_v13, 2  ;;  %vm13290_vm5 = vcmp.eq.s32.totalorder %v2330_v25, 1  ;;  %vm13294_vm0 = vcmp.eq.s32.totalorder %v3718_v63, 1  ;;  %8234 = vmatpush.msk.msrb.mxu0 %vm13259_vm1, %v20069_v49  ;;  %v20203_v63 = vld [vmem:[#allocation33_spill] sm:$0xff]  ;;  %v20207_v49 = vld [vmem:[#allocation146_spill] sm:$0xff]  ;;  %8247 = vmatpush.msk.msrb.mxu2 %vm13274_vm8, %v20210_v53  ;;  %v13382_v53 = vpop.permute.xlu1 %2007 }
 0x2dd   : > { %v1856_v59 = vperm.slane %v12560_v44, 3  ;;  %vm20197_vm3 = vcmp.lt.s32.totalorder %v9948_v10, 16  ;;  %8224 = vmatpush.msk.msrb.mxu3 %vm13263_vm15, %v12977_v3  ;;  %vm13313_vm4 = vcmp.eq.s32.totalorder %v4279_v18, 1  ;;  %vm13317_vm11 = vcmp.eq.s32.totalorder %v1241_v28, 1  ;;  %v20211_v28 = vld [vmem:[#allocation29_spill] sm:$0xff]  ;;  %20229 = vst [vmem:[#allocation137_spill] sm:$0xff] %v13382_v53 }
 0x2de   : > { %v13305_v36 = vsel %vm20197_vm3, %v20144_v61, %v20196_v20  ;;  %v3440_v4 = vperm.slane %v20203_v63, 4  ;;  %v20204_v61 = vld [vmem:[#allocation110_spill] sm:$0xff]  ;;  %vm20205_vm12 = vmmov %vm20197_vm3  ;;  %vm20208_vm6 = vcmp.lt.s32.totalorder %v9948_v10, 1  ;;  %8212 = vmatpush.msk.msrb.mxu1 %vm13278_vm7, %v20211_v28  ;;  %vm13340_vm2 = vcmp.eq.s32.totalorder %v2093_v45, 1  ;;  %8235 = vmatpush.msk.msrb.mxu0 %vm13290_vm5, %v20079_v6  ;;  %v20225_v6 = vld [vmem:[#allocation115_spill] sm:$0xff] }
 0x2df   : > { %20198 = vst [vmem:[#allocation92_spill] sm:$0xff] %v13305_v36  ;;  %v13326_v31 = vsel %vm20205_vm12, %v20196_v20, %v20204_v61  ;;  %v13332_v18 = vsel %vm20208_vm6, %v20147_v55, %v20207_v49  ;;  %vm13344_vm10 = vcmp.eq.s32.totalorder %v3578_v12, 1  ;;  %vm20217_vm13 = vmmov %vm20197_vm3  ;;  %8225 = vmatpush.msk.msrb.mxu3 %vm13294_vm0, %v20219_v60  ;;  %vm13360_vm14 = vcmp.eq.s32.totalorder %v4139_v62, 1  ;;  %v20231_v60 = vld [vmem:[#allocation123_spill] sm:$0xff]  ;;  %v20234_v25 = vld [vmem:[#allocation149_spill] sm:$0xff] }
 0x2e0   : > { %20206 = vst [vmem:[#allocation87_spill] sm:$0xff] %v13326_v31  ;;  %v20216_v31 = vld [vmem:[#allocation124_spill] sm:$0xff]  ;;  %vm13364_vm9 = vcmp.eq.s32.totalorder %v1004_v46, 1  ;;  %v3999_v33 = vperm.slane %v12596_v26, 3  ;;  %8248 = vmatpush.msk.msrb.mxu2 %vm13313_vm4, %v13332_v18  ;;  %8213 = vmatpush.msk.msrb.mxu1 %vm13317_vm11, %v20225_v6  ;;  %vm13376_vm1 = vcmp.eq.s32.totalorder %v1856_v59, 1  ;;  %v1619_v46 = vperm.slane %v12614_v0, 3  ;;  %vm20232_vm15 = vmmov %vm20197_vm3 }
 0x2e1   : > { %20209 = vst [vmem:[#allocation83_spill] sm:$0xff] %v13332_v18  ;;  %v13352_v55 = vsel %vm20217_vm13, %v20204_v61, %v20216_v31  ;;  %v20224_v61 = vld [vmem:[#allocation39_spill] sm:$0xff]  ;;  %v3300_v35 = vperm.slane %v20228_v27, 4  ;;  %v13390_v47 = vsel %vm20232_vm15, %v20216_v31, %v20231_v60  ;;  %8236 = vmatpush.msk.msrb.mxu0 %vm13340_vm2, %v20234_v25  ;;  %v20235_v59 = vld [vmem:[#allocation190_spill] sm:$0xff]  ;;  %v20236_v6 = vld [vmem:[#allocation136_spill] sm:$0xff]  ;;  %vm20237_vm8 = vcmp.lt.s32.totalorder %v9948_v10, 15 }
 0x2e2   : > { %20218 = vst [vmem:[#allocation96_spill] sm:$0xff] %v13352_v55  ;;  %v767_v28 = vperm.slane %v20224_v61, 2  ;;  %v13384_v55 = vpop.permute.xlu0 %1152  ;;  %8226 = vmatpush.msk.msrb.mxu3 %vm13344_vm10, %v20235_v59  ;;  %v13402_v0 = vsel %vm20237_vm8, %v20169_v42, %v20236_v6  ;;  %vm3472_vm7 = vcmp.eq.s32.totalorder %v3440_v4, 1  ;;  %v20239_v53 = vld [vmem:[#allocation176_spill] sm:$0xff]  ;;  %vm20241_vm5 = vcmp.lt.s32.totalorder %v9948_v10, 113  ;;  %v20243_v20 = vld [vmem:[#allocation111_spill] sm:$0xff]  ;;  %vm20245_vm0 = vmmov %vm20237_vm8  ;;  %1164 = vrot.lane.b32.xlu0 %v20020_v39, %s9092_s2 }
 0x2e3   : > { %20230 = vst [vmem:[#allocation95_spill] sm:$0xff] %v13384_v55  ;;  %v3859_v55 = vperm.slane %v12629_v58, 3  ;;  %v4980_v31 = vperm.slane %v20239_v53, 4  ;;  %8249 = vmatpush.msk.msrb.mxu2 %vm13360_vm14, %v13402_v0  ;;  %8214 = vmatpush.msk.msrb.mxu1 %vm13364_vm9, %v20243_v20  ;;  %v1479_v42 = vperm.slane %v12646_v15, 3  ;;  %v20244_v4 = vld [vmem:[#allocation144_spill] sm:$0xff]  ;;  %v20247_v59 = vld [vmem:[#allocation113_spill] sm:$0xff] }
 0x2e4   : > { %20233 = vst [vmem:[#allocation152_spill] sm:$0xff] %v13390_v47  ;;  %v20240_v47 = vld [vmem:[#allocation165_spill] sm:$0xff]  ;;  %v13423_v25 = vsel %vm20245_vm0, %v20236_v6, %v20244_v4  ;;  %vm20249_vm4 = vcmask 719872   ;;  %v20250_v45 = vld [vmem:[#allocation170_spill] sm:$0xff]  ;;  %vm13436_vm11 = vcmp.eq.s32.totalorder %v3999_v33, 1  ;;  %vm13440_vm12 = vcmp.eq.s32.totalorder %v767_v28, 1  ;;  %8254 = vmatpush.msk.msra.mxu3 %vm3472_vm7, %v13049_v22 }
 0x2e5   : > { %20238 = vst [vmem:[#allocation222_spill] sm:$0xff] %v13402_v0  ;;  %v13410_v36 = vsel %vm20241_vm5, %v20165_v51, %v20240_v47  ;;  %v13429_v51 = vsel %vm20197_vm3, %v20231_v60, %v20247_v59  ;;  %7900 = vmatmul.msk.f32.vlgmr.msrb.gmra.mxu3 %vm20249_vm4, %v20080_v14  ;;  %8237 = vmatpush.msk.msrb.mxu0 %vm13376_vm1, %v20250_v45  ;;  %v3719_v20 = vperm.slane %v12694_v8, 3  ;;  %v4840_v60 = vperm.slane %v12178_v57, 4  ;;  %v20255_v14 = vld [vmem:[#allocation68_spill] sm:$0xff]  ;;  %v20260_v59 = vld [vmem:[#allocation102_spill] sm:$0xff]  ;;  %v13496_v0 = vpop.permute.xlu2 %1391  ;;  %v20300_v12 = vld [vmem:[#allocation191_spill] sm:$0xff] }
 0x2e6   : > { %20242 = vst [vmem:[#allocation109_spill] sm:$0xff] %v13410_v36  ;;  %2019 = vrot.lane.b32.xlu1 %v20255_v14, %s9093_s10  ;;  %vm13449_vm6 = vcmp.eq.s32.totalorder %v1619_v46, 1  ;;  %vm13453_vm2 = vcmp.eq.s32.totalorder %v3300_v35, 1  ;;  %v1242_v28 = vperm.slane %v12722_v19, 3  ;;  %v3128_v45 = vperm.slane %v12045_v5, 4  ;;  %1782 = vrot.lane.b32.xlu2 %v20255_v14, %s9095_s9  ;;  %v20267_v19 = vld [vmem:[#allocation162_spill] sm:$0xff] }
 0x2e7   : > { %20246 = vst [vmem:[#allocation36_spill] sm:$0xff] %v13423_v25  ;;  %vm20261_vm10 = vcmp.lt.s32.totalorder %v9948_v10, 111  ;;  %vm13469_vm13 = vcmp.eq.s32.totalorder %v3859_v55, 1  ;;  %vm13473_vm14 = vcmp.eq.s32.totalorder %v4980_v31, 1  ;;  %v3579_v22 = vperm.slane %v12741_v29, 3  ;;  %8250 = vmatpush.msk.msrb.mxu2 %vm13436_vm11, %v13147_v37  ;;  %v20270_v55 = vld [vmem:[#allocation168_spill] sm:$0xff]  ;;  %8255 = vmatpush.msk.msra.mxu3 %vm13453_vm2, %v13102_v11 }
 0x2e8   : > { %20248 = vst [vmem:[#allocation203_spill] sm:$0xff] %v13429_v51  ;;  %v13463_v51 = vsel %vm20261_vm10, %v12682_v32, %v20260_v59  ;;  %vm20268_vm9 = vmmov %vm20261_vm10  ;;  %8215 = vmatpush.msk.msrb.mxu1 %vm13440_vm12, %v20270_v55  ;;  %vm13490_vm1 = vcmp.eq.s32.totalorder %v1479_v42, 1  ;;  %v4700_v39 = vperm.slane %v12226_v30, 4  ;;  %v1005_v15 = vperm.slane %v20190_v13, 3  ;;  %v20280_v55 = vld [vmem:[#allocation79_spill] sm:$0xff]  ;;  %v20286_v46 = vld [vmem:[#allocation40_spill] sm:$0xff] }
 0x2e9   : > { %20262 = vst [vmem:[#allocation189_spill] sm:$0xff] %v13463_v51  ;;  %v13482_v32 = vsel %vm20268_vm9, %v20260_v59, %v20267_v19  ;;  %v20273_v59 = vld [vmem:[#allocation50_spill] sm:$0xff]  ;;  %vm20274_vm15 = vcmp.lt.s32.totalorder %v9948_v10, 112  ;;  %vm13510_vm8 = vcmp.eq.s32.totalorder %v3719_v20, 1  ;;  %vm13514_vm7 = vcmp.eq.s32.totalorder %v4840_v60, 1  ;;  %8251 = vmatpush.msk.msrb.mxu2 %vm13469_vm13, %v20280_v55  ;;  %v20290_v11 = vld [vmem:[#allocation108_spill] sm:$0xff] }
 0x2ea   : > { %20269 = vst [vmem:[#allocation121_spill] sm:$0xff] %v13482_v32  ;;  %8238 = vmatpush.msk.msrb.mxu0 %vm13449_vm6, %v20273_v59  ;;  %v13508_v42 = vsel %vm20274_vm15, %v12839_v43, %v13031_v7  ;;  %v2988_v62 = vperm.slane %v12116_v17, 4  ;;  %8270 = vmatpush.msk.msra.mxu1 %vm13473_vm14, %v13463_v51  ;;  %vm13525_vm5 = vcmp.eq.s32.totalorder %v1242_v28, 1  ;;  %vm13529_vm0 = vcmp.eq.s32.totalorder %v3128_v45, 1  ;;  %v20285_v59 = vld [vmem:[#allocation31_spill] sm:$0xff]  ;;  %v20369_v43 = vld [vmem:[#allocation105_spill] sm:$0xff] }
 0x2eb   : > { %20275 = vst [vmem:[#allocation26_spill] sm:$0xff] %v13508_v42  ;;  %v3441_v60 = vperm.slane %v20203_v63, 5  ;;  %v4560_v33 = vperm.slane %v12298_v48, 4  ;;  %vm20287_vm3 = vcmask 1043456   ;;  %vm13540_vm4 = vcmp.eq.s32.totalorder %v3579_v22, 1  ;;  %v20293_v31 = vld [vmem:[#allocation151_spill] sm:$0xff] }
 0x2ec   : > { %8239 = vmatpush.msk.msrb.mxu0 %vm13490_vm1, %v20285_v59  ;;  %8256 = vmatpush.msk.msra.mxu3 %vm20287_vm3, %v20286_v46  ;;  %v768_v45 = vperm.slane %v20224_v61, 3  ;;  %v2848_v35 = vperm.slane %v20066_v52, 4  ;;  %v3301_v51 = vperm.slane %v20228_v27, 5  ;;  %vm20291_vm11 = vcmp.lt.s32.totalorder %v9948_v10, 113  ;;  %v13570_v61 = vpop.permute.xlu0 %2009  ;;  %v20331_v59 = vld [vmem:[#allocation143_spill] sm:$0xff] }
 0x2ed   : > { %v13551_v19 = vsel %vm20291_vm11, %v20240_v47, %v20290_v11  ;;  %8252 = vmatpush.msk.msrb.mxu2 %vm13510_vm8, %v20293_v31  ;;  %8271 = vmatpush.msk.msra.mxu1 %vm13514_vm7, %v13508_v42  ;;  %vm13559_vm12 = vcmp.eq.s32.totalorder %v4700_v39, 1  ;;  %vm13563_vm6 = vcmp.eq.s32.totalorder %v1005_v15, 1  ;;  %v4420_v46 = vperm.slane %v12381_v1, 4  ;;  %v13568_v47 = vpop.permute.xlu1 %2481  ;;  %20299 = vst [vmem:[#allocation142_spill] sm:$0xff] %v13570_v61  ;;  %v20303_v39 = vld [vmem:[#allocation89_spill] sm:$0xff]  ;;  %v20306_v31 = vld [vmem:[#allocation139_spill] sm:$0xff] }
 0x2ee   : > { %20292 = vst [vmem:[#allocation37_spill] sm:$0xff] %v13551_v19  ;;  %vm20301_vm2 = vcmp.lt.s32.totalorder %v9948_v10, 127  ;;  %v13584_v42 = vld.sshfl [vmem:[#allocation1] sm:$0xff pattern:$0x75316420]  ;;  %8240 = vmatpush.msk.msrb.mxu0 %vm13525_vm5, %v20306_v31  ;;  %vm13590_vm13 = vcmp.eq.s32.totalorder %v2988_v62, 1  ;;  %8257 = vmatpush.msk.msra.mxu3 %vm13529_vm0, %v13153_v23  ;;  %v13683_v23 = vpop.permute.xlu2 %1393 }
 0x2ef   : > { %20298 = vst [vmem:[#allocation192_spill] sm:$0xff] %v13568_v47  ;;  %v13576_v6 = vsel %vm20301_vm2, %v20172_v24, %v20300_v12  ;;  %vm20304_vm10 = vmmov %vm20301_vm2  ;;  %6385 = vmatmul.f32.vlgmr.msrb.gmra.mxu1 %v13584_v42  ;;  %v4981_v24 = vperm.slane %v20239_v53, 5  ;;  %v20313_v62 = vld [vmem:[#allocation161_spill] sm:$0xff]  ;;  %vm3473_vm1 = vcmp.eq.s32.totalorder %v3441_v60, 1  ;;  %vm13613_vm15 = vcmp.eq.s32.totalorder %v4560_v33, 1  ;;  %2493 = vrot.lane.b32.xlu1 %v20255_v14, %s9096_s18  ;;  %v20350_v60 = vld [vmem:[#allocation55_spill] sm:$0xff] }
 0x2f0   : > { %20302 = vst [vmem:[#allocation154_spill] sm:$0xff] %v13576_v6  ;;  %v13582_v15 = vsel %vm20304_vm10, %v20303_v39, %v13129_v34  ;;  %vm20309_vm14 = vmmov %vm20301_vm2  ;;  %8253 = vmatpush.msk.msrb.mxu2 %vm13540_vm4, %v20313_v62  ;;  %8272 = vmatpush.msk.msra.mxu1 %vm13559_vm12, %v13410_v36  ;;  %vm13623_vm8 = vcmp.eq.s32.totalorder %v768_v45, 1  ;;  %vm13627_vm7 = vcmp.eq.s32.totalorder %v2848_v35, 1  ;;  %vm13631_vm5 = vcmp.eq.s32.totalorder %v3301_v51, 1  ;;  %v20381_v61 = vld [vmem:[#allocation190_spill] sm:$0xff] }
 0x2f1   : > { %20305 = vst [vmem:[#allocation201_spill] sm:$0xff] %v13582_v15  ;;  %v13599_v47 = vsel %vm20309_vm14, %v13129_v34, %v13299_v56  ;;  %vm20311_vm9 = vmmov %vm20301_vm2  ;;  %v20316_v34 = vld [vmem:[#allocation86_spill] sm:$0xff]  ;;  %v2708_v33 = vperm.slane %v12244_v40, 4  ;;  %v13636_v31 = vld.sshfl [vmem:[#allocation1 + $0x8] sm:$0xff pattern:$0x75316420]  ;;  %8258 = vmatpush.msk.msra.mxu3 %vm13590_vm13, %v13215_v2 }
 0x2f2   : > { %20310 = vst [vmem:[#allocation81_spill] sm:$0xff] %v13599_v47  ;;  %v13605_v15 = vsel %vm20311_vm9, %v20300_v12, %v20303_v39  ;;  %8241 = vmatpush.msk.msrb.mxu0 %vm13563_vm6, %v20316_v34  ;;  %vm20324_vm0 = vcmask 719872   ;;  %vm20325_vm3 = vcmp.lt.s32.totalorder %v9948_v10, 112  ;;  %vm13649_vm4 = vcmp.eq.s32.totalorder %v4420_v46, 1  ;;  %8281 = vmatpush.msk.msra.mxu2 %vm3473_vm1, %v13203_v21  ;;  %v20336_v12 = vld [vmem:[#allocation211_spill] sm:$0xff]  ;;  %v20337_v34 = vld [vmem:[#allocation73_spill] sm:$0xff] }
 0x2f3   : > { %20312 = vst [vmem:[#allocation42_spill] sm:$0xff] %v13605_v15  ;;  %7901 = vmatmul.msk.f32.vlgmr.msrb.gmra.mxu2 %vm20324_vm0, %v13636_v31  ;;  %v13647_v45 = vsel %vm20325_vm3, %v13031_v7, %v13197_v9  ;;  %v4280_v35 = vperm.slane %v12447_v41, 4  ;;  %v4841_v22 = vperm.slane %v12178_v57, 5  ;;  %vm13658_vm11 = vcmp.eq.s32.totalorder %v4981_v24, 1  ;;  %1784 = vrot.lane.b32.xlu2 %v20337_v34, %s9095_s9  ;;  %v20342_v57 = vld [vmem:[#allocation164_spill] sm:$0xff] }
 0x2f4   : > { %20323 = vst [vmem:[#allocation120_spill] sm:$0xff] %v13636_v31  ;;  %vm20332_vm12 = vcmp.lt.s32.totalorder %v9948_v10, 1  ;;  %v2568_v39 = vperm.slane %v20336_v12, 4  ;;  %2021 = vrot.lane.b32.xlu0 %v20337_v34, %s9093_s10  ;;  %v3129_v24 = vperm.slane %v12045_v5, 5  ;;  %v4140_v21 = vperm.slane %v12555_v50, 4  ;;  %8273 = vmatpush.msk.msra.mxu1 %vm13613_vm15, %v13576_v6 }
 0x2f5   : > { %20326 = vst [vmem:[#allocation33_spill] sm:$0xff] %v13647_v45  ;;  %v13666_v7 = vsel %vm20332_vm12, %v13219_v54, %v20331_v59  ;;  %vm20334_vm6 = vmmov %vm20332_vm12  ;;  %v4701_v2 = vperm.slane %v12226_v30, 5  ;;  %v2331_v47 = vperm.slane %v12410_v38, 4  ;;  %vm13691_vm2 = vcmp.eq.s32.totalorder %v2708_v33, 1  ;;  %8259 = vmatpush.msk.msra.mxu3 %vm13627_vm7, %v20342_v57  ;;  %8282 = vmatpush.msk.msra.mxu2 %vm13631_vm5, %v13225_v16  ;;  %v20347_v33 = vld [vmem:[#allocation159_spill] sm:$0xff] }
 0x2f6   : > { %20333 = vst [vmem:[#allocation110_spill] sm:$0xff] %v13666_v7  ;;  %v13672_v46 = vsel %vm20334_vm6, %v20207_v49, %v13219_v54  ;;  %v20339_v54 = vld [vmem:[#allocation80_spill] sm:$0xff]  ;;  %v2989_v31 = vperm.slane %v12116_v17, 5  ;;  %v4000_v9 = vperm.slane %v12596_v26, 4  ;;  %v4561_v30 = vperm.slane %v12298_v48, 5  ;;  %vm20348_vm14 = vmmov %vm20334_vm6  ;;  %8274 = vmatpush.msk.msra.mxu1 %vm13649_vm4, %v20350_v60  ;;  %v13753_v49 = vpop.permute.xlu1 %2483 }
 0x2f7   : > { %20335 = vst [vmem:[#allocation146_spill] sm:$0xff] %v13672_v46  ;;  %8242 = vmatpush.msk.msrb.mxu0 %vm13623_vm8, %v20339_v54  ;;  %vm13704_vm10 = vcmp.eq.s32.totalorder %v4280_v35, 1  ;;  %vm13708_vm13 = vcmp.eq.s32.totalorder %v4841_v22, 1  ;;  %v2094_v54 = vperm.slane %v20347_v33, 4  ;;  %v2849_v48 = vperm.slane %v20066_v52, 5  ;;  %8260 = vmatpush.msk.msra.mxu3 %vm13691_vm2, %v12977_v3  ;;  %v20386_v3 = vld [vmem:[#allocation222_spill] sm:$0xff] }
 0x2f8   : > { %20338 = vst [vmem:[#allocation29_spill] sm:$0xff] %v13683_v23  ;;  %v13718_v28 = vsel %vm20348_vm14, %v20331_v59, %v13496_v0  ;;  %vm13726_vm9 = vcmp.eq.s32.totalorder %v2568_v39, 1  ;;  %v3860_v22 = vperm.slane %v12629_v58, 4  ;;  %v4421_v16 = vperm.slane %v12381_v1, 5  ;;  %v20353_v59 = vld [vmem:[#allocation38_spill] sm:$0xff]  ;;  %8275 = vmatpush.msk.msra.mxu1 %vm13704_vm10, %v13672_v46  ;;  %6425 = vmatmul.f32.vlgmr.msrb.gmra.mxu0 %v13584_v42  ;;  %v20389_v39 = vld [vmem:[#allocation141_spill] sm:$0xff] }
 0x2f9   : > { %20349 = vst [vmem:[#allocation124_spill] sm:$0xff] %v13718_v28  ;;  %8297 = vmatpush.msk.msra.mxu0 %vm13658_vm11, %v13482_v32  ;;  %vm20354_vm1 = vcmask 1043456   ;;  %vm13737_vm15 = vcmp.eq.s32.totalorder %v3129_v24, 1  ;;  %vm13741_vm8 = vcmp.eq.s32.totalorder %v4140_v21, 1  ;;  %vm13745_vm7 = vcmp.eq.s32.totalorder %v4701_v2, 1  ;;  %v13755_v32 = vpop.permute.xlu0 %2244  ;;  %8261 = vmatpush.msk.msra.mxu3 %vm13726_vm9, %v20369_v43  ;;  %v20390_v28 = vld [vmem:[#allocation69_spill] sm:$0xff] }
 0x2fa   : > { %8283 = vmatpush.msk.msra.mxu2 %vm20354_vm1, %v20353_v59  ;;  %vm13749_vm5 = vcmp.eq.s32.totalorder %v2331_v47, 1  ;;  %vm13763_vm0 = vcmp.eq.s32.totalorder %v2989_v31, 1  ;;  %vm13767_vm3 = vcmp.eq.s32.totalorder %v4000_v9, 1  ;;  %vm13771_vm4 = vcmp.eq.s32.totalorder %v4561_v30, 1  ;;  %8276 = vmatpush.msk.msra.mxu1 %vm13741_vm8, %v13423_v25  ;;  %v20401_v21 = vld [vmem:[#allocation208_spill] sm:$0xff]  ;;  %v20437_v47 = vld [vmem:[#allocation142_spill] sm:$0xff] }
 0x2fb   : > { %8298 = vmatpush.msk.msra.mxu0 %vm13708_vm13, %v13647_v45  ;;  %v1857_v24 = vperm.slane %v12560_v44, 4  ;;  %vm13780_vm11 = vcmp.eq.s32.totalorder %v2094_v54, 1  ;;  %vm13784_vm12 = vcmp.eq.s32.totalorder %v2849_v48, 1  ;;  %v2709_v30 = vperm.slane %v12244_v40, 5  ;;  %v20374_v54 = vld [vmem:[#allocation137_spill] sm:$0xff]  ;;  %8262 = vmatpush.msk.msra.mxu3 %vm13749_vm5, %v20381_v61  ;;  %v20407_v31 = vld [vmem:[#allocation64_spill] sm:$0xff] }
 0x2fc   : > { %v3720_v20 = vperm.slane %v12694_v8, 4  ;;  %8284 = vmatpush.msk.msra.mxu2 %vm13737_vm15, %v13332_v18  ;;  %vm20375_vm6 = vcmp.lt.s32.totalorder %v9948_v10, 113  ;;  %vm13802_vm2 = vcmp.eq.s32.totalorder %v3860_v22, 1  ;;  %vm13806_vm10 = vcmp.eq.s32.totalorder %v4421_v16, 1  ;;  %v20385_v16 = vld [vmem:[#allocation183_spill] sm:$0xff]  ;;  %2495 = vrot.lane.b32.xlu1 %v20337_v34, %s9096_s18  ;;  %v20416_v35 = vld [vmem:[#allocation196_spill] sm:$0xff] }
 0x2fd   : > { %v13800_v48 = vsel %vm20375_vm6, %v20290_v11, %v20374_v54  ;;  %v4281_v51 = vperm.slane %v12447_v41, 5  ;;  %8299 = vmatpush.msk.msra.mxu0 %vm13745_vm7, %v13551_v19  ;;  %v20382_v11 = vld [vmem:[#allocation95_spill] sm:$0xff]  ;;  %vm20383_vm13 = vcmp.lt.s32.totalorder %v9948_v10, 15  ;;  %v1620_v43 = vperm.slane %v20385_v16, 4  ;;  %1403 = vrot.lane.b32.xlu2 %v20390_v28, %s9094_s8  ;;  %v20463_v59 = vld [vmem:[#allocation30_spill] sm:$0xff] }
 0x2fe   : > { %20376 = vst [vmem:[#allocation115_spill] sm:$0xff] %v13800_v48  ;;  %v13821_v22 = vsel %vm20383_vm13, %v20244_v4, %v20382_v11  ;;  %v2569_v45 = vperm.slane %v20336_v12, 5  ;;  %v3580_v18 = vperm.slane %v12741_v29, 4  ;;  %8285 = vmatpush.msk.msra.mxu2 %vm13763_vm0, %v20386_v3  ;;  %vm13831_vm14 = vcmp.eq.s32.totalorder %v1857_v24, 1  ;;  %2256 = vrot.lane.b32.xlu0 %v20255_v14, %s9097_s15  ;;  %v20395_v11 = vld [vmem:[#allocation92_spill] sm:$0xff]  ;;  %v20428_v24 = vld [vmem:[#allocation151_spill] sm:$0xff] }
 0x2ff   : > { %20384 = vst [vmem:[#allocation186_spill] sm:$0xff] %v13821_v22  ;;  %v4141_v4 = vperm.slane %v12555_v50, 5  ;;  %v1480_v61 = vperm.slane %v20389_v39, 4  ;;  %v2332_v57 = vperm.slane %v12410_v38, 5  ;;  %vm13842_vm9 = vcmp.eq.s32.totalorder %v2709_v30, 1  ;;  %v13852_v50 = vpop.permute.xlu2 %1774  ;;  %8277 = vmatpush.msk.msra.mxu1 %vm13767_vm3, %v20395_v11  ;;  %8300 = vmatpush.msk.msra.mxu0 %vm13771_vm4, %v13605_v15  ;;  %v20484_v9 = vld [vmem:[#allocation82_spill] sm:$0xff] }
 0x300   : > { %vm13846_vm1 = vcmp.eq.s32.totalorder %v3720_v20, 1  ;;  %v3442_v3 = vperm.slane %v20203_v63, 6  ;;  %v4001_v48 = vperm.slane %v12596_v26, 5  ;;  %vm20396_vm15 = vcmp.lt.s32.totalorder %v9948_v10, 1  ;;  %v20400_v26 = vld [vmem:[#allocation90_spill] sm:$0xff]  ;;  %8263 = vmatpush.msk.msra.mxu3 %vm13780_vm11, %v20401_v21  ;;  %8286 = vmatpush.msk.msra.mxu2 %vm13784_vm12, %v13147_v37  ;;  %v20427_v37 = vld [vmem:[#allocation49_spill] sm:$0xff] }
 0x301   : > { %v13864_v30 = vsel %vm20396_vm15, %v13496_v0, %v13683_v23  ;;  %vm13866_vm8 = vcmp.eq.s32.totalorder %v4281_v51, 1  ;;  %v1243_v41 = vperm.slane %v20400_v26, 4  ;;  %v2095_v19 = vperm.slane %v20347_v33, 5  ;;  %v20406_v23 = vld [vmem:[#allocation132_spill] sm:$0xff]  ;;  %8301 = vmatpush.msk.msra.mxu0 %vm13806_vm10, %v20407_v31  ;;  %v13928_v60 = vpop.permute.xlu0 %2246  ;;  %v20426_v31 = vld [vmem:[#allocation39_spill] sm:$0xff]  ;;  %v20432_v20 = vld [vmem:[#allocation162_spill] sm:$0xff] }
 0x302   : > { %20397 = vst [vmem:[#allocation123_spill] sm:$0xff] %v13864_v30  ;;  %vm13878_vm7 = vcmp.eq.s32.totalorder %v1620_v43, 1  ;;  %vm13882_vm5 = vcmp.eq.s32.totalorder %v2569_v45, 1  ;;  %v3302_v51 = vperm.slane %v20228_v27, 6  ;;  %v3861_v30 = vperm.slane %v12629_v58, 5  ;;  %8278 = vmatpush.msk.msra.mxu1 %vm13802_vm2, %v20406_v23  ;;  %8264 = vmatpush.msk.msra.mxu3 %vm13831_vm14, %v20416_v35  ;;  %v20421_v35 = vld [vmem:[#allocation150_spill] sm:$0xff] }
 0x303   : > { %vm13894_vm0 = vcmp.eq.s32.totalorder %v3580_v18, 1  ;;  %vm13898_vm3 = vcmp.eq.s32.totalorder %v4141_v4, 1  ;;  %vm13902_vm4 = vcmp.eq.s32.totalorder %v1480_v61, 1  ;;  %vm13906_vm11 = vcmp.eq.s32.totalorder %v2332_v57, 1  ;;  %8287 = vmatpush.msk.msra.mxu2 %vm13842_vm9, %v20280_v55  ;;  %v13926_v61 = vpop.permute.xlu1 %1154  ;;  %8302 = vmatpush.msk.msra.mxu0 %vm13866_vm8, %v13666_v7  ;;  %v20440_v0 = vld [vmem:[#allocation135_spill] sm:$0xff] }
 0x304   : > { %vm13916_vm12 = vcmp.eq.s32.totalorder %v3442_v3, 1  ;;  %vm13920_vm6 = vcmp.eq.s32.totalorder %v4001_v48, 1  ;;  %v1006_v57 = vperm.slane %v20190_v13, 4  ;;  %v1858_v4 = vperm.slane %v12560_v44, 5  ;;  %8279 = vmatpush.msk.msra.mxu1 %vm13846_vm1, %v20421_v35  ;;  %8265 = vmatpush.msk.msra.mxu3 %vm13878_vm7, %v20427_v37  ;;  %v20441_v7 = vld [vmem:[#allocation163_spill] sm:$0xff]  ;;  %v20470_v48 = vld [vmem:[#allocation182_spill] sm:$0xff] }
 0x305   : > { %vm13936_vm2 = vcmp.eq.s32.totalorder %v1243_v41, 1  ;;  %vm13940_vm10 = vcmp.eq.s32.totalorder %v2095_v19, 1  ;;  %v3721_v2 = vperm.slane %v12694_v8, 5  ;;  %v769_v55 = vperm.slane %v20426_v31, 4  ;;  %8288 = vmatpush.msk.msra.mxu2 %vm13882_vm5, %v20428_v24  ;;  %v20431_v19 = vld [vmem:[#allocation192_spill] sm:$0xff]  ;;  %8303 = vmatpush.msk.msra.mxu0 %vm13898_vm3, %v13821_v22  ;;  %v20476_v8 = vld [vmem:[#allocation41_spill] sm:$0xff] }
 0x306   : > { %vm13952_vm13 = vcmp.eq.s32.totalorder %v3302_v51, 1  ;;  %vm20433_vm14 = vcmp.lt.s32.totalorder %v9948_v10, 111  ;;  %vm13962_vm9 = vcmp.eq.s32.totalorder %v3861_v30, 1  ;;  %vm20438_vm1 = vcmp.lt.s32.totalorder %v9948_v10, 113  ;;  %8280 = vmatpush.msk.msra.mxu1 %vm13894_vm0, %v20440_v0  ;;  %8266 = vmatpush.msk.msra.mxu3 %vm13902_vm4, %v20441_v7  ;;  %v20513_v3 = vld [vmem:[#allocation72_spill] sm:$0xff] }
 0x307   : > { %v13960_v58 = vsel %vm20433_vm14, %v20432_v20, %v20431_v19  ;;  %v13970_v37 = vsel %vm20438_vm1, %v20374_v54, %v20437_v47  ;;  %v1621_v51 = vperm.slane %v20385_v16, 5  ;;  %v3130_v30 = vperm.slane %v12045_v5, 6  ;;  %8289 = vmatpush.msk.msra.mxu2 %vm13906_vm11, %v20313_v62  ;;  %1166 = vrot.lane.b32.xlu1 %v20390_v28, %s9092_s2  ;;  %v20454_v28 = vld [vmem:[#allocation187_spill] sm:$0xff]  ;;  %v20549_v7 = vld [vmem:[#allocation84_spill] sm:$0xff] }
 0x308   : > { %20434 = vst [vmem:[#allocation149_spill] sm:$0xff] %v13960_v58  ;;  %v3581_v24 = vperm.slane %v12741_v29, 5  ;;  %v4982_v20 = vperm.slane %v20239_v53, 6  ;;  %vm13988_vm15 = vcmp.eq.s32.totalorder %v1006_v57, 1  ;;  %vm13992_vm8 = vcmp.eq.s32.totalorder %v1858_v4, 1  ;;  %8308 = vmatpush.msk.msrb.mxu1 %vm13916_vm12, %v13410_v36  ;;  %1405 = vrot.lane.b32.xlu2 %v20255_v14, %s9094_s8  ;;  %v14025_v4 = vpop.permute.xlu2 %1776  ;;  %v20489_v29 = vld [vmem:[#allocation47_spill] sm:$0xff] }
 0x309   : > { %20439 = vst [vmem:[#allocation136_spill] sm:$0xff] %v13970_v37  ;;  %v1481_v45 = vperm.slane %v20389_v39, 5  ;;  %v2990_v37 = vperm.slane %v12116_v17, 6  ;;  %vm14003_vm7 = vcmp.eq.s32.totalorder %v3721_v2, 1  ;;  %vm14007_vm5 = vcmp.eq.s32.totalorder %v769_v55, 1  ;;  %2258 = vrot.lane.b32.xlu0 %v20337_v34, %s9097_s15  ;;  %v20453_v2 = vld [vmem:[#allocation87_spill] sm:$0xff]  ;;  %8267 = vmatpush.msk.msra.mxu3 %vm13936_vm2, %v20454_v28 }
 0x30a   : > { %v3443_v43 = vperm.slane %v20203_v63, 7  ;;  %v1244_v21 = vperm.slane %v20400_v26, 5  ;;  %vm20450_vm0 = vcmp.lt.s32.totalorder %v9948_v10, 127  ;;  %v2850_v55 = vperm.slane %v20066_v52, 6  ;;  %20452 = vst [vmem:[#allocation165_spill] sm:$0xff] %v14025_v4  ;;  %8304 = vmatpush.msk.msra.mxu0 %vm13920_vm6, %v20453_v2  ;;  %8290 = vmatpush.msk.msra.mxu2 %vm13940_vm10, %v20463_v59  ;;  %v20490_v62 = vld [vmem:[#allocation167_spill] sm:$0xff] }
 0x30b   : > { %v14021_v18 = vsel %vm20450_vm0, %v13299_v56, %v13852_v50  ;;  %v3303_v57 = vperm.slane %v20228_v27, 7  ;;  %v1007_v63 = vperm.slane %v20190_v13, 5  ;;  %vm14034_vm3 = vcmp.eq.s32.totalorder %v1621_v51, 1  ;;  %8309 = vmatpush.msk.msrb.mxu1 %vm13952_vm13, %v13576_v6  ;;  %8268 = vmatpush.msk.msra.mxu3 %vm13988_vm15, %v20470_v48  ;;  %v20475_v6 = vld [vmem:[#allocation197_spill] sm:$0xff]  ;;  %v14100_v34 = vpop.permute.xlu1 %2011  ;;  %v20497_v36 = vld [vmem:[#allocation188_spill] sm:$0xff] }
 0x30c   : > { %20451 = vst [vmem:[#allocation176_spill] sm:$0xff] %v14021_v18  ;;  %vm14038_vm4 = vcmp.eq.s32.totalorder %v3130_v30, 1  ;;  %vm14042_vm11 = vcmp.eq.s32.totalorder %v3581_v24, 1  ;;  %vm14046_vm12 = vcmp.eq.s32.totalorder %v4982_v20, 1  ;;  %vm14056_vm6 = vcmp.eq.s32.totalorder %v1481_v45, 1  ;;  %v20468_v30 = vld [vmem:[#allocation147_spill] sm:$0xff]  ;;  %8291 = vmatpush.msk.msra.mxu2 %vm13992_vm8, %v20475_v6  ;;  %v14102_v6 = vpop.permute.xlu0 %1156 }
 0x30d   : > { %vm14060_vm2 = vcmp.eq.s32.totalorder %v2990_v37, 1  ;;  %v2710_v51 = vperm.slane %v12244_v40, 6  ;;  %v4842_v24 = vperm.slane %v20468_v30, 6  ;;  %v20469_v20 = vld [vmem:[#allocation117_spill] sm:$0xff]  ;;  %vm14072_vm10 = vcmp.eq.s32.totalorder %v3443_v43, 1  ;;  %v20527_v37 = vld [vmem:[#allocation95_spill] sm:$0xff] }
 0x30e   : > { %8305 = vmatpush.msk.msra.mxu0 %vm13962_vm9, %v20469_v20  ;;  %vm14076_vm13 = vcmp.eq.s32.totalorder %v1244_v21, 1  ;;  %v770_v45 = vperm.slane %v20426_v31, 5  ;;  %v2570_v59 = vperm.slane %v20336_v12, 6  ;;  %vm20477_vm14 = vcmask 1043456   ;;  %8292 = vmatpush.msk.msra.mxu2 %vm14034_vm3, %v20489_v29  ;;  %v20506_v18 = vld [vmem:[#allocation37_spill] sm:$0xff]  ;;  %v20542_v21 = vld [vmem:[#allocation43_spill] sm:$0xff] }
 0x30f   : > { %8310 = vmatpush.msk.msrb.mxu1 %vm20477_vm14, %v20476_v8  ;;  %vm14087_vm9 = vcmp.eq.s32.totalorder %v2850_v55, 1  ;;  %vm14091_vm1 = vcmp.eq.s32.totalorder %v3303_v57, 1  ;;  %vm14095_vm15 = vcmp.eq.s32.totalorder %v1007_v63, 1  ;;  %v3131_v48 = vperm.slane %v12045_v5, 7  ;;  %v20485_v55 = vld [vmem:[#allocation112_spill] sm:$0xff]  ;;  %v20488_v63 = vld [vmem:[#allocation193_spill] sm:$0xff]  ;;  %2023 = vrot.lane.b32.xlu1 %v20513_v3, %s9093_s10 }
 0x310   : > { %8306 = vmatpush.msk.msra.mxu0 %vm14003_vm7, %v20484_v9  ;;  %8269 = vmatpush.msk.msra.mxu3 %vm14007_vm5, %v20485_v55  ;;  %vm20486_vm8 = vcmp.lt.s32.totalorder %v9948_v10, 111  ;;  %v4702_v5 = vperm.slane %v20488_v63, 6  ;;  %v4983_v8 = vperm.slane %v20239_v53, 7  ;;  %v2333_v20 = vperm.slane %v12410_v38, 6  ;;  %v20534_v43 = vld [vmem:[#allocation45_spill] sm:$0xff]  ;;  %v20555_v53 = vld [vmem:[#allocation110_spill] sm:$0xff] }
 0x311   : > { %v14114_v57 = vsel %vm20486_vm8, %v20431_v19, %v13753_v49  ;;  %8311 = vmatpush.msk.msrb.mxu1 %vm14038_vm4, %v13672_v46  ;;  %vm20491_vm7 = vcmp.lt.s32.totalorder %v9948_v10, 112  ;;  %vm14131_vm5 = vcmp.eq.s32.totalorder %v2710_v51, 1  ;;  %vm14135_vm0 = vcmp.eq.s32.totalorder %v4842_v24, 1  ;;  %6465 = vmatmul.f32.vlgmr.msra.gmra.mxu3 %v13584_v42  ;;  %v20502_v24 = vld [vmem:[#allocation206_spill] sm:$0xff] }
 0x312   : > { %20487 = vst [vmem:[#allocation111_spill] sm:$0xff] %v14114_v57  ;;  %v14129_v19 = vsel %vm20491_vm7, %v20490_v62, %v13755_v32  ;;  %v2991_v29 = vperm.slane %v12116_v17, 7  ;;  %8307 = vmatpush.msk.msra.mxu0 %vm14042_vm11, %v20497_v36  ;;  %vm14144_vm3 = vcmp.eq.s32.totalorder %v770_v45, 1  ;;  %vm14148_vm4 = vcmp.eq.s32.totalorder %v2570_v59, 1  ;;  %8324 = vmatpush.msk.msrb.mxu3 %vm14046_vm12, %v13960_v58  ;;  %v20503_v17 = vld [vmem:[#allocation23_spill] sm:$0xff] }
 0x313   : > { %20492 = vst [vmem:[#allocation144_spill] sm:$0xff] %v14129_v19  ;;  %v4562_v55 = vperm.slane %v20502_v24, 6  ;;  %v2096_v62 = vperm.slane %v20347_v33, 6  ;;  %8293 = vmatpush.msk.msra.mxu2 %vm14056_vm6, %v20503_v17  ;;  %vm14160_vm11 = vcmp.eq.s32.totalorder %v3131_v48, 1  ;;  %v2851_v45 = vperm.slane %v20066_v52, 7  ;;  %8312 = vmatpush.msk.msrb.mxu1 %vm14060_vm2, %v13423_v25  ;;  %v20570_v52 = vld [vmem:[#allocation24_spill] sm:$0xff] }
 0x314   : > { %v4422_v59 = vperm.slane %v12381_v1, 6  ;;  %v1859_v46 = vperm.slane %v12560_v44, 6  ;;  %8335 = vmatpush.msk.msrb.mxu0 %vm14072_vm10, %v20506_v18  ;;  %vm14173_vm12 = vcmp.eq.s32.totalorder %v4702_v5, 1  ;;  %vm14177_vm6 = vcmp.eq.s32.totalorder %v4983_v8, 1  ;;  %1786 = vrot.lane.b32.xlu2 %v20513_v3, %s9095_s9  ;;  %v20519_v8 = vld [vmem:[#allocation25_spill] sm:$0xff]  ;;  %v20520_v18 = vld [vmem:[#allocation138_spill] sm:$0xff] }
 0x315   : > { %vm14181_vm14 = vcmp.eq.s32.totalorder %v2333_v20, 1  ;;  %v2711_v17 = vperm.slane %v12244_v40, 7  ;;  %vm20514_vm2 = vcmp.lt.s32.totalorder %v9948_v10, 127  ;;  %vm14196_vm10 = vcmp.eq.s32.totalorder %v2991_v29, 1  ;;  %v14200_v20 = vpop.permute.xlu2 %1395  ;;  %1168 = vrot.lane.b32.xlu0 %v20255_v14, %s9092_s2  ;;  %8294 = vmatpush.msk.msra.mxu2 %vm14076_vm13, %v20520_v18  ;;  %v14260_v14 = vld [vmem:[#allocation8 + $0x10] sm:$0xff]  ;;  %v20571_v5 = vld [vmem:[#allocation71_spill] sm:$0xff] }
 0x316   : > { %v14194_v41 = vsel %vm20514_vm2, %v13852_v50, %v14025_v4  ;;  %20518 = vst [vmem:[#allocation102_spill] sm:$0xff] %v14200_v20  ;;  %v4282_v40 = vperm.slane %v20519_v8, 6  ;;  %v4843_v58 = vperm.slane %v20468_v30, 7  ;;  %vm14209_vm8 = vcmp.eq.s32.totalorder %v4562_v55, 1  ;;  %8313 = vmatpush.msk.msrb.mxu1 %vm14087_vm9, %v20395_v11  ;;  %8336 = vmatpush.msk.msrb.mxu0 %vm14091_vm1, %v13605_v15  ;;  %v14277_v15 = vpop.permute.xlu1 %2485  ;;  %v14279_v11 = vpop.permute.xlu0 %2013 }
 0x317   : > { %20515 = vst [vmem:[#allocation170_spill] sm:$0xff] %v14194_v41  ;;  %v20521_v50 = vmov 0  ;;  %vm14213_vm7 = vcmp.eq.s32.totalorder %v2096_v62, 1  ;;  %v20523_v29 = vmov 0  ;;  %v1622_v4 = vperm.slane %v20385_v16, 6  ;;  %8295 = vmatpush.msk.msra.mxu2 %vm14095_vm15, %v20534_v43  ;;  %v20535_v62 = vld [vmem:[#allocation120_spill] sm:$0xff]  ;;  %8325 = vmatpush.msk.msrb.mxu3 %vm14135_vm0, %v14129_v19 }
 0x318   : > { %v20522_v50 = vsel %vm14209_vm8, 4294967295, %v20521_v50  ;;  %v20524_v29 = vsel %vm14213_vm7, 4294967295, %v20523_v29  ;;  %v2571_v25 = vperm.slane %v20336_v12, 7  ;;  %vm14225_vm13 = vcmp.eq.s32.totalorder %v2851_v45, 1  ;;  %8314 = vmatpush.msk.msrb.mxu1 %vm14131_vm5, %v20406_v23  ;;  %20548 = vst [vmem:[#allocation31_spill] sm:$0xff] %v14279_v11  ;;  %v20556_v19 = vld [vmem:[#allocation115_spill] sm:$0xff]  ;;  %2497 = vrot.lane.b32.xlu1 %v20513_v3, %s9096_s18 }
 0x319   : > { %vm20528_vm2 = vcmp.lt.s32.totalorder %v9948_v10, 15  ;;  %vm14235_vm7 = vcmp.eq.s32.totalorder %v4422_v59, 1  ;;  %vm14239_vm8 = vcmp.eq.s32.totalorder %v1859_v46, 1  ;;  %vm20536_vm9 = vcmask 719872   ;;  %v20541_v46 = vld [vmem:[#allocation184_spill] sm:$0xff]  ;;  %8296 = vmatpush.msk.msra.mxu2 %vm14144_vm3, %v20549_v7  ;;  %8326 = vmatpush.msk.msrb.mxu3 %vm14173_vm12, %v20556_v19  ;;  %v20670_v41 = vld [vmem:[#allocation93_spill] sm:$0xff] }
 0x31a   : > { %v14233_v55 = vsel %vm20528_vm2, %v20527_v37, %v13926_v61  ;;  %7902 = vmatmul.msk.f32.vlgmr.msra.gmra.mxu1 %vm20536_vm9, %v20535_v62  ;;  %vm20537_vm1 = vcmp.lt.s32.totalorder %v9948_v10, 112  ;;  %vm14254_vm2 = vcmp.eq.s32.totalorder %v2711_v17, 1  ;;  %v4142_v18 = vperm.slane %v20541_v46, 6  ;;  %6505 = vmatmul.f32.vlgmr.msra.gmra.mxu2 %v13584_v42  ;;  %v20601_v17 = vld [vmem:[#allocation35_spill] sm:$0xff]  ;;  %v20617_v59 = vld [vmem:[#allocation124_spill] sm:$0xff] }
 0x31b   : > { %20529 = vst [vmem:[#allocation168_spill] sm:$0xff] %v14233_v55  ;;  %v14252_v45 = vsel %vm20537_vm1, %v13755_v32, %v13928_v60  ;;  %v4703_v37 = vperm.slane %v20488_v63, 7  ;;  %vm20543_vm15 = vcmask 1043456   ;;  %vm14267_vm9 = vcmp.eq.s32.totalorder %v4282_v40, 1  ;;  %8315 = vmatpush.msk.msrb.mxu1 %vm14148_vm4, %v20421_v35  ;;  %8351 = vmatpush.msk.msrb.mxu2 %vm14177_vm6, %v14114_v57 }
 0x31c   : > { %20538 = vst [vmem:[#allocation50_spill] sm:$0xff] %v14252_v45  ;;  %8337 = vmatpush.msk.msrb.mxu0 %vm20543_vm15, %v20542_v21  ;;  %vm14271_vm1 = vcmp.eq.s32.totalorder %v4843_v58, 1  ;;  %v1482_v43 = vperm.slane %v20389_v39, 6  ;;  %v2334_v63 = vperm.slane %v12410_v38, 7  ;;  %vm14287_vm5 = vcmp.eq.s32.totalorder %v1622_v4, 1  ;;  %v20554_v38 = vld [vmem:[#allocation140_spill] sm:$0xff]  ;;  %1788 = vrot.lane.b32.xlu2 %v20571_v5, %s9095_s9 }
 0x31d   : > { %vm14291_vm15 = vcmp.eq.s32.totalorder %v2571_v25, 1  ;;  %v4002_v21 = vperm.slane %v20554_v38, 6  ;;  %v4563_v23 = vperm.slane %v20502_v24, 7  ;;  %v1245_v4 = vperm.slane %v20400_v26, 6  ;;  %v20561_v24 = vld [vmem:[#allocation32_spill] sm:$0xff]  ;;  %8316 = vmatpush.msk.msrb.mxu1 %vm14181_vm14, %v20440_v0  ;;  %2025 = vrot.lane.b32.xlu0 %v20571_v5, %s9093_s10  ;;  %v14365_v57 = vpop.permute.xlu2 %1397 }
 0x31e   : > { %8338 = vmatpush.msk.msrb.mxu0 %vm14160_vm11, %v20555_v53  ;;  %v2097_v56 = vperm.slane %v20347_v33, 7  ;;  %v3418_v25 = vand.u32 24, %v14260_v14  ;;  %v3278_v7 = vand.u32 32, %v14260_v14  ;;  %vm14311_vm0 = vcmp.eq.s32.totalorder %v4142_v18, 1  ;;  %20576 = vst [vmem:[#allocation40_spill] sm:$0xff] %v14365_v57  ;;  %v20585_v57 = vld [vmem:[#allocation29_spill] sm:$0xff]  ;;  %8352 = vmatpush.msk.msrb.mxu2 %vm14271_vm1, %v14252_v45 }
 0x31f   : > { %v20557_v35 = vmov 0  ;;  %vm14315_vm3 = vcmp.eq.s32.totalorder %v4703_v37, 1  ;;  %v3862_v33 = vperm.slane %v20561_v24, 6  ;;  %v4423_v27 = vperm.slane %v12381_v1, 7 }
 0x320   : > { %v20558_v35 = vsel %vm14311_vm0, 4294967295, %v20557_v35  ;;  %vm14327_vm4 = vcmp.eq.s32.totalorder %v1482_v43, 1  ;;  %v20562_v28 = vmov 0  ;;  %vm14331_vm11 = vcmp.eq.s32.totalorder %v2334_v63, 1  ;;  %8339 = vmatpush.msk.msrb.mxu0 %vm14196_vm10, %v13821_v22  ;;  %2499 = vrot.lane.b32.xlu1 %v20571_v5, %s9096_s18 }
 0x321   : > { %v20563_v28 = vsel %vm14327_vm4, 4294967295, %v20562_v28  ;;  %v20564_v18 = vmov 0  ;;  %v1008_v37 = vperm.slane %v20190_v13, 6  ;;  %v1860_v1 = vperm.slane %v12560_v44, 7 }
 0x322   : > { %v20565_v18 = vsel %vm14331_vm11, 4294967295, %v20564_v18  ;;  %vm14342_vm12 = vcmp.eq.s32.totalorder %v4002_v21, 1  ;;  %v20566_v0 = vmov 0  ;;  %vm14346_vm6 = vcmp.eq.s32.totalorder %v4563_v23, 1  ;;  %8340 = vmatpush.msk.msrb.mxu0 %vm14225_vm13, %v20453_v2 }
 0x323   : > { %v20567_v0 = vsel %vm14342_vm12, 4294967295, %v20566_v0  ;;  %v20568_v48 = vmov 0  ;;  %v3722_v43 = vperm.slane %v20570_v52, 6  ;;  %v4283_v63 = vperm.slane %v20519_v8, 7 }
 0x324   : > { %v20569_v48 = vsel %vm14346_vm6, 4294967295, %v20568_v48  ;;  %v4958_v44 = vand.u32 42, %v14260_v14  ;;  %vm14357_vm14 = vcmp.eq.s32.totalorder %v1245_v4, 1  ;;  %v20572_v21 = vmov 0  ;;  %v20581_v4 = vld [vmem:[#allocation201_spill] sm:$0xff] }
 0x325   : > { %v20573_v21 = vsel %vm14357_vm14, 4294967295, %v20572_v21  ;;  %vm14361_vm10 = vcmp.eq.s32.totalorder %v2097_v56, 1  ;;  %v20574_v23 = vmov 0  ;;  %v771_v8 = vperm.slane %v20426_v31, 6  ;;  %v20583_v56 = vld [vmem:[#allocation44_spill] sm:$0xff]  ;;  %2260 = vrot.lane.b32.xlu0 %v20513_v3, %s9097_s15 }
 0x326   : > { %v20575_v23 = vsel %vm14361_vm10, 4294967295, %v20574_v23  ;;  %vm14368_vm6 = vcmp.eq.s32.totalorder %v3418_v25, 24  ;;  %vm14372_vm12 = vcmp.eq.s32.totalorder %v3278_v7, 32  ;;  %vm20582_vm11 = vnez %v20522_v50 }
 0x327   : > { %8327 = vmatpush.msk.msrb.mxu3 %vm20582_vm11, %v20581_v4  ;;  %vm20584_vm14 = vnez %v20524_v29  ;;  %vm20586_vm10 = vcmp.lt.s32.totalorder %v9948_v10, 1  ;;  %vm20588_vm4 = vcmp.lt.s32.totalorder %v9948_v10, 113  ;;  %vm14394_vm0 = vcmp.eq.s32.totalorder %v3862_v33, 1  ;;  %v20600_v33 = vld [vmem:[#allocation63_spill] sm:$0xff] }
 0x328   : > { %8317 = vmatpush.msk.msrb.mxu1 %vm20584_vm14, %v20583_v56  ;;  %v14386_v25 = vsel %vm20586_vm10, %v20585_v57, %v14200_v20  ;;  %v14392_v7 = vsel %vm20588_vm4, %v20437_v47, %v14100_v34  ;;  %vm14398_vm11 = vcmp.eq.s32.totalorder %v4423_v27, 1  ;;  %v1623_v29 = vperm.slane %v20385_v16, 7  ;;  %v14469_v20 = vpop.permute.xlu0 %2248  ;;  %v20686_v27 = vld [vmem:[#allocation199_spill] sm:$0xff] }
 0x329   : > { %20587 = vst [vmem:[#allocation108_spill] sm:$0xff] %v14386_v25  ;;  %v3106_v56 = vand.u32 16, %v14260_v14  ;;  %vm20594_vm4 = vcmp.lt.s32.totalorder %v9948_v10, 15  ;;  %vm14416_vm14 = vcmp.eq.s32.totalorder %v1008_v37, 1  ;;  %vm14420_vm10 = vcmp.eq.s32.totalorder %v1860_v1, 1  ;;  %8328 = vmatpush.msk.msrb.mxu3 %vm14235_vm7, %v20600_v33  ;;  %v20606_v37 = vld [vmem:[#allocation166_spill] sm:$0xff]  ;;  %v14467_v33 = vpop.permute.xlu1 %2487 }
 0x32a   : > { %20589 = vst [vmem:[#allocation191_spill] sm:$0xff] %v14392_v7  ;;  %v14414_v47 = vsel %vm20594_vm4, %v13926_v61, %v14102_v6  ;;  %v2966_v30 = vand.u32 36, %v14260_v14  ;;  %8318 = vmatpush.msk.msrb.mxu1 %vm14239_vm8, %v20601_v17  ;;  %vm14431_vm13 = vcmp.eq.s32.totalorder %v3722_v43, 1  ;;  %vm14435_vm1 = vcmp.eq.s32.totalorder %v4283_v63, 1  ;;  %v20612_v43 = vld [vmem:[#allocation117_spill] sm:$0xff]  ;;  %v20613_v63 = vld [vmem:[#allocation136_spill] sm:$0xff] }
 0x32b   : > { %20595 = vst [vmem:[#allocation89_spill] sm:$0xff] %v14414_v47  ;;  %v3582_v1 = vperm.slane %v20606_v37, 6  ;;  %v20607_v45 = vmov 0   ;;  %vm14450_vm8 = vcmp.eq.s32.totalorder %v4958_v44, 42  ;;  %8341 = vmatpush.msk.msrb.mxu0 %vm14254_vm2, %v20612_v43  ;;  %8353 = vmatpush.msk.msrb.mxu2 %vm14315_vm3, %v20613_v63  ;;  %vm14460_vm7 = vcmp.eq.s32.totalorder %v771_v8, 1  ;;  %v20622_v43 = vld [vmem:[#allocation57_spill] sm:$0xff] }
 0x32c   : > { %v14443_v2 = vsel %vm14368_vm6, 1, %v20607_v45  ;;  %v14448_v12 = vsel %vm14372_vm12, 1, %v20607_v45  ;;  %v4143_v53 = vperm.slane %v20541_v46, 7  ;;  %v1483_v17 = vperm.slane %v20389_v39, 7  ;;  %8329 = vmatpush.msk.msrb.mxu3 %vm14267_vm9, %v20617_v59  ;;  %8319 = vmatpush.msk.msrb.mxu1 %vm14287_vm5, %v20622_v43 }
 0x32d   : > { %20608 = vst [vmem:[#allocation139_spill] sm:$0xff] %v14443_v2  ;;  %v2826_v44 = vand.u32 4, %v14260_v14  ;;  %vm20616_vm2 = vcmask 719872   ;;  %vm14476_vm3 = vcmp.eq.s32.totalorder %v1623_v29, 1  ;;  %v4003_v46 = vperm.slane %v20554_v38, 7  ;;  %8342 = vmatpush.msk.msrb.mxu0 %vm14291_vm15, %v20484_v9  ;;  %2262 = vrot.lane.b32.xlu0 %v20571_v5, %s9097_s15 }
 0x32e   : > { %20609 = vst [vmem:[#allocation161_spill] sm:$0xff] %v14448_v12  ;;  %7903 = vmatmul.msk.f32.vlgmr.msra.gmra.mxu0 %vm20616_vm2, %v20535_v62  ;;  %v1246_v39 = vperm.slane %v20400_v26, 7  ;;  %vm14482_vm12 = vcmp.eq.s32.totalorder %v3106_v56, 16  ;;  %v3444_v32 = vperm.slane %v14443_v2, 0  ;;  %v3304_v29 = vperm.slane %v14448_v12, 0 }
 0x32f   : > { %v14497_v26 = vsel %vm14450_vm8, 1, %v20607_v45  ;;  %vm14499_vm9 = vcmp.eq.s32.totalorder %v2966_v30, 36  ;;  %vm20626_vm5 = vnez %v20558_v35  ;;  %vm14508_vm15 = vcmp.eq.s32.totalorder %v3582_v1, 1  ;;  %v20629_v30 = vld [vmem:[#allocation114_spill] sm:$0xff]  ;;  %v20700_v35 = vld [vmem:[#allocation83_spill] sm:$0xff] }
 0x330   : > { %20623 = vst [vmem:[#allocation86_spill] sm:$0xff] %v14497_v26  ;;  %8330 = vmatpush.msk.msrb.mxu3 %vm20626_vm5, %v14233_v55  ;;  %v3863_v58 = vperm.slane %v20561_v24, 7  ;;  %v1009_v40 = vperm.slane %v20190_v13, 7  ;;  %v4818_v56 = vand.u32 10, %v14260_v14  ;;  %vm20630_vm6 = vnez %v20563_v28  ;;  %v20639_v28 = vld [vmem:[#allocation73_spill] sm:$0xff] }
 0x331   : > { %8320 = vmatpush.msk.msrb.mxu1 %vm20630_vm6, %v20629_v30  ;;  %vm20631_vm4 = vnez %v20565_v18  ;;  %vm14521_vm8 = vcmp.eq.s32.totalorder %v4143_v53, 1  ;;  %vm14525_vm2 = vcmp.eq.s32.totalorder %v1483_v17, 1  ;;  %v20634_v1 = vmov 0  ;;  %1407 = vrot.lane.b32.xlu2 %v20639_v28, %s9094_s8  ;;  %v14661_v61 = vpop.permute.xlu1 %1158 }
 0x332   : > { %8343 = vmatpush.msk.msrb.mxu0 %vm20631_vm4, %v20497_v36  ;;  %v20635_v1 = vsel %vm14525_vm2, 4294967295, %v20634_v1  ;;  %v14532_v13 = vsel %vm14482_vm12, 1, %v20607_v45  ;;  %vm14534_vm5 = vcmp.eq.s32.totalorder %v2826_v44, 4  ;;  %vm14542_vm6 = vcmp.eq.s32.totalorder %v4003_v46, 1  ;;  %v20645_v44 = vld [vmem:[#allocation96_spill] sm:$0xff]  ;;  %v20647_v46 = vld [vmem:[#allocation81_spill] sm:$0xff]  ;;  %1170 = vrot.lane.b32.xlu1 %v20639_v28, %s9092_s2 }
 0x333   : > { %20636 = vst [vmem:[#allocation143_spill] sm:$0xff] %v14532_v13  ;;  %v20640_v36 = vmov 0  ;;  %vm14546_vm4 = vcmp.eq.s32.totalorder %v1246_v39, 1  ;;  %v20642_v18 = vmov 0  ;;  %v3723_v54 = vperm.slane %v20570_v52, 7  ;;  %v20717_v28 = vld [vmem:[#allocation222_spill] sm:$0xff] }
 0x334   : > { %v20641_v36 = vsel %vm14542_vm6, 4294967295, %v20640_v36  ;;  %v20643_v18 = vsel %vm14546_vm4, 4294967295, %v20642_v18  ;;  %v4984_v43 = vperm.slane %v14497_v26, 0  ;;  %v772_v53 = vperm.slane %v20426_v31, 7  ;;  %v14572_v31 = vpop.permute.xlu2 %1778  ;;  %v20728_v52 = vld [vmem:[#allocation129_spill] sm:$0xff] }
 0x335   : > { %v14556_v17 = vsel %vm14499_vm9, 1, %v20607_v45  ;;  %vm20646_vm12 = vnez %v20567_v0  ;;  %vm20648_vm6 = vnez %v20569_v48  ;;  %vm14564_vm4 = vcmp.eq.s32.totalorder %v3444_v32, 1  ;;  %20653 = vst [vmem:[#allocation80_spill] sm:$0xff] %v14572_v31  ;;  %v20654_v0 = vld [vmem:[#allocation195_spill] sm:$0xff]  ;;  %v20656_v48 = vld [vmem:[#allocation169_spill] sm:$0xff]  ;;  %1172 = vrot.lane.b32.xlu0 %v20513_v3, %s9092_s2  ;;  %v20791_v32 = vld [vmem:[#allocation176_spill] sm:$0xff] }
 0x336   : > { %20644 = vst [vmem:[#allocation211_spill] sm:$0xff] %v14556_v17  ;;  %8331 = vmatpush.msk.msrb.mxu3 %vm20646_vm12, %v20645_v44  ;;  %8354 = vmatpush.msk.msrb.mxu2 %vm20648_vm6, %v20647_v46  ;;  %v20649_v39 = vmov 0  ;;  %vm14568_vm2 = vcmp.eq.s32.totalorder %v3304_v29, 1  ;;  %v2686_v8 = vand.u32 20, %v14260_v14  ;;  %v2546_v38 = vand.u32 41, %v14260_v14 }
 0x337   : > { %v20650_v39 = vsel %vm14564_vm4, 4294967295, %v20649_v39  ;;  %vm20655_vm9 = vnez %v20573_v21  ;;  %vm20657_vm6 = vnez %v20575_v23  ;;  %vm14582_vm12 = vcmp.eq.s32.totalorder %v3863_v58, 1  ;;  %v20665_v58 = vld [vmem:[#allocation118_spill] sm:$0xff] }
 0x338   : > { %8321 = vmatpush.msk.msrb.mxu1 %vm20655_vm9, %v20654_v0  ;;  %8344 = vmatpush.msk.msrb.mxu0 %vm20657_vm6, %v20656_v48  ;;  %vm14586_vm4 = vcmp.eq.s32.totalorder %v1009_v40, 1  ;;  %v3132_v30 = vperm.slane %v14532_v13, 0  ;;  %v3583_v31 = vperm.slane %v20606_v37, 7  ;;  %v14595_v21 = vsel %vm14534_vm5, 1, %v20607_v45  ;;  %v20666_v40 = vld [vmem:[#allocation62_spill] sm:$0xff]  ;;  %v20669_v48 = vld [vmem:[#allocation164_spill] sm:$0xff] }
 0x339   : > { %20662 = vst [vmem:[#allocation159_spill] sm:$0xff] %v14595_v21  ;;  %vm14597_vm9 = vcmp.eq.s32.totalorder %v4818_v56, 10  ;;  %8332 = vmatpush.msk.msrb.mxu3 %vm14394_vm0, %v20665_v58  ;;  %8355 = vmatpush.msk.msrb.mxu2 %vm14398_vm11, %v20666_v40  ;;  %vm20667_vm6 = vcmp.lt.s32.totalorder %v9948_v10, 111  ;;  %v2992_v24 = vperm.slane %v14556_v17, 0  ;;  %v4678_v56 = vand.u32 26, %v14260_v14  ;;  %v20729_v40 = vld [vmem:[#allocation27_spill] sm:$0xff] }
 0x33a   : > { %v14611_v37 = vsel %vm20667_vm6, %v13753_v49, %v14277_v15  ;;  %v2309_v0 = vand.u32 9, %v14260_v14  ;;  %8322 = vmatpush.msk.msrb.mxu1 %vm14416_vm14, %v20669_v48  ;;  %8345 = vmatpush.msk.msrb.mxu0 %vm14420_vm10, %v20670_v41  ;;  %vm20671_vm0 = vcmp.lt.s32.totalorder %v9948_v10, 113  ;;  %vm14628_vm11 = vcmp.eq.s32.totalorder %v3723_v54, 1  ;;  %v20679_v48 = vld [vmem:[#allocation189_spill] sm:$0xff] }
 0x33b   : > { %20668 = vst [vmem:[#allocation38_spill] sm:$0xff] %v14611_v37  ;;  %v14626_v49 = vsel %vm20671_vm0, %v14100_v34, %v14279_v11  ;;  %vm14632_vm5 = vcmp.eq.s32.totalorder %v4984_v43, 1  ;;  %vm14636_vm6 = vcmp.eq.s32.totalorder %v772_v53, 1  ;;  %v3445_v16 = vperm.slane %v14443_v2, 1  ;;  %8333 = vmatpush.msk.msrb.mxu3 %vm14431_vm13, %v20679_v48  ;;  %v20680_v34 = vld [vmem:[#allocation123_spill] sm:$0xff]  ;;  %v14663_v11 = vpop.permute.xlu0 %2250  ;;  %1409 = vrot.lane.b32.xlu2 %v20513_v3, %s9094_s8 }
 0x33c   : > { %20672 = vst [vmem:[#allocation105_spill] sm:$0xff] %v14626_v49  ;;  %8356 = vmatpush.msk.msrb.mxu2 %vm14435_vm1, %v20680_v34  ;;  %v2852_v54 = vperm.slane %v14595_v21, 0  ;;  %vm14648_vm14 = vcmp.eq.s32.totalorder %v2686_v8, 20  ;;  %v14655_v53 = vsel %vm14597_vm9, 1, %v20607_v45  ;;  %vm14657_vm10 = vcmp.eq.s32.totalorder %v2546_v38, 41  ;;  %8323 = vmatpush.msk.msrb.mxu1 %vm14460_vm7, %v20686_v27  ;;  %v20687_v8 = vld [vmem:[#allocation56_spill] sm:$0xff] }
 0x33d   : > { %20683 = vst [vmem:[#allocation137_spill] sm:$0xff] %v14655_v53  ;;  %8346 = vmatpush.msk.msrb.mxu0 %vm14476_vm3, %v20687_v8  ;;  %vm14671_vm13 = vcmp.eq.s32.totalorder %v3132_v30, 1  ;;  %vm14675_vm1 = vcmp.eq.s32.totalorder %v3583_v31, 1  ;;  %v3305_v2 = vperm.slane %v14448_v12, 1  ;;  %v4538_v25 = vand.u32 34, %v14260_v14  ;;  %v20692_v49 = vld [vmem:[#allocation26_spill] sm:$0xff]  ;;  %v14773_v31 = vpop.permute.xlu2 %1780  ;;  %6545 = vmatmul.f32.vlgmr.msrb.gmra.mxu1 %v13584_v42 }
 0x33e   : > { %8334 = vmatpush.msk.msrb.mxu3 %vm14508_vm15, %v20692_v49  ;;  %8357 = vmatpush.msk.msrb.mxu2 %vm14521_vm8, %v14414_v47  ;;  %vm14687_vm7 = vcmp.eq.s32.totalorder %v2992_v24, 1  ;;  %v4985_v51 = vperm.slane %v14497_v26, 1  ;;  %vm14692_vm3 = vcmp.eq.s32.totalorder %v4678_v56, 26  ;;  %vm14696_vm9 = vcmp.eq.s32.totalorder %v2309_v0, 9  ;;  %20719 = vst [vmem:[#allocation141_spill] sm:$0xff] %v14773_v31  ;;  %v20849_v38 = vld [vmem:[#allocation149_spill] sm:$0xff] }
 0x33f   : > { %v2072_v9 = vand.u32 25, %v14260_v14  ;;  %vm20699_vm15 = vcmask 719872   ;;  %vm20701_vm8 = vnez %v20635_v1  ;;  %vm14706_vm0 = vcmp.eq.s32.totalorder %v3445_v16, 1  ;;  %8378 = vmatpush.msk.msra.mxu1 %vm14632_vm5, %v14611_v37 }
 0x340   : > { %7904 = vmatmul.msk.f32.vlgmr.msrb.gmra.mxu3 %vm20699_vm15, %v20535_v62  ;;  %8347 = vmatpush.msk.msrb.mxu0 %vm20701_vm8, %v20700_v35  ;;  %v14713_v56 = vsel %vm14648_vm14, 1, %v20607_v45  ;;  %v4844_v0 = vperm.slane %v14655_v53, 0  ;;  %v14719_v27 = vsel %vm14657_vm10, 1, %v20607_v45  ;;  %v4398_v8 = vand.u32 2, %v14260_v14 }
 0x341   : > { %vm20704_vm15 = vnez %v20650_v39  ;;  %vm14727_vm8 = vcmp.eq.s32.totalorder %v2852_v54, 1  ;;  %vm20707_vm14 = vcmp.lt.s32.totalorder %v9948_v10, 111  ;;  %vm20709_vm10 = vcmp.lt.s32.totalorder %v9948_v10, 112 }
 0x342   : > { %8362 = vmatpush.msk.msra.mxu3 %vm20704_vm15, %v20556_v19  ;;  %v14735_v16 = vsel %vm20707_vm14, %v14277_v15, %v14467_v33  ;;  %v14741_v43 = vsel %vm20709_vm10, %v13928_v60, %v14469_v20  ;;  %v3133_v39 = vperm.slane %v14532_v13, 1  ;;  %vm14748_vm15 = vcmp.eq.s32.totalorder %v3305_v2, 1  ;;  %v20715_v2 = vld [vmem:[#allocation152_spill] sm:$0xff] }
 0x343   : > { %20708 = vst [vmem:[#allocation190_spill] sm:$0xff] %v14735_v16  ;;  %v20711_v54 = vmov 0  ;;  %v14755_v15 = vsel %vm14692_vm3, 1, %v20607_v45  ;;  %v14760_v60 = vsel %vm14696_vm9, 1, %v20607_v45  ;;  %vm14762_vm14 = vcmp.eq.s32.totalorder %v4538_v25, 34  ;;  %v14857_v57 = vpop.permute.xlu0 %1160 }
 0x344   : > { %20710 = vst [vmem:[#allocation183_spill] sm:$0xff] %v14741_v43  ;;  %v20712_v54 = vsel %vm14748_vm15, 4294967295, %v20711_v54  ;;  %v1835_v35 = vand.u32 33, %v14260_v14  ;;  %vm20716_vm10 = vnez %v20641_v36  ;;  %vm20718_vm15 = vnez %v20643_v18  ;;  %8363 = vmatpush.msk.msra.mxu3 %vm14568_vm2, %v20581_v4  ;;  %v20732_v4 = vld [vmem:[#allocation48_spill] sm:$0xff]  ;;  %v20816_v36 = vld [vmem:[#allocation170_spill] sm:$0xff] }
 0x345   : > { %8358 = vmatpush.msk.msrb.mxu2 %vm20716_vm10, %v20715_v2  ;;  %8348 = vmatpush.msk.msrb.mxu0 %vm20718_vm15, %v20717_v28  ;;  %v2712_v30 = vperm.slane %v14713_v56, 0  ;;  %v2572_v19 = vperm.slane %v14719_v27, 0  ;;  %vm14777_vm3 = vcmp.eq.s32.totalorder %v2072_v9, 25  ;;  %v4258_v13 = vand.u32 18, %v14260_v14  ;;  %20745 = vst [vmem:[#allocation208_spill] sm:$0xff] %v14857_v57  ;;  %v20750_v28 = vld [vmem:[#allocation76_spill] sm:$0xff]  ;;  %v14955_v1 = vpop.permute.xlu2 %1399 }
 0x346   : > { %vm14788_vm9 = vcmp.eq.s32.totalorder %v4844_v0, 1  ;;  %vm14792_vm15 = vcmp.eq.s32.totalorder %v4985_v51, 1  ;;  %v2993_v18 = vperm.slane %v14556_v17, 1  ;;  %vm14797_vm10 = vcmp.eq.s32.totalorder %v4398_v8, 2  ;;  %2027 = vrot.lane.b32.xlu1 %v20750_v28, %s9093_s10  ;;  %1790 = vrot.lane.b32.xlu2 %v20750_v28, %s9095_s9  ;;  %v20810_v17 = vld [vmem:[#allocation105_spill] sm:$0xff] }
 0x347   : > { %8359 = vmatpush.msk.msrb.mxu2 %vm14582_vm12, %v20728_v52  ;;  %8349 = vmatpush.msk.msrb.mxu0 %vm14586_vm4, %v20729_v40  ;;  %v4704_v0 = vperm.slane %v14755_v15, 0  ;;  %v2335_v51 = vperm.slane %v14760_v60, 0  ;;  %v14812_v37 = vsel %vm14762_vm14, 1, %v20607_v45  ;;  %vm14814_vm2 = vcmp.eq.s32.totalorder %v1835_v35, 33  ;;  %v20736_v40 = vld [vmem:[#allocation121_spill] sm:$0xff] }
 0x348   : > { %vm20733_vm5 = vcmask 1043456   ;;  %vm14821_vm12 = vcmp.eq.s32.totalorder %v3133_v39, 1  ;;  %v14828_v29 = vsel %vm14777_vm3, 1, %v20607_v45  ;;  %v2853_v41 = vperm.slane %v14595_v21, 1  ;;  %v14855_v21 = vpop.permute.xlu1 %2015  ;;  %8379 = vmatpush.msk.msra.mxu1 %vm14788_vm9, %v14741_v43 }
 0x349   : > { %8364 = vmatpush.msk.msra.mxu3 %vm20733_vm5, %v20732_v4  ;;  %v1598_v35 = vand.u32 1, %v14260_v14  ;;  %8360 = vmatpush.msk.msrb.mxu2 %vm14628_vm11, %v20736_v40  ;;  %v20737_v4 = vld [vmem:[#allocation79_spill] sm:$0xff]  ;;  %vm14838_vm4 = vcmp.eq.s32.totalorder %v2712_v30, 1  ;;  %vm14842_vm14 = vcmp.eq.s32.totalorder %v2572_v19, 1  ;;  %v14849_v31 = vsel %vm14797_vm10, 1, %v20607_v45  ;;  %20744 = vst [vmem:[#allocation90_spill] sm:$0xff] %v14855_v21 }
 0x34a   : > { %8350 = vmatpush.msk.msrb.mxu0 %vm14636_vm6, %v20737_v4  ;;  %vm14851_vm3 = vcmp.eq.s32.totalorder %v4258_v13, 18  ;;  %vm14865_vm11 = vcmp.eq.s32.totalorder %v2993_v18, 1  ;;  %v4564_v13 = vperm.slane %v14812_v37, 0  ;;  %v14873_v30 = vsel %vm14814_vm2, 1, %v20607_v45  ;;  %v20749_v4 = vld [vmem:[#allocation33_spill] sm:$0xff] }
 0x34b   : > { %8365 = vmatpush.msk.msra.mxu3 %vm14671_vm13, %v20617_v59  ;;  %20748 = vst [vmem:[#allocation196_spill] sm:$0xff] %v14873_v30  ;;  %v4845_v9 = vperm.slane %v14655_v53, 1  ;;  %v4118_v23 = vand.u32 38, %v14260_v14  ;;  %8361 = vmatpush.msk.msrb.mxu2 %vm14675_vm1, %v20749_v4  ;;  %vm14882_vm6 = vcmp.eq.s32.totalorder %v4704_v0, 1  ;;  %vm14886_vm13 = vcmp.eq.s32.totalorder %v2335_v51, 1  ;;  %v20797_v19 = vld [vmem:[#allocation109_spill] sm:$0xff] }
 0x34c   : > { %v2098_v8 = vperm.slane %v14828_v29, 0  ;;  %v1458_v59 = vand.u32 17, %v14260_v14  ;;  %vm20755_vm9 = vcmask 719872   ;;  %vm14897_vm1 = vcmp.eq.s32.totalorder %v2853_v41, 1  ;;  %8405 = vmatpush.msk.msra.mxu0 %vm14792_vm15, %v14735_v16  ;;  %v20779_v16 = vld [vmem:[#allocation46_spill] sm:$0xff]  ;;  %8380 = vmatpush.msk.msra.mxu1 %vm14882_vm6, %v14392_v7 }
 0x34d   : > { %7905 = vmatmul.msk.f32.vlgmr.msrb.gmra.mxu2 %vm20755_vm9, %v20535_v62  ;;  %8366 = vmatpush.msk.msra.mxu3 %vm14687_vm7, %v14233_v55  ;;  %v4424_v0 = vperm.slane %v14849_v31, 0  ;;  %v2713_v51 = vperm.slane %v14713_v56, 1  ;;  %v14906_v21 = vsel %vm14851_vm3, 1, %v20607_v45  ;;  %vm14908_vm10 = vcmp.eq.s32.totalorder %v1598_v35, 1  ;;  %v20841_v55 = vld [vmem:[#allocation102_spill] sm:$0xff] }
 0x34e   : > { %8389 = vmatpush.msk.msra.mxu2 %vm14706_vm0, %v20613_v63  ;;  %vm20760_vm7 = vcmp.lt.s32.totalorder %v9948_v10, 15  ;;  %vm20762_vm2 = vcmp.lt.s32.totalorder %v9948_v10, 112  ;;  %v1861_v41 = vperm.slane %v14873_v30, 0  ;;  %v3978_v24 = vand.u32 6, %v14260_v14  ;;  %6585 = vmatmul.f32.vlgmr.msrb.gmra.mxu0 %v13584_v42  ;;  %v20812_v42 = vld [vmem:[#allocation108_spill] sm:$0xff] }
 0x34f   : > { %v14921_v62 = vsel %vm20760_vm7, %v14102_v6, %v14661_v61  ;;  %v14927_v22 = vsel %vm20762_vm2, %v14469_v20, %v14663_v11  ;;  %8367 = vmatpush.msk.msra.mxu3 %vm14727_vm8, %v20645_v44  ;;  %vm14936_vm0 = vcmp.eq.s32.totalorder %v4564_v13, 1  ;;  %vm14940_vm5 = vcmp.eq.s32.totalorder %v4845_v9, 1  ;;  %2501 = vrot.lane.b32.xlu1 %v20750_v28, %s9096_s18  ;;  %v15038_v20 = vpop.permute.xlu0 %2017  ;;  %v20840_v63 = vld [vmem:[#allocation40_spill] sm:$0xff] }
 0x350   : > { %20761 = vst [vmem:[#allocation150_spill] sm:$0xff] %v14921_v62  ;;  %vm14944_vm3 = vcmp.eq.s32.totalorder %v4118_v23, 38  ;;  %v1221_v50 = vand.u32 37, %v14260_v14  ;;  %vm20770_vm9 = vnez %v20712_v54  ;;  %v4284_v13 = vperm.slane %v14906_v21, 0  ;;  %8406 = vmatpush.msk.msra.mxu0 %vm14940_vm5, %v14927_v22  ;;  %v15036_v35 = vpop.permute.xlu1 %2489  ;;  %8381 = vmatpush.msk.msra.mxu1 %vm14936_vm0, %v20791_v32 }
 0x351   : > { %20763 = vst [vmem:[#allocation39_spill] sm:$0xff] %v14927_v22  ;;  %8390 = vmatpush.msk.msra.mxu2 %vm20770_vm9, %v20647_v46  ;;  %v14961_v9 = vsel %vm14908_vm10, 1, %v20607_v45  ;;  %v2573_v23 = vperm.slane %v14719_v27, 1  ;;  %vm14964_vm8 = vcmp.eq.s32.totalorder %v1458_v59, 17  ;;  %8368 = vmatpush.msk.msra.mxu3 %vm14838_vm4, %v20665_v58  ;;  %vm14972_vm15 = vcmp.eq.s32.totalorder %v2098_v8, 1  ;;  %v20835_v58 = vld [vmem:[#allocation99_spill] sm:$0xff] }
 0x352   : > { %vm14976_vm7 = vcmp.eq.s32.totalorder %v4424_v0, 1  ;;  %vm14980_vm10 = vcmp.eq.s32.totalorder %v2713_v51, 1  ;;  %v4705_v59 = vperm.slane %v14755_v15, 1  ;;  %vm20780_vm2 = vcmask 1043456   ;;  %v20836_v46 = vld [vmem:[#allocation85_spill] sm:$0xff] }
 0x353   : > { %8391 = vmatpush.msk.msra.mxu2 %vm20780_vm2, %v20779_v16  ;;  %vm14990_vm4 = vcmp.eq.s32.totalorder %v1861_v41, 1  ;;  %v14997_v39 = vsel %vm14944_vm3, 1, %v20607_v45  ;;  %v2336_v8 = vperm.slane %v14760_v60, 1  ;;  %vm15000_vm9 = vcmp.eq.s32.totalorder %v3978_v24, 6  ;;  %8369 = vmatpush.msk.msra.mxu3 %vm14842_vm14, %v20679_v48  ;;  %v20846_v48 = vld [vmem:[#allocation42_spill] sm:$0xff] }
 0x354   : > { %v1624_v16 = vperm.slane %v14961_v9, 0  ;;  %v15014_v18 = vsel %vm14964_vm8, 1, %v20607_v45  ;;  %vm15016_vm6 = vcmp.eq.s32.totalorder %v1221_v50, 37  ;;  %v3838_v41 = vand.u32 22, %v14260_v14 }
 0x355   : > { %8392 = vmatpush.msk.msra.mxu2 %vm14821_vm12, %v20680_v34  ;;  %vm15026_vm14 = vcmp.eq.s32.totalorder %v4284_v13, 1  ;;  %vm15030_vm5 = vcmp.eq.s32.totalorder %v2573_v23, 1  ;;  %v4565_v25 = vperm.slane %v14812_v37, 1  ;;  %v984_v24 = vand.u32 5, %v14260_v14  ;;  %8370 = vmatpush.msk.msra.mxu3 %vm14886_vm13, %v20692_v49  ;;  %v20793_v49 = vld [vmem:[#allocation75_spill] sm:$0xff] }
 0x356   : > { %v4144_v50 = vperm.slane %v14997_v39, 0  ;;  %v15050_v13 = vsel %vm15000_vm9, 1, %v20607_v45  ;;  %vm3842_vm12 = vcmp.eq.s32.totalorder %v3838_v41, 22  ;;  %v3698_v23 = vand.u32 40, %v14260_v14  ;;  %1792 = vrot.lane.b32.xlu2 %v20793_v49, %s9095_s9  ;;  %2029 = vrot.lane.b32.xlu0 %v20793_v49, %s9093_s10  ;;  %v20815_v34 = vld [vmem:[#allocation55_spill] sm:$0xff] }
 0x357   : > { %20792 = vst [vmem:[#allocation49_spill] sm:$0xff] %v15050_v13  ;;  %8393 = vmatpush.msk.msra.mxu2 %vm14865_vm11, %v14414_v47  ;;  %vm15058_vm13 = vcmp.eq.s32.totalorder %v4705_v59, 1  ;;  %v1484_v6 = vperm.slane %v15014_v18, 0  ;;  %v15066_v0 = vsel %vm15016_vm6, 1, %v20607_v45  ;;  %vm988_vm0 = vcmp.eq.s32.totalorder %v984_v24, 5  ;;  %8371 = vmatpush.msk.msra.mxu3 %vm14972_vm15, %v20797_v19  ;;  %v20803_v24 = vld [vmem:[#allocation67_spill] sm:$0xff] }
 0x358   : > { %20796 = vst [vmem:[#allocation151_spill] sm:$0xff] %v15066_v0  ;;  %vm15073_vm11 = vcmp.eq.s32.totalorder %v1624_v16, 1  ;;  %vm15077_vm3 = vcmp.eq.s32.totalorder %v2336_v8, 1  ;;  %v2099_v51 = vperm.slane %v14828_v29, 1  ;;  %v15083_v22 = vsel %vm3842_vm12, 1, %v20607_v45  ;;  %8382 = vmatpush.msk.msra.mxu1 %vm14976_vm7, %v20803_v24  ;;  %v20807_v19 = vld [vmem:[#allocation154_spill] sm:$0xff]  ;;  %8407 = vmatpush.msk.msra.mxu0 %vm15058_vm13, %v20810_v17  ;;  %v15187_v41 = vpop.permute.xlu1 %2491 }
 0x359   : > { %20802 = vst [vmem:[#allocation192_spill] sm:$0xff] %v15083_v22  ;;  %8394 = vmatpush.msk.msra.mxu2 %vm14897_vm1, %v20715_v2  ;;  %v4004_v54 = vperm.slane %v15050_v13, 0  ;;  %vm15092_vm8 = vcmp.eq.s32.totalorder %v4565_v25, 1  ;;  %v15097_v16 = vsel %vm988_vm0, 1, %v20607_v45  ;;  %vm3702_vm15 = vcmp.eq.s32.totalorder %v3698_v23, 40  ;;  %8372 = vmatpush.msk.msra.mxu3 %vm14990_vm4, %v20807_v19  ;;  %v15124_v23 = vpop.permute.xlu2 %1401 }
 0x35a   : > { %20806 = vst [vmem:[#allocation162_spill] sm:$0xff] %v15097_v16  ;;  %vm15102_vm2 = vcmp.eq.s32.totalorder %v4144_v50, 1  ;;  %v1247_v25 = vperm.slane %v15066_v0, 0  ;;  %v15111_v24 = vsel %vm3702_vm15, 1, %v20607_v45  ;;  %v747_v2 = vand.u32 21, %v14260_v14  ;;  %8383 = vmatpush.msk.msra.mxu1 %vm15026_vm14, %v20812_v42  ;;  %8408 = vmatpush.msk.msra.mxu0 %vm15092_vm8, %v20816_v36  ;;  %v20832_v50 = vld [vmem:[#allocation203_spill] sm:$0xff] }
 0x35b   : > { %20811 = vst [vmem:[#allocation142_spill] sm:$0xff] %v15111_v24  ;;  %8395 = vmatpush.msk.msra.mxu2 %vm14980_vm10, %v20728_v52  ;;  %vm15120_vm1 = vcmp.eq.s32.totalorder %v1484_v6, 1  ;;  %v3864_v43 = vperm.slane %v15083_v22, 0  ;;  %v4425_v19 = vperm.slane %v14849_v31, 1  ;;  %v1862_v47 = vperm.slane %v14873_v30, 1  ;;  %8373 = vmatpush.msk.msra.mxu3 %vm15073_vm11, %v20815_v34 }
 0x35c   : > { %vm15135_vm7 = vcmp.eq.s32.totalorder %v2099_v51, 1  ;;  %v1010_v6 = vperm.slane %v15097_v16, 0  ;;  %vm751_vm10 = vcmp.eq.s32.totalorder %v747_v2, 21  ;;  %v3558_v52 = vand.u32 8, %v14260_v14  ;;  %8384 = vmatpush.msk.msra.mxu1 %vm15102_vm2, %v14921_v62  ;;  %v20822_v14 = vld [vmem:[#allocation146_spill] sm:$0xff]  ;;  %2503 = vrot.lane.b32.xlu1 %v20793_v49, %s9096_s18 }
 0x35d   : > { %8396 = vmatpush.msk.msra.mxu2 %vm15030_vm5, %v20736_v40  ;;  %vm15147_vm4 = vcmp.eq.s32.totalorder %v4004_v54, 1  ;;  %v3724_v59 = vperm.slane %v15111_v24, 0  ;;  %v4285_v51 = vperm.slane %v14906_v21, 1  ;;  %v15154_v2 = vsel %vm751_vm10, 1, %v20607_v45  ;;  %8374 = vmatpush.msk.msra.mxu3 %vm15120_vm1, %v20822_v14  ;;  %v20833_v14 = vld [vmem:[#allocation36_spill] sm:$0xff] }
 0x35e   : > { %20821 = vst [vmem:[#allocation135_spill] sm:$0xff] %v15154_v2  ;;  %vm15161_vm9 = vcmp.eq.s32.totalorder %v1247_v25, 1  ;;  %v773_v3 = vperm.slane %v15154_v2, 0  ;;  %v1625_v54 = vperm.slane %v14961_v9, 1  ;;  %vm3562_vm6 = vcmp.eq.s32.totalorder %v3558_v52, 8  ;;  %1411 = vrot.lane.b32.xlu2 %v20571_v5, %s9094_s8  ;;  %2264 = vrot.lane.b32.xlu0 %v20750_v28, %s9097_s15  ;;  %v20851_v25 = vld [vmem:[#allocation64_spill] sm:$0xff] }
 0x35f   : > { %8397 = vmatpush.msk.msra.mxu2 %vm15077_vm3, %v20749_v4  ;;  %vm15172_vm14 = vcmp.eq.s32.totalorder %v3864_v43, 1  ;;  %vm15176_vm5 = vcmp.eq.s32.totalorder %v4425_v19, 1  ;;  %vm15180_vm12 = vcmp.eq.s32.totalorder %v1862_v47, 1  ;;  %v15185_v52 = vsel %vm3562_vm6, 1, %v20607_v45  ;;  %v15189_v4 = vpop.permute.xlu0 %2252  ;;  %8385 = vmatpush.msk.msra.mxu1 %vm15147_vm4, %v20832_v50  ;;  %v20834_v45 = vld [vmem:[#allocation37_spill] sm:$0xff] }
 0x360   : > { %20831 = vst [vmem:[#allocation163_spill] sm:$0xff] %v15185_v52  ;;  %vm1042_vm13 = vcmp.eq.s32.totalorder %v1010_v6, 1  ;;  %v3584_v47 = vperm.slane %v15185_v52, 0  ;;  %v4145_v43 = vperm.slane %v14997_v39, 1  ;;  %v1485_v19 = vperm.slane %v15014_v18, 1  ;;  %8375 = vmatpush.msk.msra.mxu3 %vm15161_vm9, %v20833_v14  ;;  %v20839_v6 = vld [vmem:[#allocation139_spill] sm:$0xff] }
 0x361   : > { %8398 = vmatpush.msk.msra.mxu2 %vm15135_vm7, %v20834_v45  ;;  %vm20837_vm0 = vcmp.lt.s32.totalorder %v9948_v10, 17  ;;  %vm3756_vm11 = vcmp.eq.s32.totalorder %v3724_v59, 1  ;;  %vm4317_vm3 = vcmp.eq.s32.totalorder %v4285_v51, 1  ;;  %v3446_v44 = vperm.slane %v20839_v6, 2  ;;  %v20844_v45 = vld [vmem:[#allocation66_spill] sm:$0xff] }
 0x362   : > { %v15209_v34 = vsel %vm20837_vm0, %v20836_v46, %v20835_v58  ;;  %vm20842_vm8 = vcmp.lt.s32.totalorder %v9948_v10, 1  ;;  %8409 = vmatpush.msk.msra.mxu0 %vm15176_vm5, %v20844_v45  ;;  %vm805_vm15 = vcmp.eq.s32.totalorder %v773_v3, 1  ;;  %vm1657_vm2 = vcmp.eq.s32.totalorder %v1625_v54, 1  ;;  %v20845_v46 = vld [vmem:[#allocation92_spill] sm:$0xff] }
 0x363   : > { %20838 = vst [vmem:[#allocation187_spill] sm:$0xff] %v15209_v34  ;;  %v15216_v40 = vsel %vm20842_vm8, %v20841_v55, %v20840_v63  ;;  %8386 = vmatpush.msk.msra.mxu1 %vm15172_vm14, %v15209_v34  ;;  %8376 = vmatpush.msk.msra.mxu3 %vm1042_vm13, %v20845_v46  ;;  %vm15228_vm1 = vcmp.eq.s32.totalorder %v3584_v47, 1  ;;  %v4005_v55 = vperm.slane %v15050_v13, 1  ;;  %v1248_v51 = vperm.slane %v15066_v0, 1  ;;  %v20850_v54 = vld [vmem:[#allocation132_spill] sm:$0xff]  ;;  %v15240_v47 = vpop.permute.xlu2 %1782 }
 0x364   : > { %20843 = vst [vmem:[#allocation30_spill] sm:$0xff] %v15216_v40  ;;  %8399 = vmatpush.msk.msra.mxu2 %vm15180_vm12, %v20846_v48  ;;  %v3306_v8 = vperm.slane %v14448_v12, 2  ;;  %8410 = vmatpush.msk.msra.mxu0 %vm4317_vm3, %v15216_v40  ;;  %vm4177_vm7 = vcmp.eq.s32.totalorder %v4145_v43, 1  ;;  %vm1517_vm10 = vcmp.eq.s32.totalorder %v1485_v19, 1  ;;  %v4986_v3 = vperm.slane %v14497_v26, 2  ;;  %v20856_v19 = vld [vmem:[#allocation144_spill] sm:$0xff] }
 0x365   : > { %8387 = vmatpush.msk.msra.mxu1 %vm3756_vm11, %v20849_v38  ;;  %8377 = vmatpush.msk.msra.mxu3 %vm805_vm15, %v20850_v54  ;;  %vm3478_vm4 = vcmp.eq.s32.totalorder %v3446_v44, 1  ;;  %20852 = vst [vmem:[#allocation147_spill] sm:$0xff] %v15240_v47  ;;  %v3865_v14 = vperm.slane %v15083_v22, 1  ;;  %v1011_v46 = vperm.slane %v15097_v16, 1  ;;  %vm20853_vm9 = vcmp.lt.s32.totalorder %v9948_v10, 15  ;;  %v20859_v54 = vld [vmem:[#allocation110_spill] sm:$0xff] }
 0x366   : > { %8400 = vmatpush.msk.msra.mxu2 %vm1657_vm2, %v20851_v25  ;;  %v15248_v48 = vsel %vm20853_vm9, %v14661_v61, %v14857_v57  ;;  %v15250_v43 = vld.sshfl [vmem:[#allocation1] sm:$0xff pattern:$0x75316420]  ;;  %vm20857_vm6 = vcmp.lt.s32.totalorder %v9948_v10, 111  ;;  %vm15264_vm14 = vcmp.eq.s32.totalorder %v4005_v55, 1  ;;  %vm15268_vm5 = vcmp.eq.s32.totalorder %v1248_v51, 1  ;;  %1174 = vrot.lane.b32.xlu1 %v20571_v5, %s9092_s2 }
 0x367   : > { %20854 = vst [vmem:[#allocation182_spill] sm:$0xff] %v15248_v48  ;;  %6625 = vmatmul.f32.vlgmr.msra.gmra.mxu3 %v15250_v43  ;;  %8388 = vmatpush.msk.msra.mxu1 %vm15228_vm1, %v20856_v19  ;;  %v15260_v44 = vsel %vm20857_vm6, %v14467_v33, %v15036_v35  ;;  %vm15272_vm12 = vcmp.eq.s32.totalorder %v3306_v8, 1  ;;  %v3725_v45 = vperm.slane %v15111_v24, 1  ;;  %vm15280_vm13 = vcmp.eq.s32.totalorder %v4986_v3, 1  ;;  %v20868_v51 = vld [vmem:[#allocation143_spill] sm:$0xff]  ;;  %v20870_v47 = vld [vmem:[#allocation113_spill] sm:$0xff]  ;;  %v15300_v24 = vpop.permute.xlu0 %2254 }
 0x368   : > { %20855 = vst [vmem:[#allocation197_spill] sm:$0xff] %v15250_v43  ;;  %8411 = vmatpush.msk.msra.mxu0 %vm4177_vm7, %v15248_v48  ;;  %8401 = vmatpush.msk.msra.mxu2 %vm1517_vm10, %v20859_v54  ;;  %v774_v55 = vperm.slane %v15154_v2, 1  ;;  %v3134_v54 = vperm.slane %v20868_v51, 2  ;;  %v4846_v8 = vperm.slane %v14655_v53, 2  ;;  %vm20871_vm0 = vcmp.lt.s32.totalorder %v9948_v10, 16  ;;  %v15298_v2 = vpop.permute.xlu1 %1162  ;;  %v20873_v57 = vld [vmem:[#allocation186_spill] sm:$0xff] }
 0x369   : > { %20858 = vst [vmem:[#allocation41_spill] sm:$0xff] %v15260_v44  ;;  %8416 = vmatpush.msk.msrb.mxu1 %vm3478_vm4, %v14392_v7  ;;  %1413 = vrot.lane.b32.xlu2 %v20750_v28, %s9094_s8  ;;  %v20869_v7 = vld [vmem:[#allocation126_spill] sm:$0xff]  ;;  %vm3897_vm11 = vcmp.eq.s32.totalorder %v3865_v14, 1  ;;  %vm1043_vm3 = vcmp.eq.s32.totalorder %v1011_v46, 1  ;;  %v3585_v5 = vperm.slane %v15185_v52, 1  ;;  %v20874_v16 = vld [vmem:[#allocation211_spill] sm:$0xff] }
 0x36a   : > { %2266 = vrot.lane.b32.xlu0 %v20793_v49, %s9097_s15  ;;  %v15295_v3 = vsel %vm20871_vm0, %v20870_v47, %v20869_v7  ;;  %8402 = vmatpush.msk.msra.mxu2 %vm15268_vm5, %v20873_v57  ;;  %v2994_v22 = vperm.slane %v20874_v16, 2  ;;  %v3447_v47 = vperm.slane %v20839_v6, 3  ;;  %vm20875_vm8 = vcmp.lt.s32.totalorder %v9948_v10, 112  ;;  %v20877_v46 = vld [vmem:[#allocation98_spill] sm:$0xff]  ;;  %v20881_v61 = vld [vmem:[#allocation159_spill] sm:$0xff] }
 0x36b   : > { %20872 = vst [vmem:[#allocation82_spill] sm:$0xff] %v15295_v3  ;;  %8412 = vmatpush.msk.msra.mxu0 %vm15264_vm14, %v15295_v3  ;;  %v15314_v14 = vsel %vm20875_vm8, %v14663_v11, %v15189_v4  ;;  %vm4878_vm15 = vcmp.eq.s32.totalorder %v4846_v8, 1  ;;  %8417 = vmatpush.msk.msrb.mxu1 %vm15272_vm12, %v20791_v32  ;;  %vm20878_vm2 = vcmp.lt.s32.totalorder %v9948_v10, 17  ;;  %vm3757_vm1 = vcmp.eq.s32.totalorder %v3725_v45, 1  ;;  %v20880_v11 = vld [vmem:[#allocation87_spill] sm:$0xff] }
 0x36c   : > { %20876 = vst [vmem:[#allocation112_spill] sm:$0xff] %v15314_v14  ;;  %v15323_v57 = vsel %vm20878_vm2, %v20835_v58, %v20877_v46  ;;  %8432 = vmatpush.msk.msrb.mxu3 %vm15280_vm13, %v15260_v44  ;;  %8403 = vmatpush.msk.msra.mxu2 %vm1043_vm3, %v20880_v11  ;;  %vm806_vm7 = vcmp.eq.s32.totalorder %v774_v55, 1  ;;  %vm3166_vm10 = vcmp.eq.s32.totalorder %v3134_v54, 1  ;;  %v2854_v25 = vperm.slane %v20881_v61, 2  ;;  %v20882_v8 = vld [vmem:[#allocation51_spill] sm:$0xff]  ;;  %vm20893_vm12 = vmmov %vm20878_vm2  ;;  %v20895_v44 = vld [vmem:[#allocation117_spill] sm:$0xff] }
 0x36d   : > { %20879 = vst [vmem:[#allocation193_spill] sm:$0xff] %v15323_v57  ;;  %8413 = vmatpush.msk.msra.mxu0 %vm3897_vm11, %v15323_v57  ;;  %v3307_v59 = vperm.slane %v14448_v12, 3  ;;  %vm20883_vm4 = vcmask 1043456   ;;  %vm15334_vm9 = vcmp.eq.s32.totalorder %v3585_v5, 1  ;;  %v4987_v45 = vperm.slane %v14497_v26, 3  ;;  %v20887_v55 = vld [vmem:[#allocation111_spill] sm:$0xff]  ;;  %vm20898_vm13 = vmmov %vm20878_vm2 }
 0x36e   : > { %8418 = vmatpush.msk.msrb.mxu1 %vm20883_vm4, %v20882_v8  ;;  %8433 = vmatpush.msk.msrb.mxu3 %vm4878_vm15, %v15314_v14  ;;  %v15340_v33 = vld.sshfl [vmem:[#allocation1 + $0x8] sm:$0xff pattern:$0x75316420]  ;;  %vm20886_vm6 = vcmask 719872   ;;  %vm15345_vm14 = vcmp.eq.s32.totalorder %v2994_v22, 1  ;;  %vm15349_vm5 = vcmp.eq.s32.totalorder %v3447_v47, 1  ;;  %v15362_v22 = vpop.permute.xlu2 %1784  ;;  %vm20901_vm0 = vmmov %vm20878_vm2 }
 0x36f   : > { %7906 = vmatmul.msk.f32.vlgmr.msra.gmra.mxu1 %vm20886_vm6, %v15340_v33  ;;  %8414 = vmatpush.msk.msra.mxu0 %vm3757_vm1, %v20887_v55  ;;  %v2714_v11 = vperm.slane %v14713_v56, 2  ;;  %v20892_v8 = vld [vmem:[#allocation88_spill] sm:$0xff]  ;;  %20896 = vst [vmem:[#allocation167_spill] sm:$0xff] %v15362_v22  ;;  %v4706_v32 = vperm.slane %v14755_v15, 2  ;;  %v20897_v47 = vld [vmem:[#allocation101_spill] sm:$0xff]  ;;  %vm20904_vm11 = vmmov %vm20901_vm0  ;;  %vm15387_vm3 = vcmp.eq.s32.totalorder %v2854_v25, 1 }
 0x370   : > { %v15358_v14 = vsel %vm20893_vm12, %v20877_v46, %v20892_v8  ;;  %8404 = vmatpush.msk.msra.mxu2 %vm806_vm7, %v20895_v44  ;;  %8419 = vmatpush.msk.msrb.mxu1 %vm3166_vm10, %v20812_v42  ;;  %v15369_v12 = vsel %vm20898_vm13, %v20892_v8, %v20897_v47  ;;  %v20900_v26 = vld [vmem:[#allocation100_spill] sm:$0xff]  ;;  %v20906_v42 = vld [vmem:[#allocation50_spill] sm:$0xff]  ;;  %vm15391_vm8 = vcmp.eq.s32.totalorder %v3307_v59, 1  ;;  %vm20911_vm15 = vcmp.lt.s32.totalorder %v9948_v10, 111  ;;  %v20918_v5 = vld [vmem:[#allocation125_spill] sm:$0xff] }
 0x371   : > { %20894 = vst [vmem:[#allocation47_spill] sm:$0xff] %v15358_v14  ;;  %v15375_v46 = vsel %vm20901_vm0, %v20897_v47, %v20900_v26  ;;  %v20903_v14 = vld [vmem:[#allocation91_spill] sm:$0xff]  ;;  %6665 = vmatmul.f32.vlgmr.msra.gmra.mxu2 %v15250_v43  ;;  %8415 = vmatpush.msk.msra.mxu0 %vm15334_vm9, %v20906_v42  ;;  %v2574_v47 = vperm.slane %v14719_v27, 2  ;;  %vm15408_vm2 = vcmp.eq.s32.totalorder %v4987_v45, 1  ;;  %v3135_v59 = vperm.slane %v20868_v51, 3  ;;  %vm20922_vm10 = vmmov %vm20901_vm0  ;;  %v20924_v43 = vld [vmem:[#allocation80_spill] sm:$0xff] }
 0x372   : > { %20899 = vst [vmem:[#allocation188_spill] sm:$0xff] %v15369_v12  ;;  %v15381_v44 = vsel %vm20904_vm11, %v20900_v26, %v20903_v14  ;;  %v15399_v26 = vsel %vm20911_vm15, %v15036_v35, %v15187_v41  ;;  %8420 = vmatpush.msk.msrb.mxu1 %vm15345_vm14, %v14921_v62  ;;  %v4566_v58 = vperm.slane %v14812_v37, 2  ;;  %v4847_v35 = vperm.slane %v14655_v53, 3  ;;  %v20925_v53 = vld [vmem:[#allocation165_spill] sm:$0xff]  ;;  %1176 = vrot.lane.b32.xlu0 %v20750_v28, %s9092_s2  ;;  %v15455_v12 = vpop.permute.xlu0 %1164  ;;  %v20937_v22 = vld [vmem:[#allocation90_spill] sm:$0xff] }
 0x373   : > { %20902 = vst [vmem:[#allocation206_spill] sm:$0xff] %v15375_v46  ;;  %8443 = vmatpush.msk.msrb.mxu0 %vm15349_vm5, %v20810_v17  ;;  %vm15419_vm1 = vcmp.eq.s32.totalorder %v2714_v11, 1  ;;  %v2337_v45 = vperm.slane %v14760_v60, 2  ;;  %vm20919_vm7 = vcmp.lt.s32.totalorder %v9948_v10, 16  ;;  %v20921_v17 = vld [vmem:[#allocation104_spill] sm:$0xff]  ;;  %vm20926_vm4 = vcmp.lt.s32.totalorder %v9948_v10, 127  ;;  %8459 = vmatpush.msk.msrb.mxu2 %vm15408_vm2, %v15399_v26 }
 0x374   : > { %20905 = vst [vmem:[#allocation23_spill] sm:$0xff] %v15381_v44  ;;  %v20915_v44 = vld [vmem:[#allocation74_spill] sm:$0xff]  ;;  %v15428_v62 = vsel %vm20919_vm7, %v20869_v7, %v20918_v5  ;;  %v15434_v46 = vsel %vm20922_vm10, %v20903_v14, %v20921_v17  ;;  %v15440_v11 = vsel %vm20926_vm4, %v20925_v53, %v20924_v43  ;;  %8421 = vmatpush.msk.msrb.mxu1 %vm15387_vm3, %v20832_v50  ;;  %vm15447_vm9 = vcmp.eq.s32.totalorder %v4706_v32, 1  ;;  %v15453_v17 = vpop.permute.xlu1 %2019  ;;  %v20938_v50 = vld [vmem:[#allocation31_spill] sm:$0xff]  ;;  %vm20953_vm2 = vmmov %vm20926_vm4 }
 0x375   : > { %20912 = vst [vmem:[#allocation25_spill] sm:$0xff] %v15399_v26  ;;  %2505 = vrot.lane.b32.xlu1 %v20915_v44, %s9096_s18  ;;  %2268 = vrot.lane.b32.xlu2 %v20915_v44, %s9097_s15  ;;  %v2995_v14 = vperm.slane %v20874_v16, 3  ;;  %vm15463_vm6 = vcmp.eq.s32.totalorder %v2574_v47, 1  ;;  %v2100_v32 = vperm.slane %v14828_v29, 2  ;;  %vm20933_vm14 = vcmp.lt.s32.totalorder %v9948_v10, 112  ;;  %v20946_v26 = vld [vmem:[#allocation52_spill] sm:$0xff] }
 0x376   : > { %20920 = vst [vmem:[#allocation138_spill] sm:$0xff] %v15428_v62  ;;  %8444 = vmatpush.msk.msrb.mxu0 %vm15391_vm8, %v20816_v36  ;;  %v15472_v8 = vsel %vm20933_vm14, %v15189_v4, %v15300_v24  ;;  %vm15474_vm5 = vcmp.eq.s32.totalorder %v4847_v35, 1  ;;  %vm20939_vm12 = vcmp.lt.s32.totalorder %v9948_v10, 113  ;;  %8422 = vmatpush.msk.msrb.mxu1 %vm15419_vm1, %v15209_v34  ;;  %vm20941_vm13 = vcmask 719872   ;;  %v20952_v34 = vld [vmem:[#allocation141_spill] sm:$0xff]  ;;  %v15561_v53 = vpop.permute.xlu2 %1403  ;;  %v20995_v36 = vld [vmem:[#allocation208_spill] sm:$0xff] }
 0x377   : > { %20923 = vst [vmem:[#allocation95_spill] sm:$0xff] %v15434_v46  ;;  %v4707_v46 = vperm.slane %v14755_v15, 3  ;;  %v15482_v47 = vsel %vm20939_vm12, %v20938_v50, %v20937_v22  ;;  %7907 = vmatmul.msk.f32.vlgmr.msra.gmra.mxu0 %vm20941_vm13, %v15340_v33  ;;  %vm15489_vm0 = vcmp.eq.s32.totalorder %v3135_v59, 1  ;;  %vm15493_vm11 = vcmp.eq.s32.totalorder %v4566_v58, 1  ;;  %8460 = vmatpush.msk.msrb.mxu2 %vm15474_vm5, %v15472_v8  ;;  %vm20959_vm10 = vmmov %vm20939_vm12  ;;  %v20993_v50 = vld [vmem:[#allocation70_spill] sm:$0xff] }
 0x378   : > { %20927 = vst [vmem:[#allocation45_spill] sm:$0xff] %v15440_v11  ;;  %v2855_v35 = vperm.slane %v20881_v61, 3  ;;  %vm20947_vm3 = vcmask 1043456   ;;  %8434 = vmatpush.msk.msrb.mxu3 %vm15447_vm9, %v15482_v47  ;;  %vm15503_vm8 = vcmp.eq.s32.totalorder %v2337_v45, 1  ;;  %v4426_v59 = vperm.slane %v14849_v31, 2  ;;  %8423 = vmatpush.msk.msrb.mxu1 %vm15463_vm6, %v20849_v38  ;;  %v20998_v45 = vld [vmem:[#allocation63_spill] sm:$0xff] }
 0x379   : > { %20930 = vst [vmem:[#allocation120_spill] sm:$0xff] %v15455_v12  ;;  %8445 = vmatpush.msk.msrb.mxu0 %vm20947_vm3, %v20946_v26  ;;  %vm15508_vm15 = vcmp.eq.s32.totalorder %v4707_v46, 1  ;;  %v4567_v54 = vperm.slane %v14812_v37, 3  ;;  %v15517_v26 = vsel %vm20953_vm2, %v20924_v43, %v20952_v34  ;;  %vm15522_vm1 = vcmp.eq.s32.totalorder %v2995_v14, 1  ;;  %v21025_v28 = vld [vmem:[#allocation86_spill] sm:$0xff] }
 0x37a   : > { %20934 = vst [vmem:[#allocation184_spill] sm:$0xff] %v15472_v8  ;;  %v1863_v46 = vperm.slane %v14873_v30, 2  ;;  %v2715_v7 = vperm.slane %v14713_v56, 3  ;;  %vm20957_vm7 = vcmp.lt.s32.totalorder %v9948_v10, 1  ;;  %v15541_v38 = vsel %vm20959_vm10, %v20937_v22, %v15038_v20  ;;  %8435 = vmatpush.msk.msrb.mxu3 %vm15493_vm11, %v15440_v11  ;;  %8424 = vmatpush.msk.msrb.mxu1 %vm15503_vm8, %v20856_v19  ;;  %v20978_v8 = vld [vmem:[#allocation65_spill] sm:$0xff] }
 0x37b   : > { %20940 = vst [vmem:[#allocation43_spill] sm:$0xff] %v15482_v47  ;;  %v15535_v43 = vsel %vm20957_vm7, %v20840_v63, %v14955_v1  ;;  %8446 = vmatpush.msk.msrb.mxu0 %vm15489_vm0, %v15216_v40  ;;  %vm15549_vm4 = vcmp.eq.s32.totalorder %v2100_v32, 1  ;;  %v4286_v63 = vperm.slane %v14906_v21, 2  ;;  %vm15557_vm9 = vcmp.eq.s32.totalorder %v2855_v35, 1  ;;  %8461 = vmatpush.msk.msrb.mxu2 %vm15508_vm15, %v15541_v38  ;;  %vm20965_vm6 = vmmov %vm20957_vm7  ;;  %v20986_v35 = vld [vmem:[#allocation192_spill] sm:$0xff] }
 0x37c   : > { %20954 = vst [vmem:[#allocation84_spill] sm:$0xff] %v15517_v26  ;;  %v1626_v22 = vperm.slane %v14961_v9, 2  ;;  %v2575_v4 = vperm.slane %v14719_v27, 3  ;;  %v4427_v32 = vperm.slane %v14849_v31, 3  ;;  %v15573_v19 = vsel %vm20965_vm6, %v14955_v1, %v15124_v23  ;;  %2031 = vrot.lane.b32.xlu0 %v20915_v44, %s9093_s10  ;;  %v21014_v1 = vld [vmem:[#allocation168_spill] sm:$0xff] }
 0x37d   : > { %20958 = vst [vmem:[#allocation140_spill] sm:$0xff] %v15535_v43  ;;  %8447 = vmatpush.msk.msrb.mxu0 %vm15522_vm1, %v15248_v48  ;;  %1794 = vrot.lane.b32.xlu1 %v20915_v44, %s9095_s9  ;;  %vm4458_vm14 = vcmp.eq.s32.totalorder %v4426_v59, 1  ;;  %v4146_v25 = vperm.slane %v14997_v39, 2  ;;  %vm15581_vm5 = vcmp.eq.s32.totalorder %v4567_v54, 1  ;;  %vm15589_vm12 = vcmp.eq.s32.totalorder %v1863_v46, 1  ;;  %v20973_v54 = vld [vmem:[#allocation115_spill] sm:$0xff] }
 0x37e   : > { %20960 = vst [vmem:[#allocation32_spill] sm:$0xff] %v15541_v38  ;;  %1415 = vrot.lane.b32.xlu2 %v20793_v49, %s9094_s8  ;;  %vm15593_vm13 = vcmp.eq.s32.totalorder %v2715_v7, 1  ;;  %v1486_v59 = vperm.slane %v15014_v18, 2  ;;  %v2338_v58 = vperm.slane %v14760_v60, 3  ;;  %8425 = vmatpush.msk.msrb.mxu1 %vm15549_vm4, %v20973_v54  ;;  %vm15605_vm0 = vcmp.eq.s32.totalorder %v4286_v63, 1  ;;  %v15629_v54 = vpop.permute.xlu1 %2493  ;;  %v21001_v7 = vld [vmem:[#allocation142_spill] sm:$0xff] }
 0x37f   : > { %20966 = vst [vmem:[#allocation24_spill] sm:$0xff] %v15573_v19  ;;  %8448 = vmatpush.msk.msrb.mxu0 %vm15557_vm9, %v15295_v3  ;;  %v4006_v46 = vperm.slane %v15050_v13, 2  ;;  %vm15610_vm11 = vcmp.eq.s32.totalorder %v4427_v32, 1  ;;  %v4287_v44 = vperm.slane %v14906_v21, 3  ;;  %8436 = vmatpush.msk.msrb.mxu3 %vm4458_vm14, %v20978_v8  ;;  %vm15616_vm3 = vcmp.eq.s32.totalorder %v1626_v22, 1  ;;  %v15631_v3 = vpop.permute.xlu0 %2021  ;;  %v20983_v22 = vld [vmem:[#allocation201_spill] sm:$0xff] }
 0x380   : > { %vm15620_vm8 = vcmp.eq.s32.totalorder %v2575_v4, 1  ;;  %8462 = vmatpush.msk.msrb.mxu2 %vm15581_vm5, %v15517_v26  ;;  %v1249_v63 = vperm.slane %v15066_v0, 2  ;;  %v2101_v32 = vperm.slane %v14828_v29, 3  ;;  %8426 = vmatpush.msk.msrb.mxu1 %vm15589_vm12, %v20983_v22  ;;  %vm15639_vm15 = vcmp.eq.s32.totalorder %v4146_v25, 1  ;;  %v21015_v25 = vld [vmem:[#allocation136_spill] sm:$0xff]  ;;  %v21033_v48 = vld [vmem:[#allocation161_spill] sm:$0xff] }
 0x381   : > { %8449 = vmatpush.msk.msrb.mxu0 %vm15593_vm13, %v15323_v57  ;;  %v3866_v8 = vperm.slane %v20986_v35, 2  ;;  %vm15644_vm2 = vcmp.eq.s32.totalorder %v4287_v44, 1  ;;  %v4147_v40 = vperm.slane %v14997_v39, 3  ;;  %8437 = vmatpush.msk.msrb.mxu3 %vm15605_vm0, %v15535_v43  ;;  %vm15652_vm1 = vcmp.eq.s32.totalorder %v1486_v59, 1  ;;  %v20994_v44 = vld [vmem:[#allocation162_spill] sm:$0xff]  ;;  %s9029_s8 = scalar_lea.hbm %s18351_s7, 256 }
 0x382   : > { %vm15656_vm7 = vcmp.eq.s32.totalorder %v2338_v58, 1  ;;  %8463 = vmatpush.msk.msrb.mxu2 %vm15610_vm11, %v20993_v50  ;;  %v1012_v22 = vperm.slane %v20994_v44, 2  ;;  %v1864_v57 = vperm.slane %v14873_v30, 3  ;;  %vm20996_vm10 = vcmp.lt.s32.totalorder %v9948_v10, 15  ;;  %8427 = vmatpush.msk.msrb.mxu1 %vm15616_vm3, %v20998_v45  ;;  %v21007_v45 = vld [vmem:[#allocation124_spill] sm:$0xff]  ;;  %v21041_v58 = vld [vmem:[#allocation118_spill] sm:$0xff]  ;;  %p9031_p11 = scmp.lt.s32.totalorder %s9029_s8, %s9025_s22 }
 0x383   : > { %v15669_v59 = vsel %vm20996_vm10, %v20995_v36, %v15298_v2  ;;  %8450 = vmatpush.msk.msrb.mxu0 %vm15620_vm8, %v20887_v55  ;;  %vm15677_vm4 = vcmp.eq.s32.totalorder %v4006_v46, 1  ;;  %v3726_v50 = vperm.slane %v21001_v7, 2  ;;  %v4007_v30 = vperm.slane %v15050_v13, 3  ;;  %v21006_v55 = vld [vmem:[#allocation135_spill] sm:$0xff]  ;;  %vm21012_vm12 = vmmov %vm20996_vm10  ;;  %v21074_v36 = vld [vmem:[#allocation197_spill] sm:$0xff] }
 0x384   : > { %20997 = vst [vmem:[#allocation44_spill] sm:$0xff] %v15669_v59  ;;  %8438 = vmatpush.msk.msrb.mxu3 %vm15639_vm15, %v15669_v59  ;;  %vm15686_vm9 = vcmp.eq.s32.totalorder %v1249_v63, 1  ;;  %vm15690_vm6 = vcmp.eq.s32.totalorder %v2101_v32, 1  ;;  %8464 = vmatpush.msk.msrb.mxu2 %vm15644_vm2, %v15573_v19  ;;  %v775_v46 = vperm.slane %v21006_v55, 2  ;;  %v1627_v14 = vperm.slane %v14961_v9, 3  ;;  %v21027_v63 = vld [vmem:[#allocation81_spill] sm:$0xff]  ;;  %p9032_p9 = por %p9031_p11, %p9030_p2 }
 0x385   : > { %8428 = vmatpush.msk.msrb.mxu1 %vm15652_vm1, %v21007_v45  ;;  %8451 = vmatpush.msk.msrb.mxu0 %vm15656_vm7, %v20906_v42  ;;  %vm15705_vm14 = vcmp.eq.s32.totalorder %v3866_v8, 1  ;;  %v3586_v32 = vperm.slane %v15185_v52, 2  ;;  %vm15710_vm5 = vcmp.eq.s32.totalorder %v4147_v40, 1  ;;  %v3867_v4 = vperm.slane %v20986_v35, 3  ;;  %v15720_v42 = vpop.permute.xlu2 %1405  ;;  %v21039_v35 = vld [vmem:[#allocation128_spill] sm:$0xff] }
 0x386   : > { %1178 = vrot.lane.b32.xlu0 %v20793_v49, %s9092_s2  ;;  %8439 = vmatpush.msk.msrb.mxu3 %vm15677_vm4, %v15428_v62  ;;  %v15726_v8 = vsel %vm21012_vm12, %v15298_v2, %v15455_v12  ;;  %vm1044_vm13 = vcmp.eq.s32.totalorder %v1012_v22, 1  ;;  %vm1896_vm0 = vcmp.eq.s32.totalorder %v1864_v57, 1  ;;  %v1487_v40 = vperm.slane %v15014_v18, 3  ;;  %v21020_v22 = vld [vmem:[#allocation47_spill] sm:$0xff]  ;;  %v21036_v12 = vld [vmem:[#allocation38_spill] sm:$0xff]  ;;  %p9033_p10 = pnand %p9032_p9, %p9028_p8 }
 0x387   : > { %21013 = vst [vmem:[#allocation29_spill] sm:$0xff] %v15726_v8  ;;  %8429 = vmatpush.msk.msrb.mxu1 %vm15686_vm9, %v21014_v1  ;;  %8452 = vmatpush.msk.msrb.mxu0 %vm15690_vm6, %v21015_v25  ;;  %vm15735_vm11 = vcmp.eq.s32.totalorder %v3726_v50, 1  ;;  %v3448_v45 = vperm.slane %v20839_v6, 4  ;;  %vm15740_vm3 = vcmp.eq.s32.totalorder %v4007_v30, 1  ;;  %v3727_v57 = vperm.slane %v21001_v7, 3  ;;  %v21026_v25 = vld [vmem:[#allocation96_spill] sm:$0xff] }
 0x388   : > { %8440 = vmatpush.msk.msrb.mxu3 %vm15705_vm14, %v21020_v22  ;;  %vm15748_vm8 = vcmp.eq.s32.totalorder %v775_v46, 1  ;;  %vm15752_vm15 = vcmp.eq.s32.totalorder %v1627_v14, 1  ;;  %8465 = vmatpush.msk.msrb.mxu2 %vm15710_vm5, %v15726_v8  ;;  %v1250_v30 = vperm.slane %v15066_v0, 3  ;;  %v4988_v1 = vperm.slane %v21025_v28, 4  ;;  %v21030_v14 = vld [vmem:[#allocation116_spill] sm:$0xff]  ;;  %v21042_v2 = vld [vmem:[#allocation62_spill] sm:$0xff] }
 0x389   : > { %8430 = vmatpush.msk.msrb.mxu1 %vm1044_vm13, %v21026_v25  ;;  %8453 = vmatpush.msk.msrb.mxu0 %vm1896_vm0, %v21027_v63  ;;  %vm15763_vm2 = vcmp.eq.s32.totalorder %v3586_v32, 1  ;;  %vm21031_vm1 = vcmp.lt.s32.totalorder %v9948_v10, 16  ;;  %v3308_v7 = vperm.slane %v21033_v48, 4  ;;  %vm15774_vm7 = vcmp.eq.s32.totalorder %v3867_v4, 1  ;;  %v15790_v4 = vpop.permute.xlu1 %2495  ;;  %v15792_v63 = vpop.permute.xlu0 %2256  ;;  %v21060_v0 = vld [vmem:[#allocation123_spill] sm:$0xff] }
 0x38a   : > { %v15771_v49 = vsel %vm21031_vm1, %v20918_v5, %v21030_v14  ;;  %8441 = vmatpush.msk.msrb.mxu3 %vm15735_vm11, %v21036_v12  ;;  %vm15781_vm10 = vcmp.eq.s32.totalorder %v1487_v40, 1  ;;  %v1013_v5 = vperm.slane %v20994_v44, 3  ;;  %v3587_v25 = vperm.slane %v15185_v52, 3  ;;  %vm21040_vm4 = vmmov %vm21031_vm1  ;;  %v21156_v52 = vld [vmem:[#allocation68_spill] sm:$0xff] }
 0x38b   : > { %21032 = vst [vmem:[#allocation35_spill] sm:$0xff] %v15771_v49  ;;  %8466 = vmatpush.msk.msrb.mxu2 %vm15740_vm3, %v15771_v49  ;;  %v15798_v40 = vsel %vm21040_vm4, %v21030_v14, %v21039_v35  ;;  %8431 = vmatpush.msk.msrb.mxu1 %vm15748_vm8, %v21041_v58  ;;  %vm15806_vm9 = vcmp.eq.s32.totalorder %v3448_v45, 1  ;;  %vm15810_vm6 = vcmp.eq.s32.totalorder %v3727_v57, 1  ;;  %v776_v49 = vperm.slane %v21006_v55, 3  ;;  %v21047_v35 = vld [vmem:[#allocation183_spill] sm:$0xff]  ;;  %v21052_v57 = vld [vmem:[#allocation188_spill] sm:$0xff] }
 0x38c   : > { %8454 = vmatpush.msk.msrb.mxu0 %vm15752_vm15, %v21042_v2  ;;  %v3136_v14 = vperm.slane %v20868_v51, 4  ;;  %8442 = vmatpush.msk.msrb.mxu3 %vm15763_vm2, %v21047_v35  ;;  %vm15819_vm14 = vcmp.eq.s32.totalorder %v1250_v30, 1  ;;  %vm21050_vm5 = vcmp.lt.s32.totalorder %v9948_v10, 111  ;;  %vm15832_vm12 = vcmp.eq.s32.totalorder %v4988_v1, 1  ;;  %v21055_v30 = vld [vmem:[#allocation147_spill] sm:$0xff]  ;;  %v21061_v1 = vld [vmem:[#allocation137_spill] sm:$0xff] }
 0x38d   : > { %v15827_v45 = vsel %vm21050_vm5, %v15187_v41, %v15629_v54  ;;  %8467 = vmatpush.msk.msrb.mxu2 %vm15774_vm7, %v21052_v57  ;;  %v3449_v46 = vperm.slane %v20839_v6, 5  ;;  %vm21056_vm13 = vcmp.lt.s32.totalorder %v9948_v10, 127  ;;  %v21057_v2 = vld [vmem:[#allocation167_spill] sm:$0xff]  ;;  %vm21059_vm11 = vcmask 719872   ;;  %6705 = vmatmul.f32.vlgmr.msrb.gmra.mxu1 %v21074_v36 }
 0x38e   : > { %21051 = vst [vmem:[#allocation166_spill] sm:$0xff] %v15827_v45  ;;  %v15841_v58 = vsel %vm21056_vm13, %v20952_v34, %v21055_v30  ;;  %vm21058_vm0 = vmmov %vm21056_vm13  ;;  %7908 = vmatmul.msk.f32.vlgmr.msrb.gmra.mxu3 %vm21059_vm11, %v15340_v33  ;;  %8455 = vmatpush.msk.msrb.mxu0 %vm15781_vm10, %v21060_v0  ;;  %vm3340_vm3 = vcmp.eq.s32.totalorder %v3308_v7, 1  ;;  %v4848_v55 = vperm.slane %v21061_v1, 4  ;;  %vm15858_vm8 = vcmp.eq.s32.totalorder %v1013_v5, 1  ;;  %v21068_v5 = vld [vmem:[#allocation89_spill] sm:$0xff] }
 0x38f   : > { %v15847_v41 = vsel %vm21058_vm0, %v21055_v30, %v21057_v2  ;;  %8470 = vmatpush.msk.msra.mxu3 %vm15806_vm9, %v15482_v47  ;;  %v21064_v30 = vld [vmem:[#allocation190_spill] sm:$0xff]  ;;  %vm15865_vm15 = vcmp.eq.s32.totalorder %v3587_v25, 1  ;;  %v3309_v7 = vperm.slane %v21033_v48, 5  ;;  %v4989_v32 = vperm.slane %v21025_v28, 5  ;;  %8486 = vmatpush.msk.msra.mxu1 %vm15832_vm12, %v15827_v45  ;;  %v21077_v45 = vld [vmem:[#allocation152_spill] sm:$0xff]  ;;  %v21078_v47 = vld [vmem:[#allocation39_spill] sm:$0xff] }
 0x390   : > { %8468 = vmatpush.msk.msrb.mxu2 %vm15810_vm6, %v21064_v30  ;;  %vm21067_vm2 = vcmp.lt.s32.totalorder %v9948_v10, 1  ;;  %8456 = vmatpush.msk.msrb.mxu0 %vm15819_vm14, %v21068_v5  ;;  %vm15883_vm1 = vcmp.eq.s32.totalorder %v776_v49, 1  ;;  %vm15887_vm7 = vcmp.eq.s32.totalorder %v3136_v14, 1  ;;  %v2996_v0 = vperm.slane %v20874_v16, 4  ;;  %v21083_v34 = vld [vmem:[#allocation53_spill] sm:$0xff]  ;;  %vm21085_vm14 = vmmov %vm21059_vm11 }
 0x391   : > { %v15875_v44 = vsel %vm21067_vm2, %v15124_v23, %v15561_v53  ;;  %8471 = vmatpush.msk.msra.mxu3 %vm3340_vm3, %v15440_v11  ;;  %v15893_v23 = vpop.permute.xlu2 %1786  ;;  %vm15896_vm10 = vcmp.eq.s32.totalorder %v3449_v46, 1  ;;  %v2856_v49 = vperm.slane %v20881_v61, 4  ;;  %v2716_v50 = vperm.slane %v14713_v56, 4  ;;  %vm21094_vm11 = vmmov %vm21067_vm2  ;;  %v15980_v5 = vpop.permute.xlu1 %1166  ;;  %v21128_v11 = vld [vmem:[#allocation69_spill] sm:$0xff] }
 0x392   : > { %21073 = vst [vmem:[#allocation57_spill] sm:$0xff] %v15893_v23  ;;  %v4708_v14 = vperm.slane %v14755_v15, 4  ;;  %8457 = vmatpush.msk.msrb.mxu0 %vm15858_vm8, %v21077_v45  ;;  %8469 = vmatpush.msk.msrb.mxu2 %vm15865_vm15, %v21078_v47  ;;  %vm21079_vm4 = vcmp.lt.s32.totalorder %v9948_v10, 112  ;;  %vm15915_vm9 = vcmp.eq.s32.totalorder %v4848_v55, 1  ;;  %v2576_v23 = vperm.slane %v14719_v27, 4  ;;  %v21191_v55 = vld [vmem:[#allocation170_spill] sm:$0xff] }
 0x393   : > { %v15913_v46 = vsel %vm21079_vm4, %v15300_v24, %v15792_v63  ;;  %v3137_v28 = vperm.slane %v20868_v51, 5  ;;  %vm21084_vm6 = vcmask 1043456   ;;  %7909 = vmatmul.msk.f32.vlgmr.msrb.gmra.mxu2 %vm21085_vm14, %v15340_v33  ;;  %vm15925_vm5 = vcmp.eq.s32.totalorder %v3309_v7, 1 }
 0x394   : > { %21080 = vst [vmem:[#allocation114_spill] sm:$0xff] %v15913_v46  ;;  %8472 = vmatpush.msk.msra.mxu3 %vm21084_vm6, %v21083_v34  ;;  %vm21088_vm12 = vcmp.lt.s32.totalorder %v9948_v10, 111  ;;  %vm15935_vm13 = vcmp.eq.s32.totalorder %v4989_v32, 1  ;;  %v4568_v2 = vperm.slane %v14812_v37, 4  ;;  %vm21092_vm0 = vcmp.lt.s32.totalorder %v9948_v10, 113  ;;  %8497 = vmatpush.msk.msra.mxu2 %vm15896_vm10, %v15541_v38 }
 0x395   : > { %v15933_v24 = vsel %vm21088_vm12, %v15629_v54, %v15790_v4  ;;  %v15944_v7 = vsel %vm21092_vm0, %v15038_v20, %v15453_v17  ;;  %v15950_v34 = vsel %vm21094_vm11, %v15561_v53, %v15720_v42  ;;  %v21095_v54 = vld [vmem:[#allocation129_spill] sm:$0xff]  ;;  %vm15955_vm3 = vcmp.eq.s32.totalorder %v2996_v0, 1  ;;  %vm21098_vm8 = vmmov %vm21092_vm0  ;;  %8487 = vmatpush.msk.msra.mxu1 %vm15915_vm9, %v15913_v46  ;;  %v21143_v46 = vld [vmem:[#allocation142_spill] sm:$0xff] }
 0x396   : > { %21089 = vst [vmem:[#allocation195_spill] sm:$0xff] %v15933_v24  ;;  %8458 = vmatpush.msk.msrb.mxu0 %vm15883_vm1, %v21095_v54  ;;  %v2339_v20 = vperm.slane %v14760_v60, 4  ;;  %v15967_v53 = vsel %vm21098_vm8, %v15453_v17, %v15631_v3  ;;  %8473 = vmatpush.msk.msra.mxu3 %vm15887_vm7, %v15535_v43  ;;  %vm15975_vm15 = vcmp.eq.s32.totalorder %v4708_v14, 1  ;;  %v2997_v0 = vperm.slane %v20874_v16, 5  ;;  %v15983_v17 = vpop.permute.xlu0 %2258  ;;  %vm21112_vm9 = vmmov %vm21084_vm6  ;;  %v21168_v43 = vld [vmem:[#allocation67_spill] sm:$0xff] }
 0x397   : > { %21093 = vst [vmem:[#allocation169_spill] sm:$0xff] %v15944_v7  ;;  %v4428_v54 = vperm.slane %v14849_v31, 4  ;;  %vm15985_vm2 = vcmp.eq.s32.totalorder %v2856_v49, 1  ;;  %8498 = vmatpush.msk.msra.mxu2 %vm15925_vm5, %v15517_v26  ;;  %vm15992_vm1 = vcmp.eq.s32.totalorder %v2716_v50, 1  ;;  %vm15999_vm7 = vcmp.eq.s32.totalorder %v2576_v23, 1  ;;  %6745 = vmatmul.f32.vlgmr.msrb.gmra.mxu0 %v21074_v36  ;;  %v21125_v50 = vld [vmem:[#allocation196_spill] sm:$0xff] }
 0x398   : > { %8513 = vmatpush.msk.msra.mxu0 %vm15935_vm13, %v15933_v24  ;;  %vm16003_vm10 = vcmp.eq.s32.totalorder %v3137_v28, 1  ;;  %8474 = vmatpush.msk.msra.mxu3 %vm15955_vm3, %v15669_v59  ;;  %vm16011_vm4 = vcmp.eq.s32.totalorder %v4568_v2, 1  ;;  %v2857_v14 = vperm.slane %v20881_v61, 5  ;;  %v4288_v23 = vperm.slane %v14906_v21, 4  ;;  %v21111_v28 = vld [vmem:[#allocation54_spill] sm:$0xff]  ;;  %v21136_v26 = vld [vmem:[#allocation35_spill] sm:$0xff] }
 0x399   : > { %v4849_v45 = vperm.slane %v21061_v1, 5  ;;  %8499 = vmatpush.msk.msra.mxu2 %vm21112_vm9, %v21111_v28  ;;  %8488 = vmatpush.msk.msra.mxu1 %vm15975_vm15, %v15944_v7  ;;  %vm16023_vm6 = vcmp.eq.s32.totalorder %v2339_v20, 1  ;;  %vm21115_vm14 = vcmp.lt.s32.totalorder %v9948_v10, 112  ;;  %v2717_v32 = vperm.slane %v14713_v56, 5  ;;  %v16060_v28 = vpop.permute.xlu2 %1788  ;;  %v16130_v49 = vpop.permute.xlu1 %2023 }
 0x39a   : > { %v16031_v2 = vsel %vm21115_vm14, %v15792_v63, %v15983_v17  ;;  %v4709_v24 = vperm.slane %v14755_v15, 5  ;;  %8475 = vmatpush.msk.msra.mxu3 %vm15985_vm2, %v15428_v62  ;;  %vm16038_vm5 = vcmp.eq.s32.totalorder %v2997_v0, 1  ;;  %vm16042_vm12 = vcmp.eq.s32.totalorder %v4428_v54, 1  ;;  %v21160_v62 = vld [vmem:[#allocation176_spill] sm:$0xff] }
 0x39b   : > { %21116 = vst [vmem:[#allocation164_spill] sm:$0xff] %v16031_v2  ;;  %vm4881_vm13 = vcmp.eq.s32.totalorder %v4849_v45, 1  ;;  %v4148_v63 = vperm.slane %v14997_v39, 4  ;;  %8500 = vmatpush.msk.msra.mxu2 %vm16003_vm10, %v15573_v19  ;;  %8489 = vmatpush.msk.msra.mxu1 %vm16011_vm4, %v15841_v58  ;;  %v2102_v38 = vperm.slane %v14828_v29, 4  ;;  %v2577_v0 = vperm.slane %v14719_v27, 5 }
 0x39c   : > { %vm16055_vm0 = vcmp.eq.s32.totalorder %v4709_v24, 1  ;;  %v4008_v45 = vperm.slane %v15050_v13, 4  ;;  %8476 = vmatpush.msk.msra.mxu3 %vm15992_vm1, %v21020_v22  ;;  %vm16065_vm11 = vcmp.eq.s32.totalorder %v2857_v14, 1  ;;  %v1865_v19 = vperm.slane %v21125_v50, 4  ;;  %8514 = vmatpush.msk.msra.mxu0 %vm4881_vm13, %v16031_v2  ;;  %v21153_v14 = vld [vmem:[#allocation191_spill] sm:$0xff] }
 0x39d   : > { %vm16070_vm3 = vcmp.eq.s32.totalorder %v4288_v23, 1  ;;  %v4569_v24 = vperm.slane %v14812_v37, 5  ;;  %8501 = vmatpush.msk.msra.mxu2 %vm16038_vm5, %v15726_v8  ;;  %8490 = vmatpush.msk.msra.mxu1 %vm16042_vm12, %v21128_v11  ;;  %vm16082_vm8 = vcmp.eq.s32.totalorder %v2717_v32, 1  ;;  %v1628_v23 = vperm.slane %v14961_v9, 4  ;;  %v21133_v32 = vld [vmem:[#allocation192_spill] sm:$0xff]  ;;  %v21158_v8 = vld [vmem:[#allocation151_spill] sm:$0xff] }
 0x39e   : > { %v1488_v22 = vperm.slane %v15014_v18, 4  ;;  %v2340_v2 = vperm.slane %v14760_v60, 5  ;;  %8477 = vmatpush.msk.msra.mxu3 %vm15999_vm7, %v21036_v12  ;;  %vm16092_vm15 = vcmp.eq.s32.totalorder %v4148_v63, 1  ;;  %8515 = vmatpush.msk.msra.mxu0 %vm16055_vm0, %v15967_v53  ;;  %v3868_v20 = vperm.slane %v21133_v32, 4  ;;  %v21137_v12 = vld [vmem:[#allocation120_spill] sm:$0xff] }
 0x39f   : > { %vm4601_vm2 = vcmp.eq.s32.totalorder %v4569_v24, 1  ;;  %v4429_v11 = vperm.slane %v14849_v31, 5  ;;  %vm16101_vm1 = vcmp.eq.s32.totalorder %v2102_v38, 1  ;;  %8502 = vmatpush.msk.msra.mxu2 %vm16065_vm11, %v21136_v26  ;;  %vm21138_vm7 = vcmp.lt.s32.totalorder %v9948_v10, 15  ;;  %8491 = vmatpush.msk.msra.mxu1 %vm16070_vm3, %v15875_v44 }
 0x3a0   : > { %v16112_v25 = vsel %vm21138_vm7, %v21137_v12, %v15980_v5  ;;  %vm16117_vm10 = vcmp.eq.s32.totalorder %v2577_v0, 1  ;;  %vm16121_vm4 = vcmp.eq.s32.totalorder %v4008_v45, 1  ;;  %8478 = vmatpush.msk.msra.mxu3 %vm16023_vm6, %v21047_v35  ;;  %8516 = vmatpush.msk.msra.mxu0 %vm4601_vm2, %v15847_v41  ;;  %v2103_v54 = vperm.slane %v14828_v29, 5  ;;  %v21157_v12 = vld [vmem:[#allocation163_spill] sm:$0xff]  ;;  %v21165_v45 = vld [vmem:[#allocation206_spill] sm:$0xff] }
 0x3a1   : > { %vm4461_vm9 = vcmp.eq.s32.totalorder %v4429_v11, 1  ;;  %v3728_v0 = vperm.slane %v21143_v46, 4  ;;  %v4289_v24 = vperm.slane %v14906_v21, 5  ;;  %vm16134_vm14 = vcmp.eq.s32.totalorder %v1865_v19, 1  ;;  %8503 = vmatpush.msk.msra.mxu2 %vm16082_vm8, %v21052_v57  ;;  %8492 = vmatpush.msk.msra.mxu1 %vm16092_vm15, %v16112_v25  ;;  %v16156_v11 = vpop.permute.xlu0 %1168  ;;  %vm21166_vm8 = vmmov %vm21138_vm7  ;;  %v16206_v59 = vpop.permute.xlu2 %1407  ;;  %v21177_v35 = vld [vmem:[#allocation135_spill] sm:$0xff] }
 0x3a2   : > { %vm16141_vm6 = vcmp.eq.s32.totalorder %v1628_v23, 1  ;;  %vm16148_vm5 = vcmp.eq.s32.totalorder %v1488_v22, 1  ;;  %vm16152_vm12 = vcmp.eq.s32.totalorder %v2340_v2, 1  ;;  %21152 = vst [vmem:[#allocation93_spill] sm:$0xff] %v16156_v11  ;;  %8479 = vmatpush.msk.msra.mxu3 %vm16101_vm1, %v21153_v14  ;;  %vm16161_vm13 = vcmp.eq.s32.totalorder %v3868_v20, 1  ;;  %8517 = vmatpush.msk.msra.mxu0 %vm4461_vm9, %v21156_v52  ;;  %v21159_v14 = vld [vmem:[#allocation162_spill] sm:$0xff] }
 0x3a3   : > { %v1866_v22 = vperm.slane %v21125_v50, 5  ;;  %vm4321_vm0 = vcmp.eq.s32.totalorder %v4289_v24, 1  ;;  %v3588_v2 = vperm.slane %v21157_v12, 4  ;;  %8504 = vmatpush.msk.msra.mxu2 %vm16117_vm10, %v21064_v30  ;;  %8493 = vmatpush.msk.msra.mxu1 %vm16121_vm4, %v15798_v40  ;;  %v1251_v20 = vperm.slane %v21158_v8, 4  ;;  %v21175_v23 = vld [vmem:[#allocation105_spill] sm:$0xff] }
 0x3a4   : > { %v1014_v57 = vperm.slane %v21159_v14, 4  ;;  %v4149_v26 = vperm.slane %v14997_v39, 5  ;;  %v3450_v52 = vperm.slane %v20839_v6, 6  ;;  %8480 = vmatpush.msk.msra.mxu3 %vm16134_vm14, %v21160_v62  ;;  %vm16181_vm11 = vcmp.eq.s32.totalorder %v2103_v54, 1  ;;  %8518 = vmatpush.msk.msra.mxu0 %vm4321_vm0, %v15950_v34 }
 0x3a5   : > { %vm16185_vm3 = vcmp.eq.s32.totalorder %v3728_v0, 1  ;;  %v1629_v63 = vperm.slane %v14961_v9, 5  ;;  %v4009_v38 = vperm.slane %v15050_v13, 5  ;;  %8505 = vmatpush.msk.msra.mxu2 %vm16152_vm12, %v21078_v47  ;;  %8494 = vmatpush.msk.msra.mxu1 %vm16161_vm13, %v21165_v45  ;;  %v16202_v62 = vsel %vm21166_vm8, %v15980_v5, %v16156_v11  ;;  %v21180_v11 = vld [vmem:[#allocation127_spill] sm:$0xff] }
 0x3a6   : > { %21167 = vst [vmem:[#allocation189_spill] sm:$0xff] %v16202_v62  ;;  %vm4181_vm15 = vcmp.eq.s32.totalorder %v4149_v26, 1  ;;  %v3310_v54 = vperm.slane %v21033_v48, 6  ;;  %v3869_v0 = vperm.slane %v21133_v32, 5  ;;  %8481 = vmatpush.msk.msra.mxu3 %vm16141_vm6, %v21168_v43  ;;  %vm16211_vm2 = vcmp.eq.s32.totalorder %v1866_v22, 1  ;;  %v21176_v43 = vld [vmem:[#allocation41_spill] sm:$0xff] }
 0x3a7   : > { %vm16215_vm1 = vcmp.eq.s32.totalorder %v3588_v2, 1  ;;  %8519 = vmatpush.msk.msra.mxu0 %vm4181_vm15, %v16202_v62  ;;  %v1489_v26 = vperm.slane %v15014_v18, 5  ;;  %vm4041_vm7 = vcmp.eq.s32.totalorder %v4009_v38, 1  ;;  %vm16221_vm10 = vcmp.eq.s32.totalorder %v1251_v20, 1  ;;  %8506 = vmatpush.msk.msra.mxu2 %vm16181_vm11, %v21175_v23  ;;  %v21181_v38 = vld [vmem:[#allocation128_spill] sm:$0xff]  ;;  %v21202_v5 = vld [vmem:[#allocation103_spill] sm:$0xff] }
 0x3a8   : > { %8495 = vmatpush.msk.msra.mxu1 %vm16185_vm3, %v21176_v43  ;;  %v777_v22 = vperm.slane %v21177_v35, 4  ;;  %vm16232_vm4 = vcmp.eq.s32.totalorder %v3450_v52, 1  ;;  %vm21182_vm9 = vcmp.lt.s32.totalorder %v9948_v10, 16  ;;  %v21184_v32 = vld [vmem:[#allocation108_spill] sm:$0xff]  ;;  %vm16245_vm14 = vcmp.eq.s32.totalorder %v1629_v63, 1  ;;  %v21206_v62 = vld [vmem:[#allocation57_spill] sm:$0xff] }
 0x3a9   : > { %v16240_v20 = vsel %vm21182_vm9, %v21181_v38, %v21180_v11  ;;  %8482 = vmatpush.msk.msra.mxu3 %vm16148_vm5, %v21184_v32  ;;  %v1252_v52 = vperm.slane %v21158_v8, 5  ;;  %vm16251_vm6 = vcmp.eq.s32.totalorder %v3869_v0, 1  ;;  %v1015_v23 = vperm.slane %v21159_v14, 5  ;;  %8507 = vmatpush.msk.msra.mxu2 %vm16211_vm2, %v21191_v55  ;;  %v21192_v32 = vld [vmem:[#allocation112_spill] sm:$0xff]  ;;  %v16270_v0 = vpop.permute.xlu1 %2497  ;;  %v21196_v8 = vld [vmem:[#allocation150_spill] sm:$0xff]  ;;  %v21199_v55 = vld [vmem:[#allocation119_spill] sm:$0xff] }
 0x3aa   : > { %21183 = vst [vmem:[#allocation199_spill] sm:$0xff] %v16240_v20  ;;  %8520 = vmatpush.msk.msra.mxu0 %vm4041_vm7, %v16240_v20  ;;  %vm16256_vm12 = vcmp.eq.s32.totalorder %v1014_v57, 1  ;;  %8496 = vmatpush.msk.msra.mxu1 %vm16215_vm1, %v21192_v32  ;;  %vm16266_vm5 = vcmp.eq.s32.totalorder %v3310_v54, 1  ;;  %v3729_v14 = vperm.slane %v21143_v46, 5  ;;  %v21195_v57 = vld [vmem:[#allocation86_spill] sm:$0xff]  ;;  %vm16277_vm13 = vcmp.eq.s32.totalorder %v1489_v26, 1  ;;  %v16284_v54 = vpop.permute.xlu0 %2025  ;;  %vm21200_vm0 = vmmov %vm21182_vm9 }
 0x3ab   : > { %v4990_v20 = vperm.slane %v21195_v57, 6  ;;  %8483 = vmatpush.msk.msra.mxu3 %vm16221_vm10, %v21196_v8  ;;  %v3138_v19 = vperm.slane %v20868_v51, 6  ;;  %v16291_v46 = vsel %vm21200_vm0, %v21180_v11, %v21199_v55  ;;  %v21203_v8 = vld [vmem:[#allocation104_spill] sm:$0xff]  ;;  %vm21204_vm11 = vcmp.lt.s32.totalorder %v9948_v10, 17  ;;  %v21207_v13 = vld [vmem:[#allocation167_spill] sm:$0xff]  ;;  %v21212_v32 = vld [vmem:[#allocation66_spill] sm:$0xff] }
 0x3ac   : > { %8524 = vmatpush.msk.msrb.mxu1 %vm16232_vm4, %v15944_v7  ;;  %21201 = vst [vmem:[#allocation56_spill] sm:$0xff] %v16291_v46  ;;  %v16297_v26 = vsel %vm21204_vm11, %v21203_v8, %v21202_v5  ;;  %vm21208_vm3 = vcmp.lt.s32.totalorder %v9948_v10, 127  ;;  %vm16305_vm8 = vcmp.eq.s32.totalorder %v777_v22, 1  ;;  %8508 = vmatpush.msk.msra.mxu2 %vm16245_vm14, %v21212_v32  ;;  %v21213_v11 = vld [vmem:[#allocation23_spill] sm:$0xff]  ;;  %v3589_v8 = vperm.slane %v21157_v12, 5  ;;  %vm21215_vm15 = vmmov %vm21200_vm0  ;;  %v21236_v7 = vld [vmem:[#allocation182_spill] sm:$0xff] }
 0x3ad   : > { %21205 = vst [vmem:[#allocation26_spill] sm:$0xff] %v16297_v26  ;;  %v16303_v2 = vsel %vm21208_vm3, %v21207_v13, %v21206_v62  ;;  %8521 = vmatpush.msk.msra.mxu0 %vm16251_vm6, %v21213_v11  ;;  %v21214_v5 = vld [vmem:[#allocation131_spill] sm:$0xff]  ;;  %vm16325_vm2 = vcmp.eq.s32.totalorder %v1252_v52, 1  ;;  %vm16332_vm1 = vcmp.eq.s32.totalorder %v1015_v23, 1  ;;  %v778_v30 = vperm.slane %v21177_v35, 5 }
 0x3ae   : > { %21209 = vst [vmem:[#allocation83_spill] sm:$0xff] %v16303_v2  ;;  %v16320_v13 = vsel %vm21215_vm15, %v21199_v55, %v21214_v5  ;;  %v21217_v22 = vld [vmem:[#allocation203_spill] sm:$0xff]  ;;  %8525 = vmatpush.msk.msrb.mxu1 %vm16266_vm5, %v15841_v58  ;;  %v2998_v32 = vperm.slane %v20874_v16, 6  ;;  %v21222_v55 = vld [vmem:[#allocation30_spill] sm:$0xff]  ;;  %vm21223_vm7 = vcmp.lt.s32.totalorder %v9948_v10, 111  ;;  %vm21224_vm10 = vcmask 719872  }
 0x3af   : > { %21216 = vst [vmem:[#allocation222_spill] sm:$0xff] %v16320_v13  ;;  %8484 = vmatpush.msk.msra.mxu3 %vm16256_vm12, %v21217_v22  ;;  %8509 = vmatpush.msk.msra.mxu2 %vm16277_vm13, %v21222_v55  ;;  %v16345_v52 = vsel %vm21223_vm7, %v15790_v4, %v16270_v0  ;;  %vm16349_vm4 = vcmp.eq.s32.totalorder %v3729_v14, 1  ;;  %vm16353_vm9 = vcmp.eq.s32.totalorder %v4990_v20, 1  ;;  %v3451_v63 = vperm.slane %v20839_v6, 7  ;;  %v21229_v47 = vld [vmem:[#allocation187_spill] sm:$0xff]  ;;  %vm21234_vm12 = vmmov %vm21208_vm3 }
 0x3b0   : > { %7910 = vmatmul.msk.f32.vlgmr.msra.gmra.mxu1 %vm21224_vm10, %v15340_v33  ;;  %v21230_v22 = vld [vmem:[#allocation59_spill] sm:$0xff]  ;;  %vm21231_vm14 = vcmask 1043456   ;;  %vm16363_vm6 = vcmp.eq.s32.totalorder %v3138_v19, 1  ;;  %v2858_v14 = vperm.slane %v20881_v61, 6  ;;  %v3311_v20 = vperm.slane %v21033_v48, 7 }
 0x3b1   : > { %8485 = vmatpush.msk.msra.mxu3 %vm16305_vm8, %v21229_v47  ;;  %8526 = vmatpush.msk.msrb.mxu1 %vm21231_vm14, %v21230_v22  ;;  %v2718_v55 = vperm.slane %v14713_v56, 6  ;;  %v16374_v6 = vsel %vm21234_vm12, %v21206_v62, %v16060_v28  ;;  %vm16380_vm5 = vcmp.eq.s32.totalorder %v3589_v8, 1  ;;  %v4850_v48 = vperm.slane %v21061_v1, 6  ;;  %v16398_v8 = vpop.permute.xlu2 %1409  ;;  %v21242_v22 = vld [vmem:[#allocation25_spill] sm:$0xff] }
 0x3b2   : > { %21235 = vst [vmem:[#allocation27_spill] sm:$0xff] %v16374_v6  ;;  %6785 = vmatmul.f32.vlgmr.msra.gmra.mxu3 %v21074_v36  ;;  %8510 = vmatpush.msk.msra.mxu2 %vm16325_vm2, %v21236_v7  ;;  %v4991_v47 = vperm.slane %v21195_v57, 7  ;;  %vm21239_vm13 = vcmp.lt.s32.totalorder %v9948_v10, 1  ;;  %vm21241_vm0 = vcmp.lt.s32.totalorder %v9948_v10, 113  ;;  %vm810_vm11 = vcmp.eq.s32.totalorder %v778_v30, 1  ;;  %v16422_v30 = vpop.permute.xlu1 %2499  ;;  %v21255_v7 = vld [vmem:[#allocation193_spill] sm:$0xff]  ;;  %v16444_v19 = vpop.permute.xlu0 %2260 }
 0x3b3   : > { %v16390_v62 = vsel %vm21239_vm13, %v15720_v42, %v16206_v59  ;;  %v16396_v26 = vsel %vm21241_vm0, %v15631_v3, %v16130_v49  ;;  %8522 = vmatpush.msk.msra.mxu0 %vm16349_vm4, %v21242_v22  ;;  %8540 = vmatpush.msk.msrb.mxu3 %vm16353_vm9, %v16345_v52  ;;  %vm3030_vm3 = vcmp.eq.s32.totalorder %v2998_v32, 1  ;;  %vm21243_vm8 = vmmov %vm21239_vm13  ;;  %v21245_v3 = vld [vmem:[#allocation82_spill] sm:$0xff]  ;;  %vm16418_vm15 = vcmp.eq.s32.totalorder %v3451_v63, 1 }
 0x3b4   : > { %21240 = vst [vmem:[#allocation48_spill] sm:$0xff] %v16390_v62  ;;  %v16410_v42 = vsel %vm21243_vm8, %v16206_v59, %v16398_v8  ;;  %8511 = vmatpush.msk.msra.mxu2 %vm16332_vm1, %v21245_v3  ;;  %8527 = vmatpush.msk.msrb.mxu1 %vm16363_vm6, %v15875_v44  ;;  %v2578_v32 = vperm.slane %v14719_v27, 6  ;;  %v4710_v23 = vperm.slane %v14755_v15, 6  ;;  %v21248_v59 = vld [vmem:[#allocation184_spill] sm:$0xff]  ;;  %vm16429_vm2 = vcmp.eq.s32.totalorder %v2858_v14, 1  ;;  %vm21264_vm6 = vmmov %vm21241_vm0 }
 0x3b5   : > { %21244 = vst [vmem:[#allocation121_spill] sm:$0xff] %v16410_v42  ;;  %8523 = vmatpush.msk.msra.mxu0 %vm16380_vm5, %v21248_v59  ;;  %vm16433_vm1 = vcmp.eq.s32.totalorder %v3311_v20, 1  ;;  %vm16437_vm7 = vcmp.eq.s32.totalorder %v2718_v55, 1  ;;  %v3139_v4 = vperm.slane %v20868_v51, 7  ;;  %vm16446_vm10 = vcmp.eq.s32.totalorder %v4850_v48, 1 }
 0x3b6   : > { %8512 = vmatpush.msk.msra.mxu2 %vm810_vm11, %v21255_v7  ;;  %8528 = vmatpush.msk.msrb.mxu1 %vm3030_vm3, %v16112_v25  ;;  %vm16450_vm4 = vcmp.eq.s32.totalorder %v4991_v47, 1  ;;  %v2341_v55 = vperm.slane %v14760_v60, 6  ;;  %v4570_v3 = vperm.slane %v14812_v37, 6  ;;  %vm21260_vm9 = vcmp.lt.s32.totalorder %v9948_v10, 111 }
 0x3b7   : > { %6825 = vmatmul.f32.vlgmr.msra.gmra.mxu2 %v21074_v36  ;;  %8551 = vmatpush.msk.msrb.mxu0 %vm16418_vm15, %v15967_v53  ;;  %v16464_v51 = vsel %vm21260_vm9, %v16270_v0, %v16422_v30  ;;  %vm21262_vm14 = vcmp.lt.s32.totalorder %v9948_v10, 112  ;;  %v2999_v47 = vperm.slane %v20874_v16, 7  ;;  %v2104_v36 = vperm.slane %v14828_v29, 6 }
 0x3b8   : > { %21261 = vst [vmem:[#allocation79_spill] sm:$0xff] %v16464_v51  ;;  %v16470_v48 = vsel %vm21262_vm14, %v15983_v17, %v16444_v19  ;;  %v16478_v57 = vsel %vm21264_vm6, %v16130_v49, %v16284_v54  ;;  %8529 = vmatpush.msk.msrb.mxu1 %vm16429_vm2, %v15798_v40  ;;  %vm21266_vm12 = vcmask 719872   ;;  %vm16485_vm5 = vcmp.eq.s32.totalorder %v2578_v32, 1  ;;  %8567 = vmatpush.msk.msrb.mxu2 %vm16450_vm4, %v16464_v51  ;;  %v21294_v49 = vld [vmem:[#allocation49_spill] sm:$0xff]  ;;  %v21351_v17 = vld [vmem:[#allocation166_spill] sm:$0xff]  ;;  %v21376_v51 = vld [vmem:[#allocation24_spill] sm:$0xff] }
 0x3b9   : > { %21263 = vst [vmem:[#allocation33_spill] sm:$0xff] %v16470_v48  ;;  %7911 = vmatmul.msk.f32.vlgmr.msra.gmra.mxu0 %vm21266_vm12, %v15340_v33  ;;  %vm4742_vm13 = vcmp.eq.s32.totalorder %v4710_v23, 1  ;;  %v4430_v16 = vperm.slane %v14849_v31, 6  ;;  %8541 = vmatpush.msk.msrb.mxu3 %vm16446_vm10, %v16470_v48  ;;  %vm16496_vm0 = vcmp.eq.s32.totalorder %v3139_v4, 1  ;;  %v2859_v33 = vperm.slane %v20881_v61, 7  ;;  %v21273_v4 = vld [vmem:[#allocation58_spill] sm:$0xff] }
 0x3ba   : > { %21265 = vst [vmem:[#allocation46_spill] sm:$0xff] %v16478_v57  ;;  %8552 = vmatpush.msk.msrb.mxu0 %vm16433_vm1, %v15847_v41  ;;  %v1867_v0 = vperm.slane %v21125_v50, 6  ;;  %v2719_v32 = vperm.slane %v14713_v56, 7  ;;  %8530 = vmatpush.msk.msrb.mxu1 %vm16437_vm7, %v21165_v45  ;;  %vm16509_vm11 = vcmp.eq.s32.totalorder %v4570_v3, 1  ;;  %v4290_v24 = vperm.slane %v14906_v21, 6  ;;  %v16589_v56 = vpop.permute.xlu0 %2262  ;;  %v16640_v48 = vld [vmem:[#allocation8 + $0x18] sm:$0xff] }
 0x3bb   : > { %v4851_v61 = vperm.slane %v21061_v1, 7  ;;  %v1630_v38 = vperm.slane %v14961_v9, 6  ;;  %vm21274_vm3 = vcmask 1043456   ;;  %8542 = vmatpush.msk.msrb.mxu3 %vm4742_vm13, %v16396_v26  ;;  %vm2373_vm8 = vcmp.eq.s32.totalorder %v2341_v55, 1  ;;  %v21307_v1 = vld [vmem:[#allocation192_spill] sm:$0xff] }
 0x3bc   : > { %8553 = vmatpush.msk.msrb.mxu0 %vm21274_vm3, %v21273_v4  ;;  %vm16519_vm15 = vcmp.eq.s32.totalorder %v2999_v47, 1  ;;  %vm16523_vm2 = vcmp.eq.s32.totalorder %v2104_v36, 1  ;;  %v2579_v7 = vperm.slane %v14719_v27, 7  ;;  %8531 = vmatpush.msk.msrb.mxu1 %vm16485_vm5, %v21176_v43  ;;  %vm16531_vm1 = vcmp.eq.s32.totalorder %v4430_v16, 1  ;;  %v21287_v47 = vld [vmem:[#allocation112_spill] sm:$0xff]  ;;  %v21313_v27 = vld [vmem:[#allocation93_spill] sm:$0xff] }
 0x3bd   : > { %v4150_v14 = vperm.slane %v14997_v39, 6  ;;  %v4711_v20 = vperm.slane %v14755_v15, 7  ;;  %v1490_v55 = vperm.slane %v15014_v18, 6  ;;  %8543 = vmatpush.msk.msrb.mxu3 %vm16509_vm11, %v16303_v2  ;;  %vm16544_vm7 = vcmp.eq.s32.totalorder %v2859_v33, 1  ;;  %v21319_v36 = vld [vmem:[#allocation142_spill] sm:$0xff]  ;;  %v21326_v15 = vld [vmem:[#allocation65_spill] sm:$0xff] }
 0x3be   : > { %8554 = vmatpush.msk.msrb.mxu0 %vm16496_vm0, %v15950_v34  ;;  %vm16548_vm10 = vcmp.eq.s32.totalorder %v1867_v0, 1  ;;  %vm16552_vm4 = vcmp.eq.s32.totalorder %v2719_v32, 1  ;;  %v2342_v3 = vperm.slane %v14760_v60, 7  ;;  %8532 = vmatpush.msk.msrb.mxu1 %vm2373_vm8, %v21287_v47  ;;  %vm16558_vm9 = vcmp.eq.s32.totalorder %v4290_v24, 1  ;;  %v21295_v0 = vld [vmem:[#allocation189_spill] sm:$0xff]  ;;  %v16574_v60 = vpop.permute.xlu1 %1170  ;;  %v21300_v47 = vld [vmem:[#allocation43_spill] sm:$0xff] }
 0x3bf   : > { %vm16562_vm14 = vcmp.eq.s32.totalorder %v4851_v61, 1  ;;  %vm16566_vm6 = vcmp.eq.s32.totalorder %v1630_v38, 1  ;;  %v4010_v33 = vperm.slane %v21294_v49, 6  ;;  %v21296_v32 = vld [vmem:[#allocation73_spill] sm:$0xff]  ;;  %vm16579_vm12 = vcmp.eq.s32.totalorder %v2579_v7, 1  ;;  %v21299_v61 = vld [vmem:[#allocation151_spill] sm:$0xff] }
 0x3c0   : > { %8555 = vmatpush.msk.msrb.mxu0 %vm16519_vm15, %v21295_v0  ;;  %8544 = vmatpush.msk.msrb.mxu3 %vm16531_vm1, %v21296_v32  ;;  %v4571_v24 = vperm.slane %v14812_v37, 7  ;;  %v1253_v38 = vperm.slane %v21299_v61, 6  ;;  %v2105_v4 = vperm.slane %v14828_v29, 7  ;;  %vm16591_vm5 = vcmp.eq.s32.totalorder %v4150_v14, 1  ;;  %v21308_v32 = vld [vmem:[#allocation199_spill] sm:$0xff]  ;;  %v21359_v16 = vld [vmem:[#allocation84_spill] sm:$0xff] }
 0x3c1   : > { %8533 = vmatpush.msk.msrb.mxu1 %vm16523_vm2, %v21300_v47  ;;  %vm16595_vm13 = vcmp.eq.s32.totalorder %v4711_v20, 1  ;;  %vm16599_vm0 = vcmp.eq.s32.totalorder %v1490_v55, 1  ;;  %v3870_v29 = vperm.slane %v21307_v1, 6  ;;  %vm21309_vm11 = vcmp.lt.s32.totalorder %v9948_v10, 112  ;;  %v21312_v55 = vld [vmem:[#allocation162_spill] sm:$0xff] }
 0x3c2   : > { %8556 = vmatpush.msk.msrb.mxu0 %vm16544_vm7, %v21308_v32  ;;  %v16611_v63 = vsel %vm21309_vm11, %v16444_v19, %v16589_v56  ;;  %8545 = vmatpush.msk.msrb.mxu3 %vm16558_vm9, %v16390_v62  ;;  %vm16616_vm3 = vcmp.eq.s32.totalorder %v2342_v3, 1  ;;  %v4431_v20 = vperm.slane %v14849_v31, 7  ;;  %v1016_v47 = vperm.slane %v21312_v55, 6  ;;  %v21316_v19 = vld [vmem:[#allocation45_spill] sm:$0xff] }
 0x3c3   : > { %vm21314_vm8 = vcmp.lt.s32.totalorder %v9948_v10, 15  ;;  %8534 = vmatpush.msk.msrb.mxu1 %vm16548_vm10, %v21316_v19  ;;  %8568 = vmatpush.msk.msrb.mxu2 %vm16562_vm14, %v16611_v63  ;;  %vm16634_vm15 = vcmp.eq.s32.totalorder %v4010_v33, 1  ;;  %v1868_v31 = vperm.slane %v21125_v50, 7  ;;  %v3730_v0 = vperm.slane %v21319_v36, 6  ;;  %v21345_v19 = vld [vmem:[#allocation44_spill] sm:$0xff]  ;;  %v21379_v50 = vld [vmem:[#allocation26_spill] sm:$0xff] }
 0x3c4   : > { %v16626_v32 = vsel %vm21314_vm8, %v21313_v27, %v16574_v60  ;;  %8557 = vmatpush.msk.msrb.mxu0 %vm16552_vm4, %v21213_v11  ;;  %vm16648_vm2 = vcmp.eq.s32.totalorder %v4571_v24, 1  ;;  %vm16652_vm1 = vcmp.eq.s32.totalorder %v1253_v38, 1  ;;  %vm16656_vm7 = vcmp.eq.s32.totalorder %v2105_v4, 1 }
 0x3c5   : > { %21315 = vst [vmem:[#allocation109_spill] sm:$0xff] %v16626_v32  ;;  %8546 = vmatpush.msk.msrb.mxu3 %vm16591_vm5, %v16626_v32  ;;  %v4291_v33 = vperm.slane %v14906_v21, 7  ;;  %8535 = vmatpush.msk.msrb.mxu1 %vm16566_vm6, %v21326_v15  ;;  %vm16667_vm10 = vcmp.eq.s32.totalorder %v3870_v29, 1  ;;  %v779_v24 = vperm.slane %v21177_v35, 6  ;;  %v1631_v38 = vperm.slane %v14961_v9, 7  ;;  %v21333_v29 = vld [vmem:[#allocation140_spill] sm:$0xff] }
 0x3c6   : > { %8569 = vmatpush.msk.msrb.mxu2 %vm16595_vm13, %v16478_v57  ;;  %v3590_v4 = vperm.slane %v21157_v12, 6  ;;  %8558 = vmatpush.msk.msrb.mxu0 %vm16579_vm12, %v21242_v22  ;;  %vm16680_vm4 = vcmp.eq.s32.totalorder %v4431_v20, 1  ;;  %vm16684_vm9 = vcmp.eq.s32.totalorder %v1016_v47, 1  ;;  %v4151_v9 = vperm.slane %v14997_v39, 7  ;;  %v16712_v37 = vpop.permute.xlu1 %2027  ;;  %v21340_v47 = vld [vmem:[#allocation95_spill] sm:$0xff]  ;;  %v21350_v15 = vld [vmem:[#allocation32_spill] sm:$0xff] }
 0x3c7   : > { %8547 = vmatpush.msk.msrb.mxu3 %vm16634_vm15, %v16291_v46  ;;  %v3419_v7 = vand.u32 24, %v16640_v48  ;;  %8536 = vmatpush.msk.msrb.mxu1 %vm16599_vm0, %v21333_v29  ;;  %vm16696_vm14 = vcmp.eq.s32.totalorder %v1868_v31, 1  ;;  %vm16700_vm6 = vcmp.eq.s32.totalorder %v3730_v0, 1  ;;  %vm16704_vm12 = vcmp.eq.s32.totalorder %v4291_v33, 1  ;;  %v21354_v21 = vld [vmem:[#allocation138_spill] sm:$0xff]  ;;  %v21382_v29 = vld [vmem:[#allocation29_spill] sm:$0xff] }
 0x3c8   : > { %8570 = vmatpush.msk.msrb.mxu2 %vm16648_vm2, %v16374_v6  ;;  %v1491_v20 = vperm.slane %v15014_v18, 7  ;;  %8559 = vmatpush.msk.msrb.mxu0 %vm16616_vm3, %v21248_v59  ;;  %vm16717_vm5 = vcmp.eq.s32.totalorder %v779_v24, 1  ;;  %vm16721_vm13 = vcmp.eq.s32.totalorder %v1631_v38, 1  ;;  %v4011_v18 = vperm.slane %v21294_v49, 7  ;;  %v21346_v59 = vld [vmem:[#allocation72_spill] sm:$0xff]  ;;  %v16741_v49 = vpop.permute.xlu2 %1790 }
 0x3c9   : > { %8548 = vmatpush.msk.msrb.mxu3 %vm16667_vm10, %v21340_v47  ;;  %vm3423_vm0 = vcmp.eq.s32.totalorder %v3419_v7, 24  ;;  %8537 = vmatpush.msk.msrb.mxu1 %vm16652_vm1, %v21345_v19  ;;  %vm16732_vm11 = vcmp.eq.s32.totalorder %v3590_v4, 1  ;;  %v21349_v3 = vmov 0   ;;  %v1254_v43 = vperm.slane %v21299_v61, 7  ;;  %v16756_v4 = vpop.permute.xlu0 %1172  ;;  %v21360_v7 = vld [vmem:[#allocation114_spill] sm:$0xff] }
 0x3ca   : > { %8571 = vmatpush.msk.msrb.mxu2 %vm16680_vm4, %v21346_v59  ;;  %v16737_v31 = vsel %vm3423_vm0, 1, %v21349_v3  ;;  %v3279_v33 = vand.u32 32, %v16640_v48  ;;  %8560 = vmatpush.msk.msrb.mxu0 %vm16656_vm7, %v21350_v15  ;;  %vm16749_vm3 = vcmp.eq.s32.totalorder %v4151_v9, 1  ;;  %v3871_v61 = vperm.slane %v21307_v1, 7  ;;  %v21370_v19 = vld [vmem:[#allocation70_spill] sm:$0xff] }
 0x3cb   : > { %8549 = vmatpush.msk.msrb.mxu3 %vm16700_vm6, %v21351_v17  ;;  %v3452_v24 = vperm.slane %v16737_v31, 0  ;;  %v1017_v38 = vperm.slane %v21312_v55, 7  ;;  %8538 = vmatpush.msk.msrb.mxu1 %vm16684_vm9, %v21354_v21  ;;  %vm16764_vm8 = vcmp.eq.s32.totalorder %v1491_v20, 1  ;;  %v3731_v9 = vperm.slane %v21319_v36, 7  ;;  %v21385_v20 = vld [vmem:[#allocation195_spill] sm:$0xff]  ;;  %v21394_v59 = vld [vmem:[#allocation94_spill] sm:$0xff] }
 0x3cc   : > { %8572 = vmatpush.msk.msrb.mxu2 %vm16704_vm12, %v16410_v42  ;;  %vm3283_vm15 = vcmp.eq.s32.totalorder %v3279_v33, 32  ;;  %v4959_v1 = vand.u32 42, %v16640_v48  ;;  %vm21357_vm2 = vcmp.lt.s32.totalorder %v9948_v10, 15  ;;  %8561 = vmatpush.msk.msrb.mxu0 %vm16696_vm14, %v21359_v16  ;;  %vm16786_vm7 = vcmp.eq.s32.totalorder %v4011_v18, 1 }
 0x3cd   : > { %v16774_v55 = vsel %vm21357_vm2, %v16574_v60, %v16756_v4  ;;  %8550 = vmatpush.msk.msrb.mxu3 %vm16732_vm11, %v21360_v7  ;;  %vm16782_vm1 = vcmp.eq.s32.totalorder %v3452_v24, 1  ;;  %v16791_v23 = vsel %vm3283_vm15, 1, %v21349_v3  ;;  %v21365_v60 = vld [vmem:[#allocation47_spill] sm:$0xff]  ;;  %vm16799_vm10 = vcmp.eq.s32.totalorder %v1254_v43, 1 }
 0x3ce   : > { %21358 = vst [vmem:[#allocation154_spill] sm:$0xff] %v16774_v55  ;;  %8539 = vmatpush.msk.msrb.mxu1 %vm16717_vm5, %v21365_v60  ;;  %8573 = vmatpush.msk.msrb.mxu2 %vm16749_vm3, %v16774_v55  ;;  %v3312_v39 = vperm.slane %v16791_v23, 0  ;;  %vm16804_vm4 = vcmp.eq.s32.totalorder %v3871_v61, 1  ;;  %v780_v18 = vperm.slane %v21177_v35, 7  ;;  %vm21371_vm9 = vcmask 719872   ;;  %v21387_v35 = vld [vmem:[#allocation164_spill] sm:$0xff] }
 0x3cf   : > { %8562 = vmatpush.msk.msrb.mxu0 %vm16721_vm13, %v21370_v19  ;;  %v16812_v0 = vld.sshfl [vmem:[#allocation1 + $0x8] sm:$0xff pattern:$0x75316420]  ;;  %vm16816_vm14 = vcmp.eq.s32.totalorder %v1017_v38, 1  ;;  %vm4963_vm6 = vcmp.eq.s32.totalorder %v4959_v1, 42  ;;  %v3107_v43 = vand.u32 16, %v16640_v48  ;;  %8578 = vmatpush.msk.msra.mxu3 %vm16782_vm1, %v16396_v26 }
 0x3d0   : > { %7912 = vmatmul.msk.f32.vlgmr.msrb.gmra.mxu3 %vm21371_vm9, %v16812_v0  ;;  %v3591_v33 = vperm.slane %v21157_v12, 7  ;;  %8574 = vmatpush.msk.msrb.mxu2 %vm16786_vm7, %v16320_v13  ;;  %vm3344_vm12 = vcmp.eq.s32.totalorder %v3312_v39, 1  ;;  %vm16828_vm5 = vcmp.eq.s32.totalorder %v3731_v9, 1  ;;  %v16833_v27 = vsel %vm4963_vm6, 1, %v21349_v3  ;;  %v2502_v12 = vpop.permute.xlu1 %2501  ;;  %v21383_v39 = vld [vmem:[#allocation61_spill] sm:$0xff] }
 0x3d1   : > { %v2967_v15 = vand.u32 36, %v16640_v48  ;;  %8563 = vmatpush.msk.msrb.mxu0 %vm16764_vm8, %v21376_v51  ;;  %v4992_v24 = vperm.slane %v16833_v27, 0  ;;  %v16840_v61 = vld.sshfl [vmem:[#allocation1] sm:$0xff pattern:$0x75316420]  ;;  %vm3111_vm13 = vcmp.eq.s32.totalorder %v3107_v43, 16  ;;  %8579 = vmatpush.msk.msra.mxu3 %vm3344_vm12, %v16303_v2  ;;  %v16868_v60 = vpop.permute.xlu0 %2029  ;;  %v16878_v43 = vpop.permute.xlu2 %1792 }
 0x3d2   : > { %6865 = vmatmul.f32.vlgmr.msrb.gmra.mxu1 %v16840_v61  ;;  %v3453_v38 = vperm.slane %v16737_v31, 1  ;;  %v2827_v21 = vand.u32 4, %v16640_v48  ;;  %vm21377_vm0 = vcmp.lt.s32.totalorder %v9948_v10, 111  ;;  %8575 = vmatpush.msk.msrb.mxu2 %vm16804_vm4, %v21379_v50  ;;  %vm16854_vm11 = vcmp.eq.s32.totalorder %v780_v18, 1  ;;  %v21388_v51 = vld [vmem:[#allocation188_spill] sm:$0xff] }
 0x3d3   : > { %v16849_v9 = vsel %vm21377_vm0, %v16422_v30, %v2502_v12  ;;  %v16859_v16 = vsel %vm3111_vm13, 1, %v21349_v3  ;;  %vm2971_vm3 = vcmp.eq.s32.totalorder %v2967_v15, 36  ;;  %8564 = vmatpush.msk.msrb.mxu0 %vm16799_vm10, %v21382_v29  ;;  %vm5024_vm8 = vcmp.eq.s32.totalorder %v4992_v24, 1 }
 0x3d4   : > { %21378 = vst [vmem:[#allocation55_spill] sm:$0xff] %v16849_v9  ;;  %v3140_v30 = vperm.slane %v16859_v16, 0  ;;  %vm3623_vm15 = vcmp.eq.s32.totalorder %v3591_v33, 1  ;;  %v16866_v36 = vsel %vm2971_vm3, 1, %v21349_v3  ;;  %vm21384_vm2 = vcmask 1043456   ;;  %8576 = vmatpush.msk.msrb.mxu2 %vm16828_vm5, %v21385_v20  ;;  %v21386_v33 = vld [vmem:[#allocation35_spill] sm:$0xff]  ;;  %8594 = vmatpush.msk.msra.mxu1 %vm5024_vm8, %v16849_v9 }
 0x3d5   : > { %8580 = vmatpush.msk.msra.mxu3 %vm21384_vm2, %v21383_v39  ;;  %v3000_v18 = vperm.slane %v16866_v36, 0  ;;  %vm2831_vm1 = vcmp.eq.s32.totalorder %v2827_v21, 4  ;;  %v3313_v22 = vperm.slane %v16791_v23, 1  ;;  %v2687_v19 = vand.u32 20, %v16640_v48  ;;  %8565 = vmatpush.msk.msrb.mxu0 %vm16816_vm14, %v21386_v33  ;;  %vm21391_vm8 = vmmov %vm21384_vm2 }
 0x3d6   : > { %vm3172_vm7 = vcmp.eq.s32.totalorder %v3140_v30, 1  ;;  %vm3485_vm10 = vcmp.eq.s32.totalorder %v3453_v38, 1  ;;  %8577 = vmatpush.msk.msrb.mxu2 %vm3623_vm15, %v21387_v35  ;;  %v16887_v15 = vsel %vm2831_vm1, 1, %v21349_v3  ;;  %v4819_v38 = vand.u32 10, %v16640_v48 }
 0x3d7   : > { %8581 = vmatpush.msk.msra.mxu3 %vm3172_vm7, %v16390_v62  ;;  %vm3032_vm4 = vcmp.eq.s32.totalorder %v3000_v18, 1  ;;  %8566 = vmatpush.msk.msrb.mxu0 %vm16854_vm11, %v21388_v51  ;;  %v2860_v14 = vperm.slane %v16887_v15, 0  ;;  %vm3345_vm14 = vcmp.eq.s32.totalorder %v3313_v22, 1  ;;  %vm2691_vm6 = vcmp.eq.s32.totalorder %v2687_v19, 20 }
 0x3d8   : > { %7913 = vmatmul.msk.f32.vlgmr.msrb.gmra.mxu2 %vm21371_vm9, %v16812_v0  ;;  %v16898_v24 = vsel %vm2691_vm6, 1, %v21349_v3  ;;  %v4993_v21 = vperm.slane %v16833_v27, 1  ;;  %6905 = vmatmul.f32.vlgmr.msrb.gmra.mxu0 %v16840_v61  ;;  %v2547_v29 = vand.u32 41, %v16640_v48  ;;  %v3141_v30 = vperm.slane %v16859_v16, 1  ;;  %v16908_v39 = vpop.permute.xlu1 %2503 }
 0x3d9   : > { %8582 = vmatpush.msk.msra.mxu3 %vm3032_vm4, %v16626_v32  ;;  %8605 = vmatpush.msk.msra.mxu2 %vm3485_vm10, %v16478_v57  ;;  %vm2892_vm12 = vcmp.eq.s32.totalorder %v2860_v14, 1  ;;  %v2720_v1 = vperm.slane %v16898_v24, 0  ;;  %vm4823_vm5 = vcmp.eq.s32.totalorder %v4819_v38, 10  ;;  %v4679_v18 = vand.u32 26, %v16640_v48  ;;  %v2265_v51 = vpop.permute.xlu0 %2264  ;;  %v21390_v14 = vld [vmem:[#allocation60_spill] sm:$0xff] }
 0x3da   : > { %vm5025_vm13 = vcmp.eq.s32.totalorder %v4993_v21, 1  ;;  %v2310_v22 = vand.u32 9, %v16640_v48  ;;  %v16915_v19 = vsel %vm21377_vm0, %v2502_v12, %v16908_v39  ;;  %v16918_v33 = vsel %vm4823_vm5, 1, %v21349_v3 }
 0x3db   : > { %8583 = vmatpush.msk.msra.mxu3 %vm2892_vm12, %v16291_v46  ;;  %8606 = vmatpush.msk.msra.mxu2 %vm3345_vm14, %v16374_v6  ;;  %21389 = vst [vmem:[#allocation146_spill] sm:$0xff] %v16915_v19  ;;  %vm2752_vm11 = vcmp.eq.s32.totalorder %v2720_v1, 1  ;;  %vm2551_vm3 = vcmp.eq.s32.totalorder %v2547_v29, 41  ;;  %v4852_v38 = vperm.slane %v16918_v33, 0  ;;  %vm3173_vm15 = vcmp.eq.s32.totalorder %v3141_v30, 1 }
 0x3dc   : > { %v16925_v21 = vsel %vm2551_vm3, 1, %v21349_v3  ;;  %vm21392_vm2 = vcmp.lt.s32.totalorder %v9948_v10, 112  ;;  %8621 = vmatpush.msk.msra.mxu0 %vm5025_vm13, %v16915_v19  ;;  %vm4683_vm1 = vcmp.eq.s32.totalorder %v4679_v18, 26  ;;  %vm2314_vm7 = vcmp.eq.s32.totalorder %v2310_v22, 9  ;;  %v21408_v19 = vld [vmem:[#allocation169_spill] sm:$0xff] }
 0x3dd   : > { %8584 = vmatpush.msk.msra.mxu3 %vm2752_vm11, %v21340_v47  ;;  %8607 = vmatpush.msk.msra.mxu2 %vm21391_vm8, %v21390_v14  ;;  %v16930_v12 = vsel %vm21392_vm2, %v16589_v56, %v2265_v51  ;;  %v2580_v1 = vperm.slane %v16925_v21, 0  ;;  %vm4884_vm10 = vcmp.eq.s32.totalorder %v4852_v38, 1  ;;  %v16936_v29 = vsel %vm4683_vm1, 1, %v21349_v3  ;;  %v16938_v14 = vpop.permute.xlu2 %1411  ;;  %v21395_v47 = vld [vmem:[#allocation103_spill] sm:$0xff] }
 0x3de   : > { %21393 = vst [vmem:[#allocation36_spill] sm:$0xff] %v16930_v12  ;;  %8595 = vmatpush.msk.msra.mxu1 %vm4884_vm10, %v16930_v12  ;;  %v4712_v56 = vperm.slane %v16936_v29, 0  ;;  %v16943_v30 = vsel %vm2314_vm7, 1, %v21349_v3  ;;  %vm21396_vm9 = vcmp.lt.s32.totalorder %v9948_v10, 17  ;;  %vm21397_vm14 = vcmp.lt.s32.totalorder %v9948_v10, 127 }
 0x3df   : > { %8608 = vmatpush.msk.msra.mxu2 %vm3173_vm15, %v16410_v42  ;;  %vm2612_vm4 = vcmp.eq.s32.totalorder %v2580_v1, 1  ;;  %v16949_v18 = vsel %vm21396_vm9, %v21395_v47, %v21394_v59  ;;  %v16955_v22 = vsel %vm21397_vm14, %v16060_v28, %v16741_v49  ;;  %vm21399_vm6 = vmmov %vm21397_vm14  ;;  %vm21400_vm12 = vcmp.lt.s32.totalorder %v9948_v10, 1 }
 0x3e0   : > { %21398 = vst [vmem:[#allocation37_spill] sm:$0xff] %v16955_v22  ;;  %v16961_v38 = vsel %vm21399_vm6, %v16741_v49, %v16878_v43  ;;  %v16967_v1 = vsel %vm21400_vm12, %v16398_v8, %v16938_v14  ;;  %8585 = vmatpush.msk.msra.mxu3 %vm2612_vm4, %v21351_v17  ;;  %v2343_v47 = vperm.slane %v16943_v30, 0  ;;  %vm21402_vm5 = vcmp.lt.s32.totalorder %v9948_v10, 113 }
 0x3e1   : > { %21401 = vst [vmem:[#allocation99_spill] sm:$0xff] %v16967_v1  ;;  %v16975_v28 = vsel %vm21402_vm5, %v16284_v54, %v16712_v37  ;;  %vm4744_vm13 = vcmp.eq.s32.totalorder %v4712_v56, 1  ;;  %v3001_v49 = vperm.slane %v16866_v36, 1  ;;  %v4539_v42 = vand.u32 34, %v16640_v48  ;;  %vm21404_vm1 = vmmov %vm21402_vm5  ;;  %v17005_v57 = vpop.permute.xlu0 %2266 }
 0x3e2   : > { %21403 = vst [vmem:[#allocation85_spill] sm:$0xff] %v16975_v28  ;;  %8596 = vmatpush.msk.msra.mxu1 %vm4744_vm13, %v16975_v28  ;;  %vm2375_vm0 = vcmp.eq.s32.totalorder %v2343_v47, 1  ;;  %v2073_v8 = vand.u32 25, %v16640_v48  ;;  %v2861_v17 = vperm.slane %v16887_v15, 1  ;;  %v4399_v6 = vand.u32 2, %v16640_v48  ;;  %v16990_v47 = vpop.permute.xlu1 %1174 }
 0x3e3   : > { %8586 = vmatpush.msk.msra.mxu3 %vm2375_vm0, %v21360_v7  ;;  %vm3033_vm11 = vcmp.eq.s32.totalorder %v3001_v49, 1  ;;  %vm4543_vm3 = vcmp.eq.s32.totalorder %v4539_v42, 34  ;;  %v1836_v54 = vand.u32 33, %v16640_v48  ;;  %v2721_v56 = vperm.slane %v16898_v24, 1 }
 0x3e4   : > { %8609 = vmatpush.msk.msra.mxu2 %vm3033_vm11, %v16774_v55  ;;  %v16988_v46 = vsel %vm4543_vm3, 1, %v21349_v3  ;;  %vm2077_vm8 = vcmp.eq.s32.totalorder %v2073_v8, 25  ;;  %vm2893_vm15 = vcmp.eq.s32.totalorder %v2861_v17, 1  ;;  %vm4403_vm2 = vcmp.eq.s32.totalorder %v4399_v6, 2 }
 0x3e5   : > { %v16996_v7 = vsel %vm21404_vm1, %v16712_v37, %v16868_v60  ;;  %v4572_v42 = vperm.slane %v16988_v46, 0  ;;  %v17000_v49 = vsel %vm2077_vm8, 1, %v21349_v3  ;;  %v17003_v55 = vsel %vm4403_vm2, 1, %v21349_v3 }
 0x3e6   : > { %v2106_v8 = vperm.slane %v17000_v49, 0  ;;  %8610 = vmatpush.msk.msra.mxu2 %vm2893_vm15, %v16320_v13  ;;  %vm21405_vm7 = vcmp.lt.s32.totalorder %v9948_v10, 15  ;;  %v4432_v37 = vperm.slane %v17003_v55, 0  ;;  %vm21406_vm10 = vcmp.lt.s32.totalorder %v9948_v10, 112 }
 0x3e7   : > { %v17013_v6 = vsel %vm21405_vm7, %v16756_v4, %v16990_v47  ;;  %v17019_v17 = vsel %vm21406_vm10, %v2265_v51, %v17005_v57  ;;  %vm4604_vm4 = vcmp.eq.s32.totalorder %v4572_v42, 1  ;;  %vm1840_vm9 = vcmp.eq.s32.totalorder %v1836_v54, 33  ;;  %v21409_v42 = vld [vmem:[#allocation71_spill] sm:$0xff] }
 0x3e8   : > { %21407 = vst [vmem:[#allocation139_spill] sm:$0xff] %v17019_v17  ;;  %vm2753_vm14 = vcmp.eq.s32.totalorder %v2721_v56, 1  ;;  %v4259_v32 = vand.u32 18, %v16640_v48  ;;  %8597 = vmatpush.msk.msra.mxu1 %vm4604_vm4, %v16955_v22  ;;  %vm2138_vm6 = vcmp.eq.s32.totalorder %v2106_v8, 1  ;;  %vm4464_vm12 = vcmp.eq.s32.totalorder %v4432_v37, 1 }
 0x3e9   : > { %v17024_v13 = vsel %vm1840_vm9, 1, %v21349_v3  ;;  %8611 = vmatpush.msk.msra.mxu2 %vm2753_vm14, %v21379_v50  ;;  %v4853_v4 = vperm.slane %v16918_v33, 1  ;;  %8587 = vmatpush.msk.msra.mxu3 %vm2138_vm6, %v21408_v19  ;;  %v1599_v54 = vand.u32 1, %v16640_v48  ;;  %v2581_v56 = vperm.slane %v16925_v21, 1 }
 0x3ea   : > { %v1869_v51 = vperm.slane %v17024_v13, 0  ;;  %vm4263_vm5 = vcmp.eq.s32.totalorder %v4259_v32, 18  ;;  %8598 = vmatpush.msk.msra.mxu1 %vm4464_vm12, %v21409_v42  ;;  %v4119_v37 = vand.u32 38, %v16640_v48  ;;  %v4713_v50 = vperm.slane %v16936_v29, 1 }
 0x3eb   : > { %v17034_v8 = vsel %vm4263_vm5, 1, %v21349_v3  ;;  %vm4885_vm13 = vcmp.eq.s32.totalorder %v4853_v4, 1  ;;  %vm1603_vm11 = vcmp.eq.s32.totalorder %v1599_v54, 1  ;;  %vm2613_vm3 = vcmp.eq.s32.totalorder %v2581_v56, 1 }
 0x3ec   : > { %vm1901_vm0 = vcmp.eq.s32.totalorder %v1869_v51, 1  ;;  %v4292_v19 = vperm.slane %v17034_v8, 0  ;;  %8622 = vmatpush.msk.msra.mxu0 %vm4885_vm13, %v17019_v17  ;;  %v17042_v32 = vsel %vm1603_vm11, 1, %v21349_v3  ;;  %8612 = vmatpush.msk.msra.mxu2 %vm2613_vm3, %v21385_v20  ;;  %vm4123_vm8 = vcmp.eq.s32.totalorder %v4119_v37, 38 }
 0x3ed   : > { %8588 = vmatpush.msk.msra.mxu3 %vm1901_vm0, %v15841_v58  ;;  %21410 = vst [vmem:[#allocation40_spill] sm:$0xff] %v17042_v32  ;;  %vm4745_vm15 = vcmp.eq.s32.totalorder %v4713_v50, 1  ;;  %v1459_v4 = vand.u32 17, %v16640_v48  ;;  %v1632_v51 = vperm.slane %v17042_v32, 0  ;;  %v17048_v42 = vsel %vm4123_vm8, 1, %v21349_v3 }
 0x3ee   : > { %vm4324_vm2 = vcmp.eq.s32.totalorder %v4292_v19, 1  ;;  %8623 = vmatpush.msk.msra.mxu0 %vm4745_vm15, %v16996_v7  ;;  %v2344_v54 = vperm.slane %v16943_v30, 1  ;;  %v4152_v58 = vperm.slane %v17048_v42, 0  ;;  %v3979_v20 = vand.u32 6, %v16640_v48  ;;  %v21412_v19 = vld [vmem:[#allocation69_spill] sm:$0xff] }
 0x3ef   : > { %8599 = vmatpush.msk.msra.mxu1 %vm4324_vm2, %v16967_v1  ;;  %vm1463_vm1 = vcmp.eq.s32.totalorder %v1459_v4, 17  ;;  %v4573_v50 = vperm.slane %v16988_v46, 1  ;;  %vm1664_vm7 = vcmp.eq.s32.totalorder %v1632_v51, 1  ;;  %v1222_v37 = vand.u32 37, %v16640_v48  ;;  %v17063_v4 = vpop.permute.xlu2 %1413  ;;  %v21413_v51 = vld [vmem:[#allocation130_spill] sm:$0xff] }
 0x3f0   : > { %v17057_v56 = vsel %vm1463_vm1, 1, %v21349_v3  ;;  %vm2376_vm10 = vcmp.eq.s32.totalorder %v2344_v54, 1  ;;  %8589 = vmatpush.msk.msra.mxu3 %vm1664_vm7, %v21412_v19  ;;  %vm4184_vm4 = vcmp.eq.s32.totalorder %v4152_v58, 1  ;;  %vm3983_vm9 = vcmp.eq.s32.totalorder %v3979_v20, 6  ;;  %v17077_v58 = vpop.permute.xlu0 %1176 }
 0x3f1   : > { %21411 = vst [vmem:[#allocation102_spill] sm:$0xff] %v17057_v56  ;;  %v1492_v17 = vperm.slane %v17057_v56, 0  ;;  %8613 = vmatpush.msk.msra.mxu2 %vm2376_vm10, %v21387_v35  ;;  %vm4605_vm14 = vcmp.eq.s32.totalorder %v4573_v50, 1  ;;  %8600 = vmatpush.msk.msra.mxu1 %vm4184_vm4, %v17013_v6  ;;  %vm21414_vm6 = vcmp.lt.s32.totalorder %v9948_v10, 16  ;;  %v17073_v62 = vsel %vm3983_vm9, 1, %v21349_v3 }
 0x3f2   : > { %v17070_v54 = vsel %vm21414_vm6, %v21214_v5, %v21413_v51  ;;  %8624 = vmatpush.msk.msra.mxu0 %vm4605_vm14, %v16961_v38  ;;  %vm1226_vm12 = vcmp.eq.s32.totalorder %v1222_v37, 37  ;;  %v2107_v35 = vperm.slane %v17000_v49, 1  ;;  %vm21415_vm5 = vcmp.lt.s32.totalorder %v9948_v10, 1 }
 0x3f3   : > { %v17083_v20 = vsel %vm21415_vm5, %v16938_v14, %v17063_v4  ;;  %vm1524_vm13 = vcmp.eq.s32.totalorder %v1492_v17, 1  ;;  %v4012_v5 = vperm.slane %v17073_v62, 0  ;;  %v17087_v50 = vsel %vm1226_vm12, 1, %v21349_v3 }
 0x3f4   : > { %21416 = vst [vmem:[#allocation92_spill] sm:$0xff] %v17087_v50  ;;  %8590 = vmatpush.msk.msra.mxu3 %vm1524_vm13, %v15875_v44  ;;  %v1255_v37 = vperm.slane %v17087_v50, 0  ;;  %vm2139_vm0 = vcmp.eq.s32.totalorder %v2107_v35, 1  ;;  %v3839_v19 = vand.u32 22, %v16640_v48  ;;  %v4433_v12 = vperm.slane %v17003_v55, 1  ;;  %v17103_v35 = vpop.permute.xlu1 %2505 }
 0x3f5   : > { %vm4044_vm11 = vcmp.eq.s32.totalorder %v4012_v5, 1  ;;  %8614 = vmatpush.msk.msra.mxu2 %vm2139_vm0, %v15967_v53  ;;  %vm21417_vm3 = vcmp.lt.s32.totalorder %v9948_v10, 15  ;;  %v985_v17 = vand.u32 5, %v16640_v48  ;;  %v1870_v44 = vperm.slane %v17024_v13, 1 }
 0x3f6   : > { %v17098_v14 = vsel %vm21417_vm3, %v16990_v47, %v17077_v58  ;;  %8601 = vmatpush.msk.msra.mxu1 %vm4044_vm11, %v17070_v54  ;;  %vm1287_vm8 = vcmp.eq.s32.totalorder %v1255_v37, 1  ;;  %vm3843_vm15 = vcmp.eq.s32.totalorder %v3839_v19, 22  ;;  %vm4465_vm2 = vcmp.eq.s32.totalorder %v4433_v12, 1  ;;  %v21418_v47 = vld [vmem:[#allocation76_spill] sm:$0xff] }
 0x3f7   : > { %v3699_v5 = vand.u32 40, %v16640_v48  ;;  %8591 = vmatpush.msk.msra.mxu3 %vm1287_vm8, %v16112_v25  ;;  %v17108_v53 = vsel %vm3843_vm15, 1, %v21349_v3  ;;  %8625 = vmatpush.msk.msra.mxu0 %vm4465_vm2, %v21418_v47  ;;  %vm989_vm1 = vcmp.eq.s32.totalorder %v985_v17, 5  ;;  %vm1902_vm7 = vcmp.eq.s32.totalorder %v1870_v44, 1 }
 0x3f8   : > { %v4293_v2 = vperm.slane %v17034_v8, 1  ;;  %v3872_v9 = vperm.slane %v17108_v53, 0  ;;  %v17114_v37 = vsel %vm989_vm1, 1, %v21349_v3  ;;  %8615 = vmatpush.msk.msra.mxu2 %vm1902_vm7, %v15847_v41  ;;  %v748_v12 = vand.u32 21, %v16640_v48 }
 0x3f9   : > { %vm3703_vm10 = vcmp.eq.s32.totalorder %v3699_v5, 40  ;;  %v1018_v25 = vperm.slane %v17114_v37, 0  ;;  %v1633_v17 = vperm.slane %v17042_v32, 1  ;;  %v3559_v47 = vand.u32 8, %v16640_v48  ;;  %v17141_v32 = vpop.permute.xlu2 %2268 }
 0x3fa   : > { %v17120_v19 = vsel %vm3703_vm10, 1, %v21349_v3  ;;  %vm4325_vm4 = vcmp.eq.s32.totalorder %v4293_v2, 1  ;;  %vm3904_vm9 = vcmp.eq.s32.totalorder %v3872_v9, 1  ;;  %vm752_vm14 = vcmp.eq.s32.totalorder %v748_v12, 21  ;;  %v21420_v9 = vld [vmem:[#allocation68_spill] sm:$0xff] }
 0x3fb   : > { %v3732_v44 = vperm.slane %v17120_v19, 0  ;;  %8626 = vmatpush.msk.msra.mxu0 %vm4325_vm4, %v17083_v20  ;;  %8602 = vmatpush.msk.msra.mxu1 %vm3904_vm9, %v16949_v18  ;;  %vm1050_vm6 = vcmp.eq.s32.totalorder %v1018_v25, 1  ;;  %v17128_v41 = vsel %vm752_vm14, 1, %v21349_v3  ;;  %vm1665_vm12 = vcmp.eq.s32.totalorder %v1633_v17, 1 }
 0x3fc   : > { %21419 = vst [vmem:[#allocation42_spill] sm:$0xff] %v17128_v41  ;;  %v4153_v5 = vperm.slane %v17048_v42, 1  ;;  %8592 = vmatpush.msk.msra.mxu3 %vm1050_vm6, %v15798_v40  ;;  %v781_v2 = vperm.slane %v17128_v41, 0  ;;  %8616 = vmatpush.msk.msra.mxu2 %vm1665_vm12, %v21420_v9  ;;  %vm3563_vm13 = vcmp.eq.s32.totalorder %v3559_v47, 8  ;;  %v4994_v12 = vperm.slane %v16833_v27, 2 }
 0x3fd   : > { %vm3764_vm5 = vcmp.eq.s32.totalorder %v3732_v44, 1  ;;  %v17137_v48 = vsel %vm3563_vm13, 1, %v21349_v3  ;;  %v1493_v25 = vperm.slane %v17057_v56, 1  ;;  %v3454_v17 = vperm.slane %v16737_v31, 2 }
 0x3fe   : > { %8603 = vmatpush.msk.msra.mxu1 %vm3764_vm5, %v16345_v52  ;;  %vm4185_vm0 = vcmp.eq.s32.totalorder %v4153_v5, 1  ;;  %vm813_vm11 = vcmp.eq.s32.totalorder %v781_v2, 1  ;;  %v3592_v40 = vperm.slane %v17137_v48, 0  ;;  %vm17145_vm3 = vcmp.eq.s32.totalorder %v4994_v12, 1  ;;  %v17166_v12 = vpop.permute.xlu1 %1794 }
 0x3ff   : > { %8627 = vmatpush.msk.msra.mxu0 %vm4185_vm0, %v17098_v14  ;;  %v4013_v44 = vperm.slane %v17073_v62, 1  ;;  %vm21423_vm8 = vcmp.lt.s32.totalorder %v9948_v10, 111  ;;  %8593 = vmatpush.msk.msra.mxu3 %vm813_vm11, %v21165_v45  ;;  %vm1525_vm15 = vcmp.eq.s32.totalorder %v1493_v25, 1  ;;  %vm17157_vm2 = vcmp.eq.s32.totalorder %v3454_v17, 1  ;;  %v17168_v45 = vpop.permute.xlu0 %2031  ;;  %v21427_v25 = vld [vmem:[#allocation33_spill] sm:$0xff]  ;;  %v21428_v17 = vld [vmem:[#allocation122_spill] sm:$0xff] }
 0x400   : > { %v17154_v3 = vsel %vm21423_vm8, %v16908_v39, %v17103_v35  ;;  %v4854_v2 = vperm.slane %v16918_v33, 2  ;;  %6945 = vmatmul.f32.vlgmr.msra.gmra.mxu3 %v16840_v61  ;;  %vm3624_vm1 = vcmp.eq.s32.totalorder %v3592_v40, 1  ;;  %8617 = vmatpush.msk.msra.mxu2 %vm1525_vm15, %v15950_v34  ;;  %v1256_v9 = vperm.slane %v17087_v50, 1  ;;  %v21430_v40 = vld [vmem:[#allocation107_spill] sm:$0xff]  ;;  %v21433_v50 = vld [vmem:[#allocation106_spill] sm:$0xff] }
 0x401   : > { %21424 = vst [vmem:[#allocation149_spill] sm:$0xff] %v17154_v3  ;;  %vm4045_vm7 = vcmp.eq.s32.totalorder %v4013_v44, 1  ;;  %v3314_v39 = vperm.slane %v16791_v23, 2  ;;  %8604 = vmatpush.msk.msra.mxu1 %vm3624_vm1, %v21427_v25  ;;  %8648 = vmatpush.msk.msrb.mxu3 %vm17145_vm3, %v17154_v3  ;;  %vm21429_vm10 = vcmp.lt.s32.totalorder %v9948_v10, 16  ;;  %vm21431_vm9 = vcmp.lt.s32.totalorder %v9948_v10, 17 }
 0x402   : > { %v17178_v34 = vsel %vm21429_vm10, %v21413_v51, %v21428_v17  ;;  %vm4886_vm4 = vcmp.eq.s32.totalorder %v4854_v2, 1  ;;  %v17184_v44 = vsel %vm21431_vm9, %v21394_v59, %v21430_v40  ;;  %vm21434_vm14 = vmmov %vm21431_vm9  ;;  %vm21435_vm6 = vcmp.lt.s32.totalorder %v9948_v10, 112  ;;  %v21437_v59 = vld [vmem:[#allocation97_spill] sm:$0xff] }
 0x403   : > { %21432 = vst [vmem:[#allocation132_spill] sm:$0xff] %v17184_v44  ;;  %v17190_v56 = vsel %vm21434_vm14, %v21430_v40, %v21433_v50  ;;  %v17196_v47 = vsel %vm21435_vm6, %v17005_v57, %v17141_v32  ;;  %8632 = vmatpush.msk.msrb.mxu1 %vm17157_vm2, %v16975_v28  ;;  %8628 = vmatpush.msk.msra.mxu0 %vm4045_vm7, %v17178_v34  ;;  %vm1288_vm12 = vcmp.eq.s32.totalorder %v1256_v9, 1  ;;  %vm3346_vm5 = vcmp.eq.s32.totalorder %v3314_v39, 1  ;;  %vm21438_vm13 = vmmov %vm21431_vm9  ;;  %v21440_v2 = vld [vmem:[#allocation189_spill] sm:$0xff]  ;;  %v21443_v9 = vld [vmem:[#allocation134_spill] sm:$0xff] }
 0x404   : > { %21436 = vst [vmem:[#allocation64_spill] sm:$0xff] %v17196_v47  ;;  %v17206_v51 = vsel %vm21438_vm13, %v21433_v50, %v21437_v59  ;;  %8649 = vmatpush.msk.msrb.mxu3 %vm4886_vm4, %v17196_v47  ;;  %8618 = vmatpush.msk.msra.mxu2 %vm1288_vm12, %v21440_v2  ;;  %vm21441_vm0 = vcmp.lt.s32.totalorder %v9948_v10, 127  ;;  %v3873_v5 = vperm.slane %v17108_v53, 1  ;;  %vm21444_vm11 = vmmov %vm21429_vm10  ;;  %v21445_v50 = vld [vmem:[#allocation133_spill] sm:$0xff]  ;;  %vm21448_vm8 = vcmp.lt.s32.totalorder %v9948_v10, 113 }
 0x405   : > { %21439 = vst [vmem:[#allocation144_spill] sm:$0xff] %v17206_v51  ;;  %v17214_v57 = vsel %vm21441_vm0, %v16878_v43, %v17166_v12  ;;  %v17221_v39 = vsel %vm21444_vm11, %v21428_v17, %v21443_v9  ;;  %vm21446_vm3 = vmmov %vm21429_vm10  ;;  %8633 = vmatpush.msk.msrb.mxu1 %vm3346_vm5, %v16955_v22  ;;  %v17234_v43 = vsel %vm21448_vm8, %v16868_v60, %v17168_v45  ;;  %v1019_v59 = vperm.slane %v17114_v37, 1  ;;  %v8881_v60 = vld.sshfl [vmem:[#allocation1 + $0x10] sm:$0xff pattern:$0x75316420] }
 0x406   : > { %21442 = vst [vmem:[#allocation110_spill] sm:$0xff] %v17214_v57  ;;  %v17227_v40 = vsel %vm21446_vm3, %v21443_v9, %v21445_v50  ;;  %v3733_v2 = vperm.slane %v17120_v19, 1  ;;  %v4714_v17 = vperm.slane %v16936_v29, 2  ;;  %vm3905_vm15 = vcmp.eq.s32.totalorder %v3873_v5, 1  ;;  %v21452_v5 = vld [vmem:[#allocation199_spill] sm:$0xff] }
 0x407   : > { %21447 = vst [vmem:[#allocation143_spill] sm:$0xff] %v17227_v40  ;;  %vm21450_vm2 = vcmask 719872   ;;  %v782_v9 = vperm.slane %v17128_v41, 1  ;;  %v3142_v50 = vperm.slane %v16859_v16, 2  ;;  %v3593_v47 = vperm.slane %v17137_v48, 1  ;;  %8629 = vmatpush.msk.msra.mxu0 %vm3905_vm15, %v17184_v44  ;;  %v21455_v41 = vld [vmem:[#allocation79_spill] sm:$0xff] }
 0x408   : > { %21449 = vst [vmem:[#allocation126_spill] sm:$0xff] %v17234_v43  ;;  %7914 = vmatmul.msk.f32.vlgmr.msra.gmra.mxu1 %vm21450_vm2, %v16812_v0  ;;  %vm1051_vm1 = vcmp.eq.s32.totalorder %v1019_v59, 1  ;;  %vm21451_vm7 = vcmask 1043456   ;;  %vm3765_vm10 = vcmp.eq.s32.totalorder %v3733_v2, 1  ;;  %vm4746_vm4 = vcmp.eq.s32.totalorder %v4714_v17, 1  ;;  %v1416_v59 = vpop.permute.xlu2 %1415 }
 0x409   : > { %8634 = vmatpush.msk.msrb.mxu1 %vm21451_vm7, %v8881_v60  ;;  %v4574_v3 = vperm.slane %v16988_v46, 2  ;;  %8619 = vmatpush.msk.msra.mxu2 %vm1051_vm1, %v21452_v5  ;;  %vm814_vm9 = vcmp.eq.s32.totalorder %v782_v9, 1  ;;  %vm3174_vm14 = vcmp.eq.s32.totalorder %v3142_v50, 1  ;;  %vm17249_vm6 = vcmp.eq.s32.totalorder %v3593_v47, 1  ;;  %v21456_v9 = vld [vmem:[#allocation174_spill] sm:$0xff]  ;;  %v1179_v5 = vpop.permute.xlu0 %1178 }
 0x40a   : > { %8650 = vmatpush.msk.msrb.mxu3 %vm4746_vm4, %v17234_v43  ;;  %v4995_v28 = vperm.slane %v16833_v27, 3  ;;  %8630 = vmatpush.msk.msra.mxu0 %vm3765_vm10, %v21455_v41  ;;  %v3002_v2 = vperm.slane %v16866_v36, 2  ;;  %v3455_v17 = vperm.slane %v16737_v31, 3  ;;  %v4434_v60 = vperm.slane %v17003_v55, 2 }
 0x40b   : > { %8635 = vmatpush.msk.msrb.mxu1 %vm3174_vm14, %v16967_v1  ;;  %vm4606_vm12 = vcmp.eq.s32.totalorder %v4574_v3, 1  ;;  %vm21457_vm5 = vcmp.lt.s32.totalorder %v9948_v10, 111  ;;  %8620 = vmatpush.msk.msra.mxu2 %vm814_vm9, %v21213_v11  ;;  %v4855_v50 = vperm.slane %v16918_v33, 3  ;;  %v2862_v3 = vperm.slane %v16887_v15, 2  ;;  %v21458_v11 = vld [vmem:[#allocation204_spill] sm:$0xff] }
 0x40c   : > { %v17263_v47 = vsel %vm21457_vm5, %v17103_v35, %v21456_v9  ;;  %8651 = vmatpush.msk.msrb.mxu3 %vm4606_vm12, %v17214_v57  ;;  %vm5027_vm13 = vcmp.eq.s32.totalorder %v4995_v28, 1  ;;  %6985 = vmatmul.f32.vlgmr.msra.gmra.mxu2 %v16840_v61  ;;  %vm3034_vm0 = vcmp.eq.s32.totalorder %v3002_v2, 1  ;;  %vm3487_vm11 = vcmp.eq.s32.totalorder %v3455_v17, 1  ;;  %v21461_v9 = vld [vmem:[#allocation194_spill] sm:$0xff] }
 0x40d   : > { %8631 = vmatpush.msk.msra.mxu0 %vm17249_vm6, %v16611_v63  ;;  %vm4466_vm3 = vcmp.eq.s32.totalorder %v4434_v60, 1  ;;  %v3315_v35 = vperm.slane %v16791_v23, 3  ;;  %vm21459_vm8 = vcmp.lt.s32.totalorder %v9948_v10, 112  ;;  %vm21462_vm15 = vcmp.lt.s32.totalorder %v9948_v10, 1  ;;  %8675 = vmatpush.msk.msrb.mxu2 %vm5027_vm13, %v17263_v47  ;;  %v21465_v60 = vld [vmem:[#allocation185_spill] sm:$0xff] }
 0x40e   : > { %v17278_v28 = vsel %vm21459_vm8, %v17141_v32, %v21458_v11  ;;  %v17283_v1 = vsel %vm21462_vm15, %v1416_v59, %v21461_v9  ;;  %8636 = vmatpush.msk.msrb.mxu1 %vm3034_vm0, %v17013_v6  ;;  %vm4887_vm2 = vcmp.eq.s32.totalorder %v4855_v50, 1  ;;  %vm2894_vm1 = vcmp.eq.s32.totalorder %v2862_v3, 1  ;;  %vm21463_vm7 = vmmov %vm21462_vm15  ;;  %v21464_v32 = vld [vmem:[#allocation75_spill] sm:$0xff] }
 0x40f   : > { %21460 = vst [vmem:[#allocation113_spill] sm:$0xff] %v17278_v28  ;;  %v17290_v22 = vsel %vm21463_vm7, %v17063_v4, %v1416_v59  ;;  %8659 = vmatpush.msk.msrb.mxu0 %vm3487_vm11, %v16996_v7  ;;  %8652 = vmatpush.msk.msrb.mxu3 %vm4466_vm3, %v21464_v32  ;;  %vm3347_vm10 = vcmp.eq.s32.totalorder %v3315_v35, 1  ;;  %v4294_v2 = vperm.slane %v17034_v8, 2  ;;  %v4715_v17 = vperm.slane %v16936_v29, 3  ;;  %v21467_v3 = vld [vmem:[#allocation179_spill] sm:$0xff]  ;;  %v21469_v59 = vld [vmem:[#allocation202_spill] sm:$0xff] }
 0x410   : > { %vm21466_vm4 = vcmp.lt.s32.totalorder %v9948_v10, 127  ;;  %vm21468_vm9 = vcmp.lt.s32.totalorder %v9948_v10, 113  ;;  %8676 = vmatpush.msk.msrb.mxu2 %vm4887_vm2, %v17278_v28  ;;  %8637 = vmatpush.msk.msrb.mxu1 %vm2894_vm1, %v17070_v54  ;;  %vm21470_vm14 = vcmp.lt.s32.totalorder %v9948_v10, 15  ;;  %v2722_v11 = vperm.slane %v16898_v24, 2  ;;  %v21483_v32 = vld [vmem:[#allocation48_spill] sm:$0xff] }
 0x411   : > { %v17300_v50 = vsel %vm21466_vm4, %v17166_v12, %v21465_v60  ;;  %v17306_v4 = vsel %vm21468_vm9, %v17168_v45, %v21467_v3  ;;  %v17313_v35 = vsel %vm21470_vm14, %v1179_v5, %v21469_v59  ;;  %8660 = vmatpush.msk.msrb.mxu0 %vm3347_vm10, %v16961_v38  ;;  %vm4326_vm6 = vcmp.eq.s32.totalorder %v4294_v2, 1  ;;  %vm21472_vm5 = vmmov %vm21470_vm14  ;;  %v8882_v2 = vld.sshfl [vmem:[#allocation1 + $0x18] sm:$0xff pattern:$0x75316420]  ;;  %v21497_v28 = vld [vmem:[#allocation56_spill] sm:$0xff] }
 0x412   : > { %21471 = vst [vmem:[#allocation186_spill] sm:$0xff] %v17313_v35  ;;  %vm4747_vm12 = vcmp.eq.s32.totalorder %v4715_v17, 1  ;;  %v17320_v12 = vsel %vm21472_vm5, %v17077_v58, %v1179_v5  ;;  %v4154_v45 = vperm.slane %v17048_v42, 2  ;;  %8653 = vmatpush.msk.msrb.mxu3 %vm4326_vm6, %v17290_v22  ;;  %vm2754_vm13 = vcmp.eq.s32.totalorder %v2722_v11, 1 }
 0x413   : > { %8677 = vmatpush.msk.msrb.mxu2 %vm4747_vm12, %v17306_v4  ;;  %v4575_v9 = vperm.slane %v16988_v46, 3  ;;  %v2582_v60 = vperm.slane %v16925_v21, 2  ;;  %v3143_v3 = vperm.slane %v16859_v16, 3  ;;  %8638 = vmatpush.msk.msrb.mxu1 %vm2754_vm13, %v16949_v18  ;;  %vm21473_vm0 = vcmask 1043456  }
 0x414   : > { %8661 = vmatpush.msk.msrb.mxu0 %vm21473_vm0, %v8882_v2  ;;  %vm4186_vm11 = vcmp.eq.s32.totalorder %v4154_v45, 1  ;;  %v4014_v10 = vperm.slane %v17073_v62, 2  ;;  %v4435_v58 = vperm.slane %v17003_v55, 3  ;;  %v2345_v5 = vperm.slane %v16943_v30, 2 }
 0x415   : > { %vm21474_vm3 = vcmask 719872   ;;  %8654 = vmatpush.msk.msrb.mxu3 %vm4186_vm11, %v17320_v12  ;;  %vm4607_vm8 = vcmp.eq.s32.totalorder %v4575_v9, 1  ;;  %vm2614_vm15 = vcmp.eq.s32.totalorder %v2582_v60, 1  ;;  %vm3175_vm2 = vcmp.eq.s32.totalorder %v3143_v3, 1  ;;  %v21475_v60 = vld [vmem:[#allocation74_spill] sm:$0xff] }
 0x416   : > { %7915 = vmatmul.msk.f32.vlgmr.msra.gmra.mxu0 %vm21474_vm3, %v16812_v0  ;;  %v3003_v17 = vperm.slane %v16866_v36, 3  ;;  %8678 = vmatpush.msk.msrb.mxu2 %vm4607_vm8, %v17300_v50  ;;  %vm4046_vm1 = vcmp.eq.s32.totalorder %v4014_v10, 1  ;;  %vm4467_vm7 = vcmp.eq.s32.totalorder %v4435_v58, 1  ;;  %vm2377_vm10 = vcmp.eq.s32.totalorder %v2345_v5, 1  ;;  %v21476_v58 = vld [vmem:[#allocation55_spill] sm:$0xff] }
 0x417   : > { %8639 = vmatpush.msk.msrb.mxu1 %vm2614_vm15, %v16345_v52  ;;  %v3874_v59 = vperm.slane %v17108_v53, 2  ;;  %8662 = vmatpush.msk.msrb.mxu0 %vm3175_vm2, %v17083_v20  ;;  %v4295_v11 = vperm.slane %v17034_v8, 3  ;;  %v2108_v45 = vperm.slane %v17000_v49, 2  ;;  %v2863_v9 = vperm.slane %v16887_v15, 3 }
 0x418   : > { %8655 = vmatpush.msk.msrb.mxu3 %vm4046_vm1, %v17221_v39  ;;  %vm3035_vm4 = vcmp.eq.s32.totalorder %v3003_v17, 1  ;;  %8679 = vmatpush.msk.msrb.mxu2 %vm4467_vm7, %v21475_v60  ;;  %v3734_v52 = vperm.slane %v17120_v19, 2  ;;  %v4155_v3 = vperm.slane %v17048_v42, 3  ;;  %v1871_v2 = vperm.slane %v17024_v13, 2  ;;  %v21477_v17 = vld [vmem:[#allocation40_spill] sm:$0xff]  ;;  %v21481_v60 = vld [vmem:[#allocation73_spill] sm:$0xff] }
 0x419   : > { %8640 = vmatpush.msk.msrb.mxu1 %vm2377_vm10, %v21427_v25  ;;  %vm3906_vm9 = vcmp.eq.s32.totalorder %v3874_v59, 1  ;;  %8663 = vmatpush.msk.msrb.mxu0 %vm3035_vm4, %v17098_v14  ;;  %vm4327_vm14 = vcmp.eq.s32.totalorder %v4295_v11, 1  ;;  %vm2140_vm6 = vcmp.eq.s32.totalorder %v2108_v45, 1  ;;  %vm2895_vm12 = vcmp.eq.s32.totalorder %v2863_v9, 1  ;;  %v21478_v45 = vld [vmem:[#allocation83_spill] sm:$0xff] }
 0x41a   : > { %8656 = vmatpush.msk.msrb.mxu3 %vm3906_vm9, %v17190_v56  ;;  %v2723_v10 = vperm.slane %v16898_v24, 3  ;;  %8680 = vmatpush.msk.msrb.mxu2 %vm4327_vm14, %v17283_v1  ;;  %vm3766_vm5 = vcmp.eq.s32.totalorder %v3734_v52, 1  ;;  %vm4187_vm13 = vcmp.eq.s32.totalorder %v4155_v3, 1  ;;  %vm1903_vm0 = vcmp.eq.s32.totalorder %v1871_v2, 1  ;;  %v21479_v52 = vld [vmem:[#allocation102_spill] sm:$0xff]  ;;  %v21480_v2 = vld [vmem:[#allocation36_spill] sm:$0xff] }
 0x41b   : > { %8641 = vmatpush.msk.msrb.mxu1 %vm2140_vm6, %v16396_v26  ;;  %v3594_v25 = vperm.slane %v17137_v48, 2  ;;  %8664 = vmatpush.msk.msrb.mxu0 %vm2895_vm12, %v17178_v34  ;;  %v4015_v5 = vperm.slane %v17073_v62, 3  ;;  %v1634_v59 = vperm.slane %v21477_v17, 2  ;;  %v2583_v11 = vperm.slane %v16925_v21, 3 }
 0x41c   : > { %8657 = vmatpush.msk.msrb.mxu3 %vm3766_vm5, %v21476_v58  ;;  %vm2755_vm11 = vcmp.eq.s32.totalorder %v2723_v10, 1  ;;  %8681 = vmatpush.msk.msrb.mxu2 %vm4187_vm13, %v17313_v35  ;;  %v3456_v26 = vperm.slane %v16737_v31, 4  ;;  %v3875_v9 = vperm.slane %v17108_v53, 3  ;;  %v1494_v3 = vperm.slane %v21479_v52, 2 }
 0x41d   : > { %8642 = vmatpush.msk.msrb.mxu1 %vm1903_vm0, %v21478_v45  ;;  %vm3626_vm3 = vcmp.eq.s32.totalorder %v3594_v25, 1  ;;  %8665 = vmatpush.msk.msrb.mxu0 %vm2755_vm11, %v17184_v44  ;;  %vm4047_vm8 = vcmp.eq.s32.totalorder %v4015_v5, 1  ;;  %vm1666_vm15 = vcmp.eq.s32.totalorder %v1634_v59, 1  ;;  %vm2615_vm2 = vcmp.eq.s32.totalorder %v2583_v11, 1  ;;  %v21482_v59 = vld [vmem:[#allocation92_spill] sm:$0xff]  ;;  %v21498_v44 = vld [vmem:[#allocation27_spill] sm:$0xff] }
 0x41e   : > { %8658 = vmatpush.msk.msrb.mxu3 %vm3626_vm3, %v21480_v2  ;;  %v2346_v10 = vperm.slane %v16943_v30, 3  ;;  %8682 = vmatpush.msk.msrb.mxu2 %vm4047_vm8, %v17227_v40  ;;  %vm3488_vm1 = vcmp.eq.s32.totalorder %v3456_v26, 1  ;;  %vm3907_vm7 = vcmp.eq.s32.totalorder %v3875_v9, 1  ;;  %vm1526_vm10 = vcmp.eq.s32.totalorder %v1494_v3, 1  ;;  %v21502_v3 = vld [vmem:[#allocation72_spill] sm:$0xff] }
 0x41f   : > { %8643 = vmatpush.msk.msrb.mxu1 %vm1666_vm15, %v21481_v60  ;;  %v3316_v25 = vperm.slane %v16791_v23, 4  ;;  %8666 = vmatpush.msk.msrb.mxu0 %vm2615_vm2, %v21455_v41  ;;  %v3735_v5 = vperm.slane %v17120_v19, 3  ;;  %v1257_v11 = vperm.slane %v21482_v59, 2  ;;  %v2109_v45 = vperm.slane %v17000_v49, 3 }
 0x420   : > { %8686 = vmatpush.msk.msra.mxu3 %vm3488_vm1, %v17234_v43  ;;  %vm2378_vm4 = vcmp.eq.s32.totalorder %v2346_v10, 1  ;;  %8683 = vmatpush.msk.msrb.mxu2 %vm3907_vm7, %v17206_v51  ;;  %v3595_v60 = vperm.slane %v17137_v48, 3  ;;  %v1020_v26 = vperm.slane %v17114_v37, 2  ;;  %v1872_v41 = vperm.slane %v17024_v13, 3  ;;  %v21496_v43 = vld [vmem:[#allocation139_spill] sm:$0xff] }
 0x421   : > { %8644 = vmatpush.msk.msrb.mxu1 %vm1526_vm10, %v21483_v32  ;;  %vm3348_vm9 = vcmp.eq.s32.totalorder %v3316_v25, 1  ;;  %8667 = vmatpush.msk.msrb.mxu0 %vm2378_vm4, %v16611_v63  ;;  %vm3767_vm14 = vcmp.eq.s32.totalorder %v3735_v5, 1  ;;  %vm1289_vm6 = vcmp.eq.s32.totalorder %v1257_v11, 1  ;;  %vm2141_vm12 = vcmp.eq.s32.totalorder %v2109_v45, 1  ;;  %v21485_v32 = vld [vmem:[#allocation146_spill] sm:$0xff]  ;;  %v21490_v25 = vld [vmem:[#allocation109_spill] sm:$0xff] }
 0x422   : > { %8687 = vmatpush.msk.msra.mxu3 %vm3348_vm9, %v17214_v57  ;;  %v3144_v9 = vperm.slane %v16859_v16, 4  ;;  %vm21484_vm5 = vcmask 719872   ;;  %8684 = vmatpush.msk.msrb.mxu2 %vm3767_vm14, %v21485_v32  ;;  %vm3627_vm13 = vcmp.eq.s32.totalorder %v3595_v60, 1  ;;  %vm17388_vm0 = vcmp.eq.s32.totalorder %v1020_v26, 1  ;;  %v21491_v5 = vld [vmem:[#allocation46_spill] sm:$0xff] }
 0x423   : > { %7916 = vmatmul.msk.f32.vlgmr.msrb.gmra.mxu3 %vm21484_vm5, %v16812_v0  ;;  %vm17392_vm11 = vcmp.eq.s32.totalorder %v1872_v41, 1  ;;  %v3457_v63 = vperm.slane %v16737_v31, 5  ;;  %8645 = vmatpush.msk.msrb.mxu1 %vm1289_vm6, %v21490_v25  ;;  %v21494_v45 = vld [vmem:[#allocation42_spill] sm:$0xff]  ;;  %v1635_v26 = vperm.slane %v21477_v17, 3  ;;  %v3004_v57 = vperm.slane %v16866_v36, 4 }
 0x424   : > { %8668 = vmatpush.msk.msrb.mxu0 %vm2141_vm12, %v21491_v5  ;;  %vm17399_vm3 = vcmp.eq.s32.totalorder %v3144_v9, 1  ;;  %v783_v60 = vperm.slane %v21494_v45, 2  ;;  %v8883_v41 = vld.sshfl [vmem:[#allocation1 + $0x20] sm:$0xff pattern:$0x75316420]  ;;  %vm21495_vm8 = vcmask 1043456   ;;  %8685 = vmatpush.msk.msrb.mxu2 %vm3627_vm13, %v21496_v43 }
 0x425   : > { %8688 = vmatpush.msk.msra.mxu3 %vm21495_vm8, %v8883_v41  ;;  %vm3489_vm15 = vcmp.eq.s32.totalorder %v3457_v63, 1  ;;  %v3317_v25 = vperm.slane %v16791_v23, 5  ;;  %v4996_v5 = vperm.slane %v16833_v27, 4  ;;  %v1495_v9 = vperm.slane %v21479_v52, 3  ;;  %8646 = vmatpush.msk.msrb.mxu1 %vm17388_vm0, %v21497_v28  ;;  %vm21505_vm0 = vmmov %vm21495_vm8  ;;  %v21508_v63 = vld [vmem:[#allocation207_spill] sm:$0xff] }
 0x426   : > { %8669 = vmatpush.msk.msrb.mxu0 %vm17392_vm11, %v21498_v44  ;;  %vm815_vm2 = vcmp.eq.s32.totalorder %v783_v60, 1  ;;  %vm1667_vm1 = vcmp.eq.s32.totalorder %v1635_v26, 1  ;;  %vm3036_vm7 = vcmp.eq.s32.totalorder %v3004_v57, 1  ;;  %v2864_v41 = vperm.slane %v16887_v15, 4  ;;  %8713 = vmatpush.msk.msra.mxu2 %vm3489_vm15, %v17306_v4  ;;  %v21501_v44 = vld [vmem:[#allocation95_spill] sm:$0xff] }
 0x427   : > { %8689 = vmatpush.msk.msra.mxu3 %vm17399_vm3, %v17290_v22  ;;  %vm3349_vm10 = vcmp.eq.s32.totalorder %v3317_v25, 1  ;;  %vm17422_vm4 = vcmp.eq.s32.totalorder %v4996_v5, 1  ;;  %vm1527_vm9 = vcmp.eq.s32.totalorder %v1495_v9, 1  ;;  %v4856_v28 = vperm.slane %v16918_v33, 4  ;;  %8647 = vmatpush.msk.msrb.mxu1 %vm815_vm2, %v21501_v44  ;;  %v21503_v25 = vld [vmem:[#allocation121_spill] sm:$0xff]  ;;  %v21506_v44 = vld [vmem:[#allocation154_spill] sm:$0xff] }
 0x428   : > { %8670 = vmatpush.msk.msrb.mxu0 %vm1667_vm1, %v21502_v3  ;;  %vm2896_vm14 = vcmp.eq.s32.totalorder %v2864_v41, 1  ;;  %v1258_v57 = vperm.slane %v21482_v59, 3  ;;  %v2724_v10 = vperm.slane %v16898_v24, 4  ;;  %v3145_v11 = vperm.slane %v16859_v16, 5  ;;  %8714 = vmatpush.msk.msra.mxu2 %vm3349_vm10, %v17300_v50  ;;  %v21504_v9 = vld [vmem:[#allocation177_spill] sm:$0xff] }
 0x429   : > { %8690 = vmatpush.msk.msra.mxu3 %vm3036_vm7, %v17320_v12  ;;  %v4716_v60 = vperm.slane %v16936_v29, 4  ;;  %v1021_v26 = vperm.slane %v17114_v37, 3  ;;  %7025 = vmatmul.f32.vlgmr.msrb.gmra.mxu1 %v16840_v61  ;;  %vm4888_vm6 = vcmp.eq.s32.totalorder %v4856_v28, 1  ;;  %v2584_v5 = vperm.slane %v16925_v21, 4 }
 0x42a   : > { %8671 = vmatpush.msk.msrb.mxu0 %vm1527_vm9, %v21503_v25  ;;  %vm1290_vm12 = vcmp.eq.s32.totalorder %v1258_v57, 1  ;;  %8702 = vmatpush.msk.msra.mxu1 %vm17422_vm4, %v21504_v9  ;;  %vm2756_vm5 = vcmp.eq.s32.totalorder %v2724_v10, 1  ;;  %vm3177_vm13 = vcmp.eq.s32.totalorder %v3145_v11, 1  ;;  %v8884_v41 = vld.sshfl [vmem:[#allocation1 + $0x28] sm:$0xff pattern:$0x75316420] }
 0x42b   : > { %8691 = vmatpush.msk.msra.mxu3 %vm2896_vm14, %v17221_v39  ;;  %8715 = vmatpush.msk.msra.mxu2 %vm21505_vm0, %v8884_v41  ;;  %vm4748_vm11 = vcmp.eq.s32.totalorder %v4716_v60, 1  ;;  %vm1053_vm3 = vcmp.eq.s32.totalorder %v1021_v26, 1  ;;  %v3005_v28 = vperm.slane %v16866_v36, 5  ;;  %v4576_v3 = vperm.slane %v16988_v46, 4  ;;  %v21509_v26 = vld [vmem:[#allocation209_spill] sm:$0xff] }
 0x42c   : > { %8672 = vmatpush.msk.msrb.mxu0 %vm1290_vm12, %v21506_v44  ;;  %vm21507_vm8 = vcmask 719872   ;;  %8703 = vmatpush.msk.msra.mxu1 %vm4888_vm6, %v21508_v63  ;;  %vm2616_vm15 = vcmp.eq.s32.totalorder %v2584_v5, 1  ;;  %v784_v57 = vperm.slane %v21494_v45, 3  ;;  %v2347_v10 = vperm.slane %v16943_v30, 4 }
 0x42d   : > { %7917 = vmatmul.msk.f32.vlgmr.msrb.gmra.mxu2 %vm21507_vm8, %v16812_v0  ;;  %v2865_v11 = vperm.slane %v16887_v15, 5  ;;  %8692 = vmatpush.msk.msra.mxu3 %vm2756_vm5, %v17190_v56  ;;  %vm3037_vm2 = vcmp.eq.s32.totalorder %v3005_v28, 1  ;;  %vm4608_vm1 = vcmp.eq.s32.totalorder %v4576_v3, 1  ;;  %v4436_v60 = vperm.slane %v17003_v55, 4  ;;  %v21510_v0 = vld [vmem:[#allocation222_spill] sm:$0xff] }
 0x42e   : > { %8716 = vmatpush.msk.msra.mxu2 %vm3177_vm13, %v17283_v1  ;;  %8704 = vmatpush.msk.msra.mxu1 %vm4748_vm11, %v21509_v26  ;;  %vm816_vm7 = vcmp.eq.s32.totalorder %v784_v57, 1  ;;  %vm2379_vm10 = vcmp.eq.s32.totalorder %v2347_v10, 1  ;;  %v4997_v25 = vperm.slane %v16833_v27, 5  ;;  %v2110_v41 = vperm.slane %v17000_v49, 4  ;;  %v21513_v3 = vld [vmem:[#allocation210_spill] sm:$0xff] }
 0x42f   : > { %8673 = vmatpush.msk.msrb.mxu0 %vm1053_vm3, %v21510_v0  ;;  %vm2897_vm4 = vcmp.eq.s32.totalorder %v2865_v11, 1  ;;  %8693 = vmatpush.msk.msra.mxu3 %vm2616_vm15, %v21476_v58  ;;  %vm17461_vm9 = vcmp.eq.s32.totalorder %v4436_v60, 1  ;;  %v2725_v44 = vperm.slane %v16898_v24, 5  ;;  %v4296_v28 = vperm.slane %v17034_v8, 4  ;;  %v21514_v57 = vld [vmem:[#allocation26_spill] sm:$0xff] }
 0x430   : > { %8717 = vmatpush.msk.msra.mxu2 %vm3037_vm2, %v17313_v35  ;;  %8705 = vmatpush.msk.msra.mxu1 %vm4608_vm1, %v21513_v3  ;;  %vm5029_vm14 = vcmp.eq.s32.totalorder %v4997_v25, 1  ;;  %v4857_v10 = vperm.slane %v16918_v33, 5  ;;  %v1873_v58 = vperm.slane %v17024_v13, 4  ;;  %v2585_v11 = vperm.slane %v16925_v21, 5  ;;  %v21515_v60 = vld [vmem:[#allocation78_spill] sm:$0xff]  ;;  %v21528_v35 = vld [vmem:[#allocation77_spill] sm:$0xff] }
 0x431   : > { %8674 = vmatpush.msk.msrb.mxu0 %vm816_vm7, %v21514_v57  ;;  %8694 = vmatpush.msk.msra.mxu3 %vm2379_vm10, %v21480_v2  ;;  %vm2142_vm6 = vcmp.eq.s32.totalorder %v2110_v41, 1  ;;  %vm2757_vm12 = vcmp.eq.s32.totalorder %v2725_v44, 1  ;;  %vm4328_vm5 = vcmp.eq.s32.totalorder %v4296_v28, 1  ;;  %v4156_v0 = vperm.slane %v17048_v42, 4  ;;  %v21516_v25 = vld [vmem:[#allocation178_spill] sm:$0xff]  ;;  %v21517_v57 = vld [vmem:[#allocation85_spill] sm:$0xff] }
 0x432   : > { %8718 = vmatpush.msk.msra.mxu2 %vm2897_vm4, %v17227_v40  ;;  %7065 = vmatmul.f32.vlgmr.msrb.gmra.mxu0 %v16840_v61  ;;  %vm4889_vm13 = vcmp.eq.s32.totalorder %v4857_v10, 1  ;;  %vm1905_vm0 = vcmp.eq.s32.totalorder %v1873_v58, 1  ;;  %vm2617_vm11 = vcmp.eq.s32.totalorder %v2585_v11, 1  ;;  %v4717_v2 = vperm.slane %v16936_v29, 5  ;;  %v21518_v61 = vld [vmem:[#allocation214_spill] sm:$0xff]  ;;  %v21519_v28 = vld [vmem:[#allocation181_spill] sm:$0xff] }
 0x433   : > { %8706 = vmatpush.msk.msra.mxu1 %vm17461_vm9, %v21515_v60  ;;  %8729 = vmatpush.msk.msra.mxu0 %vm5029_vm14, %v21516_v25  ;;  %v1636_v41 = vperm.slane %v21477_v17, 4  ;;  %vm4188_vm3 = vcmp.eq.s32.totalorder %v4156_v0, 1  ;;  %v2348_v5 = vperm.slane %v16943_v30, 5  ;;  %v4016_v44 = vperm.slane %v17073_v62, 4  ;;  %v21520_v10 = vld [vmem:[#allocation37_spill] sm:$0xff]  ;;  %v21522_v0 = vld [vmem:[#allocation198_spill] sm:$0xff] }
 0x434   : > { %8695 = vmatpush.msk.msra.mxu3 %vm2142_vm6, %v21517_v57  ;;  %8719 = vmatpush.msk.msra.mxu2 %vm2757_vm12, %v17206_v51  ;;  %vm4749_vm8 = vcmp.eq.s32.totalorder %v4717_v2, 1  ;;  %v4577_v58 = vperm.slane %v16988_v46, 5  ;;  %v21521_v11 = vld [vmem:[#allocation217_spill] sm:$0xff]  ;;  %v1496_v60 = vperm.slane %v21479_v52, 4  ;;  %v21523_v57 = vld [vmem:[#allocation71_spill] sm:$0xff]  ;;  %v2111_v51 = vperm.slane %v17000_v49, 5 }
 0x435   : > { %8707 = vmatpush.msk.msra.mxu1 %vm4328_vm5, %v21518_v61  ;;  %8730 = vmatpush.msk.msra.mxu0 %vm4889_vm13, %v21519_v28  ;;  %vm1668_vm15 = vcmp.eq.s32.totalorder %v1636_v41, 1  ;;  %vm2380_vm2 = vcmp.eq.s32.totalorder %v2348_v5, 1  ;;  %vm4048_vm1 = vcmp.eq.s32.totalorder %v4016_v44, 1  ;;  %v3876_v2 = vperm.slane %v17108_v53, 4  ;;  %v21525_v40 = vld [vmem:[#allocation200_spill] sm:$0xff] }
 0x436   : > { %8696 = vmatpush.msk.msra.mxu3 %vm1905_vm0, %v21520_v10  ;;  %8720 = vmatpush.msk.msra.mxu2 %vm2617_vm11, %v21485_v32  ;;  %vm4609_vm7 = vcmp.eq.s32.totalorder %v4577_v58, 1  ;;  %v4437_v41 = vperm.slane %v17003_v55, 5  ;;  %v21524_v32 = vld [vmem:[#allocation218_spill] sm:$0xff]  ;;  %vm1528_vm10 = vcmp.eq.s32.totalorder %v1496_v60, 1  ;;  %v1259_v5 = vperm.slane %v21482_v59, 4  ;;  %v21526_v58 = vld [vmem:[#allocation99_spill] sm:$0xff] }
 0x437   : > { %8708 = vmatpush.msk.msra.mxu1 %vm4188_vm3, %v21521_v11  ;;  %8731 = vmatpush.msk.msra.mxu0 %vm4749_vm8, %v21522_v0  ;;  %v1874_v44 = vperm.slane %v17024_v13, 5  ;;  %v3736_v10 = vperm.slane %v17120_v19, 4  ;;  %vm2143_vm4 = vcmp.eq.s32.totalorder %v2111_v51, 1  ;;  %vm3908_vm9 = vcmp.eq.s32.totalorder %v3876_v2, 1 }
 0x438   : > { %8697 = vmatpush.msk.msra.mxu3 %vm1668_vm15, %v21523_v57  ;;  %8721 = vmatpush.msk.msra.mxu2 %vm2380_vm2, %v21496_v43  ;;  %vm4469_vm14 = vcmp.eq.s32.totalorder %v4437_v41, 1  ;;  %v4297_v57 = vperm.slane %v17034_v8, 5  ;;  %v21527_v43 = vld [vmem:[#allocation220_spill] sm:$0xff]  ;;  %vm1291_vm6 = vcmp.eq.s32.totalorder %v1259_v5, 1  ;;  %v1022_v60 = vperm.slane %v17114_v37, 4 }
 0x439   : > { %8709 = vmatpush.msk.msra.mxu1 %vm4048_vm1, %v21524_v32  ;;  %8732 = vmatpush.msk.msra.mxu0 %vm4609_vm7, %v21525_v40  ;;  %vm1906_vm12 = vcmp.eq.s32.totalorder %v1874_v44, 1  ;;  %vm3768_vm5 = vcmp.eq.s32.totalorder %v3736_v10, 1  ;;  %v1637_v51 = vperm.slane %v21477_v17, 5  ;;  %v3596_v2 = vperm.slane %v17137_v48, 4  ;;  %v21530_v10 = vld [vmem:[#allocation205_spill] sm:$0xff] }
 0x43a   : > { %8698 = vmatpush.msk.msra.mxu3 %vm1528_vm10, %v21526_v58  ;;  %8722 = vmatpush.msk.msra.mxu2 %vm2143_vm4, %v16996_v7  ;;  %vm4329_vm13 = vcmp.eq.s32.totalorder %v4297_v57, 1  ;;  %v4157_v41 = vperm.slane %v17048_v42, 5  ;;  %v21529_v7 = vld [vmem:[#allocation149_spill] sm:$0xff]  ;;  %vm1054_vm0 = vcmp.eq.s32.totalorder %v1022_v60, 1  ;;  %v785_v5 = vperm.slane %v21494_v45, 4  ;;  %v21531_v58 = vld [vmem:[#allocation76_spill] sm:$0xff] }
 0x43b   : > { %8710 = vmatpush.msk.msra.mxu1 %vm3908_vm9, %v21527_v43  ;;  %8733 = vmatpush.msk.msra.mxu0 %vm4469_vm14, %v21528_v35  ;;  %v1497_v44 = vperm.slane %v21479_v52, 5  ;;  %v3458_v35 = vperm.slane %v16737_v31, 6  ;;  %vm1669_vm11 = vcmp.eq.s32.totalorder %v1637_v51, 1  ;;  %vm3628_vm3 = vcmp.eq.s32.totalorder %v3596_v2, 1  ;;  %v21533_v60 = vld [vmem:[#allocation215_spill] sm:$0xff] }
 0x43c   : > { %8699 = vmatpush.msk.msra.mxu3 %vm1291_vm6, %v17013_v6  ;;  %8723 = vmatpush.msk.msra.mxu2 %vm1906_vm12, %v16961_v38  ;;  %vm4189_vm8 = vcmp.eq.s32.totalorder %v4157_v41, 1  ;;  %v4017_v6 = vperm.slane %v17073_v62, 5  ;;  %v21532_v38 = vld [vmem:[#allocation64_spill] sm:$0xff]  ;;  %vm817_vm15 = vcmp.eq.s32.totalorder %v785_v5, 1  ;;  %v4998_v57 = vperm.slane %v16833_v27, 6 }
 0x43d   : > { %8711 = vmatpush.msk.msra.mxu1 %vm3768_vm5, %v21529_v7  ;;  %8734 = vmatpush.msk.msra.mxu0 %vm4329_vm13, %v21530_v10  ;;  %vm1529_vm2 = vcmp.eq.s32.totalorder %v1497_v44, 1  ;;  %vm3490_vm1 = vcmp.eq.s32.totalorder %v3458_v35, 1  ;;  %v3318_v51 = vperm.slane %v16791_v23, 6  ;;  %v3877_v2 = vperm.slane %v17108_v53, 5 }
 0x43e   : > { %8700 = vmatpush.msk.msra.mxu3 %vm1054_vm0, %v17070_v54  ;;  %8724 = vmatpush.msk.msra.mxu2 %vm1669_vm11, %v21531_v58  ;;  %vm4049_vm7 = vcmp.eq.s32.totalorder %v4017_v6, 1  ;;  %v1260_v54 = vperm.slane %v21482_v59, 5  ;;  %vm5030_vm10 = vcmp.eq.s32.totalorder %v4998_v57, 1  ;;  %v4858_v41 = vperm.slane %v16918_v33, 6  ;;  %v21535_v6 = vld [vmem:[#allocation212_spill] sm:$0xff]  ;;  %v21538_v57 = vld [vmem:[#allocation219_spill] sm:$0xff] }
 0x43f   : > { %8712 = vmatpush.msk.msra.mxu1 %vm3628_vm3, %v21532_v38  ;;  %8735 = vmatpush.msk.msra.mxu0 %vm4189_vm8, %v21533_v60  ;;  %v1023_v5 = vperm.slane %v17114_v37, 5  ;;  %v3737_v44 = vperm.slane %v17120_v19, 5  ;;  %v17536_v35 = vld.sshfl [vmem:[#allocation1] sm:$0xff pattern:$0x75316420]  ;;  %vm3350_vm9 = vcmp.eq.s32.totalorder %v3318_v51, 1 }
 0x440   : > { %8701 = vmatpush.msk.msra.mxu3 %vm817_vm15, %v16949_v18  ;;  %8725 = vmatpush.msk.msra.mxu2 %vm1529_vm2, %v17083_v20  ;;  %v21534_v18 = vld [vmem:[#allocation216_spill] sm:$0xff]  ;;  %vm1292_vm4 = vcmp.eq.s32.totalorder %v1260_v54, 1  ;;  %vm3909_vm14 = vcmp.eq.s32.totalorder %v3877_v2, 1  ;;  %v4718_v20 = vperm.slane %v16936_v29, 6  ;;  %vm4890_vm6 = vcmp.eq.s32.totalorder %v4858_v41, 1 }
 0x441   : > { %8740 = vmatpush.msk.msrb.mxu1 %vm3490_vm1, %v21509_v26  ;;  %7105 = vmatmul.f32.vlgmr.msra.gmra.mxu3 %v17536_v35  ;;  %vm1055_vm12 = vcmp.eq.s32.totalorder %v1023_v5, 1  ;;  %vm17543_vm5 = vcmp.eq.s32.totalorder %v3737_v44, 1  ;;  %v786_v58 = vperm.slane %v21494_v45, 5  ;;  %v3146_v51 = vperm.slane %v16859_v16, 6  ;;  %v21541_v41 = vld [vmem:[#allocation180_spill] sm:$0xff] }
 0x442   : > { %8736 = vmatpush.msk.msra.mxu0 %vm4049_vm7, %v21534_v18  ;;  %8756 = vmatpush.msk.msrb.mxu3 %vm5030_vm10, %v21535_v6  ;;  %vm17550_vm13 = vcmp.eq.s32.totalorder %v4718_v20, 1  ;;  %v4578_v2 = vperm.slane %v16988_v46, 6  ;;  %v4999_v5 = vperm.slane %v16833_v27, 7  ;;  %v3459_v44 = vperm.slane %v16737_v31, 7  ;;  %v21548_v31 = vld [vmem:[#allocation132_spill] sm:$0xff] }
 0x443   : > { %8726 = vmatpush.msk.msra.mxu2 %vm1292_vm4, %v17098_v14  ;;  %8741 = vmatpush.msk.msrb.mxu1 %vm3350_vm9, %v21513_v3  ;;  %v3597_v14 = vperm.slane %v17137_v48, 5  ;;  %vm818_vm0 = vcmp.eq.s32.totalorder %v786_v58, 1  ;;  %v3006_v3 = vperm.slane %v16866_v36, 6  ;;  %v8886_v20 = vld.sshfl [vmem:[#allocation1 + $0x30] sm:$0xff pattern:$0x75316420] }
 0x444   : > { %8737 = vmatpush.msk.msra.mxu0 %vm3909_vm14, %v21538_v57  ;;  %8757 = vmatpush.msk.msrb.mxu3 %vm4890_vm6, %v21541_v41  ;;  %vm21542_vm11 = vcmask 1043456   ;;  %vm3178_vm3 = vcmp.eq.s32.totalorder %v3146_v51, 1  ;;  %vm17570_vm15 = vcmp.eq.s32.totalorder %v4578_v2, 1  ;;  %v4438_v27 = vperm.slane %v17003_v55, 6  ;;  %v21547_v58 = vld [vmem:[#allocation153_spill] sm:$0xff]  ;;  %v21563_v51 = vld [vmem:[#allocation171_spill] sm:$0xff] }
 0x445   : > { %8727 = vmatpush.msk.msra.mxu2 %vm1055_vm12, %v17178_v34  ;;  %8742 = vmatpush.msk.msrb.mxu1 %vm21542_vm11, %v8886_v20  ;;  %vm17566_vm8 = vcmp.eq.s32.totalorder %v3597_v14, 1  ;;  %vm17579_vm2 = vcmp.eq.s32.totalorder %v4999_v5, 1  ;;  %vm17583_vm1 = vcmp.eq.s32.totalorder %v3006_v3, 1  ;;  %vm17587_vm7 = vcmp.eq.s32.totalorder %v3459_v44, 1  ;;  %v21562_v34 = vld [vmem:[#allocation221_spill] sm:$0xff] }
 0x446   : > { %8738 = vmatpush.msk.msra.mxu0 %vm17543_vm5, %v17263_v47  ;;  %8758 = vmatpush.msk.msrb.mxu3 %vm17550_vm13, %v21547_v58  ;;  %v4859_v2 = vperm.slane %v16918_v33, 7  ;;  %vm17594_vm10 = vcmp.eq.s32.totalorder %v4438_v27, 1  ;;  %v2866_v41 = vperm.slane %v16887_v15, 6  ;;  %v3319_v5 = vperm.slane %v16791_v23, 7  ;;  %v21558_v33 = vld [vmem:[#allocation113_spill] sm:$0xff]  ;;  %v21559_v58 = vld [vmem:[#allocation160_spill] sm:$0xff] }
 0x447   : > { %8728 = vmatpush.msk.msra.mxu2 %vm818_vm0, %v21548_v31  ;;  %8743 = vmatpush.msk.msrb.mxu1 %vm3178_vm3, %v21518_v61  ;;  %v4298_v3 = vperm.slane %v17034_v8, 6  ;;  %v17601_v44 = vld.sshfl [vmem:[#allocation1 + $0x8] sm:$0xff pattern:$0x75316420]  ;;  %vm21557_vm4 = vcmask 719872   ;;  %v4719_v61 = vperm.slane %v16936_v29, 7 }
 0x448   : > { %7145 = vmatmul.f32.vlgmr.msra.gmra.mxu2 %v17536_v35  ;;  %7918 = vmatmul.msk.f32.vlgmr.msra.gmra.mxu1 %vm21557_vm4, %v17601_v44  ;;  %vm4891_vm9 = vcmp.eq.s32.totalorder %v4859_v2, 1  ;;  %v2726_v20 = vperm.slane %v16898_v24, 6  ;;  %v4158_v27 = vperm.slane %v17048_v42, 6  ;;  %v21560_v23 = vld [vmem:[#allocation213_spill] sm:$0xff]  ;;  %vm2898_vm14 = vcmp.eq.s32.totalorder %v2866_v41, 1  ;;  %v21561_v29 = vld [vmem:[#allocation28_spill] sm:$0xff] }
 0x449   : > { %8739 = vmatpush.msk.msra.mxu0 %vm17566_vm8, %v21558_v33  ;;  %8759 = vmatpush.msk.msrb.mxu3 %vm17570_vm15, %v21559_v58  ;;  %vm3351_vm6 = vcmp.eq.s32.totalorder %v3319_v5, 1  ;;  %v4579_v6 = vperm.slane %v16988_v46, 7  ;;  %vm4330_vm12 = vcmp.eq.s32.totalorder %v4298_v3, 1  ;;  %vm4751_vm5 = vcmp.eq.s32.totalorder %v4719_v61, 1  ;;  %v21564_v14 = vld [vmem:[#allocation145_spill] sm:$0xff]  ;;  %v21576_v61 = vld [vmem:[#allocation148_spill] sm:$0xff] }
 0x44a   : > { %8783 = vmatpush.msk.msrb.mxu2 %vm17579_vm2, %v21560_v23  ;;  %8744 = vmatpush.msk.msrb.mxu1 %vm17583_vm1, %v21521_v11  ;;  %vm2758_vm13 = vcmp.eq.s32.totalorder %v2726_v20, 1  ;;  %v2586_v31 = vperm.slane %v16925_v21, 6  ;;  %v3147_v46 = vperm.slane %v16859_v16, 7  ;;  %v4018_v26 = vperm.slane %v17073_v62, 6  ;;  %v21577_v58 = vld [vmem:[#allocation173_spill] sm:$0xff] }
 0x44b   : > { %8767 = vmatpush.msk.msrb.mxu0 %vm17587_vm7, %v21522_v0  ;;  %8760 = vmatpush.msk.msrb.mxu3 %vm17594_vm10, %v21561_v29  ;;  %vm4190_vm0 = vcmp.eq.s32.totalorder %v4158_v27, 1  ;;  %v4439_v11 = vperm.slane %v17003_v55, 7  ;;  %v2349_v0 = vperm.slane %v16943_v30, 6  ;;  %vm4611_vm11 = vcmp.eq.s32.totalorder %v4579_v6, 1  ;;  %vm21572_vm7 = vmmov %vm21557_vm4  ;;  %v21580_v6 = vld [vmem:[#allocation155_spill] sm:$0xff]  ;;  %v21581_v29 = vld [vmem:[#allocation126_spill] sm:$0xff] }
 0x44c   : > { %8784 = vmatpush.msk.msrb.mxu2 %vm4891_vm9, %v21562_v34  ;;  %8745 = vmatpush.msk.msrb.mxu1 %vm2898_vm14, %v21524_v32  ;;  %vm2618_vm3 = vcmp.eq.s32.totalorder %v2586_v31, 1  ;;  %v8888_v16 = vld.sshfl [vmem:[#allocation1 + $0x38] sm:$0xff pattern:$0x75316420]  ;;  %vm21565_vm8 = vcmask 1043456   ;;  %vm17639_vm15 = vcmp.eq.s32.totalorder %v3147_v46, 1 }
 0x44d   : > { %8768 = vmatpush.msk.msrb.mxu0 %vm3351_vm6, %v21525_v40  ;;  %8761 = vmatpush.msk.msrb.mxu3 %vm4330_vm12, %v21563_v51  ;;  %vm17643_vm2 = vcmp.eq.s32.totalorder %v4018_v26, 1  ;;  %vm17647_vm1 = vcmp.eq.s32.totalorder %v4439_v11, 1  ;;  %v3007_v2 = vperm.slane %v16866_v36, 7  ;;  %vm17655_vm10 = vcmp.eq.s32.totalorder %v2349_v0, 1  ;;  %v21585_v31 = vld [vmem:[#allocation75_spill] sm:$0xff] }
 0x44e   : > { %8785 = vmatpush.msk.msrb.mxu2 %vm4751_vm5, %v21564_v14  ;;  %8746 = vmatpush.msk.msrb.mxu1 %vm2758_vm13, %v21527_v43  ;;  %v21573_v43 = vld [vmem:[#allocation172_spill] sm:$0xff]  ;;  %v3878_v41 = vperm.slane %v17108_v53, 6  ;;  %v4299_v5 = vperm.slane %v17034_v8, 7  ;;  %v2112_v3 = vperm.slane %v17000_v49, 6  ;;  %v2867_v36 = vperm.slane %v16887_v15, 7 }
 0x44f   : > { %8769 = vmatpush.msk.msrb.mxu0 %vm21565_vm8, %v8888_v16  ;;  %8762 = vmatpush.msk.msrb.mxu3 %vm4190_vm0, %v21573_v43  ;;  %vm3039_vm4 = vcmp.eq.s32.totalorder %v3007_v2, 1  ;;  %v3738_v20 = vperm.slane %v17120_v19, 6  ;;  %v4159_v27 = vperm.slane %v17048_v42, 7  ;;  %v1875_v8 = vperm.slane %v17024_v13, 6  ;;  %v21579_v42 = vld [vmem:[#allocation175_spill] sm:$0xff] }
 0x450   : > { %7919 = vmatmul.msk.f32.vlgmr.msra.gmra.mxu0 %vm21572_vm7, %v17601_v44  ;;  %8786 = vmatpush.msk.msrb.mxu2 %vm4611_vm11, %v21576_v61  ;;  %vm3910_vm9 = vcmp.eq.s32.totalorder %v3878_v41, 1  ;;  %vm4331_vm14 = vcmp.eq.s32.totalorder %v4299_v5, 1  ;;  %vm2144_vm6 = vcmp.eq.s32.totalorder %v2112_v3, 1  ;;  %vm2899_vm12 = vcmp.eq.s32.totalorder %v2867_v36, 1 }
 0x451   : > { %8747 = vmatpush.msk.msrb.mxu1 %vm2618_vm3, %v21529_v7  ;;  %8770 = vmatpush.msk.msrb.mxu0 %vm17639_vm15, %v21530_v10  ;;  %v21578_v7 = vld [vmem:[#allocation34_spill] sm:$0xff]  ;;  %vm3770_vm5 = vcmp.eq.s32.totalorder %v3738_v20, 1  ;;  %v2727_v15 = vperm.slane %v16898_v24, 7  ;;  %vm4191_vm13 = vcmp.eq.s32.totalorder %v4159_v27, 1  ;;  %vm1907_vm0 = vcmp.eq.s32.totalorder %v1875_v8, 1 }
 0x452   : > { %8763 = vmatpush.msk.msrb.mxu3 %vm17643_vm2, %v21577_v58  ;;  %8787 = vmatpush.msk.msrb.mxu2 %vm17647_vm1, %v21578_v7  ;;  %v3598_v10 = vperm.slane %v17137_v48, 6  ;;  %v4019_v23 = vperm.slane %v17073_v62, 7  ;;  %v2587_v34 = vperm.slane %v16925_v21, 7  ;;  %v3879_v24 = vperm.slane %v17108_v53, 7  ;;  %v21583_v62 = vld [vmem:[#allocation110_spill] sm:$0xff] }
 0x453   : > { %8748 = vmatpush.msk.msrb.mxu1 %vm17655_vm10, %v21532_v38  ;;  %8771 = vmatpush.msk.msrb.mxu0 %vm3039_vm4, %v21533_v60  ;;  %vm2759_vm11 = vcmp.eq.s32.totalorder %v2727_v15, 1  ;;  %v1638_v38 = vperm.slane %v21477_v17, 6  ;;  %v21582_v60 = vld [vmem:[#allocation156_spill] sm:$0xff]  ;;  %v1498_v21 = vperm.slane %v21479_v52, 6  ;;  %v2350_v53 = vperm.slane %v16943_v30, 7 }
 0x454   : > { %8764 = vmatpush.msk.msrb.mxu3 %vm3910_vm9, %v21579_v42  ;;  %8788 = vmatpush.msk.msrb.mxu2 %vm4331_vm14, %v21580_v6  ;;  %vm3630_vm3 = vcmp.eq.s32.totalorder %v3598_v10, 1  ;;  %vm4051_vm8 = vcmp.eq.s32.totalorder %v4019_v23, 1  ;;  %vm2619_vm2 = vcmp.eq.s32.totalorder %v2587_v34, 1  ;;  %vm3911_vm1 = vcmp.eq.s32.totalorder %v3879_v24, 1 }
 0x455   : > { %8749 = vmatpush.msk.msrb.mxu1 %vm2144_vm6, %v21581_v29  ;;  %8772 = vmatpush.msk.msrb.mxu0 %vm2899_vm12, %v21534_v18  ;;  %vm1670_vm15 = vcmp.eq.s32.totalorder %v1638_v38, 1  ;;  %v3739_v18 = vperm.slane %v17120_v19, 7  ;;  %v1261_v46 = vperm.slane %v21482_v59, 6  ;;  %v2113_v26 = vperm.slane %v17000_v49, 7  ;;  %v21587_v19 = vld [vmem:[#allocation158_spill] sm:$0xff] }
 0x456   : > { %8765 = vmatpush.msk.msrb.mxu3 %vm3770_vm5, %v21504_v9  ;;  %8789 = vmatpush.msk.msrb.mxu2 %vm4191_vm13, %v21582_v60  ;;  %v21584_v9 = vld [vmem:[#allocation157_spill] sm:$0xff]  ;;  %v3599_v11 = vperm.slane %v17137_v48, 7  ;;  %vm1530_vm7 = vcmp.eq.s32.totalorder %v1498_v21, 1  ;;  %vm2382_vm10 = vcmp.eq.s32.totalorder %v2350_v53, 1  ;;  %vm21586_vm4 = vcmask 719872  }
 0x457   : > { %8750 = vmatpush.msk.msrb.mxu1 %vm1907_vm0, %v21583_v62  ;;  %8773 = vmatpush.msk.msrb.mxu0 %vm2759_vm11, %v21538_v57  ;;  %vm3771_vm9 = vcmp.eq.s32.totalorder %v3739_v18, 1  ;;  %v1024_v30 = vperm.slane %v17114_v37, 6  ;;  %vm1293_vm14 = vcmp.eq.s32.totalorder %v1261_v46, 1  ;;  %vm2145_vm6 = vcmp.eq.s32.totalorder %v2113_v26, 1 }
 0x458   : > { %8766 = vmatpush.msk.msrb.mxu3 %vm3630_vm3, %v21508_v63  ;;  %8790 = vmatpush.msk.msrb.mxu2 %vm4051_vm8, %v21584_v9  ;;  %v1876_v49 = vperm.slane %v17024_v13, 7  ;;  %vm3631_vm12 = vcmp.eq.s32.totalorder %v3599_v11, 1  ;;  %v787_v48 = vperm.slane %v21494_v45, 6  ;;  %v1499_v63 = vperm.slane %v21479_v52, 7  ;;  %vm21588_vm3 = vmmov %vm21586_vm4  ;;  %v5986_v52 = vpop.f32.mrf.mxu0 }
 0x459   : > { %8751 = vmatpush.msk.msrb.mxu1 %vm1670_vm15, %v21585_v31  ;;  %8774 = vmatpush.msk.msrb.mxu0 %vm2619_vm2, %v17263_v47  ;;  %vm1056_vm5 = vcmp.eq.s32.totalorder %v1024_v30, 1  ;;  %v1639_v47 = vperm.slane %v21477_v17, 7  ;;  %v1262_v13 = vperm.slane %v21482_v59, 7  ;;  %v21589_v17 = vld [vmem:[#allocation74_spill] sm:$0xff]  ;;  %v6026_v59 = vpop.f32.mrf.mxu2 }
 0x45a   : > { %7920 = vmatmul.msk.f32.vlgmr.msrb.gmra.mxu3 %vm21586_vm4, %v17601_v44  ;;  %8791 = vmatpush.msk.msrb.mxu2 %vm3911_vm1, %v21587_v19  ;;  %vm1908_vm13 = vcmp.eq.s32.totalorder %v1876_v49, 1  ;;  %vm819_vm0 = vcmp.eq.s32.totalorder %v787_v48, 1  ;;  %vm1531_vm8 = vcmp.eq.s32.totalorder %v1499_v63, 1 }
 0x45b   : > { %8752 = vmatpush.msk.msrb.mxu1 %vm1530_vm7, %v17290_v22  ;;  %8775 = vmatpush.msk.msrb.mxu0 %vm2382_vm10, %v21558_v33  ;;  %vm1671_vm11 = vcmp.eq.s32.totalorder %v1639_v47, 1  ;;  %v6046_v22 = vpop.f32.mrf.mxu3  ;;  %vm1294_vm15 = vcmp.eq.s32.totalorder %v1262_v13, 1  ;;  %vm21593_vm7 = vcmask 1043456  }
 0x45c   : > { %8792 = vmatpush.msk.msrb.mxu2 %vm3771_vm9, %v21516_v25  ;;  %v21591_v25 = vld [vmem:[#allocation143_spill] sm:$0xff]  ;;  %v17752_v58 = vadd.f32 %v6046_v22, %v6026_v59  ;;  %vm21594_vm10 = vmmov %vm21593_vm7 }
 0x45d   : > { %8753 = vmatpush.msk.msrb.mxu1 %vm1293_vm14, %v17320_v12  ;;  %8776 = vmatpush.msk.msrb.mxu0 %vm2145_vm6, %v17306_v4  ;;  %v6006_v12 = vpop.f32.mrf.mxu1  ;;  %v1025_v4 = vperm.slane %v17114_v37, 7  ;;  %vm21595_vm4 = vmmov %vm21593_vm7 }
 0x45e   : > { %8793 = vmatpush.msk.msrb.mxu2 %vm3631_vm12, %v21519_v28  ;;  %v21592_v28 = vld [vmem:[#allocation144_spill] sm:$0xff]  ;;  %v17750_v27 = vadd.f32 %v6006_v12, %v5986_v52  ;;  %v7316_v42 = vmul.f32 %v17752_v58, %v17752_v58  ;;  %v7250_v6 = vsel %vm21594_vm10, %v17752_v58, 0.0  ;;  %vm21596_vm9 = vmmov %vm21595_vm4 }
 0x45f   : > { %8754 = vmatpush.msk.msrb.mxu1 %vm1056_vm5, %v17221_v39  ;;  %8777 = vmatpush.msk.msrb.mxu0 %vm1908_vm13, %v17300_v50  ;;  %v788_v39 = vperm.slane %v21494_v45, 7  ;;  %vm1057_vm2 = vcmp.eq.s32.totalorder %v1025_v4, 1  ;;  %v21590_v50 = vld [vmem:[#allocation186_spill] sm:$0xff]  ;;  %vm21597_vm14 = vmmov %vm21595_vm4 }
 0x460   : > { %7921 = vmatmul.msk.f32.vlgmr.msrb.gmra.mxu2 %vm21588_vm3, %v17601_v44  ;;  %v6106_v57 = vpop.f32.mrf.mxu0  ;;  %v7315_v15 = vmul.f32 %v17750_v27, %v17750_v27  ;;  %v7249_v23 = vsel %vm21593_vm7, %v17750_v27, 0.0  ;;  %v7348_v24 = vsel %vm21596_vm9, %v7316_v42, 0.0  ;;  %vm21598_vm6 = vmmov %vm21595_vm4 }
 0x461   : > { %8755 = vmatpush.msk.msrb.mxu1 %vm819_vm0, %v17190_v56  ;;  %8778 = vmatpush.msk.msrb.mxu0 %vm1671_vm11, %v21589_v17  ;;  %vm820_vm1 = vcmp.eq.s32.totalorder %v788_v39, 1  ;;  %v6126_v44 = vpop.f32.mrf.mxu2  ;;  %v7251_v21 = vadd.f32 %v7250_v6, %v7249_v23  ;;  %vm21599_vm12 = vmmov %vm21595_vm4 }
 0x462   : > { %7185 = vmatmul.f32.vlgmr.msrb.gmra.mxu1 %v17536_v35  ;;  %v7347_v34 = vsel %vm21595_vm4, %v7315_v15, 0.0  ;;  %v17776_v62 = vadd.f32 %v6126_v44, %v6106_v57  ;;  %vm21600_vm5 = vmmov %vm21595_vm4 }
 0x463   : > { %8779 = vmatpush.msk.msrb.mxu0 %vm1531_vm8, %v17283_v1  ;;  %v6086_v56 = vpop.f32.mrf.mxu3  ;;  %v7349_v31 = vadd.f32 %v7348_v24, %v7347_v34  ;;  %vm21601_vm13 = vmmov %vm21595_vm4 }
 0x464   : > { %v7318_v26 = vmul.f32 %v17776_v62, %v17776_v62  ;;  %v7254_v19 = vsel %vm21599_vm12, %v17776_v62, 0.0  ;;  %vm21602_vm0 = vmmov %vm21595_vm4 }
 0x465   : > { %8780 = vmatpush.msk.msrb.mxu0 %vm1294_vm15, %v21590_v50  ;;  %v6066_v37 = vpop.f32.mrf.mxu1  ;;  %vm21603_vm11 = vmmov %vm21602_vm0 }
 0x466   : > { %v17762_v10 = vadd.f32 %v6086_v56, %v6066_v37  ;;  %v7352_v63 = vsel %vm21600_vm5, %v7318_v26, 0.0  ;;  %vm21604_vm3 = vmmov %vm21602_vm0 }
 0x467   : > { %8781 = vmatpush.msk.msrb.mxu0 %vm1057_vm2, %v21591_v25  ;;  %vm21605_vm8 = vmmov %vm21602_vm0 }
 0x468   : > { %v6206_v1 = vpop.f32.mrf.mxu0  ;;  %v7317_v60 = vmul.f32 %v17762_v10, %v17762_v10  ;;  %v7252_v18 = vsel %vm21597_vm14, %v17762_v10, 0.0  ;;  %vm21606_vm15 = vmmov %vm21602_vm0 }
 0x469   : > { %8782 = vmatpush.msk.msrb.mxu0 %vm820_vm1, %v21592_v28  ;;  %v6186_v0 = vpop.f32.mrf.mxu2  ;;  %v7253_v30 = vadd.f32 %v7252_v18, %v7251_v21  ;;  %vm21607_vm2 = vmmov %vm21602_vm0 }
 0x46a   : > { %7225 = vmatmul.f32.vlgmr.msrb.gmra.mxu0 %v17536_v35  ;;  %v7350_v46 = vsel %vm21598_vm6, %v7317_v60, 0.0  ;;  %v17798_v22 = vadd.f32 %v6206_v1, %v6186_v0  ;;  %vm21608_vm1 = vmmov %vm21602_vm0 }
 0x46b   : > { %v6146_v33 = vpop.f32.mrf.mxu3  ;;  %v7351_v49 = vadd.f32 %v7350_v46, %v7349_v31  ;;  %v7255_v12 = vadd.f32 %v7254_v19, %v7253_v30  ;;  %vm21609_vm7 = vmmov %vm21602_vm0 }
 0x46c   : > { %v7320_v59 = vmul.f32 %v17798_v22, %v17798_v22  ;;  %v7258_v28 = vsel %vm21603_vm11, %v17798_v22, 0.0  ;;  %vm21610_vm10 = vmmov %vm21602_vm0 }
 0x46d   : > { %v6166_v45 = vpop.f32.mrf.mxu1  ;;  %v7353_v50 = vadd.f32 %v7352_v63, %v7351_v49  ;;  %vm21611_vm4 = vmmov %vm21602_vm0 }
 0x46e   : > { %v17787_v11 = vadd.f32 %v6166_v45, %v6146_v33  ;;  %v7356_v45 = vsel %vm21604_vm3, %v7320_v59, 0.0  ;;  %vm21612_vm9 = vmmov %vm21602_vm0 }
 0x46f   : > { %vm21613_vm14 = vmmov %vm21602_vm0 }
 0x470   : > { %v6266_v16 = vpop.f32.mrf.mxu0  ;;  %v7319_v13 = vmul.f32 %v17787_v11, %v17787_v11  ;;  %v7256_v17 = vsel %vm21601_vm13, %v17787_v11, 0.0  ;;  %vm21614_vm6 = vmmov %vm21602_vm0 }
 0x471   : > { %v6286_v32 = vpop.f32.mrf.mxu2  ;;  %v7257_v56 = vadd.f32 %v7256_v17, %v7255_v12  ;;  %vm21615_vm12 = vmmov %vm21602_vm0 }
 0x472   : > { %v7354_v52 = vsel %vm21602_vm0, %v7319_v13, 0.0  ;;  %v17813_v37 = vadd.f32 %v6286_v32, %v6266_v16  ;;  %vm21616_vm5 = vmmov %vm21602_vm0 }
 0x473   : > { %v6246_v51 = vpop.f32.mrf.mxu3  ;;  %v7355_v57 = vadd.f32 %v7354_v52, %v7353_v50  ;;  %vm21617_vm13 = vmmov %vm21602_vm0 }
 0x474   : > { %v7322_v16 = vmul.f32 %v17813_v37, %v17813_v37  ;;  %vm21618_vm11 = vmmov %vm21602_vm0 }
 0x475   : > { %v6226_v14 = vpop.f32.mrf.mxu1  ;;  %v7357_v23 = vadd.f32 %v7356_v45, %v7355_v57  ;;  %vm21619_vm3 = vmmov %vm21602_vm0 }
 0x476   : > { %v17809_v25 = vadd.f32 %v6246_v51, %v6226_v14  ;;  %v7259_v51 = vadd.f32 %v7258_v28, %v7257_v56  ;;  %v7360_v60 = vsel %vm21608_vm1, %v7322_v16, 0.0  ;;  %vm21623_vm1 = vmmov %vm21602_vm0 }
 0x478   : > { %v6366_v43 = vpop.f32.mrf.mxu0  ;;  %v7321_v0 = vmul.f32 %v17809_v25, %v17809_v25  ;;  %v7260_v15 = vsel %vm21605_vm8, %v17809_v25, 0.0  ;;  %vm21620_vm8 = vmmov %vm21602_vm0 }
 0x479   : > { %v6346_v2 = vpop.f32.mrf.mxu2  ;;  %v7261_v24 = vadd.f32 %v7260_v15, %v7259_v51 }
 0x47a   : > { %v17830_v32 = vadd.f32 %v6366_v43, %v6346_v2  ;;  %v7358_v6 = vsel %vm21606_vm15, %v7321_v0, 0.0  ;;  %vm21621_vm15 = vmmov %vm21602_vm0 }
 0x47b   : > { %v6306_v40 = vpop.f32.mrf.mxu3  ;;  %v7359_v18 = vadd.f32 %v7358_v6, %v7357_v23 }
 0x47c   : > { %v7324_v43 = vmul.f32 %v17830_v32, %v17830_v32 }
 0x47d   : > { %v6326_v55 = vpop.f32.mrf.mxu1 }
 0x47e   : > { %v17822_v1 = vadd.f32 %v6326_v55, %v6306_v40  ;;  %v7262_v40 = vsel %vm21607_vm2, %v17813_v37, 0.0  ;;  %v7364_v63 = vsel %vm21612_vm9, %v7324_v43, 0.0  ;;  %vm21622_vm2 = vmmov %vm21602_vm0 }
 0x47f   : > { %v7263_v31 = vadd.f32 %v7262_v40, %v7261_v24  ;;  %vm21627_vm9 = vmmov %vm21602_vm0 }
 0x480   : > { %v17738_v5 = vpop.f32.mrf.mxu0  ;;  %v7323_v55 = vmul.f32 %v17822_v1, %v17822_v1  ;;  %v7264_v2 = vsel %vm21609_vm7, %v17822_v1, 0.0  ;;  %vm21624_vm7 = vmmov %vm21602_vm0 }
 0x481   : > { %v17740_v35 = vpop.f32.mrf.mxu2 }
 0x482   : > { %v17850_v21 = vadd.f32 %v17740_v35, %v17738_v5  ;;  %v7361_v5 = vadd.f32 %v7360_v60, %v7359_v18  ;;  %v7265_v35 = vadd.f32 %v7264_v2, %v7263_v31 }
 0x483   : > { %v17734_v54 = vpop.f32.mrf.mxu3 }
 0x484   : > { %v7326_v12 = vmul.f32 %v17850_v21, %v17850_v21  ;;  %v7270_v59 = vsel %vm21615_vm12, %v17850_v21, 0.0  ;;  %vm21630_vm12 = vmmov %vm21602_vm0 }
 0x485   : > { %v17736_v41 = vpop.f32.mrf.mxu1 }
 0x486   : > { %v17841_v34 = vadd.f32 %v17734_v54, %v17736_v41  ;;  %v7362_v54 = vsel %vm21610_vm10, %v7323_v55, 0.0  ;;  %v7266_v41 = vsel %vm21611_vm4, %v17830_v32, 0.0  ;;  %vm21625_vm10 = vmmov %vm21602_vm0 }
 0x487   : > { %v7363_v52 = vadd.f32 %v7362_v54, %v7361_v5  ;;  %vm21626_vm4 = vmmov %vm21602_vm0 }
 0x488   : > { %v17748_v20 = vpop.f32.mrf.mxu0  ;;  %v7325_v30 = vmul.f32 %v17841_v34, %v17841_v34  ;;  %v7268_v13 = vsel %vm21613_vm14, %v17841_v34, 0.0  ;;  %vm21628_vm14 = vmmov %vm21602_vm0 }
 0x489   : > { %v17746_v36 = vpop.f32.mrf.mxu2  ;;  %v7365_v57 = vadd.f32 %v7364_v63, %v7363_v52 }
 0x48a   : > { %v17874_v17 = vadd.f32 %v17748_v20, %v17746_v36  ;;  %v7368_v36 = vsel %vm21616_vm5, %v7326_v12, 0.0  ;;  %vm21631_vm5 = vmmov %vm21602_vm0 }
 0x48b   : > { %v17742_v3 = vpop.f32.mrf.mxu3 }
 0x48c   : > { %v7328_v0 = vmul.f32 %v17874_v17, %v17874_v17 }
 0x48d   : > { %v17744_v61 = vpop.f32.mrf.mxu1 }
 0x48e   : > { %v17863_v19 = vadd.f32 %v17744_v61, %v17742_v3  ;;  %v7267_v3 = vadd.f32 %v7266_v41, %v7265_v35  ;;  %v7366_v61 = vsel %vm21614_vm6, %v7325_v30, 0.0  ;;  %vm21629_vm6 = vmmov %vm21602_vm0 }
 0x48f   : > { %v7367_v15 = vadd.f32 %v7366_v61, %v7365_v57 }
 0x490   : > { %v17768_v29 = vpop.f32.mrf.mxu0  ;;  %v7327_v56 = vmul.f32 %v17863_v19, %v17863_v19  ;;  %v7269_v45 = vadd.f32 %v7268_v13, %v7267_v3  ;;  %v7272_v20 = vsel %vm21617_vm13, %v17863_v19, 0.0  ;;  %vm21632_vm13 = vmmov %vm21602_vm0 }
 0x491   : > { %v17770_v38 = vpop.f32.mrf.mxu2  ;;  %v7369_v24 = vadd.f32 %v7368_v36, %v7367_v15 }
 0x492   : > { %v17892_v51 = vadd.f32 %v17770_v38, %v17768_v29  ;;  %v7271_v16 = vadd.f32 %v7270_v59, %v7269_v45  ;;  %v7372_v38 = vsel %vm21619_vm3, %v7328_v0, 0.0  ;;  %vm21634_vm3 = vmmov %vm21602_vm0 }
 0x493   : > { %v17754_v8 = vpop.f32.mrf.mxu3 }
 0x494   : > { %v7273_v60 = vadd.f32 %v7272_v20, %v7271_v16  ;;  %v7330_v43 = vmul.f32 %v17892_v51, %v17892_v51 }
 0x495   : > { %v17756_v7 = vpop.f32.mrf.mxu1 }
 0x496   : > { %v17883_v28 = vadd.f32 %v17754_v8, %v17756_v7  ;;  %v7370_v8 = vsel %vm21602_vm0, %v7327_v56, 0.0  ;;  %v7274_v7 = vsel %vm21618_vm11, %v17874_v17, 0.0  ;;  %vm21633_vm11 = vmmov %vm21602_vm0 }
 0x497   : > { %v7371_v54 = vadd.f32 %v7370_v8, %v7369_v24  ;;  %v7275_v41 = vadd.f32 %v7274_v7, %v7273_v60 }
 0x498   : > { %v17793_v47 = vpop.f32.mrf.mxu0  ;;  %v7329_v40 = vmul.f32 %v17883_v28, %v17883_v28  ;;  %v7276_v2 = vsel %vm21620_vm8, %v17883_v28, 0.0  ;;  %vm21635_vm8 = vmmov %vm21602_vm0 }
 0x499   : > { %v17791_v48 = vpop.f32.mrf.mxu2  ;;  %v7373_v35 = vadd.f32 %v7372_v38, %v7371_v54  ;;  %v7277_v63 = vadd.f32 %v7276_v2, %v7275_v41 }
 0x49a   : > { %v17910_v18 = vadd.f32 %v17793_v47, %v17791_v48  ;;  %v7376_v48 = vsel %vm21623_vm1, %v7330_v43, 0.0  ;;  %vm21638_vm1 = vmmov %vm21602_vm0 }
 0x49b   : > { %v17778_v53 = vpop.f32.mrf.mxu3 }
 0x49c   : > { %v7332_v13 = vmul.f32 %v17910_v18, %v17910_v18 }
 0x49d   : > { %v17782_v9 = vpop.f32.mrf.mxu1 }
 0x49e   : > { %v17901_v55 = vadd.f32 %v17782_v9, %v17778_v53  ;;  %v7374_v53 = vsel %vm21621_vm15, %v7329_v40, 0.0  ;;  %v7278_v9 = vsel %vm21622_vm2, %v17892_v51, 0.0  ;;  %vm21636_vm15 = vmmov %vm21602_vm0 }
 0x49f   : > { %v7375_v52 = vadd.f32 %v7374_v53, %v7373_v35  ;;  %v7279_v3 = vadd.f32 %v7278_v9, %v7277_v63  ;;  %vm21637_vm2 = vmmov %vm21602_vm0 }
 0x4a0   : > { %v17815_v44 = vpop.f32.mrf.mxu0  ;;  %v7331_v30 = vmul.f32 %v17901_v55, %v17901_v55  ;;  %v7280_v47 = vsel %vm21624_vm7, %v17901_v55, 0.0  ;;  %vm21639_vm7 = vmmov %vm21602_vm0 }
 0x4a1   : > { %v17817_v33 = vpop.f32.mrf.mxu2  ;;  %v7377_v45 = vadd.f32 %v7376_v48, %v7375_v52  ;;  %v7281_v36 = vadd.f32 %v7280_v47, %v7279_v3 }
 0x4a2   : > { %v17928_v12 = vadd.f32 %v17817_v33, %v17815_v44  ;;  %v7380_v33 = vsel %vm21627_vm9, %v7332_v13, 0.0  ;;  %vm21642_vm9 = vmmov %vm21602_vm0 }
 0x4a3   : > { %v17800_v4 = vpop.f32.mrf.mxu3 }
 0x4a4   : > { %v7334_v0 = vmul.f32 %v17928_v12, %v17928_v12 }
 0x4a5   : > { %v17804_v39 = vpop.f32.mrf.mxu1 }
 0x4a6   : > { %v17919_v5 = vadd.f32 %v17800_v4, %v17804_v39  ;;  %v7378_v4 = vsel %vm21625_vm10, %v7331_v30, 0.0  ;;  %v7282_v39 = vsel %vm21626_vm4, %v17910_v18, 0.0  ;;  %v7384_v2 = vsel %vm21631_vm5, %v7334_v0, 0.0  ;;  %vm21640_vm10 = vmmov %vm21602_vm0 }
 0x4a7   : > { %v7379_v8 = vadd.f32 %v7378_v4, %v7377_v45  ;;  %v7283_v7 = vadd.f32 %v7282_v39, %v7281_v36  ;;  %vm21641_vm4 = vmmov %vm21602_vm0 }
 0x4a8   : > { %v17854_v26 = vpop.f32.mrf.mxu0  ;;  %v7333_v56 = vmul.f32 %v17919_v5, %v17919_v5  ;;  %v7284_v20 = vsel %vm21628_vm14, %v17919_v5, 0.0  ;;  %vm21643_vm14 = vmmov %vm21602_vm0 }
 0x4a9   : > { %v17852_v46 = vpop.f32.mrf.mxu2  ;;  %v7381_v60 = vadd.f32 %v7380_v33, %v7379_v8  ;;  %v7285_v38 = vadd.f32 %v7284_v20, %v7283_v7  ;;  %vm21646_vm5 = vmmov %vm21602_vm0 }
 0x4aa   : > { %v17946_v15 = vadd.f32 %v17854_v26, %v17852_v46 }
 0x4ab   : > { %v17824_v14 = vpop.f32.mrf.mxu3 }
 0x4ac   : > { %v7336_v26 = vmul.f32 %v17946_v15, %v17946_v15 }
 0x4ad   : > { %v17832_v42 = vpop.f32.mrf.mxu1 }
 0x4ae   : > { %v17937_v57 = vadd.f32 %v17832_v42, %v17824_v14  ;;  %v7382_v14 = vsel %vm21629_vm6, %v7333_v56, 0.0  ;;  %v7286_v42 = vsel %vm21630_vm12, %v17928_v12, 0.0  ;;  %vm21644_vm6 = vmmov %vm21602_vm0 }
 0x4af   : > { %v7383_v54 = vadd.f32 %v7382_v14, %v7381_v60  ;;  %v7287_v41 = vadd.f32 %v7286_v42, %v7285_v38  ;;  %vm21645_vm12 = vmmov %vm21602_vm0 }
 0x4b0   : > { %v6906_v23 = vpop.f32.mrf.mxu0  ;;  %v7335_v40 = vmul.f32 %v17937_v57, %v17937_v57  ;;  %v7288_v46 = vsel %vm21632_vm13, %v17937_v57, 0.0  ;;  %vm21647_vm13 = vmmov %vm21602_vm0 }
 0x4b1   : > { %v6926_v6 = vpop.f32.mrf.mxu2  ;;  %v7385_v63 = vadd.f32 %v7384_v2, %v7383_v54  ;;  %v7289_v48 = vadd.f32 %v7288_v46, %v7287_v41 }
 0x4b2   : > { %v17961_v43 = vadd.f32 %v6926_v6, %v6906_v23  ;;  %v7386_v30 = vsel %vm21602_vm0, %v7335_v40, 0.0  ;;  %v7388_v23 = vsel %vm21634_vm3, %v7336_v26, 0.0  ;;  %vm21649_vm3 = vmmov %vm21602_vm0 }
 0x4b3   : > { %v17865_v49 = vpop.f32.mrf.mxu3  ;;  %v7387_v4 = vadd.f32 %v7386_v30, %v7385_v63 }
 0x4b4   : > { %v7338_v13 = vmul.f32 %v17961_v43, %v17961_v43 }
 0x4b5   : > { %v6866_v50 = vpop.f32.mrf.mxu1  ;;  %v7389_v36 = vadd.f32 %v7388_v23, %v7387_v4 }
 0x4b6   : > { %v17954_v24 = vadd.f32 %v17865_v49, %v6866_v50  ;;  %v7290_v49 = vsel %vm21633_vm11, %v17946_v15, 0.0  ;;  %v7392_v20 = vsel %vm21638_vm1, %v7338_v13, 0.0  ;;  %vm21648_vm11 = vmmov %vm21602_vm0 }
 0x4b7   : > { %v7291_v39 = vadd.f32 %v7290_v49, %v7289_v48  ;;  %vm21653_vm1 = vmmov %vm21602_vm0 }
 0x4b8   : > { %v7006_v59 = vpop.f32.mrf.mxu0  ;;  %v7337_v50 = vmul.f32 %v17954_v24, %v17954_v24  ;;  %v7292_v6 = vsel %vm21635_vm8, %v17954_v24, 0.0  ;;  %vm21650_vm8 = vmmov %vm21602_vm0 }
 0x4b9   : > { %v6986_v61 = vpop.f32.mrf.mxu2  ;;  %v7293_v33 = vadd.f32 %v7292_v6, %v7291_v39 }
 0x4ba   : > { %v17975_v52 = vadd.f32 %v7006_v59, %v6986_v61  ;;  %v7390_v56 = vsel %vm21636_vm15, %v7337_v50, 0.0  ;;  %vm21651_vm15 = vmmov %vm21602_vm0 }
 0x4bb   : > { %v6946_v29 = vpop.f32.mrf.mxu3  ;;  %v7391_v8 = vadd.f32 %v7390_v56, %v7389_v36 }
 0x4bc   : > { %v7340_v59 = vmul.f32 %v17975_v52, %v17975_v52 }
 0x4bd   : > { %v6966_v31 = vpop.f32.mrf.mxu1  ;;  %v7393_v38 = vadd.f32 %v7392_v20, %v7391_v8 }
 0x4be   : > { %v17968_v35 = vadd.f32 %v6966_v31, %v6946_v29  ;;  %v7294_v29 = vsel %vm21637_vm2, %v17961_v43, 0.0  ;;  %v7396_v26 = vsel %vm21642_vm9, %v7340_v59, 0.0  ;;  %vm21652_vm2 = vmmov %vm21602_vm0 }
 0x4bf   : > { %v7295_v7 = vadd.f32 %v7294_v29, %v7293_v33  ;;  %vm21659_vm9 = vmmov %vm21602_vm0 }
 0x4c0   : > { %v7066_v53 = vpop.f32.mrf.mxu0  ;;  %v7339_v31 = vmul.f32 %v17968_v35, %v17968_v35  ;;  %v7296_v61 = vsel %vm21639_vm7, %v17968_v35, 0.0 }
 0x4c1   : > { %v7086_v9 = vpop.f32.mrf.mxu2  ;;  %v7297_v2 = vadd.f32 %v7296_v61, %v7295_v7 }
 0x4c2   : > { %v17989_v0 = vadd.f32 %v7086_v9, %v7066_v53  ;;  %v7394_v40 = vsel %vm21640_vm10, %v7339_v31, 0.0 }
 0x4c3   : > { %v7046_v44 = vpop.f32.mrf.mxu3  ;;  %v7395_v30 = vadd.f32 %v7394_v40, %v7393_v38 }
 0x4c4   : > { %v7342_v41 = vmul.f32 %v17989_v0, %v17989_v0  ;;  %v7302_v63 = vsel %vm21645_vm12, %v17989_v0, 0.0  ;;  %vm21662_vm12 = vmmov %vm21602_vm0 }
 0x4c5   : > { %v7026_v16 = vpop.f32.mrf.mxu1  ;;  %v7397_v23 = vadd.f32 %v7396_v26, %v7395_v30 }
 0x4c6   : > { %v17982_v45 = vadd.f32 %v7046_v44, %v7026_v16  ;;  %v7298_v44 = vsel %vm21641_vm4, %v17975_v52, 0.0  ;;  %v7400_v13 = vsel %vm21646_vm5, %v7342_v41, 0.0  ;;  %vm21663_vm5 = vmmov %vm21602_vm0 }
 0x4c7   : > { %v7299_v49 = vadd.f32 %v7298_v44, %v7297_v2 }
 0x4c8   : > { %v7341_v16 = vmul.f32 %v17982_v45, %v17982_v45  ;;  %v7300_v54 = vsel %vm21643_vm14, %v17982_v45, 0.0  ;;  %vm21660_vm14 = vmmov %vm21602_vm0 }
 0x4c9   : > { %v7301_v6 = vadd.f32 %v7300_v54, %v7299_v49 }
 0x4ca   : > { %v7398_v50 = vsel %vm21644_vm6, %v7341_v16, 0.0  ;;  %vm21661_vm6 = vmmov %vm21602_vm0 }
 0x4cb   : > { %v7106_v47 = vpop.f32.mrf.mxu3  ;;  %v7146_v14 = vpop.f32.mrf.mxu2  ;;  %v7399_v39 = vadd.f32 %v7398_v50, %v7397_v23  ;;  %v7303_v56 = vadd.f32 %v7302_v63, %v7301_v6 }
 0x4cd   : > { %v7126_v3 = vpop.f32.mrf.mxu1  ;;  %v7166_v42 = vpop.f32.mrf.mxu0  ;;  %v7401_v33 = vadd.f32 %v7400_v13, %v7399_v39 }
 0x4ce   : > { %v17996_v60 = vadd.f32 %v7126_v3, %v7106_v47  ;;  %v18003_v53 = vadd.f32 %v7166_v42, %v7146_v14 }
 0x4d0   : > { %v7343_v48 = vmul.f32 %v17996_v60, %v17996_v60  ;;  %v7304_v3 = vsel %vm21647_vm13, %v17996_v60, 0.0  ;;  %v7344_v4 = vmul.f32 %v18003_v53, %v18003_v53  ;;  %v7306_v31 = vsel %vm21648_vm11, %v18003_v53, 0.0  ;;  %vm21664_vm13 = vmmov %vm21602_vm0 }
 0x4d1   : > { %v7305_v20 = vadd.f32 %v7304_v3, %v7303_v56  ;;  %vm21665_vm11 = vmmov %vm21602_vm0 }
 0x4d2   : > { %v7402_v29 = vsel %vm21602_vm0, %v7343_v48, 0.0  ;;  %v7404_v59 = vsel %vm21649_vm3, %v7344_v4, 0.0  ;;  %vm21666_vm3 = vmmov %vm21602_vm0 }
 0x4d3   : > { %v7403_v7 = vadd.f32 %v7402_v29, %v7401_v33  ;;  %v7307_v14 = vadd.f32 %v7306_v31, %v7305_v20 }
 0x4d5   : > { %v7405_v38 = vadd.f32 %v7404_v59, %v7403_v7  ;;  %v7429_v59 = vld [vmem:[%s18349_s5] sm:$0xf] }
 0x4dd   : > { %v7206_v46 = vpop.f32.mrf.mxu3 }
 0x4df   : > { %v7186_v9 = vpop.f32.mrf.mxu1 }
 0x4e0   : > { %v18010_v47 = vadd.f32 %v7206_v46, %v7186_v9 }
 0x4e2   : > { %v7345_v36 = vmul.f32 %v18010_v47, %v18010_v47  ;;  %v7308_v8 = vsel %vm21650_vm8, %v18010_v47, 0.0  ;;  %vm21667_vm8 = vmmov %vm21602_vm0 }
 0x4e3   : > { %v7246_v61 = vpop.f32.mrf.mxu2  ;;  %v7309_v16 = vadd.f32 %v7308_v8, %v7307_v14 }
 0x4e4   : > { %v7406_v44 = vsel %vm21651_vm15, %v7345_v36, 0.0  ;;  %v7416_v36 = vld [vmem:[%s18348_s4] sm:$0xf]  ;;  %vm21668_vm15 = vmmov %vm21602_vm0 }
 0x4e5   : > { %v7407_v54 = vadd.f32 %v7406_v44, %v7405_v38 }
 0x4e7   : > { %v7226_v42 = vpop.f32.mrf.mxu0 }
 0x4e8   : > { %v18025_v40 = vadd.f32 %v7246_v61, %v7226_v42 }
 0x4ea   : > { %v7346_v2 = vmul.f32 %v18025_v40, %v18025_v40  ;;  %v7310_v46 = vsel %vm21652_vm2, %v18025_v40, 0.0  ;;  %vm21669_vm2 = vmmov %vm21602_vm0 }
 0x4eb   : > { %v7311_v26 = vadd.f32 %v7310_v46, %v7309_v16 }
 0x4ec   : > { %v7408_v41 = vsel %vm21653_vm1, %v7346_v2, 0.0  ;;  %vm21670_vm1 = vmmov %vm21602_vm0 }
 0x4ed   : > { %7312 = vadd.xlane.f32.xlu1 %v7311_v26  ;;  %v7409_v9 = vadd.f32 %v7408_v41, %v7407_v54 }
 0x4ef   : > { %7410 = vadd.xlane.f32.xlu2 %v7409_v9 }
 0x560   : > { %v7313_v30 = vpop.xlane.xlu1 %7312 }
 0x561   : > { %v7314_v49 = vmul.f32 0.00024414063, %v7313_v30 }
 0x562   : > { %v7411_v50 = vpop.xlane.xlu2 %7410 }
 0x563   : > { %v7413_v63 = vmul.f32 %v7314_v49, %v7314_v49  ;;  %v7412_v48 = vmul.f32 0.00024414063, %v7411_v50 }
 0x565   : > { %v7414_v23 = vsub.f32 %v7412_v48, %v7413_v63 }
 0x567   : > { %v7415_v6 = vmax.f32 %v7414_v23, 0.0 }
 0x569   : > { %v7417_v13 = vadd.f32 1e-05, %v7415_v6 }
 0x56b   : > { %8871 = vrsqrt.f32 %v7417_v13  ;;  %vm7424_vm10 = vweird.f32 %v7417_v13 }
 0x571   : > { %v8872_v3 = vpop.eup %8871 }
 0x572   : > { %v7419_v4 = vmul.f32 %v8872_v3, %v7417_v13  ;;  %vm7425_vm7 = vweird.f32 %v8872_v3 }
 0x573   : > { %vm7426_vm4 = vmor %vm7424_vm10, %vm7425_vm7 }
 0x574   : > { %v7420_v39 = vmul.f32 %v8872_v3, %v7419_v4  ;;  %vm21671_vm7 = vmmov %vm21602_vm0 }
 0x575   : > { %vm21672_vm10 = vmmov %vm21602_vm0 }
 0x576   : > { %v7421_v56 = vmul.f32 0.5, %v7420_v39 }
 0x578   : > { %v7422_v29 = vsub.f32 1.5, %v7421_v56 }
 0x57a   : > { %v7423_v31 = vmul.f32 %v8872_v3, %v7422_v29 }
 0x57c   : > { %v7427_v33 = vsel %vm7426_vm4, %v8872_v3, %v7423_v31  ;;  %vm21673_vm4 = vmmov %vm21602_vm0 }
 0x57d   : > { %v7428_v20 = vmul.f32 %v7427_v33, %v7416_v36 }
 0x57f   : > { %7434 = vperm.xlu0 %8870, %v7428_v20   ;;  %v7430_v61 = vmul.f32 %v7428_v20, %v7314_v49 }
 0x581   : > { %v7431_v8 = vsub.f32 %v7429_v59, %v7430_v61 }
 0x587   : > { %7471 = vperm.xlu0 %8870, %v7431_v8  }
 0x5f1   : > { %v7435_v7 = vpop.permute.xlu0 %7434 }
 0x5f2   : > { %v7437_v14 = vmul.f32 %v7435_v7, %v17750_v27  ;;  %v7438_v42 = vmul.f32 %v7435_v7, %v17752_v58  ;;  %v7439_v44 = vmul.f32 %v7435_v7, %v17762_v10  ;;  %v7440_v16 = vmul.f32 %v7435_v7, %v17776_v62 }
 0x5f3   : > { %v7441_v38 = vmul.f32 %v7435_v7, %v17787_v11  ;;  %v7442_v2 = vmul.f32 %v7435_v7, %v17798_v22  ;;  %v7443_v46 = vmul.f32 %v7435_v7, %v17809_v25  ;;  %v7444_v26 = vmul.f32 %v7435_v7, %v17813_v37 }
 0x5f4   : > { %v7445_v54 = vmul.f32 %v7435_v7, %v17822_v1  ;;  %v7446_v41 = vmul.f32 %v7435_v7, %v17830_v32  ;;  %v7447_v27 = vmul.f32 %v7435_v7, %v17841_v34  ;;  %v7448_v58 = vmul.f32 %v7435_v7, %v17850_v21 }
 0x5f5   : > { %v7449_v10 = vmul.f32 %v7435_v7, %v17863_v19  ;;  %v7450_v62 = vmul.f32 %v7435_v7, %v17874_v17  ;;  %v7451_v11 = vmul.f32 %v7435_v7, %v17883_v28  ;;  %v7452_v22 = vmul.f32 %v7435_v7, %v17892_v51 }
 0x5f6   : > { %v7453_v25 = vmul.f32 %v7435_v7, %v17901_v55  ;;  %v7454_v37 = vmul.f32 %v7435_v7, %v17910_v18  ;;  %v7455_v1 = vmul.f32 %v7435_v7, %v17919_v5  ;;  %v7456_v32 = vmul.f32 %v7435_v7, %v17928_v12 }
 0x5f7   : > { %v7457_v34 = vmul.f32 %v7435_v7, %v17937_v57  ;;  %v7458_v21 = vmul.f32 %v7435_v7, %v17946_v15  ;;  %v7459_v19 = vmul.f32 %v7435_v7, %v17954_v24  ;;  %v7460_v17 = vmul.f32 %v7435_v7, %v17961_v43 }
 0x5f8   : > { %v7461_v28 = vmul.f32 %v7435_v7, %v17968_v35  ;;  %v7462_v51 = vmul.f32 %v7435_v7, %v17975_v52  ;;  %v7463_v55 = vmul.f32 %v7435_v7, %v17982_v45  ;;  %v7464_v18 = vmul.f32 %v7435_v7, %v17989_v0 }
 0x5f9   : > { %v7472_v9 = vpop.permute.xlu0 %7471  ;;  %v7465_v5 = vmul.f32 %v7435_v7, %v17996_v60  ;;  %v7466_v12 = vmul.f32 %v7435_v7, %v18003_v53  ;;  %v7467_v57 = vmul.f32 %v7435_v7, %v18010_v47  ;;  %v7468_v15 = vmul.f32 %v7435_v7, %v18025_v40 }
 0x5fa   : > { %v18071_v30 = vadd.f32 %v7472_v9, %v7437_v14  ;;  %v18073_v24 = vadd.f32 %v7472_v9, %v7438_v42  ;;  %v18075_v43 = vadd.f32 %v7472_v9, %v7439_v44  ;;  %v18077_v35 = vadd.f32 %v7472_v9, %v7440_v16 }
 0x5fb   : > { %v18079_v52 = vadd.f32 %v7472_v9, %v7441_v38  ;;  %v18081_v45 = vadd.f32 %v7472_v9, %v7442_v2  ;;  %v18083_v0 = vadd.f32 %v7472_v9, %v7443_v46  ;;  %v18085_v60 = vadd.f32 %v7472_v9, %v7444_v26 }
 0x5fc   : > { %21654 = vst [vmem:[#allocation211_spill] sm:$0xff] %v18071_v30  ;;  %v18087_v53 = vadd.f32 %v7472_v9, %v7445_v54  ;;  %v18089_v47 = vadd.f32 %v7472_v9, %v7446_v41  ;;  %v18091_v40 = vadd.f32 %v7472_v9, %v7447_v27  ;;  %v18093_v49 = vadd.f32 %v7472_v9, %v7448_v58 }
 0x5fd   : > { %v18095_v50 = vadd.f32 %v7472_v9, %v7449_v10  ;;  %v18097_v63 = vadd.f32 %v7472_v9, %v7450_v62  ;;  %v18099_v48 = vadd.f32 %v7472_v9, %v7451_v11  ;;  %v18101_v23 = vadd.f32 %v7472_v9, %v7452_v22 }
 0x5fe   : > { %v18103_v6 = vadd.f32 %v7472_v9, %v7453_v25  ;;  %v18105_v13 = vadd.f32 %v7472_v9, %v7454_v37  ;;  %v18107_v3 = vadd.f32 %v7472_v9, %v7455_v1  ;;  %v18109_v4 = vadd.f32 %v7472_v9, %v7456_v32 }
 0x5ff   : > { %v18111_v39 = vadd.f32 %v7472_v9, %v7457_v34  ;;  %v18113_v56 = vadd.f32 %v7472_v9, %v7458_v21  ;;  %v18115_v29 = vadd.f32 %v7472_v9, %v7459_v19  ;;  %v18117_v31 = vadd.f32 %v7472_v9, %v7460_v17 }
 0x600   : > { %v18119_v36 = vadd.f32 %v7472_v9, %v7461_v28  ;;  %v18121_v33 = vadd.f32 %v7472_v9, %v7462_v51  ;;  %v18123_v20 = vadd.f32 %v7472_v9, %v7463_v55  ;;  %v18125_v61 = vadd.f32 %v7472_v9, %v7464_v18 }
 0x601   : > { %v18128_v59 = vmul.f32 0.01, %v18071_v30  ;;  %v18130_v8 = vadd.f32 %v7472_v9, %v7465_v5  ;;  %v18132_v7 = vadd.f32 %v7472_v9, %v7466_v12  ;;  %v7523_v14 = vmul.f32 0.01, %v18073_v24 }
 0x602   : > { %v18136_v42 = vmul.f32 0.01, %v18075_v43  ;;  %v18138_v44 = vadd.f32 %v7472_v9, %v7467_v57  ;;  %v7525_v16 = vmul.f32 0.01, %v18077_v35  ;;  %v18142_v38 = vmul.f32 0.01, %v18079_v52 }
 0x603   : > { %21655 = vst [vmem:[#allocation98_spill] sm:$0xff] %v18128_v59  ;;  %v7527_v2 = vmul.f32 0.01, %v18081_v45  ;;  %v18145_v46 = vadd.f32 %v7472_v9, %v7468_v15  ;;  %v18148_v26 = vmul.f32 0.01, %v18083_v0  ;;  %v7555_v9 = vmax.f32 %v18073_v24, %v7523_v14 }
 0x604   : > { %v7529_v54 = vmul.f32 0.01, %v18085_v60  ;;  %v18152_v41 = vmul.f32 0.01, %v18087_v53  ;;  %v7531_v27 = vmul.f32 0.01, %v18089_v47  ;;  %v7556_v34 = vmax.f32 %v18075_v43, %v18136_v42 }
 0x605   : > { %v18156_v58 = vmul.f32 0.01, %v18091_v40  ;;  %v7533_v10 = vmul.f32 0.01, %v18093_v49  ;;  %v18162_v11 = vmul.f32 0.01, %v18095_v50  ;;  %v7557_v28 = vmax.f32 %v18077_v35, %v7525_v16 }
 0x606   : > { %v7535_v22 = vmul.f32 0.01, %v18097_v63  ;;  %v18166_v25 = vmul.f32 0.01, %v18099_v48  ;;  %v7537_v37 = vmul.f32 0.01, %v18101_v23  ;;  %v7558_v5 = vmax.f32 %v18079_v52, %v18142_v38 }
 0x607   : > { %v18171_v1 = vmul.f32 0.01, %v18103_v6  ;;  %v7539_v32 = vmul.f32 0.01, %v18105_v13  ;;  %v18177_v21 = vmul.f32 0.01, %v18107_v3  ;;  %v7559_v24 = vmax.f32 %v18081_v45, %v7527_v2 }
 0x608   : > { %v7541_v19 = vmul.f32 0.01, %v18109_v4  ;;  %v18181_v17 = vmul.f32 0.01, %v18111_v39  ;;  %v7543_v51 = vmul.f32 0.01, %v18113_v56  ;;  %v7560_v52 = vmax.f32 %v18083_v0, %v18148_v26 }
 0x609   : > { %v18186_v55 = vmul.f32 0.01, %v18115_v29  ;;  %v7545_v18 = vmul.f32 0.01, %v18117_v31  ;;  %v18192_v12 = vmul.f32 0.01, %v18119_v36  ;;  %v7561_v38 = vmax.f32 %v18085_v60, %v7529_v54 }
 0x60a   : > { %v7547_v57 = vmul.f32 0.01, %v18121_v33  ;;  %v18196_v15 = vmul.f32 0.01, %v18123_v20  ;;  %v7549_v43 = vmul.f32 0.01, %v18125_v61  ;;  %v7562_v45 = vmax.f32 %v18087_v53, %v18152_v41 }
 0x60b   : > { %v18201_v35 = vmul.f32 0.01, %v18130_v8  ;;  %v7551_v14 = vmul.f32 0.01, %v18132_v7  ;;  %v18207_v42 = vmul.f32 0.01, %v18138_v44  ;;  %v7563_v2 = vmax.f32 %v18089_v47, %v7531_v27 }
 0x60c   : > { %v18210_v16 = vmul.f32 0.01, %v18145_v46  ;;  %v7564_v62 = vmax.f32 %v18091_v40, %v18156_v58  ;;  %v7565_v59 = vmax.f32 %v18093_v49, %v7533_v10  ;;  %v7566_v0 = vmax.f32 %v18095_v50, %v18162_v11  ;;  %v7506_v11 = vld [vmem:[%s9308_s11] sm:$0xff] }
 0x60d   : > { %v7567_v26 = vmax.f32 %v18097_v63, %v7535_v22  ;;  %v7568_v30 = vmax.f32 %v18099_v48, %v18166_v25  ;;  %v7569_v60 = vmax.f32 %v18101_v23, %v7537_v37  ;;  %v7570_v53 = vmax.f32 %v18103_v6, %v18171_v1  ;;  %v7507_v22 = vld [vmem:[%s9308_s11 + $0x8] sm:$0xff]  ;;  %v21656_v37 = vld [vmem:[#allocation211_spill] sm:$0xff]  ;;  %v21657_v1 = vld [vmem:[#allocation98_spill] sm:$0xff] }
 0x60e   : > { %v7571_v47 = vmax.f32 %v18105_v13, %v7539_v32  ;;  %v7572_v40 = vmax.f32 %v18107_v3, %v18177_v21  ;;  %v7573_v49 = vmax.f32 %v18109_v4, %v7541_v19  ;;  %v7574_v50 = vmax.f32 %v18111_v39, %v18181_v17  ;;  %v7508_v21 = vld [vmem:[%s9308_s11 + $0x10] sm:$0xff]  ;;  %v7509_v19 = vld [vmem:[%s9308_s11 + $0x18] sm:$0xff]  ;;  %v7510_v17 = vld [vmem:[%s9308_s11 + $0x20] sm:$0xff] }
 0x60f   : > { %v7575_v63 = vmax.f32 %v18113_v56, %v7543_v51  ;;  %v7576_v48 = vmax.f32 %v18115_v29, %v18186_v55  ;;  %v7577_v23 = vmax.f32 %v18117_v31, %v7545_v18  ;;  %v7578_v6 = vmax.f32 %v18119_v36, %v18192_v12  ;;  %v7511_v18 = vld [vmem:[%s9308_s11 + $0x28] sm:$0xff]  ;;  %v7512_v12 = vld [vmem:[%s9308_s11 + $0x30] sm:$0xff] }
 0x610   : > { %v7579_v13 = vmax.f32 %v18121_v33, %v7547_v57  ;;  %v7580_v3 = vmax.f32 %v18123_v20, %v18196_v15  ;;  %v7618_v4 = vrot.slane %v7555_v9, 4  ;;  %v7619_v54 = vrot.slane %v7557_v28, 4 }
 0x611   : > { %v7581_v39 = vmax.f32 %v18125_v61, %v7549_v43  ;;  %v7620_v56 = vrot.slane %v7559_v24, 4  ;;  %v7621_v41 = vrot.slane %v7561_v38, 4  ;;  %v7622_v29 = vrot.slane %v7563_v2, 4  ;;  %v7513_v43 = vld [vmem:[%s9308_s11 + $0x38] sm:$0xff] }
 0x612   : > { %v7582_v31 = vmax.f32 %v18130_v8, %v18201_v35  ;;  %v7583_v36 = vmax.f32 %v18132_v7, %v7551_v14  ;;  %v7623_v33 = vrot.slane %v7565_v59, 4  ;;  %v7624_v27 = vrot.slane %v7567_v26, 4 }
 0x613   : > { %v7584_v20 = vmax.f32 %v18138_v44, %v18207_v42  ;;  %v7585_v58 = vmax.f32 %v18145_v46, %v18210_v16  ;;  %v7625_v61 = vrot.slane %v7569_v60, 4  ;;  %v7626_v10 = vrot.slane %v7571_v47, 4  ;;  %v7515_v47 = vld [vmem:[%s9308_s11 + $0x48] sm:$0xff] }
 0x614   : > { %v7627_v25 = vrot.slane %v7573_v49, 4  ;;  %v7628_v9 = vrot.slane %v7575_v63, 4  ;;  %v21658_v32 = vmax.f32 %v21656_v37, %v21657_v1  ;;  %v7635_v7 = vsel %vm21660_vm14, %v7556_v34, %v7619_v54  ;;  %v7521_v37 = vld [vmem:[%s9308_s11 + $0x78] sm:$0xff] }
 0x615   : > { %v7629_v46 = vrot.slane %v7577_v23, 4  ;;  %v7636_v28 = vsel %vm21661_vm6, %v7558_v5, %v7620_v56  ;;  %v7637_v51 = vsel %vm21662_vm12, %v7560_v52, %v7621_v41  ;;  %v7638_v55 = vsel %vm21663_vm5, %v7562_v45, %v7622_v29  ;;  %v7514_v52 = vld [vmem:[%s9308_s11 + $0x40] sm:$0xff]  ;;  %v7516_v23 = vld [vmem:[%s9308_s11 + $0x50] sm:$0xff] }
 0x616   : > { %v7634_v59 = vsel %vm21659_vm9, %v21658_v32, %v7618_v4  ;;  %v7630_v57 = vrot.slane %v7579_v13, 4  ;;  %v7631_v15 = vrot.slane %v7581_v39, 4  ;;  %v7639_v24 = vsel %vm21664_vm13, %v7564_v62, %v7623_v33  ;;  %v7518_v39 = vld [vmem:[%s9308_s11 + $0x60] sm:$0xff] }
 0x617   : > { %v7640_v34 = vsel %vm21602_vm0, %v7566_v0, %v7624_v27  ;;  %v7632_v14 = vrot.slane %v7583_v36, 4  ;;  %v7641_v16 = vsel %vm21665_vm11, %v7568_v30, %v7625_v61  ;;  %v7666_v38 = vadd.f32 %v7634_v59, %v7506_v11  ;;  %v7520_v11 = vld [vmem:[%s9308_s11 + $0x70] sm:$0xff] }
 0x618   : > { %v7667_v5 = vadd.f32 %v7635_v7, %v7507_v22  ;;  %v7642_v45 = vsel %vm21666_vm3, %v7570_v53, %v7626_v10  ;;  %v7668_v2 = vadd.f32 %v7636_v28, %v7508_v21  ;;  %v7669_v26 = vadd.f32 %v7637_v51, %v7509_v19  ;;  %v7517_v53 = vld [vmem:[%s9308_s11 + $0x58] sm:$0xff] }
 0x619   : > { %v7670_v60 = vadd.f32 %v7638_v55, %v7510_v17  ;;  %v7633_v49 = vrot.slane %v7585_v58, 4  ;;  %v7643_v62 = vsel %vm21667_vm8, %v7572_v40, %v7627_v25  ;;  %v7671_v0 = vadd.f32 %v7639_v24, %v7511_v18 }
 0x61a   : > { %v7672_v63 = vadd.f32 %v7640_v34, %v7512_v12  ;;  %v7644_v30 = vsel %vm21668_vm15, %v7574_v50, %v7628_v9  ;;  %v7645_v13 = vsel %vm21669_vm2, %v7576_v48, %v7629_v46  ;;  %v7646_v4 = vsel %vm21670_vm1, %v7578_v6, %v7630_v57  ;;  %v7519_v50 = vld [vmem:[%s9308_s11 + $0x68] sm:$0xff]  ;;  %s7744_s11 = sshll.u32 %s18292_s14, 4  ;;  %s7745_s11 = int_to_ptr.vmem [resolvable:$true] %s7744_s11 }
 0x61b   : > { %v7673_v54 = vadd.f32 %v7641_v16, %v7513_v43  ;;  %v7647_v56 = vsel %vm21671_vm7, %v7580_v3, %v7631_v15  ;;  %v7674_v41 = vadd.f32 %v7642_v45, %v7514_v52  ;;  %v7682_v29 = vmul.f32 0.01, %v7666_v38 }
 0x61c   : > { %v7683_v40 = vmul.f32 0.01, %v7667_v5  ;;  %v7675_v36 = vadd.f32 %v7643_v62, %v7515_v47  ;;  %v7684_v33 = vmul.f32 0.01, %v7668_v2  ;;  %v7685_v27 = vmul.f32 0.01, %v7669_v26 }
 0x61d   : > { %v7686_v58 = vmul.f32 0.01, %v7670_v60  ;;  %v7676_v61 = vadd.f32 %v7644_v30, %v7516_v23  ;;  %v7687_v48 = vmul.f32 0.01, %v7671_v0  ;;  %v7688_v10 = vmul.f32 0.01, %v7672_v63 }
 0x61e   : > { %v7698_v6 = vmax.f32 %v7666_v38, %v7682_v29  ;;  %v7648_v3 = vsel %vm21672_vm10, %v7582_v31, %v7632_v14  ;;  %v7677_v22 = vadd.f32 %v7645_v13, %v7517_v53  ;;  %v7689_v25 = vmul.f32 0.01, %v7673_v54 }
 0x61f   : > { %v7699_v9 = vmax.f32 %v7667_v5, %v7683_v40  ;;  %v7649_v1 = vsel %vm21673_vm4, %v7584_v20, %v7633_v49  ;;  %v7678_v32 = vadd.f32 %v7646_v4, %v7518_v39  ;;  %v7690_v59 = vmul.f32 0.01, %v7674_v41 }
 0x620   : > { %v7700_v7 = vmax.f32 %v7668_v2, %v7684_v33  ;;  %7714 = vst [vmem:[%s18292_s14] sm:$0xff] %v7698_v6  ;;  %v7679_v8 = vadd.f32 %v7647_v56, %v7519_v50  ;;  %v7691_v35 = vmul.f32 0.01, %v7675_v36  ;;  %v7701_v31 = vmax.f32 %v7669_v26, %v7685_v27 }
 0x621   : > { %v7702_v21 = vmax.f32 %v7670_v60, %v7686_v58  ;;  %7715 = vst [vmem:[%s18292_s14 + $0x8] sm:$0xff] %v7699_v9  ;;  %v7680_v44 = vadd.f32 %v7648_v3, %v7520_v11  ;;  %v7692_v42 = vmul.f32 0.01, %v7676_v61  ;;  %v7703_v20 = vmax.f32 %v7671_v0, %v7687_v48 }
 0x622   : > { %v7704_v19 = vmax.f32 %v7672_v63, %v7688_v10  ;;  %7716 = vst [vmem:[%s18292_s14 + $0x10] sm:$0xff] %v7700_v7  ;;  %v7681_v17 = vadd.f32 %v7649_v1, %v7521_v37  ;;  %v7693_v46 = vmul.f32 0.01, %v7677_v22  ;;  %v7705_v28 = vmax.f32 %v7673_v54, %v7689_v25 }
 0x623   : > { %7717 = vst [vmem:[%s18292_s14 + $0x18] sm:$0xff] %v7701_v31  ;;  %v7694_v51 = vmul.f32 0.01, %v7678_v32  ;;  %v7706_v55 = vmax.f32 %v7674_v41, %v7690_v59  ;;  %v7695_v18 = vmul.f32 0.01, %v7679_v8  ;;  %v7707_v12 = vmax.f32 %v7675_v36, %v7691_v35 }
 0x624   : > { %7718 = vst [vmem:[%s18292_s14 + $0x20] sm:$0xff] %v7702_v21  ;;  %v7696_v57 = vmul.f32 0.01, %v7680_v44  ;;  %v7708_v15 = vmax.f32 %v7676_v61, %v7692_v42  ;;  %v7697_v24 = vmul.f32 0.01, %v7681_v17  ;;  %v7709_v34 = vmax.f32 %v7677_v22, %v7693_v46 }
 0x625   : > { %7719 = vst [vmem:[%s18292_s14 + $0x28] sm:$0xff] %v7703_v20  ;;  %v7710_v43 = vmax.f32 %v7678_v32, %v7694_v51  ;;  %v7711_v14 = vmax.f32 %v7679_v8, %v7695_v18 }
 0x626   : > { %7720 = vst [vmem:[%s18292_s14 + $0x30] sm:$0xff] %v7704_v19  ;;  %v7712_v16 = vmax.f32 %v7680_v44, %v7696_v57  ;;  %v7713_v38 = vmax.f32 %v7681_v17, %v7697_v24 }
 0x627   : > { %7721 = vst [vmem:[%s18292_s14 + $0x38] sm:$0xff] %v7705_v28 }
 0x628   : > { %7722 = vst [vmem:[%s18292_s14 + $0x40] sm:$0xff] %v7706_v55 }
 0x629   : > { %7723 = vst [vmem:[%s18292_s14 + $0x48] sm:$0xff] %v7707_v12 }
 0x62a   : > { %7724 = vst [vmem:[%s18292_s14 + $0x50] sm:$0xff] %v7708_v15 }
 0x62b   : > { %7725 = vst [vmem:[%s18292_s14 + $0x58] sm:$0xff] %v7709_v34 }
 0x62c   : > { %7726 = vst [vmem:[%s18292_s14 + $0x60] sm:$0xff] %v7710_v43 }
 0x62d   : > { %7727 = vst [vmem:[%s18292_s14 + $0x68] sm:$0xff] %v7711_v14 }
 0x62e   : > { %7728 = vst [vmem:[%s18292_s14 + $0x70] sm:$0xff] %v7712_v16 }
 0x62f   : > { %7729 = vst [vmem:[%s18292_s14 + $0x78] sm:$0xff] %v7713_v38 }
 0x630   : > { %9036 = shalt.err (!%p9033_p10)
}
 0x631   : > { %8804 = dma.vmem_to_hbm [thread:$0]  (%p9206_p7), %s7745_s11, 2048, %s7747_s30, %s7731_s29  }
 0x632 PF: > { %s21675_s20 = sld [smem:[#allocation17_spill]]  ;;  %p21677_p12 = scmp.ge.s32.totalorder %s9087_s27, 2 }
 0x634   : > { %p8821_p13 = pnand %p21677_p12, %p9174_p6 }
 0x636   : > { %p8822_p0 = pneg %p8821_p13 }
 0x638   : > { %s7758_s13 = sand.u32 1, %s21675_s20  }
 0x639   : > { %s7759_s24 = scalar_lea.sflag [#allocation5], %s7758_s13 }
 0x63a   : > { %9070 = dma.done.wait (%p8822_p0), %s7759_s24, 2048  }
 0x63b   : > { %9072 = vsyncadd (%p8822_p0), %s7759_s24, 4294965248  ;;  %s21678_s27 = sld [smem:[#allocation20_spill]]  ;;  %s21681_s24 = smov %s9079_s25 }
 0x63c   : > { %s21679_s26 = sld [smem:[#allocation18_spill]] }
 0x63d   : > { %s21680_s12 = sld [smem:[#allocation21_spill]] }
 0x641   : > { %p26_p3 = scmp.ge.s32.totalorder %s21678_s27, 4  }
 0x642   : > { %s21682_s25 = smov %s21679_s26 }
 0x643   : > { %s21683_s26 = smov %s21680_s12  ;;  %28 = sbr.rel (!%p26_p3) target bundleno = 11 (0xb), region = 126 }
 0x648   :  { %7765 = vsyncpa [#allocation4], 1 }
 0x649   :  { %7767 = vsyncpa [#allocation4 + $0x1], 1 }
 0x64a   :  { %7768 = vsyncpa [#allocation7], 1 }
 0x64b   :  { %7770 = vsyncpa [#allocation7 + $0x1], 1 }
 0x64c   :  { %7771 = vsyncpa [#allocation10], 1 }
 0x64d   :  { %7773 = vsyncpa [#allocation10 + $0x1], 1 }
 0x64e   :  { %7774 = vsyncpa [#allocation5], 1 }
 0x64f   :  { %7776 = vsyncpa [#allocation5 + $0x1], 1 }

</bundles_post_ra>
